<compile_context>
chip_gen: v7x
topology: tpu7x:2x2x1
jax: 0.10.0
libtpu: 0.0.40
codegen_flags: <defaults>
</compile_context>

<pallas_src>
import functools
import math

import jax
import jax.numpy as jnp
from jax import lax
from jax.experimental import pallas as pl
from jax.experimental.pallas import tpu as pltpu

MIN_NORM = 1e-15          # PoincareBall.min_norm
EPS_F32 = 4e-3            # PoincareBall.eps[torch.float32]


# ---------------- hyperbolic math helpers (traced inside the kernel) -----------

def _artanh(x):
    # clamp margin must be representable in f32 (1 - 1e-15 rounds to exactly 1.0)
    x = jnp.clip(x, -(1.0 - 1e-7), 1.0 - 1e-7)
    return 0.5 * (jnp.log1p(x) - jnp.log1p(-x))


def _tanh(x):
    # hgcn tanh with clamp=15
    return jnp.tanh(jnp.clip(x, -15.0, 15.0))


def _norm_and_inv(x):
    """(||x|| clamped to >= MIN_NORM, 1/||x||) from one rsqrt — no sqrt+div chain."""
    ss = jnp.maximum(jnp.sum(x * x, axis=-1, keepdims=True), MIN_NORM * MIN_NORM)
    inv = lax.rsqrt(ss)
    return ss * inv, inv


def _proj_expmap0_threaded(u, sqrt_c, inv_sqrt_c, maxnorm, inv_maxnorm, sc_maxnorm):
    """Fused proj(expmap0(u)).  Returns (value, analytic ||value||, analytic 1/||value||).

    ||expmap0(u)|| == tanh(sqrt_c*||u||)/sqrt_c, so one reduction serves the map,
    the projection decision, and the *next* op's norm (threaded out).
    """
    u_norm, u_inv = _norm_and_inv(u)
    t = _tanh(sqrt_c * u_norm)
    over = t > sc_maxnorm                       # == exp_norm > maxnorm (const compare)
    out_norm = jnp.where(over, maxnorm, t * inv_sqrt_c)
    out = (out_norm * u_inv) * u
    out_inv = jnp.where(over, inv_maxnorm, sqrt_c / jnp.maximum(t, MIN_NORM))
    return out, out_norm, out_inv


def _hgcn_layer(h, h_norm, h_inv, adj, wt, hb, cy2, c,
                sqrt_c, inv_sqrt_c, maxnorm, inv_maxnorm, sc_maxnorm):
    """HyperbolicGraphConvolution = HypLinear -> HypAgg (no att) -> HypAct(ReLU).

    h_norm / h_inv are the analytic norm / inverse-norm of h threaded from the
    previous stage; returns the same triple for the next layer.
    """
    # ---- HypLinear: mobius_matvec(W, h) (threaded ||h||, 1/||h|| : no reduce on h) ----
    mx = jnp.dot(h, wt, preferred_element_type=jnp.float32)     # wt is (in, out)
    mx_norm, mx_inv = _norm_and_inv(mx)
    t = _tanh((mx_norm * h_inv) * _artanh(sqrt_c * h_norm))
    res = ((t * inv_sqrt_c) * mx_inv) * mx
    zero = mx_norm <= MIN_NORM                   # torch: all(mx == 0) per row
    res = jnp.where(zero, 0.0, res)
    r_norm = jnp.where(zero, 0.0, t * inv_sqrt_c)   # analytic ||res||

    # proj(res) via the analytic norm (no reduce)
    over1 = r_norm > maxnorm
    res = jnp.where(over1, (maxnorm / jnp.maximum(r_norm, MIN_NORM)) * res, res)
    n1 = jnp.where(over1, maxnorm, r_norm)          # ||proj(res)||

    # mobius_add(res, hyp_bias): x2 analytic, c*||hb||^2 precomputed on the host
    x2 = n1 * n1
    xy = jnp.sum(res * hb, axis=-1, keepdims=True)
    two_cxy = (2.0 * c) * xy
    num = (1.0 + two_cxy + cy2) * res + (1.0 - c * x2) * hb
    denom = 1.0 + two_cxy + cy2 * (c * x2)
    add = num * (1.0 / jnp.maximum(denom, MIN_NORM))

    # proj(add): one real reduce; thread the clamped norm + inverse to the logmap0
    a_norm, a_inv = _norm_and_inv(add)
    over2 = a_norm > maxnorm
    add = jnp.where(over2, (maxnorm * a_inv) * add, add)
    a_norm = jnp.where(over2, maxnorm, a_norm)
    a_inv = jnp.where(over2, inv_maxnorm, a_inv)

    # ---- HypAgg (use_att=False): aggregate in the tangent space at the origin ----
    lm = ((inv_sqrt_c * _artanh(sqrt_c * a_norm)) * a_inv) * add
    support_t = jnp.dot(adj, lm, preferred_element_type=jnp.float32)
    hh, hh_norm, hh_inv = _proj_expmap0_threaded(support_t, sqrt_c, inv_sqrt_c,
                                                 maxnorm, inv_maxnorm, sc_maxnorm)

    # ---- HypAct: ReLU in the tangent space, back onto the ball ----
    xt = jnp.maximum(((inv_sqrt_c * _artanh(sqrt_c * hh_norm)) * hh_inv) * hh, 0.0)
    return _proj_expmap0_threaded(xt, sqrt_c, inv_sqrt_c,
                                  maxnorm, inv_maxnorm, sc_maxnorm)


# ------------------------------- Pallas kernel ---------------------------------

def hyp_gcn_kernel(c, cy2_ref, x_ref, adj_ref, pool_ref,
                   w1_ref, hb1_ref, w2_ref, hb2_ref, w3_ref, hb3_ref,
                   wl2_ref, bl2_ref, wl3_ref, bl3_ref, out_ref):
    # c is a trace-time Python float -> these are compile-time constants
    sqrt_c = math.sqrt(c)
    inv_sqrt_c = 1.0 / sqrt_c
    maxnorm = (1.0 - EPS_F32) / sqrt_c
    inv_maxnorm = 1.0 / maxnorm
    sc_maxnorm = 1.0 - EPS_F32        # == sqrt_c * maxnorm

    adj = adj_ref[...]                # block-diagonal (R, R), batch folded into rows

    # x = proj(expmap0(proj_tan0(x))) ; proj_tan0 is identity on the Poincare ball
    h, h_norm, h_inv = _proj_expmap0_threaded(x_ref[...], sqrt_c, inv_sqrt_c,
                                              maxnorm, inv_maxnorm, sc_maxnorm)

    for w_ref, hb_ref, li in ((w1_ref, hb1_ref, 0),
                              (w2_ref, hb2_ref, 1),
                              (w3_ref, hb3_ref, 2)):
        h, h_norm, h_inv = _hgcn_layer(h, h_norm, h_inv, adj,
                                       w_ref[...], hb_ref[...], cy2_ref[li], c,
                                       sqrt_c, inv_sqrt_c,
                                       maxnorm, inv_maxnorm, sc_maxnorm)

    # back to the tangent space at the origin (norm threaded: no extra reduce)
    ht = ((inv_sqrt_c * _artanh(sqrt_c * h_norm)) * h_inv) * h

    # global_add_pool == block-diagonal one-hot (P, R) @ (R, H)
    pooled = jnp.dot(pool_ref[...], ht, preferred_element_type=jnp.float32)

    # lin2 + ReLU (weights pre-transposed to (in, out))
    z = jnp.maximum(
        jnp.dot(pooled, wl2_ref[...], preferred_element_type=jnp.float32) + bl2_ref[...],
        0.0)

    # lin3 + log_softmax(dim=-1)
    logits = jnp.dot(z, wl3_ref[...], preferred_element_type=jnp.float32) + bl3_ref[...]
    m = jnp.max(logits, axis=-1, keepdims=True)
    shifted = logits - m
    lse = jnp.log(jnp.sum(jnp.exp(shifted), axis=-1, keepdims=True))
    out_ref[...] = shifted - lse


# ------------------------------- host-side glue --------------------------------

def _host_hyp_bias(b, c):
    """proj(expmap0(proj_tan0(bias))) — input-independent, computed once on the host."""
    c = jnp.float32(c)
    sqrt_c = jnp.sqrt(c)
    norm = jnp.maximum(jnp.sqrt(jnp.sum(b * b, axis=-1, keepdims=True)), MIN_NORM)
    res = jnp.tanh(jnp.clip(sqrt_c * norm, -15.0, 15.0)) * b / (sqrt_c * norm)
    rnorm = jnp.maximum(jnp.sqrt(jnp.sum(res * res, axis=-1, keepdims=True)), MIN_NORM)
    maxnorm = (1.0 - EPS_F32) / sqrt_c
    return jnp.where(rnorm > maxnorm, res / rnorm * maxnorm, res)


def _block_diag(mats):
    """(Bc, r, c) -> block-diagonal (Bc*r, Bc*c) with static slices."""
    Bc, r, cdim = mats.shape
    out = jnp.zeros((Bc * r, Bc * cdim), mats.dtype)
    for i in range(Bc):
        out = out.at[i * r:(i + 1) * r, i * cdim:(i + 1) * cdim].set(mats[i])
    return out


def _default_num_steps(B):
    """Single grid step on single-TC chips (v5e/v6e); two steps on v7x (2 TCs)."""
    try:
        kind = jax.devices()[0].device_kind.lower()
    except Exception:
        kind = ""
    if "v7" in kind and B % 2 == 0:
        return 2
    return 1


def hyp_gcn_forward(x, adj, pool, params, c, num_steps=None):
    """Batched forward over B independent graph-batches, batch folded into rows.

    x: (B, N, F)  adj: (B, N, N)  pool: (B, G, N)   ->   (B, G, nclass)
    """
    B, N, F_ = x.shape
    G = pool.shape[1]
    H = params["w1"].shape[0]
    H2 = params["wl2"].shape[0]
    nclass = params["wl3"].shape[0]
    c = float(c)

    if num_steps is None:
        num_steps = _default_num_steps(B)
    if B % num_steps != 0:
        num_steps = 1
    Bc = B // num_steps
    R = Bc * N            # rows per grid step (batch folded into sublanes)
    P = Bc * G            # pooled rows per grid step

    # fold the batch: (num_steps, Bc*N, F), block-diag adjacency / pooling per step
    xm = x.reshape(num_steps, R, F_)
    adj_bd = jnp.stack([_block_diag(adj[s * Bc:(s + 1) * Bc]) for s in range(num_steps)])
    pool_bd = jnp.stack([_block_diag(pool[s * Bc:(s + 1) * Bc]) for s in range(num_steps)])

    # host-side constant folding: transpose weights to (in, out), bake hyperbolic
    # biases and their c*||b||^2 terms (SMEM scalars)
    w1t, w2t, w3t = params["w1"].T, params["w2"].T, params["w3"].T
    wl2t, wl3t = params["wl2"].T, params["wl3"].T
    hb1 = _host_hyp_bias(params["b1"], c)
    hb2 = _host_hyp_bias(params["b2"], c)
    hb3 = _host_hyp_bias(params["b3"], c)
    cy2 = (jnp.float32(c) * jnp.stack([jnp.sum(hb1 * hb1),
                                       jnp.sum(hb2 * hb2),
                                       jnp.sum(hb3 * hb3)])).astype(jnp.float32)

    args = (cy2, xm, adj_bd, pool_bd,
            w1t, hb1, w2t, hb2, w3t, hb3,
            wl2t, params["bl2"], wl3t, params["bl3"])

    def step_spec(arr):
        nd = arr.ndim
        return pl.BlockSpec((None,) + arr.shape[1:],
                            lambda s, _n=nd: (s,) + (0,) * (_n - 1))

    def shared_spec(arr):
        nd = arr.ndim
        return pl.BlockSpec(arr.shape, lambda s, _n=nd: (0,) * _n)

    in_specs = ([pl.BlockSpec(memory_space=pltpu.MemorySpace.SMEM),   # cy2 scalars
                 step_spec(xm), step_spec(adj_bd), step_spec(pool_bd)]
                + [shared_spec(a) for a in args[4:]])
    out_spec = pl.BlockSpec((None, P, nclass), lambda s: (s, 0, 0))

    # advisory cost so XLA can schedule surrounding glue around the custom call
    flops = int(num_steps * (2 * R * F_ * H + 4 * R * H * H + 6 * R * R * H
                             + 2 * P * R * H + 2 * P * H * H2 + 2 * P * H2 * nclass
                             + 150 * R * H))
    transcendentals = int(num_steps * R * 64)
    bytes_accessed = int(sum(int(a.size) * a.dtype.itemsize for a in args)
                         + num_steps * P * nclass * 4)

    out = pl.pallas_call(
        functools.partial(hyp_gcn_kernel, c),
        out_shape=jax.ShapeDtypeStruct((num_steps, P, nclass), jnp.float32),
        grid=(num_steps,),
        in_specs=in_specs,
        out_specs=out_spec,
        compiler_params=pltpu.CompilerParams(dimension_semantics=("parallel",)),
        cost_estimate=pl.CostEstimate(flops=flops,
                                      transcendentals=transcendentals,
                                      bytes_accessed=bytes_accessed),
    )(*args)

    return out.reshape(B, G, nclass)


def edge_to_adj(edge_index, x):
    """JAX equivalent of the PyTorch edge_to_adj: adj[row, col] = (sum(x[row]) + sum(x[col])) / 2."""
    row, col = edge_index[0], edge_index[1]
    weights = (x[row].sum(-1) + x[col].sum(-1)) / 2.0
    n = x.shape[0]
    # note: like the torch version, duplicate edges keep the last write (set, not add)
    return jnp.zeros((n, n), dtype=jnp.float32).at[row, col].set(weights)


# --------------------- pure-JAX reference (mirrors the torch math) --------------

def _ref_norm(x):
    return jnp.maximum(jnp.sqrt(jnp.sum(x * x, -1, keepdims=True)), MIN_NORM)


def _ref_proj(x, c):
    norm = _ref_norm(x)
    maxnorm = (1.0 - EPS_F32) / jnp.sqrt(c)
    return jnp.where(norm > maxnorm, x / norm * maxnorm, x)


def _ref_expmap0(u, c):
    sqrt_c = jnp.sqrt(c)
    u_norm = _ref_norm(u)
    return jnp.tanh(jnp.clip(sqrt_c * u_norm, -15.0, 15.0)) * u / (sqrt_c * u_norm)


def _ref_logmap0(p, c):
    sqrt_c = jnp.sqrt(c)
    p_norm = _ref_norm(p)
    a = jnp.clip(sqrt_c * p_norm, -(1.0 - 1e-7), 1.0 - 1e-7)
    return (1.0 / sqrt_c) * 0.5 * (jnp.log1p(a) - jnp.log1p(-a)) / p_norm * p


def _ref_mobius_matvec(w, x, c):
    sqrt_c = jnp.sqrt(c)
    x_norm = _ref_norm(x)
    mx = x @ w.T
    mx_norm = _ref_norm(mx)
    a = jnp.clip(sqrt_c * x_norm, -(1.0 - 1e-7), 1.0 - 1e-7)
    res = jnp.tanh(jnp.clip(mx_norm / x_norm * 0.5 * (jnp.log1p(a) - jnp.log1p(-a)),
                            -15.0, 15.0)) * mx / (mx_norm * sqrt_c)
    cond = jnp.all(mx == 0.0, axis=-1, keepdims=True)
    return jnp.where(cond, jnp.zeros_like(res), res)


def _ref_mobius_add(x, y, c):
    x2 = jnp.sum(x * x, -1, keepdims=True)
    y2 = jnp.sum(y * y, -1, keepdims=True)
    xy = jnp.sum(x * y, -1, keepdims=True)
    num = (1.0 + 2.0 * c * xy + c * y2) * x + (1.0 - c * x2) * y
    denom = 1.0 + 2.0 * c * xy + c * c * x2 * y2
    return num / jnp.maximum(denom, MIN_NORM)


def reference_forward(x, adj, pool, params, c):
    c = jnp.float32(c)
    h = _ref_proj(_ref_expmap0(x, c), c)
    for wk, bk in (("w1", "b1"), ("w2", "b2"), ("w3", "b3")):
        w, b = params[wk], params[bk]
        res = _ref_proj(_ref_mobius_matvec(w, h, c), c)
        hyp_bias = _ref_proj(_ref_expmap0(b, c), c)
        res = _ref_proj(_ref_mobius_add(res, hyp_bias, c), c)
        support_t = adj @ _ref_logmap0(res, c)
        h = _ref_proj(_ref_expmap0(support_t, c), c)
        xt = jnp.maximum(_ref_logmap0(h, c), 0.0)
        h = _ref_proj(_ref_expmap0(xt, c), c)
    h = _ref_logmap0(h, c)
    pooled = pool @ h
    z = jnp.maximum(pooled @ params["wl2"].T + params["bl2"], 0.0)
    logits = z @ params["wl3"].T + params["bl3"]
    return jax.nn.log_softmax(logits, axis=-1)


# ------------------------------------ driver ------------------------------------

if __name__ == "__main__":
    key = jax.random.PRNGKey(0)

    # small, module-consistent shapes
    N = 24          # nodes per graph-batch
    NFEAT = 16
    NHID = 32
    NCLASS = 4
    G = 2           # graphs in each batch (global_add_pool groups)
    B = 4           # independent graph-batches processed in one pallas_call
    C = 1.0         # curvature (args.c)

    keys = jax.random.split(key, 12)

    # node features for B graph-batches
    xs = jax.random.normal(keys[0], (B, N, NFEAT), dtype=jnp.float32) * 0.1

    # deterministic edge_index: bidirectional ring (no duplicate edges)
    src = jnp.arange(N, dtype=jnp.int32)
    dst = (src + 1) % N
    edge_index = jnp.stack(
        [jnp.concatenate([src, dst]), jnp.concatenate([dst, src])], axis=0)

    # data.batch: first half graph 0, second half graph 1 -> one-hot pooling matrix
    batch = jnp.concatenate(
        [jnp.zeros(N // 2, dtype=jnp.int32), jnp.ones(N - N // 2, dtype=jnp.int32)])
    pool_single = jax.nn.one_hot(batch, G, dtype=jnp.float32).T   # (G, N)
    pool = jnp.tile(pool_single[None], (B, 1, 1))                 # (B, G, N)

    adj = jnp.stack([edge_to_adj(edge_index, xs[b]) for b in range(B)], axis=0)

    def xavier(k, shape, scale=0.1):
        return jax.random.normal(k, shape, dtype=jnp.float32) * scale

    params = {
        # HypLinear weights in torch layout (out_features, in_features); biases (1, out)
        "w1": xavier(keys[1], (NHID, NFEAT)),
        "b1": xavier(keys[2], (1, NHID), 0.01),
        "w2": xavier(keys[3], (NHID, NHID)),
        "b2": xavier(keys[4], (1, NHID), 0.01),
        "w3": xavier(keys[5], (NHID, NHID)),
        "b3": xavier(keys[6], (1, NHID), 0.01),
        # lin2: nhid -> nhid//2 ; lin3: nhid//2 -> nclass (torch Linear layout)
        "wl2": xavier(keys[7], (NHID // 2, NHID)),
        "bl2": xavier(keys[8], (1, NHID // 2), 0.01),
        "wl3": xavier(keys[9], (NCLASS, NHID // 2)),
        "bl3": xavier(keys[10], (1, NCLASS), 0.01),
    }

    out = hyp_gcn_forward(xs, adj, pool, params, C)
    out = jax.block_until_ready(out)

    assert out.shape == (B, G, NCLASS)
    assert bool(jnp.all(jnp.isfinite(out)))
    # log_softmax rows should (approximately) exponentiate-sum to 1
    assert bool(jnp.allclose(jnp.exp(out).sum(-1), 1.0, atol=1e-4))

    # correctness vs pure-JAX mirror of the torch math
    ref = jnp.stack([reference_forward(xs[b], adj[b], pool[b], params, C) for b in range(B)])
    max_err = float(jnp.max(jnp.abs(out - ref)))
    assert max_err < 2e-3, f"mismatch vs reference: max abs err = {max_err}"

    print("KERNEL_OK")
</pallas_src>

<mosaic_0001>
module attributes {stable_mosaic.version = 11 : i64} {
  func.func @hyp_gcn_kernel(%arg0: i32, %arg1: memref<3xf32, #tpu.memory_space<smem>>, %arg2: memref<1x96x16xf32, #tpu.memory_space<vmem>>, %arg3: memref<1x96x96xf32, #tpu.memory_space<vmem>>, %arg4: memref<1x8x96xf32, #tpu.memory_space<vmem>>, %arg5: memref<16x32xf32, #tpu.memory_space<vmem>>, %arg6: memref<1x32xf32, #tpu.memory_space<vmem>>, %arg7: memref<32x32xf32, #tpu.memory_space<vmem>>, %arg8: memref<1x32xf32, #tpu.memory_space<vmem>>, %arg9: memref<32x32xf32, #tpu.memory_space<vmem>>, %arg10: memref<1x32xf32, #tpu.memory_space<vmem>>, %arg11: memref<32x16xf32, #tpu.memory_space<vmem>>, %arg12: memref<1x16xf32, #tpu.memory_space<vmem>>, %arg13: memref<16x4xf32, #tpu.memory_space<vmem>>, %arg14: memref<1x4xf32, #tpu.memory_space<vmem>>, %arg15: memref<1x8x4xf32, #tpu.memory_space<vmem>>) attributes {dimension_semantics = [#tpu.dimension_semantics<parallel>], iteration_bounds = array<i64: 1>, scalar_prefetch = 0 : i64, scratch_operands = 0 : i64, tpu.core_type = #tpu.core_type<tc>, window_params = [{transform_indices = @transform_0, window_bounds = array<i64: 3>}, {transform_indices = @transform_1, window_bounds = array<i64: 1, 96, 16>}, {transform_indices = @transform_2, window_bounds = array<i64: 1, 96, 96>}, {transform_indices = @transform_3, window_bounds = array<i64: 1, 8, 96>}, {pipeline_mode = #tpu.pipeline_mode<synchronous>, transform_indices = @transform_4, window_bounds = array<i64: 16, 32>}, {pipeline_mode = #tpu.pipeline_mode<synchronous>, transform_indices = @transform_5, window_bounds = array<i64: 1, 32>}, {pipeline_mode = #tpu.pipeline_mode<synchronous>, transform_indices = @transform_6, window_bounds = array<i64: 32, 32>}, {pipeline_mode = #tpu.pipeline_mode<synchronous>, transform_indices = @transform_7, window_bounds = array<i64: 1, 32>}, {pipeline_mode = #tpu.pipeline_mode<synchronous>, transform_indices = @transform_8, window_bounds = array<i64: 32, 32>}, {pipeline_mode = #tpu.pipeline_mode<synchronous>, transform_indices = @transform_9, window_bounds = array<i64: 1, 32>}, {pipeline_mode = #tpu.pipeline_mode<synchronous>, transform_indices = @transform_10, window_bounds = array<i64: 32, 16>}, {pipeline_mode = #tpu.pipeline_mode<synchronous>, transform_indices = @transform_11, window_bounds = array<i64: 1, 16>}, {pipeline_mode = #tpu.pipeline_mode<synchronous>, transform_indices = @transform_12, window_bounds = array<i64: 16, 4>}, {pipeline_mode = #tpu.pipeline_mode<synchronous>, transform_indices = @transform_13, window_bounds = array<i64: 1, 4>}, {transform_indices = @transform_14, window_bounds = array<i64: 1, 8, 4>}]} {
    %c0 = arith.constant 0 : index
    %c0_0 = arith.constant 0 : index
    %c0_1 = arith.constant 0 : index
    %0 = vector.load %arg3[%c0, %c0_0, %c0_1] : memref<1x96x96xf32, #tpu.memory_space<vmem>>, vector<1x96x96xf32>
    %1 = vector.shape_cast %0 : vector<1x96x96xf32> to vector<96x96xf32>
    %c0_2 = arith.constant 0 : index
    %c0_3 = arith.constant 0 : index
    %c0_4 = arith.constant 0 : index
    %2 = vector.load %arg2[%c0_2, %c0_3, %c0_4] : memref<1x96x16xf32, #tpu.memory_space<vmem>>, vector<1x96x16xf32>
    %3 = vector.shape_cast %2 : vector<1x96x16xf32> to vector<96x16xf32>
    %4 = arith.mulf %3, %3 : vector<96x16xf32>
    %cst = arith.constant dense<0.000000e+00> : vector<96xf32>
    %5 = vector.multi_reduction <add>, %4, %cst [1] : vector<96x16xf32> to vector<96xf32>
    %6 = vector.shape_cast %5 : vector<96xf32> to vector<96x1xf32>
    %cst_5 = arith.constant 1.000000e-30 : f32
    %7 = vector.broadcast %cst_5 : f32 to vector<96x1xf32>
    %8 = arith.maximumf %6, %7 : vector<96x1xf32>
    %9 = math.rsqrt %8 : vector<96x1xf32>
    %10 = arith.mulf %8, %9 : vector<96x1xf32>
    %cst_6 = arith.constant 1.000000e+00 : f32
    %11 = vector.broadcast %cst_6 : f32 to vector<96x1xf32>
    %12 = arith.mulf %11, %10 : vector<96x1xf32>
    %cst_7 = arith.constant -1.500000e+01 : f32
    %cst_8 = arith.constant 1.500000e+01 : f32
    %13 = vector.broadcast %cst_7 : f32 to vector<96x1xf32>
    %14 = arith.maximumf %13, %12 : vector<96x1xf32>
    %15 = vector.broadcast %cst_8 : f32 to vector<96x1xf32>
    %16 = arith.minimumf %15, %14 : vector<96x1xf32>
    %17 = math.tanh %16 : vector<96x1xf32>
    %cst_9 = arith.constant 0.995999991 : f32
    %18 = vector.broadcast %cst_9 : f32 to vector<96x1xf32>
    %19 = arith.cmpf ogt, %17, %18 : vector<96x1xf32>
    %cst_10 = arith.constant 1.000000e+00 : f32
    %20 = vector.broadcast %cst_10 : f32 to vector<96x1xf32>
    %21 = arith.mulf %17, %20 : vector<96x1xf32>
    %cst_11 = arith.constant 0.995999991 : f32
    %22 = vector.broadcast %cst_11 : f32 to vector<96x1xf32>
    %23 = arith.select %19, %22, %21 : vector<96x1xi1>, vector<96x1xf32>
    %24 = arith.mulf %23, %9 : vector<96x1xf32>
    %25 = vector.broadcast %24 : vector<96x1xf32> to vector<96x16xf32>
    %26 = arith.mulf %25, %3 : vector<96x16xf32>
    %cst_12 = arith.constant 1.000000e-15 : f32
    %27 = vector.broadcast %cst_12 : f32 to vector<96x1xf32>
    %28 = arith.maximumf %17, %27 : vector<96x1xf32>
    %cst_13 = arith.constant 1.000000e+00 : f32
    %29 = vector.broadcast %cst_13 : f32 to vector<96x1xf32>
    %30 = arith.divf %29, %28 : vector<96x1xf32>
    %cst_14 = arith.constant 1.00401604 : f32
    %31 = vector.broadcast %cst_14 : f32 to vector<96x1xf32>
    %32 = arith.select %19, %31, %30 : vector<96x1xi1>, vector<96x1xf32>
    %c0_15 = arith.constant 0 : index
    %c0_16 = arith.constant 0 : index
    %33 = vector.load %arg5[%c0_15, %c0_16] : memref<16x32xf32, #tpu.memory_space<vmem>>, vector<16x32xf32>
    %c0_17 = arith.constant 0 : index
    %c0_18 = arith.constant 0 : index
    %34 = vector.load %arg6[%c0_17, %c0_18] : memref<1x32xf32, #tpu.memory_space<vmem>>, vector<1x32xf32>
    %c0_19 = arith.constant 0 : index
    %35 = memref.load %arg1[%c0_19] : memref<3xf32, #tpu.memory_space<smem>>
    %cst_20 = arith.constant dense<0.000000e+00> : vector<96x32xf32>
    %36 = tpu.matmul %26, %33, %cst_20 {dimension_numbers = #tpu.dot_dimension_numbers<[1], [0], [0], [1], [0, 0, 1, 1], [], []>} : vector<96x16xf32>, vector<16x32xf32>, vector<96x32xf32> -> vector<96x32xf32>
    %37 = arith.mulf %36, %36 : vector<96x32xf32>
    %cst_21 = arith.constant dense<0.000000e+00> : vector<96xf32>
    %38 = vector.multi_reduction <add>, %37, %cst_21 [1] : vector<96x32xf32> to vector<96xf32>
    %39 = vector.shape_cast %38 : vector<96xf32> to vector<96x1xf32>
    %cst_22 = arith.constant 1.000000e-30 : f32
    %40 = vector.broadcast %cst_22 : f32 to vector<96x1xf32>
    %41 = arith.maximumf %39, %40 : vector<96x1xf32>
    %42 = math.rsqrt %41 : vector<96x1xf32>
    %43 = arith.mulf %41, %42 : vector<96x1xf32>
    %44 = arith.mulf %43, %32 : vector<96x1xf32>
    %cst_23 = arith.constant 1.000000e+00 : f32
    %45 = vector.broadcast %cst_23 : f32 to vector<96x1xf32>
    %46 = arith.mulf %45, %23 : vector<96x1xf32>
    %cst_24 = arith.constant -0.99999988 : f32
    %cst_25 = arith.constant 0.99999988 : f32
    %47 = vector.broadcast %cst_24 : f32 to vector<96x1xf32>
    %48 = arith.maximumf %47, %46 : vector<96x1xf32>
    %49 = vector.broadcast %cst_25 : f32 to vector<96x1xf32>
    %50 = arith.minimumf %49, %48 : vector<96x1xf32>
    %51 = math.log1p %50 : vector<96x1xf32>
    %cst_26 = arith.constant 0.000000e+00 : f32
    %52 = vector.broadcast %cst_26 : f32 to vector<96x1xf32>
    %53 = arith.subf %52, %50 : vector<96x1xf32>
    %54 = math.log1p %53 : vector<96x1xf32>
    %55 = arith.subf %51, %54 : vector<96x1xf32>
    %cst_27 = arith.constant 5.000000e-01 : f32
    %56 = vector.broadcast %cst_27 : f32 to vector<96x1xf32>
    %57 = arith.mulf %56, %55 : vector<96x1xf32>
    %58 = arith.mulf %44, %57 : vector<96x1xf32>
    %cst_28 = arith.constant -1.500000e+01 : f32
    %cst_29 = arith.constant 1.500000e+01 : f32
    %59 = vector.broadcast %cst_28 : f32 to vector<96x1xf32>
    %60 = arith.maximumf %59, %58 : vector<96x1xf32>
    %61 = vector.broadcast %cst_29 : f32 to vector<96x1xf32>
    %62 = arith.minimumf %61, %60 : vector<96x1xf32>
    %63 = math.tanh %62 : vector<96x1xf32>
    %cst_30 = arith.constant 1.000000e+00 : f32
    %64 = vector.broadcast %cst_30 : f32 to vector<96x1xf32>
    %65 = arith.mulf %63, %64 : vector<96x1xf32>
    %66 = arith.mulf %65, %42 : vector<96x1xf32>
    %67 = vector.broadcast %66 : vector<96x1xf32> to vector<96x32xf32>
    %68 = arith.mulf %67, %36 : vector<96x32xf32>
    %cst_31 = arith.constant 1.000000e-15 : f32
    %69 = vector.broadcast %cst_31 : f32 to vector<96x1xf32>
    %70 = arith.cmpf ole, %43, %69 : vector<96x1xf32>
    %cst_32 = arith.constant 0.000000e+00 : f32
    %71 = vector.shape_cast %70 : vector<96x1xi1> to vector<96x1xi1>
    %72 = vector.broadcast %71 : vector<96x1xi1> to vector<96x32xi1>
    %73 = vector.broadcast %cst_32 : f32 to vector<96x32xf32>
    %74 = arith.select %72, %73, %68 : vector<96x32xi1>, vector<96x32xf32>
    %cst_33 = arith.constant 1.000000e+00 : f32
    %75 = vector.broadcast %cst_33 : f32 to vector<96x1xf32>
    %76 = arith.mulf %63, %75 : vector<96x1xf32>
    %cst_34 = arith.constant 0.000000e+00 : f32
    %77 = vector.broadcast %cst_34 : f32 to vector<96x1xf32>
    %78 = arith.select %70, %77, %76 : vector<96x1xi1>, vector<96x1xf32>
    %cst_35 = arith.constant 0.995999991 : f32
    %79 = vector.broadcast %cst_35 : f32 to vector<96x1xf32>
    %80 = arith.cmpf ogt, %78, %79 : vector<96x1xf32>
    %cst_36 = arith.constant 1.000000e-15 : f32
    %81 = vector.broadcast %cst_36 : f32 to vector<96x1xf32>
    %82 = arith.maximumf %78, %81 : vector<96x1xf32>
    %cst_37 = arith.constant 0.995999991 : f32
    %83 = vector.broadcast %cst_37 : f32 to vector<96x1xf32>
    %84 = arith.divf %83, %82 : vector<96x1xf32>
    %85 = vector.broadcast %84 : vector<96x1xf32> to vector<96x32xf32>
    %86 = arith.mulf %85, %74 : vector<96x32xf32>
    %87 = vector.shape_cast %80 : vector<96x1xi1> to vector<96x1xi1>
    %88 = vector.broadcast %87 : vector<96x1xi1> to vector<96x32xi1>
    %89 = arith.select %88, %86, %74 : vector<96x32xi1>, vector<96x32xf32>
    %cst_38 = arith.constant 0.995999991 : f32
    %90 = vector.broadcast %cst_38 : f32 to vector<96x1xf32>
    %91 = arith.select %80, %90, %78 : vector<96x1xi1>, vector<96x1xf32>
    %92 = arith.mulf %91, %91 : vector<96x1xf32>
    %93 = vector.broadcast %34 : vector<1x32xf32> to vector<96x32xf32>
    %94 = arith.mulf %89, %93 : vector<96x32xf32>
    %cst_39 = arith.constant dense<0.000000e+00> : vector<96xf32>
    %95 = vector.multi_reduction <add>, %94, %cst_39 [1] : vector<96x32xf32> to vector<96xf32>
    %96 = vector.shape_cast %95 : vector<96xf32> to vector<96x1xf32>
    %cst_40 = arith.constant 2.000000e+00 : f32
    %97 = vector.broadcast %cst_40 : f32 to vector<96x1xf32>
    %98 = arith.mulf %97, %96 : vector<96x1xf32>
    %cst_41 = arith.constant 1.000000e+00 : f32
    %99 = vector.broadcast %cst_41 : f32 to vector<96x1xf32>
    %100 = arith.addf %99, %98 : vector<96x1xf32>
    %101 = vector.broadcast %35 : f32 to vector<96x1xf32>
    %102 = arith.addf %100, %101 : vector<96x1xf32>
    %103 = vector.broadcast %102 : vector<96x1xf32> to vector<96x32xf32>
    %104 = arith.mulf %103, %89 : vector<96x32xf32>
    %cst_42 = arith.constant 1.000000e+00 : f32
    %105 = vector.broadcast %cst_42 : f32 to vector<96x1xf32>
    %106 = arith.mulf %105, %92 : vector<96x1xf32>
    %cst_43 = arith.constant 1.000000e+00 : f32
    %107 = vector.broadcast %cst_43 : f32 to vector<96x1xf32>
    %108 = arith.subf %107, %106 : vector<96x1xf32>
    %109 = vector.broadcast %108 : vector<96x1xf32> to vector<96x32xf32>
    %110 = vector.broadcast %34 : vector<1x32xf32> to vector<96x32xf32>
    %111 = arith.mulf %109, %110 : vector<96x32xf32>
    %112 = arith.addf %104, %111 : vector<96x32xf32>
    %cst_44 = arith.constant 1.000000e+00 : f32
    %113 = vector.broadcast %cst_44 : f32 to vector<96x1xf32>
    %114 = arith.addf %113, %98 : vector<96x1xf32>
    %cst_45 = arith.constant 1.000000e+00 : f32
    %115 = vector.broadcast %cst_45 : f32 to vector<96x1xf32>
    %116 = arith.mulf %115, %92 : vector<96x1xf32>
    %117 = vector.broadcast %35 : f32 to vector<96x1xf32>
    %118 = arith.mulf %117, %116 : vector<96x1xf32>
    %119 = arith.addf %114, %118 : vector<96x1xf32>
    %cst_46 = arith.constant 1.000000e-15 : f32
    %120 = vector.broadcast %cst_46 : f32 to vector<96x1xf32>
    %121 = arith.maximumf %119, %120 : vector<96x1xf32>
    %cst_47 = arith.constant 1.000000e+00 : f32
    %122 = vector.broadcast %cst_47 : f32 to vector<96x1xf32>
    %123 = arith.divf %122, %121 : vector<96x1xf32>
    %124 = vector.broadcast %123 : vector<96x1xf32> to vector<96x32xf32>
    %125 = arith.mulf %112, %124 : vector<96x32xf32>
    %126 = arith.mulf %125, %125 : vector<96x32xf32>
    %cst_48 = arith.constant dense<0.000000e+00> : vector<96xf32>
    %127 = vector.multi_reduction <add>, %126, %cst_48 [1] : vector<96x32xf32> to vector<96xf32>
    %128 = vector.shape_cast %127 : vector<96xf32> to vector<96x1xf32>
    %cst_49 = arith.constant 1.000000e-30 : f32
    %129 = vector.broadcast %cst_49 : f32 to vector<96x1xf32>
    %130 = arith.maximumf %128, %129 : vector<96x1xf32>
    %131 = math.rsqrt %130 : vector<96x1xf32>
    %132 = arith.mulf %130, %131 : vector<96x1xf32>
    %cst_50 = arith.constant 0.995999991 : f32
    %133 = vector.broadcast %cst_50 : f32 to vector<96x1xf32>
    %134 = arith.cmpf ogt, %132, %133 : vector<96x1xf32>
    %cst_51 = arith.constant 0.995999991 : f32
    %135 = vector.broadcast %cst_51 : f32 to vector<96x1xf32>
    %136 = arith.mulf %135, %131 : vector<96x1xf32>
    %137 = vector.broadcast %136 : vector<96x1xf32> to vector<96x32xf32>
    %138 = arith.mulf %137, %125 : vector<96x32xf32>
    %139 = vector.shape_cast %134 : vector<96x1xi1> to vector<96x1xi1>
    %140 = vector.broadcast %139 : vector<96x1xi1> to vector<96x32xi1>
    %141 = arith.select %140, %138, %125 : vector<96x32xi1>, vector<96x32xf32>
    %cst_52 = arith.constant 0.995999991 : f32
    %142 = vector.broadcast %cst_52 : f32 to vector<96x1xf32>
    %143 = arith.select %134, %142, %132 : vector<96x1xi1>, vector<96x1xf32>
    %cst_53 = arith.constant 1.00401604 : f32
    %144 = vector.broadcast %cst_53 : f32 to vector<96x1xf32>
    %145 = arith.select %134, %144, %131 : vector<96x1xi1>, vector<96x1xf32>
    %cst_54 = arith.constant 1.000000e+00 : f32
    %146 = vector.broadcast %cst_54 : f32 to vector<96x1xf32>
    %147 = arith.mulf %146, %143 : vector<96x1xf32>
    %cst_55 = arith.constant -0.99999988 : f32
    %cst_56 = arith.constant 0.99999988 : f32
    %148 = vector.broadcast %cst_55 : f32 to vector<96x1xf32>
    %149 = arith.maximumf %148, %147 : vector<96x1xf32>
    %150 = vector.broadcast %cst_56 : f32 to vector<96x1xf32>
    %151 = arith.minimumf %150, %149 : vector<96x1xf32>
    %152 = math.log1p %151 : vector<96x1xf32>
    %cst_57 = arith.constant 0.000000e+00 : f32
    %153 = vector.broadcast %cst_57 : f32 to vector<96x1xf32>
    %154 = arith.subf %153, %151 : vector<96x1xf32>
    %155 = math.log1p %154 : vector<96x1xf32>
    %156 = arith.subf %152, %155 : vector<96x1xf32>
    %cst_58 = arith.constant 5.000000e-01 : f32
    %157 = vector.broadcast %cst_58 : f32 to vector<96x1xf32>
    %158 = arith.mulf %157, %156 : vector<96x1xf32>
    %cst_59 = arith.constant 1.000000e+00 : f32
    %159 = vector.broadcast %cst_59 : f32 to vector<96x1xf32>
    %160 = arith.mulf %159, %158 : vector<96x1xf32>
    %161 = arith.mulf %160, %145 : vector<96x1xf32>
    %162 = vector.broadcast %161 : vector<96x1xf32> to vector<96x32xf32>
    %163 = arith.mulf %162, %141 : vector<96x32xf32>
    %cst_60 = arith.constant dense<0.000000e+00> : vector<96x32xf32>
    %164 = tpu.matmul %1, %163, %cst_60 {dimension_numbers = #tpu.dot_dimension_numbers<[1], [0], [0], [1], [0, 0, 1, 1], [], []>} : vector<96x96xf32>, vector<96x32xf32>, vector<96x32xf32> -> vector<96x32xf32>
    %165 = arith.mulf %164, %164 : vector<96x32xf32>
    %cst_61 = arith.constant dense<0.000000e+00> : vector<96xf32>
    %166 = vector.multi_reduction <add>, %165, %cst_61 [1] : vector<96x32xf32> to vector<96xf32>
    %167 = vector.shape_cast %166 : vector<96xf32> to vector<96x1xf32>
    %cst_62 = arith.constant 1.000000e-30 : f32
    %168 = vector.broadcast %cst_62 : f32 to vector<96x1xf32>
    %169 = arith.maximumf %167, %168 : vector<96x1xf32>
    %170 = math.rsqrt %169 : vector<96x1xf32>
    %171 = arith.mulf %169, %170 : vector<96x1xf32>
    %cst_63 = arith.constant 1.000000e+00 : f32
    %172 = vector.broadcast %cst_63 : f32 to vector<96x1xf32>
    %173 = arith.mulf %172, %171 : vector<96x1xf32>
    %cst_64 = arith.constant -1.500000e+01 : f32
    %cst_65 = arith.constant 1.500000e+01 : f32
    %174 = vector.broadcast %cst_64 : f32 to vector<96x1xf32>
    %175 = arith.maximumf %174, %173 : vector<96x1xf32>
    %176 = vector.broadcast %cst_65 : f32 to vector<96x1xf32>
    %177 = arith.minimumf %176, %175 : vector<96x1xf32>
    %178 = math.tanh %177 : vector<96x1xf32>
    %cst_66 = arith.constant 0.995999991 : f32
    %179 = vector.broadcast %cst_66 : f32 to vector<96x1xf32>
    %180 = arith.cmpf ogt, %178, %179 : vector<96x1xf32>
    %cst_67 = arith.constant 1.000000e+00 : f32
    %181 = vector.broadcast %cst_67 : f32 to vector<96x1xf32>
    %182 = arith.mulf %178, %181 : vector<96x1xf32>
    %cst_68 = arith.constant 0.995999991 : f32
    %183 = vector.broadcast %cst_68 : f32 to vector<96x1xf32>
    %184 = arith.select %180, %183, %182 : vector<96x1xi1>, vector<96x1xf32>
    %185 = arith.mulf %184, %170 : vector<96x1xf32>
    %186 = vector.broadcast %185 : vector<96x1xf32> to vector<96x32xf32>
    %187 = arith.mulf %186, %164 : vector<96x32xf32>
    %cst_69 = arith.constant 1.000000e-15 : f32
    %188 = vector.broadcast %cst_69 : f32 to vector<96x1xf32>
    %189 = arith.maximumf %178, %188 : vector<96x1xf32>
    %cst_70 = arith.constant 1.000000e+00 : f32
    %190 = vector.broadcast %cst_70 : f32 to vector<96x1xf32>
    %191 = arith.divf %190, %189 : vector<96x1xf32>
    %cst_71 = arith.constant 1.00401604 : f32
    %192 = vector.broadcast %cst_71 : f32 to vector<96x1xf32>
    %193 = arith.select %180, %192, %191 : vector<96x1xi1>, vector<96x1xf32>
    %cst_72 = arith.constant 1.000000e+00 : f32
    %194 = vector.broadcast %cst_72 : f32 to vector<96x1xf32>
    %195 = arith.mulf %194, %184 : vector<96x1xf32>
    %cst_73 = arith.constant -0.99999988 : f32
    %cst_74 = arith.constant 0.99999988 : f32
    %196 = vector.broadcast %cst_73 : f32 to vector<96x1xf32>
    %197 = arith.maximumf %196, %195 : vector<96x1xf32>
    %198 = vector.broadcast %cst_74 : f32 to vector<96x1xf32>
    %199 = arith.minimumf %198, %197 : vector<96x1xf32>
    %200 = math.log1p %199 : vector<96x1xf32>
    %cst_75 = arith.constant 0.000000e+00 : f32
    %201 = vector.broadcast %cst_75 : f32 to vector<96x1xf32>
    %202 = arith.subf %201, %199 : vector<96x1xf32>
    %203 = math.log1p %202 : vector<96x1xf32>
    %204 = arith.subf %200, %203 : vector<96x1xf32>
    %cst_76 = arith.constant 5.000000e-01 : f32
    %205 = vector.broadcast %cst_76 : f32 to vector<96x1xf32>
    %206 = arith.mulf %205, %204 : vector<96x1xf32>
    %cst_77 = arith.constant 1.000000e+00 : f32
    %207 = vector.broadcast %cst_77 : f32 to vector<96x1xf32>
    %208 = arith.mulf %207, %206 : vector<96x1xf32>
    %209 = arith.mulf %208, %193 : vector<96x1xf32>
    %210 = vector.broadcast %209 : vector<96x1xf32> to vector<96x32xf32>
    %211 = arith.mulf %210, %187 : vector<96x32xf32>
    %cst_78 = arith.constant 0.000000e+00 : f32
    %212 = vector.broadcast %cst_78 : f32 to vector<96x32xf32>
    %213 = arith.maximumf %211, %212 : vector<96x32xf32>
    %214 = arith.mulf %213, %213 : vector<96x32xf32>
    %cst_79 = arith.constant dense<0.000000e+00> : vector<96xf32>
    %215 = vector.multi_reduction <add>, %214, %cst_79 [1] : vector<96x32xf32> to vector<96xf32>
    %216 = vector.shape_cast %215 : vector<96xf32> to vector<96x1xf32>
    %cst_80 = arith.constant 1.000000e-30 : f32
    %217 = vector.broadcast %cst_80 : f32 to vector<96x1xf32>
    %218 = arith.maximumf %216, %217 : vector<96x1xf32>
    %219 = math.rsqrt %218 : vector<96x1xf32>
    %220 = arith.mulf %218, %219 : vector<96x1xf32>
    %cst_81 = arith.constant 1.000000e+00 : f32
    %221 = vector.broadcast %cst_81 : f32 to vector<96x1xf32>
    %222 = arith.mulf %221, %220 : vector<96x1xf32>
    %cst_82 = arith.constant -1.500000e+01 : f32
    %cst_83 = arith.constant 1.500000e+01 : f32
    %223 = vector.broadcast %cst_82 : f32 to vector<96x1xf32>
    %224 = arith.maximumf %223, %222 : vector<96x1xf32>
    %225 = vector.broadcast %cst_83 : f32 to vector<96x1xf32>
    %226 = arith.minimumf %225, %224 : vector<96x1xf32>
    %227 = math.tanh %226 : vector<96x1xf32>
    %cst_84 = arith.constant 0.995999991 : f32
    %228 = vector.broadcast %cst_84 : f32 to vector<96x1xf32>
    %229 = arith.cmpf ogt, %227, %228 : vector<96x1xf32>
    %cst_85 = arith.constant 1.000000e+00 : f32
    %230 = vector.broadcast %cst_85 : f32 to vector<96x1xf32>
    %231 = arith.mulf %227, %230 : vector<96x1xf32>
    %cst_86 = arith.constant 0.995999991 : f32
    %232 = vector.broadcast %cst_86 : f32 to vector<96x1xf32>
    %233 = arith.select %229, %232, %231 : vector<96x1xi1>, vector<96x1xf32>
    %234 = arith.mulf %233, %219 : vector<96x1xf32>
    %235 = vector.broadcast %234 : vector<96x1xf32> to vector<96x32xf32>
    %236 = arith.mulf %235, %213 : vector<96x32xf32>
    %cst_87 = arith.constant 1.000000e-15 : f32
    %237 = vector.broadcast %cst_87 : f32 to vector<96x1xf32>
    %238 = arith.maximumf %227, %237 : vector<96x1xf32>
    %cst_88 = arith.constant 1.000000e+00 : f32
    %239 = vector.broadcast %cst_88 : f32 to vector<96x1xf32>
    %240 = arith.divf %239, %238 : vector<96x1xf32>
    %cst_89 = arith.constant 1.00401604 : f32
    %241 = vector.broadcast %cst_89 : f32 to vector<96x1xf32>
    %242 = arith.select %229, %241, %240 : vector<96x1xi1>, vector<96x1xf32>
    %c0_90 = arith.constant 0 : index
    %c0_91 = arith.constant 0 : index
    %243 = vector.load %arg7[%c0_90, %c0_91] : memref<32x32xf32, #tpu.memory_space<vmem>>, vector<32x32xf32>
    %c0_92 = arith.constant 0 : index
    %c0_93 = arith.constant 0 : index
    %244 = vector.load %arg8[%c0_92, %c0_93] : memref<1x32xf32, #tpu.memory_space<vmem>>, vector<1x32xf32>
    %c1 = arith.constant 1 : index
    %245 = memref.load %arg1[%c1] : memref<3xf32, #tpu.memory_space<smem>>
    %cst_94 = arith.constant dense<0.000000e+00> : vector<96x32xf32>
    %246 = tpu.matmul %236, %243, %cst_94 {dimension_numbers = #tpu.dot_dimension_numbers<[1], [0], [0], [1], [0, 0, 1, 1], [], []>} : vector<96x32xf32>, vector<32x32xf32>, vector<96x32xf32> -> vector<96x32xf32>
    %247 = arith.mulf %246, %246 : vector<96x32xf32>
    %cst_95 = arith.constant dense<0.000000e+00> : vector<96xf32>
    %248 = vector.multi_reduction <add>, %247, %cst_95 [1] : vector<96x32xf32> to vector<96xf32>
    %249 = vector.shape_cast %248 : vector<96xf32> to vector<96x1xf32>
    %cst_96 = arith.constant 1.000000e-30 : f32
    %250 = vector.broadcast %cst_96 : f32 to vector<96x1xf32>
    %251 = arith.maximumf %249, %250 : vector<96x1xf32>
    %252 = math.rsqrt %251 : vector<96x1xf32>
    %253 = arith.mulf %251, %252 : vector<96x1xf32>
    %254 = arith.mulf %253, %242 : vector<96x1xf32>
    %cst_97 = arith.constant 1.000000e+00 : f32
    %255 = vector.broadcast %cst_97 : f32 to vector<96x1xf32>
    %256 = arith.mulf %255, %233 : vector<96x1xf32>
    %cst_98 = arith.constant -0.99999988 : f32
    %cst_99 = arith.constant 0.99999988 : f32
    %257 = vector.broadcast %cst_98 : f32 to vector<96x1xf32>
    %258 = arith.maximumf %257, %256 : vector<96x1xf32>
    %259 = vector.broadcast %cst_99 : f32 to vector<96x1xf32>
    %260 = arith.minimumf %259, %258 : vector<96x1xf32>
    %261 = math.log1p %260 : vector<96x1xf32>
    %cst_100 = arith.constant 0.000000e+00 : f32
    %262 = vector.broadcast %cst_100 : f32 to vector<96x1xf32>
    %263 = arith.subf %262, %260 : vector<96x1xf32>
    %264 = math.log1p %263 : vector<96x1xf32>
    %265 = arith.subf %261, %264 : vector<96x1xf32>
    %cst_101 = arith.constant 5.000000e-01 : f32
    %266 = vector.broadcast %cst_101 : f32 to vector<96x1xf32>
    %267 = arith.mulf %266, %265 : vector<96x1xf32>
    %268 = arith.mulf %254, %267 : vector<96x1xf32>
    %cst_102 = arith.constant -1.500000e+01 : f32
    %cst_103 = arith.constant 1.500000e+01 : f32
    %269 = vector.broadcast %cst_102 : f32 to vector<96x1xf32>
    %270 = arith.maximumf %269, %268 : vector<96x1xf32>
    %271 = vector.broadcast %cst_103 : f32 to vector<96x1xf32>
    %272 = arith.minimumf %271, %270 : vector<96x1xf32>
    %273 = math.tanh %272 : vector<96x1xf32>
    %cst_104 = arith.constant 1.000000e+00 : f32
    %274 = vector.broadcast %cst_104 : f32 to vector<96x1xf32>
    %275 = arith.mulf %273, %274 : vector<96x1xf32>
    %276 = arith.mulf %275, %252 : vector<96x1xf32>
    %277 = vector.broadcast %276 : vector<96x1xf32> to vector<96x32xf32>
    %278 = arith.mulf %277, %246 : vector<96x32xf32>
    %cst_105 = arith.constant 1.000000e-15 : f32
    %279 = vector.broadcast %cst_105 : f32 to vector<96x1xf32>
    %280 = arith.cmpf ole, %253, %279 : vector<96x1xf32>
    %cst_106 = arith.constant 0.000000e+00 : f32
    %281 = vector.shape_cast %280 : vector<96x1xi1> to vector<96x1xi1>
    %282 = vector.broadcast %281 : vector<96x1xi1> to vector<96x32xi1>
    %283 = vector.broadcast %cst_106 : f32 to vector<96x32xf32>
    %284 = arith.select %282, %283, %278 : vector<96x32xi1>, vector<96x32xf32>
    %cst_107 = arith.constant 1.000000e+00 : f32
    %285 = vector.broadcast %cst_107 : f32 to vector<96x1xf32>
    %286 = arith.mulf %273, %285 : vector<96x1xf32>
    %cst_108 = arith.constant 0.000000e+00 : f32
    %287 = vector.broadcast %cst_108 : f32 to vector<96x1xf32>
    %288 = arith.select %280, %287, %286 : vector<96x1xi1>, vector<96x1xf32>
    %cst_109 = arith.constant 0.995999991 : f32
    %289 = vector.broadcast %cst_109 : f32 to vector<96x1xf32>
    %290 = arith.cmpf ogt, %288, %289 : vector<96x1xf32>
    %cst_110 = arith.constant 1.000000e-15 : f32
    %291 = vector.broadcast %cst_110 : f32 to vector<96x1xf32>
    %292 = arith.maximumf %288, %291 : vector<96x1xf32>
    %cst_111 = arith.constant 0.995999991 : f32
    %293 = vector.broadcast %cst_111 : f32 to vector<96x1xf32>
    %294 = arith.divf %293, %292 : vector<96x1xf32>
    %295 = vector.broadcast %294 : vector<96x1xf32> to vector<96x32xf32>
    %296 = arith.mulf %295, %284 : vector<96x32xf32>
    %297 = vector.shape_cast %290 : vector<96x1xi1> to vector<96x1xi1>
    %298 = vector.broadcast %297 : vector<96x1xi1> to vector<96x32xi1>
    %299 = arith.select %298, %296, %284 : vector<96x32xi1>, vector<96x32xf32>
    %cst_112 = arith.constant 0.995999991 : f32
    %300 = vector.broadcast %cst_112 : f32 to vector<96x1xf32>
    %301 = arith.select %290, %300, %288 : vector<96x1xi1>, vector<96x1xf32>
    %302 = arith.mulf %301, %301 : vector<96x1xf32>
    %303 = vector.broadcast %244 : vector<1x32xf32> to vector<96x32xf32>
    %304 = arith.mulf %299, %303 : vector<96x32xf32>
    %cst_113 = arith.constant dense<0.000000e+00> : vector<96xf32>
    %305 = vector.multi_reduction <add>, %304, %cst_113 [1] : vector<96x32xf32> to vector<96xf32>
    %306 = vector.shape_cast %305 : vector<96xf32> to vector<96x1xf32>
    %cst_114 = arith.constant 2.000000e+00 : f32
    %307 = vector.broadcast %cst_114 : f32 to vector<96x1xf32>
    %308 = arith.mulf %307, %306 : vector<96x1xf32>
    %cst_115 = arith.constant 1.000000e+00 : f32
    %309 = vector.broadcast %cst_115 : f32 to vector<96x1xf32>
    %310 = arith.addf %309, %308 : vector<96x1xf32>
    %311 = vector.broadcast %245 : f32 to vector<96x1xf32>
    %312 = arith.addf %310, %311 : vector<96x1xf32>
    %313 = vector.broadcast %312 : vector<96x1xf32> to vector<96x32xf32>
    %314 = arith.mulf %313, %299 : vector<96x32xf32>
    %cst_116 = arith.constant 1.000000e+00 : f32
    %315 = vector.broadcast %cst_116 : f32 to vector<96x1xf32>
    %316 = arith.mulf %315, %302 : vector<96x1xf32>
    %cst_117 = arith.constant 1.000000e+00 : f32
    %317 = vector.broadcast %cst_117 : f32 to vector<96x1xf32>
    %318 = arith.subf %317, %316 : vector<96x1xf32>
    %319 = vector.broadcast %318 : vector<96x1xf32> to vector<96x32xf32>
    %320 = vector.broadcast %244 : vector<1x32xf32> to vector<96x32xf32>
    %321 = arith.mulf %319, %320 : vector<96x32xf32>
    %322 = arith.addf %314, %321 : vector<96x32xf32>
    %cst_118 = arith.constant 1.000000e+00 : f32
    %323 = vector.broadcast %cst_118 : f32 to vector<96x1xf32>
    %324 = arith.addf %323, %308 : vector<96x1xf32>
    %cst_119 = arith.constant 1.000000e+00 : f32
    %325 = vector.broadcast %cst_119 : f32 to vector<96x1xf32>
    %326 = arith.mulf %325, %302 : vector<96x1xf32>
    %327 = vector.broadcast %245 : f32 to vector<96x1xf32>
    %328 = arith.mulf %327, %326 : vector<96x1xf32>
    %329 = arith.addf %324, %328 : vector<96x1xf32>
    %cst_120 = arith.constant 1.000000e-15 : f32
    %330 = vector.broadcast %cst_120 : f32 to vector<96x1xf32>
    %331 = arith.maximumf %329, %330 : vector<96x1xf32>
    %cst_121 = arith.constant 1.000000e+00 : f32
    %332 = vector.broadcast %cst_121 : f32 to vector<96x1xf32>
    %333 = arith.divf %332, %331 : vector<96x1xf32>
    %334 = vector.broadcast %333 : vector<96x1xf32> to vector<96x32xf32>
    %335 = arith.mulf %322, %334 : vector<96x32xf32>
    %336 = arith.mulf %335, %335 : vector<96x32xf32>
    %cst_122 = arith.constant dense<0.000000e+00> : vector<96xf32>
    %337 = vector.multi_reduction <add>, %336, %cst_122 [1] : vector<96x32xf32> to vector<96xf32>
    %338 = vector.shape_cast %337 : vector<96xf32> to vector<96x1xf32>
    %cst_123 = arith.constant 1.000000e-30 : f32
    %339 = vector.broadcast %cst_123 : f32 to vector<96x1xf32>
    %340 = arith.maximumf %338, %339 : vector<96x1xf32>
    %341 = math.rsqrt %340 : vector<96x1xf32>
    %342 = arith.mulf %340, %341 : vector<96x1xf32>
    %cst_124 = arith.constant 0.995999991 : f32
    %343 = vector.broadcast %cst_124 : f32 to vector<96x1xf32>
    %344 = arith.cmpf ogt, %342, %343 : vector<96x1xf32>
    %cst_125 = arith.constant 0.995999991 : f32
    %345 = vector.broadcast %cst_125 : f32 to vector<96x1xf32>
    %346 = arith.mulf %345, %341 : vector<96x1xf32>
    %347 = vector.broadcast %346 : vector<96x1xf32> to vector<96x32xf32>
    %348 = arith.mulf %347, %335 : vector<96x32xf32>
    %349 = vector.shape_cast %344 : vector<96x1xi1> to vector<96x1xi1>
    %350 = vector.broadcast %349 : vector<96x1xi1> to vector<96x32xi1>
    %351 = arith.select %350, %348, %335 : vector<96x32xi1>, vector<96x32xf32>
    %cst_126 = arith.constant 0.995999991 : f32
    %352 = vector.broadcast %cst_126 : f32 to vector<96x1xf32>
    %353 = arith.select %344, %352, %342 : vector<96x1xi1>, vector<96x1xf32>
    %cst_127 = arith.constant 1.00401604 : f32
    %354 = vector.broadcast %cst_127 : f32 to vector<96x1xf32>
    %355 = arith.select %344, %354, %341 : vector<96x1xi1>, vector<96x1xf32>
    %cst_128 = arith.constant 1.000000e+00 : f32
    %356 = vector.broadcast %cst_128 : f32 to vector<96x1xf32>
    %357 = arith.mulf %356, %353 : vector<96x1xf32>
    %cst_129 = arith.constant -0.99999988 : f32
    %cst_130 = arith.constant 0.99999988 : f32
    %358 = vector.broadcast %cst_129 : f32 to vector<96x1xf32>
    %359 = arith.maximumf %358, %357 : vector<96x1xf32>
    %360 = vector.broadcast %cst_130 : f32 to vector<96x1xf32>
    %361 = arith.minimumf %360, %359 : vector<96x1xf32>
    %362 = math.log1p %361 : vector<96x1xf32>
    %cst_131 = arith.constant 0.000000e+00 : f32
    %363 = vector.broadcast %cst_131 : f32 to vector<96x1xf32>
    %364 = arith.subf %363, %361 : vector<96x1xf32>
    %365 = math.log1p %364 : vector<96x1xf32>
    %366 = arith.subf %362, %365 : vector<96x1xf32>
    %cst_132 = arith.constant 5.000000e-01 : f32
    %367 = vector.broadcast %cst_132 : f32 to vector<96x1xf32>
    %368 = arith.mulf %367, %366 : vector<96x1xf32>
    %cst_133 = arith.constant 1.000000e+00 : f32
    %369 = vector.broadcast %cst_133 : f32 to vector<96x1xf32>
    %370 = arith.mulf %369, %368 : vector<96x1xf32>
    %371 = arith.mulf %370, %355 : vector<96x1xf32>
    %372 = vector.broadcast %371 : vector<96x1xf32> to vector<96x32xf32>
    %373 = arith.mulf %372, %351 : vector<96x32xf32>
    %cst_134 = arith.constant dense<0.000000e+00> : vector<96x32xf32>
    %374 = tpu.matmul %1, %373, %cst_134 {dimension_numbers = #tpu.dot_dimension_numbers<[1], [0], [0], [1], [0, 0, 1, 1], [], []>} : vector<96x96xf32>, vector<96x32xf32>, vector<96x32xf32> -> vector<96x32xf32>
    %375 = arith.mulf %374, %374 : vector<96x32xf32>
    %cst_135 = arith.constant dense<0.000000e+00> : vector<96xf32>
    %376 = vector.multi_reduction <add>, %375, %cst_135 [1] : vector<96x32xf32> to vector<96xf32>
    %377 = vector.shape_cast %376 : vector<96xf32> to vector<96x1xf32>
    %cst_136 = arith.constant 1.000000e-30 : f32
    %378 = vector.broadcast %cst_136 : f32 to vector<96x1xf32>
    %379 = arith.maximumf %377, %378 : vector<96x1xf32>
    %380 = math.rsqrt %379 : vector<96x1xf32>
    %381 = arith.mulf %379, %380 : vector<96x1xf32>
    %cst_137 = arith.constant 1.000000e+00 : f32
    %382 = vector.broadcast %cst_137 : f32 to vector<96x1xf32>
    %383 = arith.mulf %382, %381 : vector<96x1xf32>
    %cst_138 = arith.constant -1.500000e+01 : f32
    %cst_139 = arith.constant 1.500000e+01 : f32
    %384 = vector.broadcast %cst_138 : f32 to vector<96x1xf32>
    %385 = arith.maximumf %384, %383 : vector<96x1xf32>
    %386 = vector.broadcast %cst_139 : f32 to vector<96x1xf32>
    %387 = arith.minimumf %386, %385 : vector<96x1xf32>
    %388 = math.tanh %387 : vector<96x1xf32>
    %cst_140 = arith.constant 0.995999991 : f32
    %389 = vector.broadcast %cst_140 : f32 to vector<96x1xf32>
    %390 = arith.cmpf ogt, %388, %389 : vector<96x1xf32>
    %cst_141 = arith.constant 1.000000e+00 : f32
    %391 = vector.broadcast %cst_141 : f32 to vector<96x1xf32>
    %392 = arith.mulf %388, %391 : vector<96x1xf32>
    %cst_142 = arith.constant 0.995999991 : f32
    %393 = vector.broadcast %cst_142 : f32 to vector<96x1xf32>
    %394 = arith.select %390, %393, %392 : vector<96x1xi1>, vector<96x1xf32>
    %395 = arith.mulf %394, %380 : vector<96x1xf32>
    %396 = vector.broadcast %395 : vector<96x1xf32> to vector<96x32xf32>
    %397 = arith.mulf %396, %374 : vector<96x32xf32>
    %cst_143 = arith.constant 1.000000e-15 : f32
    %398 = vector.broadcast %cst_143 : f32 to vector<96x1xf32>
    %399 = arith.maximumf %388, %398 : vector<96x1xf32>
    %cst_144 = arith.constant 1.000000e+00 : f32
    %400 = vector.broadcast %cst_144 : f32 to vector<96x1xf32>
    %401 = arith.divf %400, %399 : vector<96x1xf32>
    %cst_145 = arith.constant 1.00401604 : f32
    %402 = vector.broadcast %cst_145 : f32 to vector<96x1xf32>
    %403 = arith.select %390, %402, %401 : vector<96x1xi1>, vector<96x1xf32>
    %cst_146 = arith.constant 1.000000e+00 : f32
    %404 = vector.broadcast %cst_146 : f32 to vector<96x1xf32>
    %405 = arith.mulf %404, %394 : vector<96x1xf32>
    %cst_147 = arith.constant -0.99999988 : f32
    %cst_148 = arith.constant 0.99999988 : f32
    %406 = vector.broadcast %cst_147 : f32 to vector<96x1xf32>
    %407 = arith.maximumf %406, %405 : vector<96x1xf32>
    %408 = vector.broadcast %cst_148 : f32 to vector<96x1xf32>
    %409 = arith.minimumf %408, %407 : vector<96x1xf32>
    %410 = math.log1p %409 : vector<96x1xf32>
    %cst_149 = arith.constant 0.000000e+00 : f32
    %411 = vector.broadcast %cst_149 : f32 to vector<96x1xf32>
    %412 = arith.subf %411, %409 : vector<96x1xf32>
    %413 = math.log1p %412 : vector<96x1xf32>
    %414 = arith.subf %410, %413 : vector<96x1xf32>
    %cst_150 = arith.constant 5.000000e-01 : f32
    %415 = vector.broadcast %cst_150 : f32 to vector<96x1xf32>
    %416 = arith.mulf %415, %414 : vector<96x1xf32>
    %cst_151 = arith.constant 1.000000e+00 : f32
    %417 = vector.broadcast %cst_151 : f32 to vector<96x1xf32>
    %418 = arith.mulf %417, %416 : vector<96x1xf32>
    %419 = arith.mulf %418, %403 : vector<96x1xf32>
    %420 = vector.broadcast %419 : vector<96x1xf32> to vector<96x32xf32>
    %421 = arith.mulf %420, %397 : vector<96x32xf32>
    %cst_152 = arith.constant 0.000000e+00 : f32
    %422 = vector.broadcast %cst_152 : f32 to vector<96x32xf32>
    %423 = arith.maximumf %421, %422 : vector<96x32xf32>
    %424 = arith.mulf %423, %423 : vector<96x32xf32>
    %cst_153 = arith.constant dense<0.000000e+00> : vector<96xf32>
    %425 = vector.multi_reduction <add>, %424, %cst_153 [1] : vector<96x32xf32> to vector<96xf32>
    %426 = vector.shape_cast %425 : vector<96xf32> to vector<96x1xf32>
    %cst_154 = arith.constant 1.000000e-30 : f32
    %427 = vector.broadcast %cst_154 : f32 to vector<96x1xf32>
    %428 = arith.maximumf %426, %427 : vector<96x1xf32>
    %429 = math.rsqrt %428 : vector<96x1xf32>
    %430 = arith.mulf %428, %429 : vector<96x1xf32>
    %cst_155 = arith.constant 1.000000e+00 : f32
    %431 = vector.broadcast %cst_155 : f32 to vector<96x1xf32>
    %432 = arith.mulf %431, %430 : vector<96x1xf32>
    %cst_156 = arith.constant -1.500000e+01 : f32
    %cst_157 = arith.constant 1.500000e+01 : f32
    %433 = vector.broadcast %cst_156 : f32 to vector<96x1xf32>
    %434 = arith.maximumf %433, %432 : vector<96x1xf32>
    %435 = vector.broadcast %cst_157 : f32 to vector<96x1xf32>
    %436 = arith.minimumf %435, %434 : vector<96x1xf32>
    %437 = math.tanh %436 : vector<96x1xf32>
    %cst_158 = arith.constant 0.995999991 : f32
    %438 = vector.broadcast %cst_158 : f32 to vector<96x1xf32>
    %439 = arith.cmpf ogt, %437, %438 : vector<96x1xf32>
    %cst_159 = arith.constant 1.000000e+00 : f32
    %440 = vector.broadcast %cst_159 : f32 to vector<96x1xf32>
    %441 = arith.mulf %437, %440 : vector<96x1xf32>
    %cst_160 = arith.constant 0.995999991 : f32
    %442 = vector.broadcast %cst_160 : f32 to vector<96x1xf32>
    %443 = arith.select %439, %442, %441 : vector<96x1xi1>, vector<96x1xf32>
    %444 = arith.mulf %443, %429 : vector<96x1xf32>
    %445 = vector.broadcast %444 : vector<96x1xf32> to vector<96x32xf32>
    %446 = arith.mulf %445, %423 : vector<96x32xf32>
    %cst_161 = arith.constant 1.000000e-15 : f32
    %447 = vector.broadcast %cst_161 : f32 to vector<96x1xf32>
    %448 = arith.maximumf %437, %447 : vector<96x1xf32>
    %cst_162 = arith.constant 1.000000e+00 : f32
    %449 = vector.broadcast %cst_162 : f32 to vector<96x1xf32>
    %450 = arith.divf %449, %448 : vector<96x1xf32>
    %cst_163 = arith.constant 1.00401604 : f32
    %451 = vector.broadcast %cst_163 : f32 to vector<96x1xf32>
    %452 = arith.select %439, %451, %450 : vector<96x1xi1>, vector<96x1xf32>
    %c0_164 = arith.constant 0 : index
    %c0_165 = arith.constant 0 : index
    %453 = vector.load %arg9[%c0_164, %c0_165] : memref<32x32xf32, #tpu.memory_space<vmem>>, vector<32x32xf32>
    %c0_166 = arith.constant 0 : index
    %c0_167 = arith.constant 0 : index
    %454 = vector.load %arg10[%c0_166, %c0_167] : memref<1x32xf32, #tpu.memory_space<vmem>>, vector<1x32xf32>
    %c2 = arith.constant 2 : index
    %455 = memref.load %arg1[%c2] : memref<3xf32, #tpu.memory_space<smem>>
    %cst_168 = arith.constant dense<0.000000e+00> : vector<96x32xf32>
    %456 = tpu.matmul %446, %453, %cst_168 {dimension_numbers = #tpu.dot_dimension_numbers<[1], [0], [0], [1], [0, 0, 1, 1], [], []>} : vector<96x32xf32>, vector<32x32xf32>, vector<96x32xf32> -> vector<96x32xf32>
    %457 = arith.mulf %456, %456 : vector<96x32xf32>
    %cst_169 = arith.constant dense<0.000000e+00> : vector<96xf32>
    %458 = vector.multi_reduction <add>, %457, %cst_169 [1] : vector<96x32xf32> to vector<96xf32>
    %459 = vector.shape_cast %458 : vector<96xf32> to vector<96x1xf32>
    %cst_170 = arith.constant 1.000000e-30 : f32
    %460 = vector.broadcast %cst_170 : f32 to vector<96x1xf32>
    %461 = arith.maximumf %459, %460 : vector<96x1xf32>
    %462 = math.rsqrt %461 : vector<96x1xf32>
    %463 = arith.mulf %461, %462 : vector<96x1xf32>
    %464 = arith.mulf %463, %452 : vector<96x1xf32>
    %cst_171 = arith.constant 1.000000e+00 : f32
    %465 = vector.broadcast %cst_171 : f32 to vector<96x1xf32>
    %466 = arith.mulf %465, %443 : vector<96x1xf32>
    %cst_172 = arith.constant -0.99999988 : f32
    %cst_173 = arith.constant 0.99999988 : f32
    %467 = vector.broadcast %cst_172 : f32 to vector<96x1xf32>
    %468 = arith.maximumf %467, %466 : vector<96x1xf32>
    %469 = vector.broadcast %cst_173 : f32 to vector<96x1xf32>
    %470 = arith.minimumf %469, %468 : vector<96x1xf32>
    %471 = math.log1p %470 : vector<96x1xf32>
    %cst_174 = arith.constant 0.000000e+00 : f32
    %472 = vector.broadcast %cst_174 : f32 to vector<96x1xf32>
    %473 = arith.subf %472, %470 : vector<96x1xf32>
    %474 = math.log1p %473 : vector<96x1xf32>
    %475 = arith.subf %471, %474 : vector<96x1xf32>
    %cst_175 = arith.constant 5.000000e-01 : f32
    %476 = vector.broadcast %cst_175 : f32 to vector<96x1xf32>
    %477 = arith.mulf %476, %475 : vector<96x1xf32>
    %478 = arith.mulf %464, %477 : vector<96x1xf32>
    %cst_176 = arith.constant -1.500000e+01 : f32
    %cst_177 = arith.constant 1.500000e+01 : f32
    %479 = vector.broadcast %cst_176 : f32 to vector<96x1xf32>
    %480 = arith.maximumf %479, %478 : vector<96x1xf32>
    %481 = vector.broadcast %cst_177 : f32 to vector<96x1xf32>
    %482 = arith.minimumf %481, %480 : vector<96x1xf32>
    %483 = math.tanh %482 : vector<96x1xf32>
    %cst_178 = arith.constant 1.000000e+00 : f32
    %484 = vector.broadcast %cst_178 : f32 to vector<96x1xf32>
    %485 = arith.mulf %483, %484 : vector<96x1xf32>
    %486 = arith.mulf %485, %462 : vector<96x1xf32>
    %487 = vector.broadcast %486 : vector<96x1xf32> to vector<96x32xf32>
    %488 = arith.mulf %487, %456 : vector<96x32xf32>
    %cst_179 = arith.constant 1.000000e-15 : f32
    %489 = vector.broadcast %cst_179 : f32 to vector<96x1xf32>
    %490 = arith.cmpf ole, %463, %489 : vector<96x1xf32>
    %cst_180 = arith.constant 0.000000e+00 : f32
    %491 = vector.shape_cast %490 : vector<96x1xi1> to vector<96x1xi1>
    %492 = vector.broadcast %491 : vector<96x1xi1> to vector<96x32xi1>
    %493 = vector.broadcast %cst_180 : f32 to vector<96x32xf32>
    %494 = arith.select %492, %493, %488 : vector<96x32xi1>, vector<96x32xf32>
    %cst_181 = arith.constant 1.000000e+00 : f32
    %495 = vector.broadcast %cst_181 : f32 to vector<96x1xf32>
    %496 = arith.mulf %483, %495 : vector<96x1xf32>
    %cst_182 = arith.constant 0.000000e+00 : f32
    %497 = vector.broadcast %cst_182 : f32 to vector<96x1xf32>
    %498 = arith.select %490, %497, %496 : vector<96x1xi1>, vector<96x1xf32>
    %cst_183 = arith.constant 0.995999991 : f32
    %499 = vector.broadcast %cst_183 : f32 to vector<96x1xf32>
    %500 = arith.cmpf ogt, %498, %499 : vector<96x1xf32>
    %cst_184 = arith.constant 1.000000e-15 : f32
    %501 = vector.broadcast %cst_184 : f32 to vector<96x1xf32>
    %502 = arith.maximumf %498, %501 : vector<96x1xf32>
    %cst_185 = arith.constant 0.995999991 : f32
    %503 = vector.broadcast %cst_185 : f32 to vector<96x1xf32>
    %504 = arith.divf %503, %502 : vector<96x1xf32>
    %505 = vector.broadcast %504 : vector<96x1xf32> to vector<96x32xf32>
    %506 = arith.mulf %505, %494 : vector<96x32xf32>
    %507 = vector.shape_cast %500 : vector<96x1xi1> to vector<96x1xi1>
    %508 = vector.broadcast %507 : vector<96x1xi1> to vector<96x32xi1>
    %509 = arith.select %508, %506, %494 : vector<96x32xi1>, vector<96x32xf32>
    %cst_186 = arith.constant 0.995999991 : f32
    %510 = vector.broadcast %cst_186 : f32 to vector<96x1xf32>
    %511 = arith.select %500, %510, %498 : vector<96x1xi1>, vector<96x1xf32>
    %512 = arith.mulf %511, %511 : vector<96x1xf32>
    %513 = vector.broadcast %454 : vector<1x32xf32> to vector<96x32xf32>
    %514 = arith.mulf %509, %513 : vector<96x32xf32>
    %cst_187 = arith.constant dense<0.000000e+00> : vector<96xf32>
    %515 = vector.multi_reduction <add>, %514, %cst_187 [1] : vector<96x32xf32> to vector<96xf32>
    %516 = vector.shape_cast %515 : vector<96xf32> to vector<96x1xf32>
    %cst_188 = arith.constant 2.000000e+00 : f32
    %517 = vector.broadcast %cst_188 : f32 to vector<96x1xf32>
    %518 = arith.mulf %517, %516 : vector<96x1xf32>
    %cst_189 = arith.constant 1.000000e+00 : f32
    %519 = vector.broadcast %cst_189 : f32 to vector<96x1xf32>
    %520 = arith.addf %519, %518 : vector<96x1xf32>
    %521 = vector.broadcast %455 : f32 to vector<96x1xf32>
    %522 = arith.addf %520, %521 : vector<96x1xf32>
    %523 = vector.broadcast %522 : vector<96x1xf32> to vector<96x32xf32>
    %524 = arith.mulf %523, %509 : vector<96x32xf32>
    %cst_190 = arith.constant 1.000000e+00 : f32
    %525 = vector.broadcast %cst_190 : f32 to vector<96x1xf32>
    %526 = arith.mulf %525, %512 : vector<96x1xf32>
    %cst_191 = arith.constant 1.000000e+00 : f32
    %527 = vector.broadcast %cst_191 : f32 to vector<96x1xf32>
    %528 = arith.subf %527, %526 : vector<96x1xf32>
    %529 = vector.broadcast %528 : vector<96x1xf32> to vector<96x32xf32>
    %530 = vector.broadcast %454 : vector<1x32xf32> to vector<96x32xf32>
    %531 = arith.mulf %529, %530 : vector<96x32xf32>
    %532 = arith.addf %524, %531 : vector<96x32xf32>
    %cst_192 = arith.constant 1.000000e+00 : f32
    %533 = vector.broadcast %cst_192 : f32 to vector<96x1xf32>
    %534 = arith.addf %533, %518 : vector<96x1xf32>
    %cst_193 = arith.constant 1.000000e+00 : f32
    %535 = vector.broadcast %cst_193 : f32 to vector<96x1xf32>
    %536 = arith.mulf %535, %512 : vector<96x1xf32>
    %537 = vector.broadcast %455 : f32 to vector<96x1xf32>
    %538 = arith.mulf %537, %536 : vector<96x1xf32>
    %539 = arith.addf %534, %538 : vector<96x1xf32>
    %cst_194 = arith.constant 1.000000e-15 : f32
    %540 = vector.broadcast %cst_194 : f32 to vector<96x1xf32>
    %541 = arith.maximumf %539, %540 : vector<96x1xf32>
    %cst_195 = arith.constant 1.000000e+00 : f32
    %542 = vector.broadcast %cst_195 : f32 to vector<96x1xf32>
    %543 = arith.divf %542, %541 : vector<96x1xf32>
    %544 = vector.broadcast %543 : vector<96x1xf32> to vector<96x32xf32>
    %545 = arith.mulf %532, %544 : vector<96x32xf32>
    %546 = arith.mulf %545, %545 : vector<96x32xf32>
    %cst_196 = arith.constant dense<0.000000e+00> : vector<96xf32>
    %547 = vector.multi_reduction <add>, %546, %cst_196 [1] : vector<96x32xf32> to vector<96xf32>
    %548 = vector.shape_cast %547 : vector<96xf32> to vector<96x1xf32>
    %cst_197 = arith.constant 1.000000e-30 : f32
    %549 = vector.broadcast %cst_197 : f32 to vector<96x1xf32>
    %550 = arith.maximumf %548, %549 : vector<96x1xf32>
    %551 = math.rsqrt %550 : vector<96x1xf32>
    %552 = arith.mulf %550, %551 : vector<96x1xf32>
    %cst_198 = arith.constant 0.995999991 : f32
    %553 = vector.broadcast %cst_198 : f32 to vector<96x1xf32>
    %554 = arith.cmpf ogt, %552, %553 : vector<96x1xf32>
    %cst_199 = arith.constant 0.995999991 : f32
    %555 = vector.broadcast %cst_199 : f32 to vector<96x1xf32>
    %556 = arith.mulf %555, %551 : vector<96x1xf32>
    %557 = vector.broadcast %556 : vector<96x1xf32> to vector<96x32xf32>
    %558 = arith.mulf %557, %545 : vector<96x32xf32>
    %559 = vector.shape_cast %554 : vector<96x1xi1> to vector<96x1xi1>
    %560 = vector.broadcast %559 : vector<96x1xi1> to vector<96x32xi1>
    %561 = arith.select %560, %558, %545 : vector<96x32xi1>, vector<96x32xf32>
    %cst_200 = arith.constant 0.995999991 : f32
    %562 = vector.broadcast %cst_200 : f32 to vector<96x1xf32>
    %563 = arith.select %554, %562, %552 : vector<96x1xi1>, vector<96x1xf32>
    %cst_201 = arith.constant 1.00401604 : f32
    %564 = vector.broadcast %cst_201 : f32 to vector<96x1xf32>
    %565 = arith.select %554, %564, %551 : vector<96x1xi1>, vector<96x1xf32>
    %cst_202 = arith.constant 1.000000e+00 : f32
    %566 = vector.broadcast %cst_202 : f32 to vector<96x1xf32>
    %567 = arith.mulf %566, %563 : vector<96x1xf32>
    %cst_203 = arith.constant -0.99999988 : f32
    %cst_204 = arith.constant 0.99999988 : f32
    %568 = vector.broadcast %cst_203 : f32 to vector<96x1xf32>
    %569 = arith.maximumf %568, %567 : vector<96x1xf32>
    %570 = vector.broadcast %cst_204 : f32 to vector<96x1xf32>
    %571 = arith.minimumf %570, %569 : vector<96x1xf32>
    %572 = math.log1p %571 : vector<96x1xf32>
    %cst_205 = arith.constant 0.000000e+00 : f32
    %573 = vector.broadcast %cst_205 : f32 to vector<96x1xf32>
    %574 = arith.subf %573, %571 : vector<96x1xf32>
    %575 = math.log1p %574 : vector<96x1xf32>
    %576 = arith.subf %572, %575 : vector<96x1xf32>
    %cst_206 = arith.constant 5.000000e-01 : f32
    %577 = vector.broadcast %cst_206 : f32 to vector<96x1xf32>
    %578 = arith.mulf %577, %576 : vector<96x1xf32>
    %cst_207 = arith.constant 1.000000e+00 : f32
    %579 = vector.broadcast %cst_207 : f32 to vector<96x1xf32>
    %580 = arith.mulf %579, %578 : vector<96x1xf32>
    %581 = arith.mulf %580, %565 : vector<96x1xf32>
    %582 = vector.broadcast %581 : vector<96x1xf32> to vector<96x32xf32>
    %583 = arith.mulf %582, %561 : vector<96x32xf32>
    %cst_208 = arith.constant dense<0.000000e+00> : vector<96x32xf32>
    %584 = tpu.matmul %1, %583, %cst_208 {dimension_numbers = #tpu.dot_dimension_numbers<[1], [0], [0], [1], [0, 0, 1, 1], [], []>} : vector<96x96xf32>, vector<96x32xf32>, vector<96x32xf32> -> vector<96x32xf32>
    %585 = arith.mulf %584, %584 : vector<96x32xf32>
    %cst_209 = arith.constant dense<0.000000e+00> : vector<96xf32>
    %586 = vector.multi_reduction <add>, %585, %cst_209 [1] : vector<96x32xf32> to vector<96xf32>
    %587 = vector.shape_cast %586 : vector<96xf32> to vector<96x1xf32>
    %cst_210 = arith.constant 1.000000e-30 : f32
    %588 = vector.broadcast %cst_210 : f32 to vector<96x1xf32>
    %589 = arith.maximumf %587, %588 : vector<96x1xf32>
    %590 = math.rsqrt %589 : vector<96x1xf32>
    %591 = arith.mulf %589, %590 : vector<96x1xf32>
    %cst_211 = arith.constant 1.000000e+00 : f32
    %592 = vector.broadcast %cst_211 : f32 to vector<96x1xf32>
    %593 = arith.mulf %592, %591 : vector<96x1xf32>
    %cst_212 = arith.constant -1.500000e+01 : f32
    %cst_213 = arith.constant 1.500000e+01 : f32
    %594 = vector.broadcast %cst_212 : f32 to vector<96x1xf32>
    %595 = arith.maximumf %594, %593 : vector<96x1xf32>
    %596 = vector.broadcast %cst_213 : f32 to vector<96x1xf32>
    %597 = arith.minimumf %596, %595 : vector<96x1xf32>
    %598 = math.tanh %597 : vector<96x1xf32>
    %cst_214 = arith.constant 0.995999991 : f32
    %599 = vector.broadcast %cst_214 : f32 to vector<96x1xf32>
    %600 = arith.cmpf ogt, %598, %599 : vector<96x1xf32>
    %cst_215 = arith.constant 1.000000e+00 : f32
    %601 = vector.broadcast %cst_215 : f32 to vector<96x1xf32>
    %602 = arith.mulf %598, %601 : vector<96x1xf32>
    %cst_216 = arith.constant 0.995999991 : f32
    %603 = vector.broadcast %cst_216 : f32 to vector<96x1xf32>
    %604 = arith.select %600, %603, %602 : vector<96x1xi1>, vector<96x1xf32>
    %605 = arith.mulf %604, %590 : vector<96x1xf32>
    %606 = vector.broadcast %605 : vector<96x1xf32> to vector<96x32xf32>
    %607 = arith.mulf %606, %584 : vector<96x32xf32>
    %cst_217 = arith.constant 1.000000e-15 : f32
    %608 = vector.broadcast %cst_217 : f32 to vector<96x1xf32>
    %609 = arith.maximumf %598, %608 : vector<96x1xf32>
    %cst_218 = arith.constant 1.000000e+00 : f32
    %610 = vector.broadcast %cst_218 : f32 to vector<96x1xf32>
    %611 = arith.divf %610, %609 : vector<96x1xf32>
    %cst_219 = arith.constant 1.00401604 : f32
    %612 = vector.broadcast %cst_219 : f32 to vector<96x1xf32>
    %613 = arith.select %600, %612, %611 : vector<96x1xi1>, vector<96x1xf32>
    %cst_220 = arith.constant 1.000000e+00 : f32
    %614 = vector.broadcast %cst_220 : f32 to vector<96x1xf32>
    %615 = arith.mulf %614, %604 : vector<96x1xf32>
    %cst_221 = arith.constant -0.99999988 : f32
    %cst_222 = arith.constant 0.99999988 : f32
    %616 = vector.broadcast %cst_221 : f32 to vector<96x1xf32>
    %617 = arith.maximumf %616, %615 : vector<96x1xf32>
    %618 = vector.broadcast %cst_222 : f32 to vector<96x1xf32>
    %619 = arith.minimumf %618, %617 : vector<96x1xf32>
    %620 = math.log1p %619 : vector<96x1xf32>
    %cst_223 = arith.constant 0.000000e+00 : f32
    %621 = vector.broadcast %cst_223 : f32 to vector<96x1xf32>
    %622 = arith.subf %621, %619 : vector<96x1xf32>
    %623 = math.log1p %622 : vector<96x1xf32>
    %624 = arith.subf %620, %623 : vector<96x1xf32>
    %cst_224 = arith.constant 5.000000e-01 : f32
    %625 = vector.broadcast %cst_224 : f32 to vector<96x1xf32>
    %626 = arith.mulf %625, %624 : vector<96x1xf32>
    %cst_225 = arith.constant 1.000000e+00 : f32
    %627 = vector.broadcast %cst_225 : f32 to vector<96x1xf32>
    %628 = arith.mulf %627, %626 : vector<96x1xf32>
    %629 = arith.mulf %628, %613 : vector<96x1xf32>
    %630 = vector.broadcast %629 : vector<96x1xf32> to vector<96x32xf32>
    %631 = arith.mulf %630, %607 : vector<96x32xf32>
    %cst_226 = arith.constant 0.000000e+00 : f32
    %632 = vector.broadcast %cst_226 : f32 to vector<96x32xf32>
    %633 = arith.maximumf %631, %632 : vector<96x32xf32>
    %634 = arith.mulf %633, %633 : vector<96x32xf32>
    %cst_227 = arith.constant dense<0.000000e+00> : vector<96xf32>
    %635 = vector.multi_reduction <add>, %634, %cst_227 [1] : vector<96x32xf32> to vector<96xf32>
    %636 = vector.shape_cast %635 : vector<96xf32> to vector<96x1xf32>
    %cst_228 = arith.constant 1.000000e-30 : f32
    %637 = vector.broadcast %cst_228 : f32 to vector<96x1xf32>
    %638 = arith.maximumf %636, %637 : vector<96x1xf32>
    %639 = math.rsqrt %638 : vector<96x1xf32>
    %640 = arith.mulf %638, %639 : vector<96x1xf32>
    %cst_229 = arith.constant 1.000000e+00 : f32
    %641 = vector.broadcast %cst_229 : f32 to vector<96x1xf32>
    %642 = arith.mulf %641, %640 : vector<96x1xf32>
    %cst_230 = arith.constant -1.500000e+01 : f32
    %cst_231 = arith.constant 1.500000e+01 : f32
    %643 = vector.broadcast %cst_230 : f32 to vector<96x1xf32>
    %644 = arith.maximumf %643, %642 : vector<96x1xf32>
    %645 = vector.broadcast %cst_231 : f32 to vector<96x1xf32>
    %646 = arith.minimumf %645, %644 : vector<96x1xf32>
    %647 = math.tanh %646 : vector<96x1xf32>
    %cst_232 = arith.constant 0.995999991 : f32
    %648 = vector.broadcast %cst_232 : f32 to vector<96x1xf32>
    %649 = arith.cmpf ogt, %647, %648 : vector<96x1xf32>
    %cst_233 = arith.constant 1.000000e+00 : f32
    %650 = vector.broadcast %cst_233 : f32 to vector<96x1xf32>
    %651 = arith.mulf %647, %650 : vector<96x1xf32>
    %cst_234 = arith.constant 0.995999991 : f32
    %652 = vector.broadcast %cst_234 : f32 to vector<96x1xf32>
    %653 = arith.select %649, %652, %651 : vector<96x1xi1>, vector<96x1xf32>
    %654 = arith.mulf %653, %639 : vector<96x1xf32>
    %655 = vector.broadcast %654 : vector<96x1xf32> to vector<96x32xf32>
    %656 = arith.mulf %655, %633 : vector<96x32xf32>
    %cst_235 = arith.constant 1.000000e-15 : f32
    %657 = vector.broadcast %cst_235 : f32 to vector<96x1xf32>
    %658 = arith.maximumf %647, %657 : vector<96x1xf32>
    %cst_236 = arith.constant 1.000000e+00 : f32
    %659 = vector.broadcast %cst_236 : f32 to vector<96x1xf32>
    %660 = arith.divf %659, %658 : vector<96x1xf32>
    %cst_237 = arith.constant 1.00401604 : f32
    %661 = vector.broadcast %cst_237 : f32 to vector<96x1xf32>
    %662 = arith.select %649, %661, %660 : vector<96x1xi1>, vector<96x1xf32>
    %cst_238 = arith.constant 1.000000e+00 : f32
    %663 = vector.broadcast %cst_238 : f32 to vector<96x1xf32>
    %664 = arith.mulf %663, %653 : vector<96x1xf32>
    %cst_239 = arith.constant -0.99999988 : f32
    %cst_240 = arith.constant 0.99999988 : f32
    %665 = vector.broadcast %cst_239 : f32 to vector<96x1xf32>
    %666 = arith.maximumf %665, %664 : vector<96x1xf32>
    %667 = vector.broadcast %cst_240 : f32 to vector<96x1xf32>
    %668 = arith.minimumf %667, %666 : vector<96x1xf32>
    %669 = math.log1p %668 : vector<96x1xf32>
    %cst_241 = arith.constant 0.000000e+00 : f32
    %670 = vector.broadcast %cst_241 : f32 to vector<96x1xf32>
    %671 = arith.subf %670, %668 : vector<96x1xf32>
    %672 = math.log1p %671 : vector<96x1xf32>
    %673 = arith.subf %669, %672 : vector<96x1xf32>
    %cst_242 = arith.constant 5.000000e-01 : f32
    %674 = vector.broadcast %cst_242 : f32 to vector<96x1xf32>
    %675 = arith.mulf %674, %673 : vector<96x1xf32>
    %cst_243 = arith.constant 1.000000e+00 : f32
    %676 = vector.broadcast %cst_243 : f32 to vector<96x1xf32>
    %677 = arith.mulf %676, %675 : vector<96x1xf32>
    %678 = arith.mulf %677, %662 : vector<96x1xf32>
    %679 = vector.broadcast %678 : vector<96x1xf32> to vector<96x32xf32>
    %680 = arith.mulf %679, %656 : vector<96x32xf32>
    %c0_244 = arith.constant 0 : index
    %c0_245 = arith.constant 0 : index
    %c0_246 = arith.constant 0 : index
    %681 = vector.load %arg4[%c0_244, %c0_245, %c0_246] : memref<1x8x96xf32, #tpu.memory_space<vmem>>, vector<1x8x96xf32>
    %682 = vector.shape_cast %681 : vector<1x8x96xf32> to vector<8x96xf32>
    %cst_247 = arith.constant dense<0.000000e+00> : vector<8x32xf32>
    %683 = tpu.matmul %682, %680, %cst_247 {dimension_numbers = #tpu.dot_dimension_numbers<[1], [0], [0], [1], [0, 0, 1, 1], [], []>} : vector<8x96xf32>, vector<96x32xf32>, vector<8x32xf32> -> vector<8x32xf32>
    %c0_248 = arith.constant 0 : index
    %c0_249 = arith.constant 0 : index
    %684 = vector.load %arg11[%c0_248, %c0_249] : memref<32x16xf32, #tpu.memory_space<vmem>>, vector<32x16xf32>
    %cst_250 = arith.constant dense<0.000000e+00> : vector<8x16xf32>
    %685 = tpu.matmul %683, %684, %cst_250 {dimension_numbers = #tpu.dot_dimension_numbers<[1], [0], [0], [1], [0, 0, 1, 1], [], []>} : vector<8x32xf32>, vector<32x16xf32>, vector<8x16xf32> -> vector<8x16xf32>
    %c0_251 = arith.constant 0 : index
    %c0_252 = arith.constant 0 : index
    %686 = vector.load %arg12[%c0_251, %c0_252] : memref<1x16xf32, #tpu.memory_space<vmem>>, vector<1x16xf32>
    %687 = vector.broadcast %686 : vector<1x16xf32> to vector<8x16xf32>
    %688 = arith.addf %685, %687 : vector<8x16xf32>
    %cst_253 = arith.constant 0.000000e+00 : f32
    %689 = vector.broadcast %cst_253 : f32 to vector<8x16xf32>
    %690 = arith.maximumf %688, %689 : vector<8x16xf32>
    %c0_254 = arith.constant 0 : index
    %c0_255 = arith.constant 0 : index
    %691 = vector.load %arg13[%c0_254, %c0_255] : memref<16x4xf32, #tpu.memory_space<vmem>>, vector<16x4xf32>
    %cst_256 = arith.constant dense<0.000000e+00> : vector<8x4xf32>
    %692 = tpu.matmul %690, %691, %cst_256 {dimension_numbers = #tpu.dot_dimension_numbers<[1], [0], [0], [1], [0, 0, 1, 1], [], []>} : vector<8x16xf32>, vector<16x4xf32>, vector<8x4xf32> -> vector<8x4xf32>
    %c0_257 = arith.constant 0 : index
    %c0_258 = arith.constant 0 : index
    %693 = vector.load %arg14[%c0_257, %c0_258] : memref<1x4xf32, #tpu.memory_space<vmem>>, vector<1x4xf32>
    %694 = vector.broadcast %693 : vector<1x4xf32> to vector<8x4xf32>
    %695 = arith.addf %692, %694 : vector<8x4xf32>
    %cst_259 = arith.constant dense<0xFF800000> : vector<8xf32>
    %696 = vector.multi_reduction <maximumf>, %695, %cst_259 [1] : vector<8x4xf32> to vector<8xf32>
    %697 = vector.shape_cast %696 : vector<8xf32> to vector<8x1xf32>
    %698 = vector.broadcast %697 : vector<8x1xf32> to vector<8x4xf32>
    %699 = arith.subf %695, %698 : vector<8x4xf32>
    %700 = math.exp %699 : vector<8x4xf32>
    %cst_260 = arith.constant dense<0.000000e+00> : vector<8xf32>
    %701 = vector.multi_reduction <add>, %700, %cst_260 [1] : vector<8x4xf32> to vector<8xf32>
    %702 = vector.shape_cast %701 : vector<8xf32> to vector<8x1xf32>
    %703 = math.log %702 : vector<8x1xf32>
    %704 = vector.broadcast %703 : vector<8x1xf32> to vector<8x4xf32>
    %705 = arith.subf %699, %704 : vector<8x4xf32>
    %c0_261 = arith.constant 0 : index
    %c0_262 = arith.constant 0 : index
    %c0_263 = arith.constant 0 : index
    %706 = vector.load %arg15[%c0_261, %c0_262, %c0_263] : memref<1x8x4xf32, #tpu.memory_space<vmem>>, vector<1x8x4xf32>
    %707 = vector.shape_cast %706 : vector<1x8x4xf32> to vector<8x4xf32>
    %708 = vector.shape_cast %705 : vector<8x4xf32> to vector<1x8x4xf32>
    tpu.vector_store %arg15[%c0_261, %c0_262, %c0_263], %708 {strides = array<i32>} : memref<1x8x4xf32, #tpu.memory_space<vmem>>, vector<1x8x4xf32>,
    return
  }
  func.func @transform_0(%arg0: i32) -> i32 {
    %c0_i32 = arith.constant 0 : i32
    %c0_i32_0 = arith.constant 0 : i32
    return %c0_i32 : i32
  }
  func.func @transform_1(%arg0: i32) -> (i32, i32, i32) {
    %c0_i32 = arith.constant 0 : i32
    %c0_i32_0 = arith.constant 0 : i32
    %c0_i32_1 = arith.constant 0 : i32
    return %arg0, %c0_i32, %c0_i32_0 : i32, i32, i32
  }
  func.func @transform_2(%arg0: i32) -> (i32, i32, i32) {
    %c0_i32 = arith.constant 0 : i32
    %c0_i32_0 = arith.constant 0 : i32
    %c0_i32_1 = arith.constant 0 : i32
    return %arg0, %c0_i32, %c0_i32_0 : i32, i32, i32
  }
  func.func @transform_3(%arg0: i32) -> (i32, i32, i32) {
    %c0_i32 = arith.constant 0 : i32
    %c0_i32_0 = arith.constant 0 : i32
    %c0_i32_1 = arith.constant 0 : i32
    return %arg0, %c0_i32, %c0_i32_0 : i32, i32, i32
  }
  func.func @transform_4(%arg0: i32) -> (i32, i32) {
    %c0_i32 = arith.constant 0 : i32
    %c0_i32_0 = arith.constant 0 : i32
    %c0_i32_1 = arith.constant 0 : i32
    return %c0_i32, %c0_i32_0 : i32, i32
  }
  func.func @transform_5(%arg0: i32) -> (i32, i32) {
    %c0_i32 = arith.constant 0 : i32
    %c0_i32_0 = arith.constant 0 : i32
    %c0_i32_1 = arith.constant 0 : i32
    return %c0_i32, %c0_i32_0 : i32, i32
  }
  func.func @transform_6(%arg0: i32) -> (i32, i32) {
    %c0_i32 = arith.constant 0 : i32
    %c0_i32_0 = arith.constant 0 : i32
    %c0_i32_1 = arith.constant 0 : i32
    return %c0_i32, %c0_i32_0 : i32, i32
  }
  func.func @transform_7(%arg0: i32) -> (i32, i32) {
    %c0_i32 = arith.constant 0 : i32
    %c0_i32_0 = arith.constant 0 : i32
    %c0_i32_1 = arith.constant 0 : i32
    return %c0_i32, %c0_i32_0 : i32, i32
  }
  func.func @transform_8(%arg0: i32) -> (i32, i32) {
    %c0_i32 = arith.constant 0 : i32
    %c0_i32_0 = arith.constant 0 : i32
    %c0_i32_1 = arith.constant 0 : i32
    return %c0_i32, %c0_i32_0 : i32, i32
  }
  func.func @transform_9(%arg0: i32) -> (i32, i32) {
    %c0_i32 = arith.constant 0 : i32
    %c0_i32_0 = arith.constant 0 : i32
    %c0_i32_1 = arith.constant 0 : i32
    return %c0_i32, %c0_i32_0 : i32, i32
  }
  func.func @transform_10(%arg0: i32) -> (i32, i32) {
    %c0_i32 = arith.constant 0 : i32
    %c0_i32_0 = arith.constant 0 : i32
    %c0_i32_1 = arith.constant 0 : i32
    return %c0_i32, %c0_i32_0 : i32, i32
  }
  func.func @transform_11(%arg0: i32) -> (i32, i32) {
    %c0_i32 = arith.constant 0 : i32
    %c0_i32_0 = arith.constant 0 : i32
    %c0_i32_1 = arith.constant 0 : i32
    return %c0_i32, %c0_i32_0 : i32, i32
  }
  func.func @transform_12(%arg0: i32) -> (i32, i32) {
    %c0_i32 = arith.constant 0 : i32
    %c0_i32_0 = arith.constant 0 : i32
    %c0_i32_1 = arith.constant 0 : i32
    return %c0_i32, %c0_i32_0 : i32, i32
  }
  func.func @transform_13(%arg0: i32) -> (i32, i32) {
    %c0_i32 = arith.constant 0 : i32
    %c0_i32_0 = arith.constant 0 : i32
    %c0_i32_1 = arith.constant 0 : i32
    return %c0_i32, %c0_i32_0 : i32, i32
  }
  func.func @transform_14(%arg0: i32) -> (i32, i32, i32) {
    %c0_i32 = arith.constant 0 : i32
    %c0_i32_0 = arith.constant 0 : i32
    %c0_i32_1 = arith.constant 0 : i32
    return %arg0, %c0_i32, %c0_i32_0 : i32, i32, i32
  }
}

</mosaic_0001>

<bundles_post_ra>
// kernel: tpu_custom_call.1
= control target key start
LH: loop header
LB: loop body
LE: loop exit
PB: predicated region body
PF: predicated region fallthrough
CT: control target
= control target key end

     0   :  { %19 = vsyncpa [#allocation4], 0  ;;  %s17296_s0 = inlined_call_operand.vmem [shape: f32[3], index: 0, kind: input, shape index: {}]   ;;  %s17297_s1 = inlined_call_operand.vmem [shape: f32[1,96,16], index: 1, kind: input, shape index: {}]   ;;  %s17298_s2 = inlined_call_operand.vmem [shape: f32[1,96,96], index: 2, kind: input, shape index: {}]   ;;  %s17299_s3 = inlined_call_operand.hbm [shape: f32[1,8,96], index: 3, kind: input, shape index: {}]   ;;  %s17300_s4 = inlined_call_operand.vmem [shape: f32[16,32], index: 4, kind: input, shape index: {}]   ;;  %s17301_s5 = inlined_call_operand.vmem [shape: f32[1,32], index: 5, kind: input, shape index: {}]   ;;  %s17302_s6 = inlined_call_operand.vmem [shape: f32[32,32], index: 6, kind: input, shape index: {}]   ;;  %s17303_s7 = inlined_call_operand.vmem [shape: f32[1,32], index: 7, kind: input, shape index: {}]   ;;  %s17304_s8 = inlined_call_operand.vmem [shape: f32[32,32], index: 8, kind: input, shape index: {}]   ;;  %s17305_s9 = inlined_call_operand.vmem [shape: f32[1,32], index: 9, kind: input, shape index: {}]   ;;  %s17306_s10 = inlined_call_operand.vmem [shape: f32[32,16], index: 10, kind: input, shape index: {}]   ;;  %s17307_s11 = inlined_call_operand.vmem [shape: f32[1,16], index: 11, kind: input, shape index: {}]   ;;  %s17308_s12 = inlined_call_operand.vmem [shape: f32[16,4], index: 12, kind: input, shape index: {}]   ;;  %s17309_s13 = inlined_call_operand.vmem [shape: f32[1,4], index: 13, kind: input, shape index: {}]   ;;  %s17310_s14 = inlined_call_operand.vmem [shape: f32[1,8,4], index: 14, kind: output, shape index: {}]  }
   0x1   :  { %s27_s15 = sshll.u32 %s17296_s0, 4  ;;  %s28_s15 = int_to_ptr.vmem [resolvable:$true] %s27_s15 }
   0x2   :  { %20 = vsyncpa [#allocation3], 0  ;;  %s10164_s16 = scalar_lea.vmem %s28_s15, 16  ;;  %p10169_p1 = scmp.lt.s32.totalorder %s28_s15, %s28_s15 }
   0x3   :  { %p10165_p0 = scmp.ne.s32.totalorder %s28_s15, %s10164_s16  ;;  %p10170_p2 = scmp.lt.s32.totalorder %s10164_s16, %s10164_s16 }
   0x5   :  { %p10171_p3 = por %p10170_p2, %p10169_p1 }
   0x7   :  { %p10172_p4 = pnand %p10171_p3, %p10165_p0 }
   0x9   :  { %10175 = shalt.err (!%p10172_p4)
}
   0xa   :  { %s10202_s17 = smov [#allocation2]   ;;  %s10203_s18 = smov [#allocation5]  }
   0xb   :  { %30 = dma.vmem_to_smem %s28_s15, 16, %s10202_s17, [#allocation4]  }
   0xc   :  { %s41_s19 = sshll.u32 %s10203_s18, 4  ;;  %s10176_s22 = scalar_lea.hbm %s17299_s3, 128  ;;  %s42_s19 = int_to_ptr.vmem [resolvable:$true] %s41_s19 }
   0xd   :  { %p10177_p5 = scmp.ne.s32.totalorder %s17299_s3, %s10176_s22  ;;  %p10180_p6 = scmp.lt.u32.totalorder %s10176_s22, %s17299_s3 }
   0xf   :  { %p10182_p7 = pnand %p10180_p6, %p10177_p5 }
  0x11   :  { %10185 = shalt.err (!%p10182_p7)
}
  0x12   :  { %s10186_s26 = scalar_lea.vmem %s42_s19, 128  ;;  %p10191_p9 = scmp.lt.s32.totalorder %s42_s19, %s42_s19 }
  0x13   :  { %p10187_p8 = scmp.ne.s32.totalorder %s42_s19, %s10186_s26  ;;  %p10192_p10 = scmp.lt.s32.totalorder %s10186_s26, %s10186_s26 }
  0x15   :  { %p10193_p11 = por %p10192_p10, %p10191_p9 }
  0x17   :  { %p10194_p12 = pnand %p10193_p11, %p10187_p8 }
  0x19   :  { %10197 = shalt.err (!%p10194_p12)
}
  0x1a   :  { %44 = dma.hbm_to_vmem [thread:$0]  %s17299_s3, 128, %s42_s19, [#allocation3]  }
  0x1b   :  { %10198 = dma.done.wait [#allocation4], 16  }
  0x1c   :  { %10199 = vsyncadd [#allocation4], 4294967280 }
  0x1d   :  { %10200 = dma.done.wait [#allocation3], 128  }
  0x1e   :  { %10201 = vsyncadd [#allocation3], 4294967168 }
  0x1f   :  { %71 = sfence }
  0x20   :  { %v10300_v0 = vld [vmem:[%s17297_s1 + $0x10] sm:$0xff]  ;;  %vm108_vm0 = vcmask 130048   ;;  %v10305_v1 = vld [vmem:[%s17297_s1] sm:$0xff]  ;;  %v10310_v2 = vld [vmem:[%s17297_s1 + $0x18] sm:$0xff]  ;;  %vm490_vm13 = vcmask 261120  }
  0x21   :  { %v98_v3 = vmul.f32 %v10300_v0, %v10300_v0  ;;  %v96_v4 = vmul.f32 %v10305_v1, %v10305_v1  ;;  %v99_v5 = vmul.f32 %v10310_v2, %v10310_v2  ;;  %v10321_v6 = vld [vmem:[%s17297_s1 + $0x8] sm:$0xff]  ;;  %v10333_v9 = vld [vmem:[%s17297_s1 + $0x20] sm:$0xff]  ;;  %v10346_v16 = vld [vmem:[%s17297_s1 + $0x38] sm:$0xff] }
  0x22   :  { %v97_v7 = vmul.f32 %v10321_v6, %v10321_v6  ;;  %v10328_v8 = vld [vmem:[%s17297_s1 + $0x28] sm:$0xff]  ;;  %v100_v15 = vmul.f32 %v10333_v9, %v10333_v9  ;;  %v10351_v17 = vld [vmem:[%s17297_s1 + $0x30] sm:$0xff]  ;;  %v103_v20 = vmul.f32 %v10346_v16, %v10346_v16  ;;  %v10367_v23 = vld [vmem:[%s17297_s1 + $0x40] sm:$0xff] }
  0x23   :  { %v115_v10 = vsel %vm108_vm0, %v98_v3, 0.0  ;;  %v109_v11 = vsel %vm108_vm0, %v96_v4, 0.0  ;;  %v118_v12 = vsel %vm108_vm0, %v99_v5, 0.0  ;;  %v101_v14 = vmul.f32 %v10328_v8, %v10328_v8  ;;  %v10362_v22 = vld [vmem:[%s17297_s1 + $0x48] sm:$0xff]  ;;  %v10378_v28 = vld [vmem:[%s17297_s1 + $0x58] sm:$0xff]  ;;  %v10383_v29 = vld [vmem:[%s17297_s1 + $0x50] sm:$0xff] }
  0x24   :  { %116 = vadd.xlane.f32.xlu1 %v115_v10  ;;  %110 = vadd.xlane.f32.xlu0 %v109_v11  ;;  %v112_v13 = vsel %vm108_vm0, %v97_v7, 0.0  ;;  %v121_v19 = vsel %vm108_vm0, %v100_v15, 0.0  ;;  %v102_v21 = vmul.f32 %v10351_v17, %v10351_v17  ;;  %v130_v24 = vsel %vm108_vm0, %v103_v20, 0.0  ;;  %v313_v36 = vld [vmem:[%s17300_s4] sm:$0xff]  ;;  %v314_v37 = vld [vmem:[%s17300_s4 + $0x8] sm:$0xff] }
  0x25   :  { %v124_v18 = vsel %vm108_vm0, %v101_v14, 0.0  ;;  %v105_v26 = vmul.f32 %v10362_v22, %v10362_v22  ;;  %v104_v27 = vmul.f32 %v10367_v23, %v10367_v23  ;;  %v107_v32 = vmul.f32 %v10378_v28, %v10378_v28 }
  0x26   :  { %v127_v25 = vsel %vm108_vm0, %v102_v21, 0.0  ;;  %v106_v33 = vmul.f32 %v10383_v29, %v10383_v29  ;;  %v8669_v38 = vpack.c.bf16 %v314_v37, %v313_v36 }
  0x27   :  { %v136_v30 = vsel %vm108_vm0, %v105_v26, 0.0  ;;  %v133_v31 = vsel %vm108_vm0, %v104_v27, 0.0  ;;  %v142_v34 = vsel %vm108_vm0, %v107_v32, 0.0 }
  0x28   :  { %119 = vadd.xlane.f32.xlu1 %v118_v12  ;;  %113 = vadd.xlane.f32.xlu0 %v112_v13  ;;  %v139_v35 = vsel %vm108_vm0, %v106_v33, 0.0 }
  0x29   :  { %8670 = vmatprep.subr.bf16.mxu0 %v8669_v38 }
  0x2a   :  { %8672 = vmatpush3.bf16.msra.mxu0 %v8669_v38 }
  0x2c   :  { %125 = vadd.xlane.f32.xlu1 %v124_v18  ;;  %122 = vadd.xlane.f32.xlu0 %v121_v19 }
  0x30   :  { %131 = vadd.xlane.f32.xlu1 %v130_v24  ;;  %128 = vadd.xlane.f32.xlu0 %v127_v25 }
  0x34   :  { %137 = vadd.xlane.f32.xlu1 %v136_v30  ;;  %134 = vadd.xlane.f32.xlu0 %v133_v31 }
  0x38   :  { %143 = vadd.xlane.f32.xlu1 %v142_v34  ;;  %140 = vadd.xlane.f32.xlu0 %v139_v35 }
  0xb1   :  { %v117_v39 = vpop.xlane.xlu1 %116  ;;  %v111_v40 = vpop.xlane.xlu0 %110 }
  0xb2   :  { %v147_v41 = vmax.f32 %v117_v39, 1e-30  ;;  %v145_v42 = vmax.f32 %v111_v40, 1e-30 }
  0xb4   :  { %8793 = vrsqrt.f32 %v147_v41 }
  0xb5   :  { %8795 = vrsqrt.f32 %v145_v42  ;;  %v120_v43 = vpop.xlane.xlu1 %119  ;;  %v114_v44 = vpop.xlane.xlu0 %113 }
  0xb6   :  { %v148_v45 = vmax.f32 %v120_v43, 1e-30  ;;  %v146_v46 = vmax.f32 %v114_v44, 1e-30 }
  0xb8   :  { %8797 = vrsqrt.f32 %v148_v45 }
  0xb9   :  { %8799 = vrsqrt.f32 %v146_v46  ;;  %v126_v47 = vpop.xlane.xlu1 %125  ;;  %v123_v48 = vpop.xlane.xlu0 %122 }
  0xba   :  { %v150_v49 = vmax.f32 %v126_v47, 1e-30  ;;  %v149_v50 = vmax.f32 %v123_v48, 1e-30 }
  0xbc   :  { %8801 = vrsqrt.f32 %v150_v49 }
  0xbd   :  { %8803 = vrsqrt.f32 %v149_v50  ;;  %v132_v51 = vpop.xlane.xlu1 %131  ;;  %v129_v52 = vpop.xlane.xlu0 %128 }
  0xbe   :  { %v10399_v53 = vpop.eup %8793  ;;  %v152_v54 = vmax.f32 %v132_v51, 1e-30  ;;  %v151_v55 = vmax.f32 %v129_v52, 1e-30 }
  0xbf   :  { %v8796_v56 = vpop.eup %8795  ;;  %v171_v57 = vmul.f32 %v10399_v53, %v147_v41 }
  0xc0   :  { %v169_v58 = vmul.f32 %v8796_v56, %v145_v42  ;;  %8805 = vrsqrt.f32 %v152_v54 }
  0xc1   :  { %v7965_v59 = vclamps-f32 %v171_v57, 15.0  ;;  %8807 = vrsqrt.f32 %v151_v55  ;;  %v138_v60 = vpop.xlane.xlu1 %137  ;;  %v135_v61 = vpop.xlane.xlu0 %134 }
  0xc2   :  { %v10402_v62 = vpop.eup %8797  ;;  %v7963_v63 = vclamps-f32 %v169_v58, 15.0  ;;  %v154_v3 = vmax.f32 %v138_v60, 1e-30  ;;  %v153_v4 = vmax.f32 %v135_v61, 1e-30 }
  0xc3   :  { %v10404_v5 = vpop.eup %8799  ;;  %8809 = vtanh.f32 %v7965_v59  ;;  %v172_v7 = vmul.f32 %v10402_v62, %v148_v45 }
  0xc4   :  { %8811 = vtanh.f32 %v7963_v63  ;;  %v170_v10 = vmul.f32 %v10404_v5, %v146_v46 }
  0xc5   :  { %v7966_v11 = vclamps-f32 %v172_v7, 15.0  ;;  %8813 = vrsqrt.f32 %v154_v3  ;;  %v144_v12 = vpop.xlane.xlu1 %143  ;;  %v141_v13 = vpop.xlane.xlu0 %140 }
  0xc6   :  { %v10408_v14 = vpop.eup %8801  ;;  %v7964_v15 = vclamps-f32 %v170_v10, 15.0  ;;  %8815 = vrsqrt.f32 %v153_v4  ;;  %v156_v18 = vmax.f32 %v144_v12, 1e-30  ;;  %v155_v19 = vmax.f32 %v141_v13, 1e-30 }
  0xc7   :  { %v8804_v20 = vpop.eup %8803  ;;  %8817 = vtanh.f32 %v7966_v11  ;;  %v174_v21 = vmul.f32 %v10408_v14, %v150_v49 }
  0xc8   :  { %8819 = vtanh.f32 %v7964_v15  ;;  %v173_v24 = vmul.f32 %v8804_v20, %v149_v50 }
  0xc9   :  { %v7968_v25 = vclamps-f32 %v174_v21, 15.0  ;;  %8821 = vrsqrt.f32 %v156_v18 }
  0xca   :  { %v10411_v26 = vpop.eup %8805  ;;  %v7967_v27 = vclamps-f32 %v173_v24, 15.0  ;;  %8823 = vrsqrt.f32 %v155_v19 }
  0xcb   :  { %v10413_v30 = vpop.eup %8807  ;;  %8825 = vtanh.f32 %v7968_v25  ;;  %v176_v31 = vmul.f32 %v10411_v26, %v152_v54 }
  0xcc   :  { %8827 = vtanh.f32 %v7967_v27  ;;  %v175_v32 = vmul.f32 %v10413_v30, %v151_v55 }
  0xcd   :  { %v10417_v33 = vpop.eup %8809  ;;  %v7970_v34 = vclamps-f32 %v176_v31, 15.0 }
  0xce   :  { %v8812_v35 = vpop.eup %8811  ;;  %v7969_v36 = vclamps-f32 %v175_v32, 15.0  ;;  %vm219_vm1 = vcmp.gt.f32.partialorder %v10417_v33, 0.996  ;;  %v267_v13 = vmax.f32 %v10417_v33, 1e-15 }
  0xcf   :  { %v10420_v37 = vpop.eup %8813  ;;  %8829 = vtanh.f32 %v7970_v34  ;;  %vm217_vm2 = vcmp.gt.f32.partialorder %v8812_v35, 0.996  ;;  %v265_v38 = vmax.f32 %v8812_v35, 1e-15  ;;  %v10435_v45 = vsel %vm219_vm1, 0.996, %v10417_v33 }
  0xd0   :  { %v10422_v39 = vpop.eup %8815  ;;  %8831 = vtanh.f32 %v7969_v36  ;;  %v178_v40 = vmul.f32 %v10420_v37, %v154_v3  ;;  %v10426_v41 = vsel %vm217_vm2, 0.996, %v8812_v35  ;;  %v243_v54 = vmul.f32 %v10399_v53, %v10435_v45 }
  0xd1   :  { %v10428_v42 = vpop.eup %8817  ;;  %v177_v43 = vmul.f32 %v10422_v39, %v153_v4  ;;  %v241_v44 = vmul.f32 %v8796_v56, %v10426_v41  ;;  %8833 = vrcp.f32 %v265_v38 }
  0xd2   :  { %v10437_v46 = vpop.eup %8819  ;;  %v7972_v47 = vclamps-f32 %v178_v40, 15.0  ;;  %vm220_vm3 = vcmp.gt.f32.partialorder %v10428_v42, 0.996  ;;  %v255_v7 = vmul.f32 %v243_v54, %v10300_v0 }
  0xd3   :  { %v10440_v48 = vpop.eup %8821  ;;  %v7971_v49 = vclamps-f32 %v177_v43, 15.0  ;;  %v253_v50 = vmul.f32 %v241_v44, %v10305_v1  ;;  %vm218_vm4 = vcmp.gt.f32.partialorder %v10437_v46, 0.996  ;;  %v10461_v57 = vsel %vm220_vm3, 0.996, %v10428_v42 }
  0xd4   :  { %v10443_v51 = vpop.eup %8823  ;;  %8835 = vtanh.f32 %v7972_v47  ;;  %v180_v52 = vmul.f32 %v10440_v48, %v156_v18  ;;  %v10456_v1 = vsel %vm218_vm4, 0.996, %v10437_v46  ;;  %v244_v61 = vmul.f32 %v10402_v62, %v10461_v57 }
  0xd5   :  { %v10449_v55 = vpop.eup %8825  ;;  %8837 = vtanh.f32 %v7971_v49  ;;  %v179_v56 = vmul.f32 %v10443_v51, %v155_v19  ;;  %8428 = vmatprep.mubr.msk.f32.mxu0 %vm108_vm0, %v253_v50  ;;  %v242_v59 = vmul.f32 %v10404_v5, %v10456_v1  ;;  %v266_v10 = vmax.f32 %v10437_v46, 1e-15 }
  0xd6   :  { %v10463_v58 = vpop.eup %8827  ;;  %v7974_v53 = vclamps-f32 %v180_v52, 15.0  ;;  %vm222_vm6 = vcmp.gt.f32.partialorder %v10449_v55, 0.996  ;;  %v256_v0 = vmul.f32 %v244_v61, %v10310_v2  ;;  %v268_v43 = vmax.f32 %v10428_v42, 1e-15 }
  0xd7   :  { %v7973_v60 = vclamps-f32 %v179_v56, 15.0  ;;  %vm221_vm5 = vcmp.gt.f32.partialorder %v10463_v58, 0.996  ;;  %v254_v63 = vmul.f32 %v242_v59, %v10321_v6  ;;  %v10487_v6 = vsel %vm222_vm6, 0.996, %v10449_v55 }
  0xd8   :  { %8839 = vtanh.f32 %v7974_v53  ;;  %v10474_v3 = vsel %vm221_vm5, 0.996, %v10463_v58  ;;  %v246_v18 = vmul.f32 %v10408_v14, %v10487_v6  ;;  %v269_v49 = vmax.f32 %v10463_v58, 1e-15 }
  0xd9   :  { %v10476_v4 = vpop.eup %8829  ;;  %8841 = vtanh.f32 %v7973_v60  ;;  %v245_v5 = vmul.f32 %v8804_v20, %v10474_v3  ;;  %8429 = vmatmul.mubr.msk.f32.vlgmr.msra.gmra.mrb[0].mxu0 %vm108_vm0, %v254_v63 }
  0xda   :  { %v10481_v62 = vpop.eup %8831  ;;  %vm224_vm7 = vcmp.gt.f32.partialorder %v10476_v4, 0.996  ;;  %8431 = vmatprep.mubr.msk.f32.mxu0 %vm108_vm0, %v255_v7  ;;  %8843 = vrcp.f32 %v266_v10  ;;  %v258_v24 = vmul.f32 %v246_v18, %v10328_v8  ;;  %v272_v50 = vmax.f32 %v10476_v4, 1e-15 }
  0xdb   :  { %v8834_v11 = vpop.eup %8833  ;;  %v257_v12 = vmul.f32 %v245_v5, %v10333_v9  ;;  %vm223_vm8 = vcmp.gt.f32.partialorder %v10481_v62, 0.996  ;;  %v10511_v9 = vsel %vm224_vm7, 0.996, %v10476_v4  ;;  %8845 = vrcp.f32 %v267_v13 }
  0xdc   :  { %v10497_v15 = vsel %vm217_vm2, 1.004016, %v8834_v11  ;;  %v10504_v19 = vsel %vm223_vm8, 0.996, %v10481_v62  ;;  %v248_v25 = vmul.f32 %v10411_v26, %v10511_v9  ;;  %8847 = vrcp.f32 %v268_v43 }
  0xdd   :  { %v247_v2 = vmul.f32 %v10413_v30, %v10504_v19  ;;  %8432 = vmatmul.mubr.msk.f32.gmra.mrb[2].mxu0 %vm108_vm0, %v256_v0  ;;  %v271_v52 = vmax.f32 %v10481_v62, 1e-15 }
  0xde   :  { %v10513_v20 = vpop.eup %8835  ;;  %8434 = vmatprep.mubr.msk.f32.mxu0 %vm108_vm0, %v257_v12  ;;  %v260_v31 = vmul.f32 %v248_v25, %v10346_v16 }
  0xdf   :  { %v10516_v21 = vpop.eup %8837  ;;  %v259_v14 = vmul.f32 %v247_v2, %v10351_v17  ;;  %vm226_vm9 = vcmp.gt.f32.partialorder %v10513_v20, 0.996  ;;  %v274_v56 = vmax.f32 %v10513_v20, 1e-15 }
  0xe0   :  { %vm225_vm10 = vcmp.gt.f32.partialorder %v10516_v21, 0.996  ;;  %v10533_v30 = vsel %vm226_vm9, 0.996, %v10513_v20  ;;  %v273_v59 = vmax.f32 %v10516_v21, 1e-15 }
  0xe1   :  { %v10528_v27 = vsel %vm225_vm10, 0.996, %v10516_v21  ;;  %8435 = vmatmul.mubr.msk.f32.gmra.mrb[4].mxu0 %vm108_vm0, %v258_v24  ;;  %v250_v34 = vmul.f32 %v10420_v37, %v10533_v30 }
  0xe2   :  { %v8840_v17 = vpop.eup %8839  ;;  %v249_v8 = vmul.f32 %v10422_v39, %v10528_v27  ;;  %8437 = vmatprep.mubr.msk.f32.mxu0 %vm108_vm0, %v259_v14 }
  0xe3   :  { %v10538_v26 = vpop.eup %8841  ;;  %vm228_vm11 = vcmp.gt.f32.partialorder %v8840_v17, 0.996  ;;  %v262_v37 = vmul.f32 %v250_v34, %v10362_v22  ;;  %v270_v22 = vmax.f32 %v10449_v55, 1e-15  ;;  %v276_v58 = vmax.f32 %v8840_v17, 1e-15 }
  0xe4   :  { %v261_v32 = vmul.f32 %v249_v8, %v10367_v23  ;;  %vm227_vm12 = vcmp.gt.f32.partialorder %v10538_v26, 0.996  ;;  %v10552_v36 = vsel %vm228_vm11, 0.996, %v8840_v17  ;;  %v8844_v38 = vpop.eup %8843 }
  0xe5   :  { %v10549_v35 = vsel %vm227_vm12, 0.996, %v10538_v26  ;;  %8438 = vmatmul.mubr.msk.f32.gmra.mrb[6].mxu0 %vm108_vm0, %v260_v31  ;;  %v10560_v23 = vsel %vm218_vm4, 1.004016, %v8844_v38  ;;  %v252_v40 = vmul.f32 %v10440_v48, %v10552_v36  ;;  %v8846_v44 = vpop.eup %8845  ;;  %8849 = vrcp.f32 %v270_v22 }
  0xe6   :  { %v251_v16 = vmul.f32 %v10443_v51, %v10549_v35  ;;  %8440 = vmatprep.mubr.msk.f32.mxu0 %vm108_vm0, %v261_v32  ;;  %v10572_v46 = vsel %vm219_vm1, 1.004016, %v8846_v44  ;;  %8851 = vrcp.f32 %v269_v49 }
  0xe7   :  { %v264_v47 = vmul.f32 %v252_v40, %v10378_v28  ;;  %8853 = vrcp.f32 %v272_v50 }
  0xe8   :  { %v263_v39 = vmul.f32 %v251_v16, %v10383_v29  ;;  %v8848_v29 = vpop.eup %8847  ;;  %8855 = vrcp.f32 %v271_v52 }
  0xe9   :  { %8441 = vmatmul.mubr.msk.f32.gmra.mrb[8].mxu0 %vm108_vm0, %v262_v37  ;;  %v10578_v48 = vsel %vm220_vm3, 1.004016, %v8848_v29  ;;  %8857 = vrcp.f32 %v274_v56 }
  0xea   :  { %8443 = vmatprep.mubr.msk.f32.mxu0 %vm108_vm0, %v263_v39  ;;  %8859 = vrcp.f32 %v273_v59 }
  0xeb   :  { %8861 = vrcp.f32 %v276_v58  ;;  %v7987_v58 = vclamps-f32 %v10426_v41, 0.9999999 }
  0xed   :  { %8444 = vmatmul.mubr.msk.f32.gmra.mrb[10].mxu0 %vm108_vm0, %v264_v47 }
  0xef   :  { %v8850_v28 = vpop.eup %8849 }
  0xf0   :  { %v10584_v33 = vsel %vm222_vm6, 1.004016, %v8850_v28  ;;  %v8852_v51 = vpop.eup %8851 }
  0xf1   :  { %v10589_v54 = vsel %vm221_vm5, 1.004016, %v8852_v51  ;;  %v8854_v42 = vpop.eup %8853 }
  0xf2   :  { %v10594_v53 = vsel %vm224_vm7, 1.004016, %v8854_v42  ;;  %v8856_v55 = vpop.eup %8855 }
  0xf3   :  { %v10599_v60 = vsel %vm223_vm8, 1.004016, %v8856_v55  ;;  %v8858_v61 = vpop.eup %8857 }
  0xf4   :  { %v10603_v63 = vsel %vm226_vm9, 1.004016, %v8858_v61  ;;  %v8860_v7 = vpop.eup %8859  ;;  %v7988_v61 = vclamps-f32 %v10456_v1, 0.9999999  ;;  %v602_v1 = vmul.f32 -0.5, %v7987_v58 }
  0xf5   :  { %v10607_v4 = vsel %vm225_vm10, 1.004016, %v8860_v7  ;;  %v8862_v5 = vpop.eup %8861  ;;  %v599_v7 = vadd.f32 1.0, %v7987_v58 }
  0xf6   :  { %v10610_v10 = vsel %vm228_vm11, 1.004016, %v8862_v5  ;;  %v708_v5 = vsub.f32 0.0, %v7988_v61 }
  0xf7   :  { %8863 = vlog2.f32 %v599_v7 }
 0x1ac   :  { %v10612_v62 = vpop.f32.mrb[0].mxu0 }
 0x1ad   :  { %v479_v11 = vmul.f32 %v10612_v62, %v10612_v62  ;;  %v10616_v0 = vpop.f32.mrb[1].mxu0 }
 0x1ae   :  { %v478_v12 = vmul.f32 %v10616_v0, %v10616_v0 }
 0x1af   :  { %v494_v13 = vsel %vm490_vm13, %v479_v11, 0.0  ;;  %v10674_v11 = vsub.f32 0.0, %v7987_v58 }
 0x1b0   :  { %495 = vadd.xlane.f32.xlu1 %v494_v13  ;;  %v10621_v18 = vpop.f32.mrb[2].mxu0  ;;  %v491_v2 = vsel %vm490_vm13, %v478_v12, 0.0  ;;  %v608_v12 = vadd.f32 1.0, %v7988_v61  ;;  %v728_v13 = vadd.f32 1.0, %v708_v5 }
 0x1b1   :  { %v481_v20 = vmul.f32 %v10621_v18, %v10621_v18  ;;  %492 = vadd.xlane.f32.xlu0 %v491_v2  ;;  %v10626_v21 = vpop.f32.mrb[3].mxu0  ;;  %v10677_v2 = vclamps-f32 %v10461_v57, 0.9999999  ;;  %v611_v57 = vmul.f32 -0.5, %v7988_v61  ;;  %v725_v7 = vand.u32 2147483647, %v10674_v11 }
 0x1b2   :  { %v480_v14 = vmul.f32 %v10626_v21, %v10626_v21  ;;  %8865 = vlog2.f32 %v608_v12 }
 0x1b3   :  { %v500_v24 = vsel %vm490_vm13, %v481_v20, 0.0  ;;  %v719_v20 = vadd.f32 1.0, %v10674_v11  ;;  %8867 = vlog2.f32 %v728_v13  ;;  %v10684_v41 = vsub.f32 0.0, %v10677_v2 }
 0x1b4   :  { %501 = vadd.xlane.f32.xlu1 %v500_v24  ;;  %v10631_v25 = vpop.f32.mrb[4].mxu0  ;;  %v497_v17 = vsel %vm490_vm13, %v480_v14, 0.0  ;;  %v10681_v14 = vclamps-f32 %v10435_v45, 0.9999999  ;;  %v614_v24 = vand.u32 2147483647, %v7988_v61 }
 0x1b5   :  { %17360 = vst [vmem:[#allocation8_spill] sm:$0xff] %v10631_v25  ;;  %v483_v8 = vmul.f32 %v10631_v25, %v10631_v25  ;;  %498 = vadd.xlane.f32.xlu0 %v497_v17  ;;  %v10636_v31 = vpop.f32.mrb[5].mxu0  ;;  %8869 = vlog2.f32 %v719_v20  ;;  %v10687_v17 = vclamps-f32 %v10474_v3, 0.9999999  ;;  %v746_v45 = vadd.f32 1.0, %v10684_v41 }
 0x1b6   :  { %17361 = vst [vmem:[#allocation9_spill] sm:$0xff] %v10636_v31  ;;  %v482_v32 = vmul.f32 %v10636_v31, %v10636_v31  ;;  %v10703_v3 = vclamps-f32 %v10533_v30, 0.9999999  ;;  %vm10709_vm14 = vcmp.lt.f32.partialorder %v614_v24, 0.0004427343  ;;  %v629_v20 = vmul.f32 -0.5, %v10677_v2 }
 0x1b7   :  { %v506_v34 = vsel %vm490_vm13, %v483_v8, 0.0  ;;  %v10690_v8 = vclamps-f32 %v10487_v6, 0.9999999  ;;  %v626_v6 = vadd.f32 1.0, %v10677_v2  ;;  %8871 = vlog2.f32 %v746_v45 }
 0x1b8   :  { %507 = vadd.xlane.f32.xlu1 %v506_v34  ;;  %v10641_v38 = vpop.f32.mrb[6].mxu0  ;;  %v503_v16 = vsel %vm490_vm13, %v482_v32, 0.0  ;;  %v10693_v32 = vclamps-f32 %v10504_v19, 0.9999999  ;;  %v731_v34 = vmul.f32 -0.5, %v708_v5  ;;  %v635_v19 = vadd.f32 1.0, %v10687_v17 }
 0x1b9   :  { %17362 = vst [vmem:[#allocation10_spill] sm:$0xff] %v10641_v38  ;;  %v485_v37 = vmul.f32 %v10641_v38, %v10641_v38  ;;  %504 = vadd.xlane.f32.xlu0 %v503_v16  ;;  %v10646_v39 = vpop.f32.mrb[7].mxu0  ;;  %v10697_v16 = vsub.f32 0.0, %v10681_v14  ;;  %8873 = vlog2.f32 %v626_v6  ;;  %vm10737_vm2 = vcmp.lt.f32.partialorder %v725_v7, 0.0004427343 }
 0x1ba   :  { %17363 = vst [vmem:[#allocation11_spill] sm:$0xff] %v10646_v39  ;;  %v484_v40 = vmul.f32 %v10646_v39, %v10646_v39  ;;  %v752_v7 = vand.u32 2147483647, %v10684_v41 }
 0x1bb   :  { %v512_v43 = vsel %vm490_vm13, %v485_v37, 0.0  ;;  %v8864_v37 = vpop.eup %8863 }
 0x1bc   :  { %513 = vadd.xlane.f32.xlu1 %v512_v43  ;;  %v10651_v44 = vpop.f32.mrb[8].mxu0  ;;  %v509_v47 = vsel %vm490_vm13, %v484_v40, 0.0  ;;  %v10700_v40 = vclamps-f32 %v10511_v9, 0.9999999  ;;  %v10707_v43 = vclamps-f32 %v10528_v27, 0.9999999  ;;  %v8866_v30 = vpop.eup %8865 }
 0x1bd   :  { %17364 = vst [vmem:[#allocation12_spill] sm:$0xff] %v10651_v44  ;;  %v487_v22 = vmul.f32 %v10651_v44, %v10651_v44  ;;  %510 = vadd.xlane.f32.xlu0 %v509_v47  ;;  %v10656_v29 = vpop.f32.mrb[9].mxu0  ;;  %v734_v47 = vand.u32 2147483647, %v708_v5  ;;  %v605_v9 = vand.u32 2147483647, %v7987_v58 }
 0x1be   :  { %17365 = vst [vmem:[#allocation13_spill] sm:$0xff] %v10656_v29  ;;  %v486_v49 = vmul.f32 %v10656_v29, %v10656_v29  ;;  %v737_v27 = vadd.f32 1.0, %v10697_v16  ;;  %v610_v24 = vmul.f32 0.6931472, %v8866_v30  ;;  %vm10770_vm4 = vcmp.lt.f32.partialorder %v752_v7, 0.0004427343 }
 0x1bf   :  { %v518_v50 = vsel %vm490_vm13, %v487_v22, 0.0  ;;  %v603_v22 = vadd.f32 1.0, %v602_v1  ;;  %vm10723_vm15 = vcmp.lt.f32.partialorder %v734_v47, 0.0004427343  ;;  %v10729_v1 = vsub.f32 0.0, %v10690_v8 }
 0x1c0   :  { %519 = vadd.xlane.f32.xlu1 %v518_v50  ;;  %v10661_v28 = vpop.f32.mrb[10].mxu0  ;;  %v515_v51 = vsel %vm490_vm13, %v486_v49, 0.0  ;;  %v10714_v49 = vclamps-f32 %v10552_v36, 0.9999999  ;;  %v612_v50 = vadd.f32 1.0, %v611_v57  ;;  %v617_v36 = vadd.f32 1.0, %v10681_v14 }
 0x1c1   :  { %17366 = vst [vmem:[#allocation14_spill] sm:$0xff] %v10661_v28  ;;  %v489_v52 = vmul.f32 %v10661_v28, %v10661_v28  ;;  %516 = vadd.xlane.f32.xlu0 %v515_v51  ;;  %v10666_v42 = vpop.f32.mrb[11].mxu0  ;;  %v722_v51 = vmul.f32 -0.5, %v10674_v11  ;;  %v604_v13 = vmul.f32 %v7987_v58, %v603_v22  ;;  %vm10731_vm1 = vcmp.lt.f32.partialorder %v605_v9, 0.0004427343 }
 0x1c2   :  { %17367 = vst [vmem:[#allocation15_spill] sm:$0xff] %v10666_v42  ;;  %v488_v56 = vmul.f32 %v10666_v42, %v10666_v42  ;;  %v613_v57 = vmul.f32 %v7988_v61, %v612_v50  ;;  %8875 = vlog2.f32 %v737_v27  ;;  %v620_v22 = vmul.f32 -0.5, %v10681_v14 }
 0x1c3   :  { %v524_v55 = vsel %vm490_vm13, %v489_v52, 0.0  ;;  %v732_v52 = vadd.f32 1.0, %v731_v34  ;;  %v723_v34 = vadd.f32 1.0, %v722_v51  ;;  %8877 = vlog2.f32 %v617_v36 }
 0x1c4   :  { %525 = vadd.xlane.f32.xlu1 %v524_v55  ;;  %v521_v59 = vsel %vm490_vm13, %v488_v56, 0.0  ;;  %v601_v56 = vmul.f32 0.6931472, %v8864_v37  ;;  %v8868_v55 = vpop.eup %8867  ;;  %v644_v61 = vadd.f32 1.0, %v10690_v8  ;;  %v630_v50 = vadd.f32 1.0, %v629_v20 }
 0x1c5   :  { %522 = vadd.xlane.f32.xlu0 %v521_v59  ;;  %v10719_v59 = vclamps-f32 %v10549_v35, 0.9999999  ;;  %v8870_v45 = vpop.eup %8869  ;;  %v730_v37 = vmul.f32 0.6931472, %v8868_v55  ;;  %v733_v6 = vmul.f32 %v732_v52, %v708_v5  ;;  %v632_v9 = vand.u32 2147483647, %v10677_v2 }
 0x1c6   :  { %v607_v47 = vsel %vm10731_vm1, %v604_v13, %v601_v56  ;;  %v749_v51 = vmul.f32 -0.5, %v10684_v41  ;;  %v764_v5 = vadd.f32 1.0, %v10729_v1  ;;  %v616_v30 = vsel %vm10709_vm14, %v613_v57, %v610_v24  ;;  %v8872_v24 = vpop.eup %8871 }
 0x1c7   :  { %v721_v52 = vmul.f32 0.6931472, %v8870_v45  ;;  %v724_v56 = vmul.f32 %v723_v34, %v10674_v11  ;;  %v10750_v27 = vsub.f32 0.0, %v10687_v17  ;;  %v736_v55 = vsel %vm10723_vm15, %v733_v6, %v730_v37  ;;  %v8874_v34 = vpop.eup %8873 }
 0x1c8   :  { %v740_v36 = vmul.f32 -0.5, %v10697_v16  ;;  %v647_v13 = vmul.f32 -0.5, %v10690_v8  ;;  %v621_v20 = vadd.f32 1.0, %v620_v22  ;;  %v623_v35 = vand.u32 2147483647, %v10681_v14 }
 0x1c9   :  { %8879 = vlog2.f32 %v644_v61  ;;  %v631_v11 = vmul.f32 %v10677_v2, %v630_v50  ;;  %vm10760_vm3 = vcmp.lt.f32.partialorder %v632_v9, 0.0004427343  ;;  %v750_v12 = vadd.f32 1.0, %v749_v51 }
 0x1ca   :  { %8881 = vlog2.f32 %v764_v5  ;;  %v828_v45 = vsub.f32 %v616_v30, %v736_v55  ;;  %v727_v37 = vsel %vm10737_vm2, %v724_v56, %v721_v52  ;;  %v755_v6 = vadd.f32 1.0, %v10750_v27 }
 0x1cb   :  { %v10768_v22 = vsub.f32 0.0, %v10700_v40  ;;  %v741_v2 = vadd.f32 1.0, %v740_v36  ;;  %v743_v50 = vand.u32 2147483647, %v10697_v16  ;;  %v648_v9 = vadd.f32 1.0, %v647_v13 }
 0x1cc   :  { %v748_v51 = vmul.f32 0.6931472, %v8872_v24  ;;  %v622_v5 = vmul.f32 %v10681_v14, %v621_v20  ;;  %vm10776_vm5 = vcmp.lt.f32.partialorder %v623_v35, 0.0004427343  ;;  %v650_v58 = vand.u32 2147483647, %v10690_v8  ;;  %v8876_v52 = vpop.eup %8875 }
 0x1cd   :  { %8883 = vlog2.f32 %v635_v19  ;;  %v827_v56 = vsub.f32 %v607_v47, %v727_v37  ;;  %v628_v55 = vmul.f32 0.6931472, %v8874_v34  ;;  %v751_v7 = vmul.f32 %v750_v12, %v10684_v41  ;;  %v8878_v42 = vpop.eup %8877 }
 0x1ce   :  { %v767_v36 = vmul.f32 -0.5, %v10729_v1  ;;  %v10783_v28 = vmul.f32 0.5, %v828_v45  ;;  %v638_v13 = vmul.f32 -0.5, %v10687_v17  ;;  %8885 = vlog2.f32 %v755_v6 }
 0x1cf   :  { %v782_v14 = vadd.f32 1.0, %v10768_v22  ;;  %v742_v20 = vmul.f32 %v741_v2, %v10697_v16  ;;  %vm10788_vm6 = vcmp.lt.f32.partialorder %v743_v50, 0.0004427343  ;;  %v649_v47 = vmul.f32 %v10690_v8, %v648_v9 }
 0x1d0   :  { %v662_v41 = vadd.f32 1.0, %v10700_v40  ;;  %v754_v19 = vsel %vm10770_vm4, %v751_v7, %v748_v51  ;;  %v739_v24 = vmul.f32 0.6931472, %v8876_v52  ;;  %vm10796_vm7 = vcmp.lt.f32.partialorder %v650_v58, 0.0004427343 }
 0x1d1   :  { %v770_v34 = vand.u32 2147483647, %v10729_v1  ;;  %v641_v16 = vand.u32 2147483647, %v10687_v17  ;;  %v10802_v45 = vmul.f32 0.5, %v827_v56  ;;  %v634_v37 = vsel %vm10760_vm3, %v631_v11, %v628_v55 }
 0x1d2   :  { %v619_v8 = vmul.f32 0.6931472, %v8878_v42  ;;  %v768_v6 = vadd.f32 1.0, %v767_v36  ;;  %v639_v50 = vadd.f32 1.0, %v638_v13  ;;  %v665_v61 = vmul.f32 -0.5, %v10700_v40 }
 0x1d3   :  { %v8880_v2 = vpop.eup %8879  ;;  %8887 = vlog2.f32 %v782_v14  ;;  %v653_v9 = vadd.f32 1.0, %v10693_v32  ;;  %v830_v58 = vsub.f32 %v634_v37, %v754_v19  ;;  %v758_v52 = vmul.f32 -0.5, %v10750_v27 }
 0x1d4   :  { %v8882_v51 = vpop.eup %8881  ;;  %8889 = vlog2.f32 %v662_v41  ;;  %v10810_v56 = vsub.f32 0.0, %v10693_v32  ;;  %v745_v11 = vsel %vm10788_vm6, %v742_v20, %v739_v24  ;;  %vm10814_vm8 = vcmp.lt.f32.partialorder %v770_v34, 0.0004427343 }
 0x1d5   :  { %vm10818_vm9 = vcmp.lt.f32.partialorder %v641_v16, 0.0004427343  ;;  %v761_v55 = vand.u32 2147483647, %v10750_v27  ;;  %v625_v7 = vsel %vm10776_vm5, %v622_v5, %v619_v8  ;;  %v646_v36 = vmul.f32 0.6931472, %v8880_v2 }
 0x1d6   :  { %v769_v13 = vmul.f32 %v768_v6, %v10729_v1  ;;  %v785_v14 = vmul.f32 -0.5, %v10768_v22  ;;  %v766_v20 = vmul.f32 0.6931472, %v8882_v51  ;;  %v640_v41 = vmul.f32 %v10687_v17, %v639_v50 }
 0x1d7   :  { %v8884_v35 = vpop.eup %8883  ;;  %v666_v19 = vadd.f32 1.0, %v665_v61  ;;  %8891 = vlog2.f32 %v653_v9  ;;  %v10828_v24 = vmul.f32 0.5, %v830_v58  ;;  %v829_v34 = vsub.f32 %v625_v7, %v745_v11 }
 0x1d8   :  { %v759_v16 = vadd.f32 1.0, %v758_v52  ;;  %v773_v37 = vadd.f32 1.0, %v10810_v56  ;;  %v8886_v29 = vpop.eup %8885  ;;  %vm10831_vm10 = vcmp.lt.f32.partialorder %v761_v55, 0.0004427343  ;;  %v668_v1 = vand.u32 2147483647, %v10700_v40 }
 0x1d9   :  { %v656_v30 = vmul.f32 -0.5, %v10693_v32  ;;  %v10838_v8 = vsub.f32 0.0, %v10703_v3  ;;  %v652_v17 = vsel %vm10796_vm7, %v649_v47, %v646_v36  ;;  %v637_v6 = vmul.f32 0.6931472, %v8884_v35 }
 0x1da   :  { %v786_v2 = vadd.f32 1.0, %v785_v14  ;;  %v788_v50 = vand.u32 2147483647, %v10768_v22  ;;  %v772_v61 = vsel %vm10814_vm8, %v769_v13, %v766_v20  ;;  %v667_v9 = vmul.f32 %v10700_v40, %v666_v19 }
 0x1db   :  { %v659_v51 = vand.u32 2147483647, %v10693_v32  ;;  %v680_v58 = vadd.f32 1.0, %v10703_v3  ;;  %v10848_v52 = vmul.f32 0.5, %v829_v34  ;;  %v757_v11 = vmul.f32 0.6931472, %v8886_v29 }
 0x1dc   :  { %v760_v55 = vmul.f32 %v759_v16, %v10750_v27  ;;  %8893 = vlog2.f32 %v773_v37  ;;  %vm10851_vm11 = vcmp.lt.f32.partialorder %v668_v1, 0.0004427343  ;;  %v657_v7 = vadd.f32 1.0, %v656_v30 }
 0x1dd   :  { %v8888_v47 = vpop.eup %8887  ;;  %v800_v42 = vadd.f32 1.0, %v10838_v8  ;;  %v10857_v40 = vsub.f32 0.0, %v10707_v43  ;;  %v832_v13 = vsub.f32 %v652_v17, %v772_v61  ;;  %v643_v14 = vsel %vm10818_vm9, %v640_v41, %v637_v6 }
 0x1de   :  { %v8890_v36 = vpop.eup %8889  ;;  %v787_v29 = vmul.f32 %v786_v2, %v10768_v22  ;;  %vm10862_vm14 = vcmp.lt.f32.partialorder %v788_v50, 0.0004427343  ;;  %vm10866_vm15 = vcmp.lt.f32.partialorder %v659_v51, 0.0004427343  ;;  %v776_v20 = vmul.f32 -0.5, %v10810_v56 }
 0x1df   :  { %8895 = vlog2.f32 %v680_v58  ;;  %v683_v19 = vmul.f32 -0.5, %v10703_v3  ;;  %v763_v34 = vsel %vm10831_vm10, %v760_v55, %v757_v11  ;;  %v784_v57 = vmul.f32 0.6931472, %v8888_v47 }
 0x1e0   :  { %v779_v41 = vand.u32 2147483647, %v10810_v56  ;;  %v674_v22 = vmul.f32 -0.5, %v10707_v43  ;;  %v664_v37 = vmul.f32 0.6931472, %v8890_v36  ;;  %v10877_v1 = vmul.f32 %v10693_v32, %v657_v7 }
 0x1e1   :  { %v8892_v16 = vpop.eup %8891  ;;  %8897 = vlog2.f32 %v800_v42  ;;  %v791_v30 = vadd.f32 1.0, %v10857_v40  ;;  %v10880_v17 = vmul.f32 0.5, %v832_v13  ;;  %v803_v6 = vmul.f32 -0.5, %v10838_v8 }
 0x1e2   :  { %v671_v5 = vadd.f32 1.0, %v10707_v43  ;;  %v10885_v2 = vsub.f32 0.0, %v10714_v49  ;;  %v831_v50 = vsub.f32 %v643_v14, %v763_v34  ;;  %v777_v61 = vadd.f32 1.0, %v776_v20 }
 0x1e3   :  { %v684_v51 = vadd.f32 1.0, %v683_v19  ;;  %v686_v58 = vand.u32 2147483647, %v10703_v3  ;;  %v790_v32 = vsel %vm10862_vm14, %v787_v29, %v784_v57  ;;  %v655_v11 = vmul.f32 0.6931472, %v8892_v16 }
 0x1e4   :  { %vm10890_vm1 = vcmp.lt.f32.partialorder %v779_v41, 0.0004427343  ;;  %v675_v47 = vadd.f32 1.0, %v674_v22  ;;  %v670_v7 = vsel %vm10851_vm11, %v667_v9, %v664_v37  ;;  %v806_v42 = vand.u32 2147483647, %v10838_v8 }
 0x1e5   :  { %8899 = vlog2.f32 %v791_v30  ;;  %v698_v36 = vadd.f32 1.0, %v10714_v49  ;;  %v804_v14 = vadd.f32 1.0, %v803_v6  ;;  %v818_v27 = vadd.f32 1.0, %v10885_v2 }
 0x1e6   :  { %v8894_v13 = vpop.eup %8893  ;;  %8901 = vlog2.f32 %v671_v5  ;;  %v10900_v29 = vsub.f32 0.0, %v10719_v59  ;;  %v10902_v20 = vmul.f32 0.5, %v831_v50  ;;  %v834_v19 = vsub.f32 %v670_v7, %v790_v32 }
 0x1e7   :  { %v778_v34 = vmul.f32 %v777_v61, %v10810_v56  ;;  %v10906_v9 = vmul.f32 %v10703_v3, %v684_v51  ;;  %v661_v57 = vsel %vm10866_vm15, %v10877_v1, %v655_v11  ;;  %vm10913_vm2 = vcmp.lt.f32.partialorder %v686_v58, 0.0004427343 }
 0x1e8   :  { %v10918_v22 = vmul.f32 %v10707_v43, %v675_v47  ;;  %v677_v16 = vand.u32 2147483647, %v10707_v43  ;;  %v701_v56 = vmul.f32 -0.5, %v10714_v49  ;;  %v775_v6 = vmul.f32 0.6931472, %v8894_v13 }
 0x1e9   :  { %v8896_v37 = vpop.eup %8895  ;;  %vm10925_vm3 = vcmp.lt.f32.partialorder %v806_v42, 0.0004427343  ;;  %8903 = vlog2.f32 %v698_v36  ;;  %v689_v1 = vadd.f32 1.0, %v10719_v59  ;;  %v805_v50 = vmul.f32 %v804_v14, %v10838_v8 }
 0x1ea   :  { %8905 = vlog2.f32 %v818_v27  ;;  %v809_v43 = vadd.f32 1.0, %v10900_v29  ;;  %v10935_v51 = vmul.f32 0.5, %v834_v19  ;;  %v794_v58 = vmul.f32 -0.5, %v10857_v40 }
 0x1eb   :  { %v8898_v61 = vpop.eup %8897  ;;  %v797_v32 = vand.u32 2147483647, %v10857_v40  ;;  %v682_v47 = vmul.f32 0.6931472, %v8896_v37  ;;  %v702_v8 = vadd.f32 1.0, %v701_v56  ;;  %v781_v13 = vsel %vm10890_vm1, %v778_v34, %v775_v6 }
 0x1ec   :  { %v704_v7 = vand.u32 2147483647, %v10714_v49  ;;  %v821_v14 = vmul.f32 -0.5, %v10885_v2  ;;  %v802_v19 = vmul.f32 0.6931472, %v8898_v61  ;;  %v692_v34 = vmul.f32 -0.5, %v10719_v59 }
 0x1ed   :  { %vm10951_vm4 = vcmp.lt.f32.partialorder %v677_v16, 0.0004427343  ;;  %v275_v56 = vmax.f32 %v10538_v26, 1e-15  ;;  %vm10958_vm5 = vcmp.lt.f32.partialorder %v797_v32, 0.0004427343 }
 0x1ee   :  { %v824_v61 = vand.u32 2147483647, %v10885_v2  ;;  %vm10979_vm6 = vcmp.lt.f32.partialorder %v704_v7, 0.0004427343  ;;  %v695_v35 = vand.u32 2147483647, %v10719_v59 }
 0x1ef   :  { %v8900_v37 = vpop.eup %8899 }
 0x1f0   :  { %v8902_v6 = vpop.eup %8901  ;;  %vm10994_vm7 = vcmp.lt.f32.partialorder %v824_v61, 0.0004427343  ;;  %vm11035_vm8 = vcmp.lt.f32.partialorder %v695_v35, 0.0004427343 }
 0x1f1   :  { %v673_v41 = vmul.f32 0.6931472, %v8902_v6 }
 0x23d   :  { %v10908_v12 = vpop.xlane.xlu1 %495 }
 0x23e   :  { %v17315_v3 = vmax.f32 %v10908_v12, 1e-30  ;;  %v10923_v30 = vpop.xlane.xlu0 %492  ;;  %v17413_v6 = vmax.f32 %v10908_v12, 1e-30  ;;  %v679_v12 = vsel %vm10951_vm4, %v10918_v22, %v673_v41 }
 0x23f   :  { %v17314_v5 = vmax.f32 %v10923_v30, 1e-30 }
 0x240   :  { %8907 = vrsqrt.f32 %v17315_v3  ;;  %v795_v3 = vadd.f32 1.0, %v794_v58  ;;  %v8904_v58 = vpop.eup %8903 }
 0x241   :  { %8909 = vrsqrt.f32 %v17314_v5  ;;  %v10941_v11 = vpop.xlane.xlu1 %501  ;;  %v8906_v7 = vpop.eup %8905 }
 0x242   :  { %v17316_v42 = vmax.f32 %v10941_v11, 1e-30  ;;  %v10945_v36 = vpop.xlane.xlu0 %498  ;;  %8911 = vlog2.f32 %v689_v1  ;;  %v10967_v1 = vsub.f32 %v661_v57, %v781_v13  ;;  %v812_v57 = vmul.f32 -0.5, %v10900_v29 }
 0x243   :  { %v17318_v27 = vmax.f32 %v10945_v36, 1e-30  ;;  %8913 = vlog2.f32 %v809_v43  ;;  %v10970_v43 = vmul.f32 %v10714_v49, %v702_v8  ;;  %v808_v8 = vsel %vm10925_vm3, %v805_v50, %v802_v19 }
 0x244   :  { %8915 = vrsqrt.f32 %v17316_v42  ;;  %v688_v42 = vsel %vm10913_vm2, %v10906_v9, %v682_v47  ;;  %v793_v13 = vmul.f32 0.6931472, %v8900_v37  ;;  %v796_v9 = vmul.f32 %v795_v3, %v10857_v40 }
 0x245   :  { %8917 = vrsqrt.f32 %v17318_v27  ;;  %v10965_v16 = vpop.xlane.xlu1 %507  ;;  %v822_v27 = vadd.f32 1.0, %v821_v14  ;;  %v693_v47 = vadd.f32 1.0, %v692_v34  ;;  %v815_v50 = vand.u32 2147483647, %v10900_v29 }
 0x246   :  { %v10974_v32 = vpop.xlane.xlu0 %504  ;;  %8919 = vrcp.f32 %v275_v56  ;;  %v17410_v39 = vmax.f32 %v10965_v16, 1e-30  ;;  %v11005_v3 = vsub.f32 %v688_v42, %v808_v8  ;;  %v813_v37 = vadd.f32 1.0, %v812_v57 }
 0x247   :  { %v17321_v49 = vmax.f32 %v10974_v32, 1e-30  ;;  %v823_v56 = vmul.f32 %v822_v27, %v10885_v2  ;;  %v799_v31 = vsel %vm10958_vm5, %v796_v9, %v793_v13  ;;  %v17414_v42 = vmax.f32 %v10923_v30, 1e-30 }
 0x248   :  { %8921 = vrsqrt.f32 %v17410_v39  ;;  %v700_v39 = vmul.f32 0.6931472, %v8904_v58  ;;  %v694_v27 = vmul.f32 %v10719_v59, %v693_v47  ;;  %v820_v58 = vmul.f32 0.6931472, %v8906_v7 }
 0x249   :  { %8923 = vrsqrt.f32 %v17321_v49  ;;  %v10992_v14 = vpop.xlane.xlu1 %513  ;;  %vm11039_vm9 = vcmp.lt.f32.partialorder %v815_v50, 0.0004427343  ;;  %v835_v5 = vsub.f32 %v679_v12, %v799_v31  ;;  %v814_v47 = vmul.f32 %v813_v37, %v10900_v29 }
 0x24a   :  { %v11000_v19 = vpop.eup %8907  ;;  %v11003_v40 = vpop.xlane.xlu0 %510  ;;  %v17415_v2 = vmax.f32 %v10992_v14, 1e-30  ;;  %v17420_v50 = vmax.f32 %v10941_v11, 1e-30  ;;  %v826_v44 = vsel %vm10994_vm7, %v823_v56, %v820_v58  ;;  %v17422_v38 = vmax.f32 %v10965_v16, 1e-30 }
 0x24b   :  { %v11008_v34 = vpop.eup %8909  ;;  %v11013_v61 = vmul.f32 %v11000_v19, %v17413_v6  ;;  %v533_v49 = vmax.f32 %v11003_v40, 1e-30  ;;  %v845_v13 = vmul.f32 0.5, %v10967_v1 }
 0x24c   :  { %v8912_v25 = vpop.eup %8911  ;;  %v11021_v8 = vmul.f32 %v11008_v34, %v17414_v42  ;;  %8925 = vrsqrt.f32 %v17415_v2  ;;  %v17421_v2 = vmax.f32 %v10945_v36, 1e-30 }
 0x24d   :  { %v8914_v57 = vpop.eup %8913  ;;  %v564_v55 = vmul.f32 %v11013_v61, %v10560_v23  ;;  %8927 = vrsqrt.f32 %v533_v49  ;;  %v11033_v30 = vpop.xlane.xlu1 %519  ;;  %vm924_vm10 = vcmp.le.f32.partialorder %v11013_v61, 1e-15 }
 0x24e   :  { %v11043_v22 = vpop.eup %8915  ;;  %v563_v59 = vmul.f32 %v11021_v8, %v10497_v15  ;;  %v536_v23 = vmax.f32 %v11033_v30, 1e-30  ;;  %v11048_v41 = vpop.xlane.xlu0 %516  ;;  %v706_v15 = vsel %vm10979_vm6, %v10970_v43, %v700_v39 }
 0x24f   :  { %v11051_v7 = vpop.eup %8917  ;;  %v852_v35 = vmul.f32 %v10783_v28, %v564_v55  ;;  %v11057_v6 = vmul.f32 %v11043_v22, %v17420_v50  ;;  %v535_v42 = vmax.f32 %v11048_v41, 1e-30  ;;  %v811_v28 = vmul.f32 0.6931472, %v8914_v57 }
 0x250   :  { %v851_v31 = vmul.f32 %v10802_v45, %v563_v59  ;;  %v11067_v29 = vmul.f32 %v11051_v7, %v17421_v2  ;;  %8929 = vrsqrt.f32 %v536_v23  ;;  %v8920_v11 = vpop.eup %8919  ;;  %v691_v57 = vmul.f32 0.6931472, %v8912_v25 }
 0x251   :  { %v8000_v37 = vclamps-f32 %v852_v35, 15.0  ;;  %v566_v12 = vmul.f32 %v11057_v6, %v10578_v48  ;;  %8931 = vrsqrt.f32 %v535_v42  ;;  %v11075_v43 = vpop.xlane.xlu1 %525  ;;  %v17423_v35 = vmax.f32 %v10974_v32, 1e-30 }
 0x252   :  { %v11077_v45 = vpop.eup %8921  ;;  %v7999_v36 = vclamps-f32 %v851_v31, 15.0  ;;  %v565_v39 = vmul.f32 %v11067_v29, %v10572_v46  ;;  %v538_v55 = vmax.f32 %v11075_v43, 1e-30  ;;  %v11082_v59 = vpop.xlane.xlu0 %522  ;;  %v817_v50 = vsel %vm11039_vm9, %v814_v47, %v811_v28 }
 0x253   :  { %v11084_v41 = vpop.eup %8923  ;;  %8933 = vtanh.f32 %v8000_v37  ;;  %v854_v48 = vmul.f32 %v10828_v24, %v566_v12  ;;  %v11090_v56 = vmul.f32 %v11077_v45, %v17422_v38  ;;  %v537_v58 = vmax.f32 %v11082_v59, 1e-30 }
 0x254   :  { %8935 = vtanh.f32 %v7999_v36  ;;  %v853_v46 = vmul.f32 %v10848_v52, %v565_v39  ;;  %v11097_v25 = vmul.f32 %v11084_v41, %v17423_v35  ;;  %v838_v16 = vsub.f32 %v706_v15, %v826_v44 }
 0x255   :  { %v8002_v31 = vclamps-f32 %v854_v48, 15.0  ;;  %v568_v24 = vmul.f32 %v11090_v56, %v10584_v33  ;;  %8937 = vrsqrt.f32 %v538_v55  ;;  %v697_v32 = vsel %vm11035_vm8, %v694_v27, %v691_v57 }
 0x256   :  { %v11105_v2 = vpop.eup %8925  ;;  %v8001_v37 = vclamps-f32 %v853_v46, 15.0  ;;  %v567_v52 = vmul.f32 %v11097_v25, %v10589_v54  ;;  %8939 = vrsqrt.f32 %v537_v58  ;;  %v17424_v47 = vmax.f32 %v10992_v14, 1e-30 }
 0x257   :  { %v11113_v9 = vpop.eup %8927  ;;  %8941 = vtanh.f32 %v8002_v31  ;;  %v856_v33 = vmul.f32 %v10880_v17, %v568_v24  ;;  %v837_v28 = vsub.f32 %v697_v32, %v817_v50  ;;  %v848_v14 = vmul.f32 0.5, %v11005_v3 }
 0x258   :  { %v11119_v15 = vmul.f32 %v11105_v2, %v17424_v47  ;;  %8943 = vtanh.f32 %v8001_v37  ;;  %v855_v54 = vmul.f32 %v10902_v20, %v567_v52  ;;  %v11126_v27 = vmul.f32 %v11113_v9, %v533_v49 }
 0x259   :  { %v8004_v12 = vclamps-f32 %v856_v33, 15.0  ;;  %v847_v44 = vmul.f32 0.5, %v835_v5  ;;  %v850_v57 = vmul.f32 0.5, %v838_v16  ;;  %v311_v1 = vsel %vm227_vm12, 1.004016, %v8920_v11 }
 0x25a   :  { %v570_v17 = vmul.f32 %v11119_v15, %v10594_v53  ;;  %v11131_v36 = vpop.eup %8929  ;;  %v8003_v39 = vclamps-f32 %v855_v54, 15.0  ;;  %v569_v20 = vmul.f32 %v11126_v27, %v10599_v60  ;;  %v849_v3 = vmul.f32 0.5, %v837_v28 }
 0x25b   :  { %v11137_v40 = vpop.eup %8931  ;;  %8945 = vtanh.f32 %v8004_v12  ;;  %v11143_v53 = vmul.f32 %v11131_v36, %v536_v23  ;;  %vm923_vm12 = vcmp.le.f32.partialorder %v11021_v8, 1e-15  ;;  %vm926_vm11 = vcmp.le.f32.partialorder %v11057_v6, 1e-15 }
 0x25c   :  { %v858_v49 = vmul.f32 %v10935_v51, %v570_v17  ;;  %8947 = vtanh.f32 %v8003_v39  ;;  %v857_v5 = vmul.f32 %v845_v13, %v569_v20  ;;  %v11147_v60 = vmul.f32 %v11137_v40, %v535_v42 }
 0x25d   :  { %v8934_v26 = vpop.eup %8933  ;;  %v572_v51 = vmul.f32 %v11143_v53, %v10603_v63  ;;  %vm925_vm14 = vcmp.le.f32.partialorder %v11067_v29, 1e-15  ;;  %vm928_vm15 = vcmp.le.f32.partialorder %v11090_v56, 1e-15  ;;  %vm927_vm1 = vcmp.le.f32.partialorder %v11097_v25, 1e-15 }
 0x25e   :  { %v8006_v11 = vclamps-f32 %v858_v49, 15.0  ;;  %v8936_v30 = vpop.eup %8935  ;;  %v11155_v23 = vsel %vm924_vm10, 0.0, %v8934_v26  ;;  %v8005_v48 = vclamps-f32 %v857_v5, 15.0  ;;  %v571_v42 = vmul.f32 %v11147_v60, %v10607_v4 }
 0x25f   :  { %v11160_v38 = vpop.eup %8937  ;;  %v996_v46 = vmax.f32 %v11155_v23, 1e-15  ;;  %v11165_v35 = vsel %vm923_vm12, 0.0, %v8936_v30  ;;  %v860_v63 = vmul.f32 %v848_v14, %v572_v51  ;;  %v900_v32 = vmul.f32 %v8934_v26, %v11000_v19 }
 0x260   :  { %8949 = vtanh.f32 %v8006_v11  ;;  %v11167_v50 = vpop.eup %8939  ;;  %v995_v31 = vmax.f32 %v11165_v35, 1e-15  ;;  %v859_v24 = vmul.f32 %v847_v44, %v571_v42  ;;  %v11173_v4 = vmul.f32 %v11160_v38, %v538_v55 }
 0x261   :  { %8951 = vtanh.f32 %v8005_v48  ;;  %v8942_v16 = vpop.eup %8941  ;;  %v8008_v37 = vclamps-f32 %v860_v63, 15.0  ;;  %v11178_v52 = vmul.f32 %v11167_v50, %v537_v58  ;;  %vm984_vm2 = vcmp.gt.f32.partialorder %v11155_v23, 0.996 }
 0x262   :  { %8953 = vrcp.f32 %v996_v46  ;;  %v11181_v33 = vpop.eup %8943  ;;  %v11185_v47 = vsel %vm926_vm11, 0.0, %v8942_v16  ;;  %v8007_v43 = vclamps-f32 %v859_v24, 15.0  ;;  %v574_v55 = vmul.f32 %v11173_v4, %v10610_v10 }
 0x263   :  { %8955 = vrcp.f32 %v995_v31  ;;  %v998_v28 = vmax.f32 %v11185_v47, 1e-15  ;;  %v11193_v59 = vsel %vm925_vm14, 0.0, %v11181_v33  ;;  %v573_v54 = vmul.f32 %v11178_v52, %v311_v1 }
 0x264   :  { %8957 = vtanh.f32 %v8008_v37  ;;  %v997_v19 = vmax.f32 %v11193_v59, 1e-15  ;;  %v862_v58 = vmul.f32 %v850_v57, %v574_v55  ;;  %v912_v10 = vmul.f32 %v10612_v62, %v900_v32 }
 0x265   :  { %8959 = vtanh.f32 %v8007_v43  ;;  %v11198_v13 = vpop.eup %8945  ;;  %vm930_vm3 = vcmp.le.f32.partialorder %v11119_v15, 1e-15  ;;  %v861_v44 = vmul.f32 %v849_v3, %v573_v54  ;;  %v1080_v20 = vsel %vm984_vm2, 0.996, %v11155_v23 }
 0x266   :  { %8961 = vrcp.f32 %v998_v28  ;;  %v11203_v12 = vpop.eup %8947  ;;  %v11208_v17 = vsel %vm928_vm15, 0.0, %v11198_v13  ;;  %v8010_v14 = vclamps-f32 %v862_v58, 15.0  ;;  %vm929_vm4 = vcmp.le.f32.partialorder %v11126_v27, 1e-15 }
 0x267   :  { %8963 = vrcp.f32 %v997_v19  ;;  %v1000_v39 = vmax.f32 %v11208_v17, 1e-15  ;;  %v11215_v62 = vsel %vm927_vm1, 0.0, %v11203_v12  ;;  %vm932_vm5 = vcmp.le.f32.partialorder %v11143_v53, 1e-15 }
 0x268   :  { %8965 = vtanh.f32 %v8010_v14  ;;  %v8009_v57 = vclamps-f32 %v861_v44, 15.0  ;;  %v999_v49 = vmax.f32 %v11215_v62, 1e-15  ;;  %v899_v3 = vmul.f32 %v8936_v30, %v11008_v34 }
 0x269   :  { %vm983_vm6 = vcmp.gt.f32.partialorder %v11165_v35, 0.996  ;;  %v902_v5 = vmul.f32 %v8942_v16, %v11043_v22  ;;  %8967 = vrcp.f32 %v1000_v39  ;;  %vm931_vm7 = vcmp.le.f32.partialorder %v11147_v60, 1e-15 }
 0x26a   :  { %v11222_v1 = vpop.eup %8949  ;;  %v1079_v51 = vsel %vm983_vm6, 0.996, %v11165_v35  ;;  %vm934_vm8 = vcmp.le.f32.partialorder %v11173_v4, 1e-15  ;;  %8969 = vtanh.f32 %v8009_v57  ;;  %v911_v30 = vmul.f32 %v899_v3, %v10616_v0 }
 0x26b   :  { %v11228_v26 = vpop.eup %8951  ;;  %v11233_v11 = vsel %vm930_vm3, 0.0, %v11222_v1  ;;  %v960_v63 = vsel %vm924_vm10, 0.0, %v912_v10  ;;  %v914_v24 = vmul.f32 %v10621_v18, %v902_v5  ;;  %8971 = vrcp.f32 %v999_v49  ;;  %v11277_v10 = vld [vmem:[%s17301_s5] ss:$0 sm:$0xff]  ;;  %s316_s5 = sld [smem:[#allocation2]] }
 0x26c   :  { %v8954_v48 = vpop.eup %8953  ;;  %v1002_v34 = vmax.f32 %v11233_v11, 1e-15  ;;  %v11243_v22 = vsel %vm929_vm4, 0.0, %v11228_v26  ;;  %v11253_v37 = vmul.f32 %v1080_v20, %v1080_v20  ;;  %vm986_vm9 = vcmp.gt.f32.partialorder %v11185_v47, 0.996 }
 0x26d   :  { %v8956_v42 = vpop.eup %8955  ;;  %v1001_v46 = vmax.f32 %v11243_v22, 1e-15  ;;  %v1010_v31 = vmul.f32 0.996, %v8954_v48  ;;  %vm933_vm10 = vcmp.le.f32.partialorder %v11178_v52, 1e-15  ;;  %v11266_v55 = vmul.f32 %v1079_v51, %v1079_v51 }
 0x26e   :  { %v11251_v16 = vpop.eup %8957  ;;  %v1008_v32 = vmul.f32 0.996, %v8956_v42  ;;  %v959_v18 = vsel %vm923_vm12, 0.0, %v911_v30  ;;  %8973 = vrcp.f32 %v1002_v34  ;;  %v1082_v44 = vsel %vm986_vm9, 0.996, %v11185_v47 }
 0x26f   :  { %v11256_v43 = vpop.eup %8959  ;;  %v11261_v0 = vsel %vm932_vm5, 0.0, %v11251_v16  ;;  %v1032_v61 = vmul.f32 %v1010_v31, %v960_v63  ;;  %8975 = vrcp.f32 %v1001_v46  ;;  %v962_v23 = vsel %vm926_vm11, 0.0, %v914_v24 }
 0x270   :  { %v8962_v28 = vpop.eup %8961  ;;  %v1004_v19 = vmax.f32 %v11261_v0, 1e-15  ;;  %v11272_v58 = vsel %vm931_vm7, 0.0, %v11256_v43  ;;  %v1031_v54 = vmul.f32 %v1008_v32, %v959_v18  ;;  %v11299_v48 = vmul.f32 %v1082_v44, %v1082_v44  ;;  %v17425_v44 = vld [vmem:[#allocation8_spill] sm:$0xff] }
 0x271   :  { %v11281_v8 = vsel %vm984_vm2, %v1032_v61, %v960_v63  ;;  %v1014_v14 = vmul.f32 0.996, %v8962_v28  ;;  %v8964_v39 = vpop.eup %8963  ;;  %v1003_v20 = vmax.f32 %v11272_v58, 1e-15  ;;  %v901_v34 = vmul.f32 %v11181_v33, %v11051_v7 }
 0x272   :  { %v1110_v57 = vmul.f32 %v11277_v10, %v11281_v8  ;;  %v11291_v49 = vsel %vm983_vm6, %v1031_v54, %v959_v18  ;;  %v11295_v3 = vpop.eup %8965  ;;  %8977 = vrcp.f32 %v1004_v19  ;;  %v1207_v35 = vsub.f32 1.0, %v11253_v37 }
 0x273   :  { %v1109_v5 = vmul.f32 %v11277_v10, %v11291_v49  ;;  %v1034_v51 = vmul.f32 %v1014_v14, %v962_v23  ;;  %vm985_vm12 = vcmp.gt.f32.partialorder %v11193_v59, 0.996  ;;  %v8968_v6 = vpop.eup %8967  ;;  %v11309_v42 = vsel %vm934_vm8, 0.0, %v11295_v3 }
 0x274   :  { %v1124_v30 = vsel %vm490_vm13, %v1110_v57, 0.0  ;;  %v913_v7 = vmul.f32 %v901_v34, %v10626_v21  ;;  %v11317_v33 = vpop.eup %8969  ;;  %v1012_v24 = vmul.f32 0.996, %v8964_v39  ;;  %v1081_v32 = vsel %vm985_vm12, 0.996, %v11193_v59 }
 0x275   :  { %1125 = vadd.xlane.f32.xlu1 %v1124_v30  ;;  %v1121_v46 = vsel %vm490_vm13, %v1109_v5, 0.0  ;;  %v11314_v63 = vsel %vm986_vm9, %v1034_v51, %v962_v23  ;;  %v904_v61 = vmul.f32 %v11198_v13, %v11077_v45  ;;  %8979 = vrcp.f32 %v1003_v20  ;;  %v8972_v28 = vpop.eup %8971 }
 0x276   :  { %1122 = vadd.xlane.f32.xlu0 %v1121_v46  ;;  %v1112_v31 = vmul.f32 %v11277_v10, %v11314_v63  ;;  %v1206_v47 = vsub.f32 1.0, %v11266_v55  ;;  %v1209_v18 = vsub.f32 1.0, %v11299_v48  ;;  %v961_v21 = vsel %vm925_vm14, 0.0, %v913_v7 }
 0x277   :  { %v11333_v19 = vsel %vm933_vm10, 0.0, %v11317_v33  ;;  %v1033_v14 = vmul.f32 %v1012_v24, %v961_v21  ;;  %v916_v39 = vmul.f32 %v17425_v44, %v904_v61  ;;  %v1006_v45 = vmax.f32 %v11309_v42, 1e-15 }
 0x278   :  { %v1130_v54 = vsel %vm490_vm13, %v1112_v31, 0.0  ;;  %vm988_vm11 = vcmp.gt.f32.partialorder %v11208_v17, 0.996  ;;  %v1018_v13 = vmul.f32 0.996, %v8968_v6  ;;  %v903_v29 = vmul.f32 %v11203_v12, %v11084_v41  ;;  %v8974_v20 = vpop.eup %8973  ;;  %v17426_v6 = vld [vmem:[#allocation9_spill] sm:$0xff] }
 0x279   :  { %1131 = vadd.xlane.f32.xlu1 %v1130_v54  ;;  %v11343_v57 = vsel %vm985_vm12, %v1033_v14, %v961_v21  ;;  %v11345_v23 = vmul.f32 %v1081_v32, %v1081_v32  ;;  %v964_v5 = vsel %vm928_vm15, 0.0, %v916_v39  ;;  %v1084_v51 = vsel %vm988_vm11, 0.996, %v11208_v17  ;;  %v8976_v34 = vpop.eup %8975 }
 0x27a   :  { %v1005_v30 = vmax.f32 %v11333_v19, 1e-15  ;;  %v1111_v41 = vmul.f32 %v11277_v10, %v11343_v57  ;;  %v1036_v12 = vmul.f32 %v1018_v13, %v964_v5  ;;  %v915_v59 = vmul.f32 %v903_v29, %v17426_v6 }
 0x27b   :  { %vm987_vm14 = vcmp.gt.f32.partialorder %v11215_v62, 0.996  ;;  %v1016_v46 = vmul.f32 0.996, %v8972_v28  ;;  %v906_v56 = vmul.f32 %v11222_v1, %v11105_v2  ;;  %vm990_vm15 = vcmp.gt.f32.partialorder %v11233_v11, 0.996 }
 0x27c   :  { %8981 = vrcp.f32 %v1006_v45  ;;  %v1127_v7 = vsel %vm490_vm13, %v1111_v41, 0.0  ;;  %v11363_v31 = vsel %vm988_vm11, %v1036_v12, %v964_v5  ;;  %v963_v24 = vsel %vm927_vm1, 0.0, %v915_v59  ;;  %v8978_v32 = vpop.eup %8977  ;;  %v17427_v1 = vld [vmem:[#allocation10_spill] sm:$0xff]  ;;  %v17428_v41 = vld [vmem:[#allocation11_spill] sm:$0xff] }
 0x27d   :  { %1128 = vadd.xlane.f32.xlu0 %v1127_v7  ;;  %v1114_v61 = vmul.f32 %v11277_v10, %v11363_v31  ;;  %v1035_v21 = vmul.f32 %v1016_v46, %v963_v24  ;;  %v1083_v2 = vsel %vm987_vm14, 0.996, %v11215_v62  ;;  %v918_v28 = vmul.f32 %v17427_v1, %v906_v56 }
 0x27e   :  { %v1208_v54 = vsub.f32 1.0, %v11345_v23  ;;  %v1022_v17 = vmul.f32 0.996, %v8974_v20  ;;  %v1086_v25 = vsel %vm990_vm15, 0.996, %v11233_v11  ;;  %v905_v14 = vmul.f32 %v11228_v26, %v11113_v9 }
 0x27f   :  { %8983 = vrcp.f32 %v1005_v30  ;;  %v1136_v44 = vsel %vm490_vm13, %v1114_v61, 0.0  ;;  %v11382_v39 = vsel %vm987_vm14, %v1035_v21, %v963_v24  ;;  %v966_v45 = vsel %vm930_vm3, 0.0, %v918_v28  ;;  %v8980_v13 = vpop.eup %8979 }
 0x280   :  { %v11386_v29 = vmul.f32 %v1084_v51, %v1084_v51  ;;  %1137 = vadd.xlane.f32.xlu1 %v1136_v44  ;;  %v1113_v20 = vmul.f32 %v11277_v10, %v11382_v39  ;;  %v1038_v5 = vmul.f32 %v1022_v17, %v966_v45  ;;  %v917_v9 = vmul.f32 %v905_v14, %v17428_v41 }
 0x281   :  { %v11391_v26 = vmul.f32 %v1083_v2, %v1083_v2  ;;  %vm989_vm1 = vcmp.gt.f32.partialorder %v11243_v22, 0.996  ;;  %v1020_v62 = vmul.f32 0.996, %v8976_v34  ;;  %v908_v30 = vmul.f32 %v11251_v16, %v11131_v36  ;;  %v17429_v16 = vld [vmem:[#allocation12_spill] sm:$0xff] }
 0x282   :  { %v1133_v15 = vsel %vm490_vm13, %v1113_v20, 0.0  ;;  %v11399_v51 = vsel %vm990_vm15, %v1038_v5, %v966_v45  ;;  %v965_v12 = vsel %vm929_vm4, 0.0, %v917_v9  ;;  %v1085_v6 = vsel %vm989_vm1, 0.996, %v11243_v22 }
 0x283   :  { %1134 = vadd.xlane.f32.xlu0 %v1133_v15  ;;  %v11406_v59 = vmul.f32 %v1086_v25, %v1086_v25  ;;  %v1116_v34 = vmul.f32 %v11277_v10, %v11399_v51  ;;  %v1037_v36 = vmul.f32 %v1020_v62, %v965_v12  ;;  %v920_v46 = vmul.f32 %v17429_v16, %v908_v30 }
 0x284   :  { %vm992_vm2 = vcmp.gt.f32.partialorder %v11261_v0, 0.996  ;;  %v1026_v11 = vmul.f32 0.996, %v8978_v32  ;;  %v907_v27 = vmul.f32 %v11256_v43, %v11137_v40  ;;  %vm991_vm3 = vcmp.gt.f32.partialorder %v11272_v58, 0.996 }
 0x285   :  { %v1211_v56 = vsub.f32 1.0, %v11386_v29  ;;  %v1142_v7 = vsel %vm490_vm13, %v1116_v34, 0.0  ;;  %v11419_v24 = vsel %vm989_vm1, %v1037_v36, %v965_v12  ;;  %v968_v61 = vsel %vm932_vm5, 0.0, %v920_v46  ;;  %v17430_v43 = vld [vmem:[#allocation13_spill] sm:$0xff] }
 0x286   :  { %v8982_v21 = vpop.eup %8981  ;;  %1143 = vadd.xlane.f32.xlu1 %v1142_v7  ;;  %v1115_v32 = vmul.f32 %v11277_v10, %v11419_v24  ;;  %v1040_v2 = vmul.f32 %v1026_v11, %v968_v61  ;;  %v1088_v40 = vsel %vm992_vm2, 0.996, %v11261_v0  ;;  %v919_v1 = vmul.f32 %v907_v27, %v17430_v43 }
 0x287   :  { %v1210_v28 = vsub.f32 1.0, %v11391_v26  ;;  %v1024_v22 = vmul.f32 0.996, %v8980_v13  ;;  %v1087_v53 = vsel %vm991_vm3, 0.996, %v11272_v58  ;;  %v910_v17 = vmul.f32 %v11295_v3, %v11160_v38  ;;  %v17431_v38 = vld [vmem:[#allocation14_spill] sm:$0xff] }
 0x288   :  { %v1213_v25 = vsub.f32 1.0, %v11406_v59  ;;  %v1139_v14 = vsel %vm490_vm13, %v1115_v32, 0.0  ;;  %v11439_v44 = vsel %vm992_vm2, %v1040_v2, %v968_v61  ;;  %v967_v45 = vsel %vm931_vm7, 0.0, %v919_v1 }
 0x289   :  { %v8984_v20 = vpop.eup %8983  ;;  %v11443_v13 = vmul.f32 %v1085_v6, %v1085_v6  ;;  %1140 = vadd.xlane.f32.xlu0 %v1139_v14  ;;  %v1118_v5 = vmul.f32 %v11277_v10, %v11439_v44  ;;  %v1039_v41 = vmul.f32 %v1024_v22, %v967_v45  ;;  %v922_v3 = vmul.f32 %v17431_v38, %v910_v17 }
 0x28a   :  { %v11448_v9 = vmul.f32 %v1088_v40, %v1088_v40  ;;  %vm994_vm4 = vcmp.gt.f32.partialorder %v11309_v42, 0.996  ;;  %v1030_v0 = vmul.f32 0.996, %v8982_v21  ;;  %v909_v62 = vmul.f32 %v11317_v33, %v11167_v50  ;;  %v17432_v33 = vld [vmem:[#allocation15_spill] sm:$0xff] }
 0x28b   :  { %v1148_v60 = vsel %vm490_vm13, %v1118_v5, 0.0  ;;  %v11456_v30 = vsel %vm991_vm3, %v1039_v41, %v967_v45  ;;  %v970_v15 = vsel %vm934_vm8, 0.0, %v922_v3  ;;  %v1090_v12 = vsel %vm994_vm4, 0.996, %v11309_v42 }
 0x28c   :  { %1149 = vadd.xlane.f32.xlu1 %v1148_v60  ;;  %v11463_v6 = vmul.f32 %v1087_v53, %v1087_v53  ;;  %v1117_v34 = vmul.f32 %v11277_v10, %v11456_v30  ;;  %v1042_v50 = vmul.f32 %v1030_v0, %v970_v15  ;;  %v921_v36 = vmul.f32 %v909_v62, %v17432_v33 }
 0x28d   :  { %v11468_v16 = vmul.f32 %v1090_v12, %v1090_v12  ;;  %vm993_vm5 = vcmp.gt.f32.partialorder %v11333_v19, 0.996  ;;  %v1028_v58 = vmul.f32 0.996, %v8984_v20  ;;  %v11474_v4 = vmul.f32 %v11277_v10, %v1207_v35 }
 0x28e   :  { %v1212_v46 = vsub.f32 1.0, %v11443_v13  ;;  %v1145_v11 = vsel %vm490_vm13, %v1117_v34, 0.0  ;;  %v11480_v27 = vsel %vm994_vm4, %v1042_v50, %v970_v15  ;;  %v969_v7 = vsel %vm933_vm10, 0.0, %v921_v36 }
 0x28f   :  { %1146 = vadd.xlane.f32.xlu0 %v1145_v11  ;;  %v1120_v61 = vmul.f32 %v11277_v10, %v11480_v27  ;;  %v1041_v21 = vmul.f32 %v1028_v58, %v969_v7  ;;  %v1089_v35 = vsel %vm993_vm5, 0.996, %v11333_v19  ;;  %v11492_v32 = vmul.f32 %v11277_v10, %v1206_v47 }
 0x290   :  { %v1215_v42 = vsub.f32 1.0, %v11448_v9  ;;  %v1214_v2 = vsub.f32 1.0, %v11463_v6  ;;  %v11496_v52 = vmul.f32 %v1089_v35, %v1089_v35  ;;  %v11501_v40 = vmul.f32 %v11277_v10, %v1209_v18 }
 0x291   :  { %v1154_v43 = vsel %vm490_vm13, %v1120_v61, 0.0  ;;  %v1217_v1 = vsub.f32 1.0, %v11468_v16  ;;  %v11507_v22 = vsel %vm993_vm5, %v1041_v21, %v969_v7  ;;  %v11512_v47 = vmul.f32 %v11277_v10, %v1208_v54 }
 0x292   :  { %1155 = vadd.xlane.f32.xlu1 %v1154_v43  ;;  %v1119_v53 = vmul.f32 %v11277_v10, %v11507_v22  ;;  %v1216_v18 = vsub.f32 1.0, %v11496_v52  ;;  %v11518_v17 = vmul.f32 %v11277_v10, %v1211_v56  ;;  %v11521_v14 = vmul.f32 %v11277_v10, %v1210_v28 }
 0x293   :  { %v11524_v19 = vmul.f32 %v11277_v10, %v1213_v25  ;;  %v11528_v54 = vmul.f32 %v11277_v10, %v1212_v46  ;;  %v11531_v20 = vmul.f32 %v11277_v10, %v1215_v42  ;;  %v11534_v5 = vmul.f32 %v11277_v10, %v1214_v2 }
 0x294   :  { %v1151_v45 = vsel %vm490_vm13, %v1119_v53, 0.0  ;;  %v11537_v56 = vmul.f32 %v11277_v10, %v1217_v1  ;;  %v11540_v28 = vmul.f32 %v11277_v10, %v1216_v18  ;;  %v11542_v25 = vstv %s316_s5 }
 0x295   :  { %1152 = vadd.xlane.f32.xlu0 %v1151_v45  ;;  %v1243_v62 = vmul.f32 %v11542_v25, %v11253_v37  ;;  %v1242_v15 = vmul.f32 %v11542_v25, %v11266_v55  ;;  %v1245_v58 = vmul.f32 %v11542_v25, %v11299_v48  ;;  %v1244_v42 = vmul.f32 %v11542_v25, %v11345_v23 }
 0x296   :  { %v1247_v45 = vmul.f32 %v11542_v25, %v11386_v29  ;;  %vm1794_vm6 = vcmask 785408  }
 0x302   :  { %v1126_v41 = vpop.xlane.xlu1 %1125 }
 0x303   :  { %v1158_v38 = vmul.f32 2.0, %v1126_v41  ;;  %v1123_v3 = vpop.xlane.xlu0 %1122 }
 0x304   :  { %v1157_v0 = vmul.f32 2.0, %v1123_v3 }
 0x305   :  { %v1170_v60 = vadd.f32 1.0, %v1158_v38 }
 0x306   :  { %v1169_v12 = vadd.f32 1.0, %v1157_v0  ;;  %v1132_v34 = vpop.xlane.xlu1 %1131 }
 0x307   :  { %v1255_v50 = vadd.f32 %v1243_v62, %v1170_v60  ;;  %v1160_v33 = vmul.f32 2.0, %v1132_v34  ;;  %v1183_v37 = vadd.f32 %v11542_v25, %v1170_v60 }
 0x308   :  { %v1254_v10 = vadd.f32 %v1242_v15, %v1169_v12  ;;  %v1182_v55 = vadd.f32 %v11542_v25, %v1169_v12  ;;  %v1246_v15 = vmul.f32 %v11542_v25, %v11391_v26 }
 0x309   :  { %v1267_v36 = vmax.f32 %v1255_v50, 1e-15  ;;  %v1172_v46 = vadd.f32 1.0, %v1160_v33  ;;  %v1195_v48 = vmul.f32 %v1183_v37, %v11281_v8 }
 0x30a   :  { %v1266_v11 = vmax.f32 %v1254_v10, 1e-15  ;;  %v1129_v61 = vpop.xlane.xlu0 %1128  ;;  %v1194_v18 = vmul.f32 %v1182_v55, %v11291_v49 }
 0x30b   :  { %8985 = vrcp.f32 %v1267_v36  ;;  %v1257_v7 = vadd.f32 %v1245_v58, %v1172_v46  ;;  %v1159_v21 = vmul.f32 2.0, %v1129_v61  ;;  %v1185_v3 = vadd.f32 %v11542_v25, %v1172_v46 }
 0x30c   :  { %8987 = vrcp.f32 %v1266_v11  ;;  %v1231_v23 = vadd.f32 %v11474_v4, %v1195_v48  ;;  %v1230_v49 = vadd.f32 %v11492_v32, %v1194_v18  ;;  %v1249_v4 = vmul.f32 %v11542_v25, %v11406_v59 }
 0x30d   :  { %v1269_v35 = vmax.f32 %v1257_v7, 1e-15  ;;  %v1171_v2 = vadd.f32 1.0, %v1159_v21  ;;  %v1138_v43 = vpop.xlane.xlu1 %1137  ;;  %v1197_v36 = vmul.f32 %v1185_v3, %v11314_v63  ;;  %v1251_v3 = vmul.f32 %v11542_v25, %v11448_v9 }
 0x30e   :  { %v1162_v1 = vmul.f32 2.0, %v1138_v43 }
 0x30f   :  { %8989 = vrcp.f32 %v1269_v35  ;;  %v1256_v53 = vadd.f32 %v1244_v42, %v1171_v2  ;;  %v1184_v29 = vadd.f32 %v11542_v25, %v1171_v2  ;;  %v1248_v42 = vmul.f32 %v11542_v25, %v11443_v13 }
 0x310   :  { %v1174_v41 = vadd.f32 1.0, %v1162_v1  ;;  %v1135_v38 = vpop.xlane.xlu0 %1134  ;;  %v1233_v2 = vadd.f32 %v11501_v40, %v1197_v36 }
 0x311   :  { %v1268_v0 = vmax.f32 %v1256_v53, 1e-15  ;;  %v1161_v62 = vmul.f32 2.0, %v1135_v38  ;;  %v1196_v63 = vmul.f32 %v1184_v29, %v11343_v57 }
 0x312   :  { %v1259_v60 = vadd.f32 %v1247_v45, %v1174_v41  ;;  %v1187_v32 = vadd.f32 %v11542_v25, %v1174_v41 }
 0x313   :  { %8991 = vrcp.f32 %v1268_v0  ;;  %v1173_v8 = vadd.f32 1.0, %v1161_v62  ;;  %v1144_v12 = vpop.xlane.xlu1 %1143  ;;  %v1232_v40 = vadd.f32 %v11512_v47, %v1196_v63  ;;  %v1250_v47 = vmul.f32 %v11542_v25, %v11463_v6 }
 0x314   :  { %v1271_v50 = vmax.f32 %v1259_v60, 1e-15  ;;  %v1164_v33 = vmul.f32 2.0, %v1144_v12  ;;  %v1199_v41 = vmul.f32 %v1187_v32, %v11363_v31 }
 0x315   :  { %v8986_v34 = vpop.eup %8985  ;;  %v1258_v58 = vadd.f32 %v1246_v15, %v1173_v8  ;;  %v1186_v53 = vadd.f32 %v11542_v25, %v1173_v8 }
 0x316   :  { %v8988_v10 = vpop.eup %8987  ;;  %v11565_v46 = vmul.f32 %v8986_v34, %v1231_v23  ;;  %8993 = vrcp.f32 %v1271_v50  ;;  %v1176_v26 = vadd.f32 1.0, %v1164_v33  ;;  %v1141_v11 = vpop.xlane.xlu0 %1140  ;;  %v1235_v9 = vadd.f32 %v11518_v17, %v1199_v41 }
 0x317   :  { %v11569_v7 = vmul.f32 %v8988_v10, %v1230_v49  ;;  %v1270_v61 = vmax.f32 %v1258_v58, 1e-15  ;;  %v1163_v37 = vmul.f32 2.0, %v1141_v11  ;;  %v1198_v12 = vmul.f32 %v1186_v53, %v11382_v39 }
 0x318   :  { %v1315_v21 = vmul.f32 %v11565_v46, %v11565_v46  ;;  %v1261_v35 = vadd.f32 %v1249_v4, %v1176_v26  ;;  %v1189_v23 = vadd.f32 %v11542_v25, %v1176_v26  ;;  %v1253_v17 = vmul.f32 %v11542_v25, %v11468_v16 }
 0x319   :  { %v8990_v55 = vpop.eup %8989  ;;  %v1314_v59 = vmul.f32 %v11569_v7, %v11569_v7  ;;  %8995 = vrcp.f32 %v1270_v61  ;;  %v1175_v43 = vadd.f32 1.0, %v1163_v37  ;;  %v1150_v1 = vpop.xlane.xlu1 %1149  ;;  %v1234_v32 = vadd.f32 %v11521_v14, %v1198_v12 }
 0x31a   :  { %v1329_v48 = vsel %vm490_vm13, %v1315_v21, 0.0  ;;  %v1273_v18 = vmax.f32 %v1261_v35, 1e-15  ;;  %v1166_v45 = vmul.f32 2.0, %v1150_v1  ;;  %v11584_v38 = vmul.f32 %v8990_v55, %v1233_v2 }
 0x31b   :  { %1330 = vadd.xlane.f32.xlu1 %v1329_v48  ;;  %v1326_v57 = vsel %vm490_vm13, %v1314_v59, 0.0  ;;  %v1260_v13 = vadd.f32 %v1248_v42, %v1175_v43  ;;  %v1188_v36 = vadd.f32 %v11542_v25, %v1175_v43  ;;  %v1201_v6 = vmul.f32 %v1189_v23, %v11399_v51 }
 0x31c   :  { %1327 = vadd.xlane.f32.xlu0 %v1326_v57  ;;  %8997 = vrcp.f32 %v1273_v18  ;;  %v1178_v0 = vadd.f32 1.0, %v1166_v45  ;;  %v1147_v62 = vpop.xlane.xlu0 %1146  ;;  %v1317_v31 = vmul.f32 %v11584_v38, %v11584_v38  ;;  %v1252_v14 = vmul.f32 %v11542_v25, %v11496_v52 }
 0x31d   :  { %v8992_v60 = vpop.eup %8991  ;;  %v1272_v15 = vmax.f32 %v1260_v13, 1e-15  ;;  %v1165_v8 = vmul.f32 2.0, %v1147_v62  ;;  %v1200_v16 = vmul.f32 %v1188_v36, %v11419_v24  ;;  %v1237_v43 = vadd.f32 %v11524_v19, %v1201_v6 }
 0x31e   :  { %v1263_v34 = vadd.f32 %v1251_v3, %v1178_v0  ;;  %v11595_v49 = vmul.f32 %v8992_v60, %v1232_v40  ;;  %v1335_v33 = vsel %vm490_vm13, %v1317_v31, 0.0  ;;  %v1191_v63 = vadd.f32 %v11542_v25, %v1178_v0 }
 0x31f   :  { %8999 = vrcp.f32 %v1272_v15  ;;  %v1177_v29 = vadd.f32 1.0, %v1165_v8  ;;  %v1156_v50 = vpop.xlane.xlu1 %1155  ;;  %1336 = vadd.xlane.f32.xlu1 %v1335_v33  ;;  %v1236_v13 = vadd.f32 %v11528_v54, %v1200_v16 }
 0x320   :  { %v8994_v10 = vpop.eup %8993  ;;  %v1275_v58 = vmax.f32 %v1263_v34, 1e-15  ;;  %v1168_v4 = vmul.f32 2.0, %v1156_v50  ;;  %v1316_v39 = vmul.f32 %v11595_v49, %v11595_v49  ;;  %v1203_v57 = vmul.f32 %v1191_v63, %v11439_v44 }
 0x321   :  { %v1262_v26 = vadd.f32 %v1250_v47, %v1177_v29  ;;  %v11605_v11 = vmul.f32 %v8994_v10, %v1235_v9  ;;  %v1190_v18 = vadd.f32 %v11542_v25, %v1177_v29 }
 0x322   :  { %9001 = vrcp.f32 %v1275_v58  ;;  %v1180_v61 = vadd.f32 1.0, %v1168_v4  ;;  %v1153_v37 = vpop.xlane.xlu0 %1152  ;;  %v1332_v21 = vsel %vm490_vm13, %v1316_v39, 0.0  ;;  %v1239_v44 = vadd.f32 %v11531_v20, %v1203_v57 }
 0x323   :  { %v8996_v55 = vpop.eup %8995  ;;  %v1274_v35 = vmax.f32 %v1262_v26, 1e-15  ;;  %v1167_v42 = vmul.f32 2.0, %v1153_v37  ;;  %1333 = vadd.xlane.f32.xlu0 %v1332_v21  ;;  %v1319_v51 = vmul.f32 %v11605_v11, %v11605_v11  ;;  %v1202_v60 = vmul.f32 %v1190_v18, %v11456_v30 }
 0x324   :  { %v1265_v59 = vadd.f32 %v1253_v17, %v1180_v61  ;;  %v11615_v2 = vmul.f32 %v8996_v55, %v1234_v32  ;;  %v1193_v3 = vadd.f32 %v11542_v25, %v1180_v61  ;;  %v11667_v61 = vld [vmem:[%s17298_s2] sm:$0xff] }
 0x325   :  { %9003 = vrcp.f32 %v1274_v35  ;;  %v1179_v1 = vadd.f32 1.0, %v1167_v42  ;;  %v1341_v48 = vsel %vm490_vm13, %v1319_v51, 0.0  ;;  %v1238_v30 = vadd.f32 %v11534_v5, %v1202_v60  ;;  %17437 = vst [vmem:[#allocation12_spill] sm:$0xff] %v11667_v61  ;;  %8470 = vmatprep.mubr.msk.f32.mxu1 %vm1794_vm6, %v11667_v61 }
 0x326   :  { %v8998_v53 = vpop.eup %8997  ;;  %v1277_v45 = vmax.f32 %v1265_v59, 1e-15  ;;  %1342 = vadd.xlane.f32.xlu1 %v1341_v48  ;;  %v1318_v24 = vmul.f32 %v11615_v2, %v11615_v2  ;;  %v1205_v12 = vmul.f32 %v1193_v3, %v11480_v27 }
 0x327   :  { %v1264_v41 = vadd.f32 %v1252_v14, %v1179_v1  ;;  %v11623_v52 = vmul.f32 %v8998_v53, %v1237_v43  ;;  %v1192_v8 = vadd.f32 %v11542_v25, %v1179_v1 }
 0x328   :  { %9005 = vrcp.f32 %v1277_v45  ;;  %v1338_v19 = vsel %vm490_vm13, %v1318_v24, 0.0  ;;  %v1241_v50 = vadd.f32 %v11537_v56, %v1205_v12 }
 0x329   :  { %v9000_v40 = vpop.eup %8999  ;;  %v1276_v0 = vmax.f32 %v1264_v41, 1e-15  ;;  %1339 = vadd.xlane.f32.xlu0 %v1338_v19  ;;  %v1321_v62 = vmul.f32 %v11623_v52, %v11623_v52  ;;  %v1204_v29 = vmul.f32 %v1192_v8, %v11507_v22 }
 0x32a   :  { %v11631_v23 = vmul.f32 %v9000_v40, %v1236_v13 }
 0x32b   :  { %9007 = vrcp.f32 %v1276_v0  ;;  %v1347_v54 = vsel %vm490_vm13, %v1321_v62, 0.0  ;;  %v1240_v36 = vadd.f32 %v11540_v28, %v1204_v29 }
 0x32c   :  { %v9002_v15 = vpop.eup %9001  ;;  %1348 = vadd.xlane.f32.xlu1 %v1347_v54  ;;  %v1320_v31 = vmul.f32 %v11631_v23, %v11631_v23 }
 0x32d   :  { %v11639_v34 = vmul.f32 %v9002_v15, %v1239_v44 }
 0x32e   :  { %v1344_v47 = vsel %vm490_vm13, %v1320_v31, 0.0 }
 0x32f   :  { %17433 = vst [vmem:[#allocation8_spill] sm:$0xff] %v11639_v34  ;;  %v9004_v9 = vpop.eup %9003  ;;  %1345 = vadd.xlane.f32.xlu0 %v1344_v47  ;;  %v1323_v20 = vmul.f32 %v11639_v34, %v11639_v34 }
 0x330   :  { %v11646_v25 = vmul.f32 %v9004_v9, %v1238_v30 }
 0x331   :  { %v1353_v33 = vsel %vm490_vm13, %v1323_v20, 0.0 }
 0x332   :  { %17434 = vst [vmem:[#allocation9_spill] sm:$0xff] %v11646_v25  ;;  %v9006_v27 = vpop.eup %9005  ;;  %1354 = vadd.xlane.f32.xlu1 %v1353_v33  ;;  %v1322_v5 = vmul.f32 %v11646_v25, %v11646_v25 }
 0x333   :  { %v11652_v10 = vmul.f32 %v9006_v27, %v1241_v50 }
 0x334   :  { %v1350_v58 = vsel %vm490_vm13, %v1322_v5, 0.0 }
 0x335   :  { %17435 = vst [vmem:[#allocation10_spill] sm:$0xff] %v11652_v10  ;;  %v9008_v4 = vpop.eup %9007  ;;  %1351 = vadd.xlane.f32.xlu0 %v1350_v58  ;;  %v1325_v22 = vmul.f32 %v11652_v10, %v11652_v10 }
 0x336   :  { %v11658_v39 = vmul.f32 %v9008_v4, %v1240_v36 }
 0x337   :  { %v1359_v56 = vsel %vm490_vm13, %v1325_v22, 0.0 }
 0x338   :  { %17436 = vst [vmem:[#allocation11_spill] sm:$0xff] %v11658_v39  ;;  %1360 = vadd.xlane.f32.xlu1 %v1359_v56  ;;  %v1324_v6 = vmul.f32 %v11658_v39, %v11658_v39 }
 0x33a   :  { %v1356_v26 = vsel %vm490_vm13, %v1324_v6, 0.0 }
 0x33b   :  { %1357 = vadd.xlane.f32.xlu0 %v1356_v26 }
 0x3a8   :  { %v1331_v17 = vpop.xlane.xlu1 %1330 }
 0x3a9   :  { %v1363_v28 = vmax.f32 %v1331_v17, 1e-30  ;;  %v1328_v32 = vpop.xlane.xlu0 %1327 }
 0x3aa   :  { %v1362_v37 = vmax.f32 %v1328_v32, 1e-30 }
 0x3ab   :  { %9009 = vrsqrt.f32 %v1363_v28 }
 0x3ac   :  { %9011 = vrsqrt.f32 %v1362_v37  ;;  %v1337_v21 = vpop.xlane.xlu1 %1336 }
 0x3ad   :  { %v1365_v55 = vmax.f32 %v1337_v21, 1e-30 }
 0x3af   :  { %9013 = vrsqrt.f32 %v1365_v55 }
 0x3b0   :  { %v1334_v63 = vpop.xlane.xlu0 %1333 }
 0x3b1   :  { %v1364_v35 = vmax.f32 %v1334_v63, 1e-30 }
 0x3b3   :  { %9015 = vrsqrt.f32 %v1364_v35  ;;  %v1343_v42 = vpop.xlane.xlu1 %1342 }
 0x3b4   :  { %v1367_v59 = vmax.f32 %v1343_v42, 1e-30 }
 0x3b5   :  { %v9010_v51 = vpop.eup %9009 }
 0x3b6   :  { %v9012_v16 = vpop.eup %9011  ;;  %v1340_v43 = vpop.xlane.xlu0 %1339  ;;  %v1387_v1 = vmul.f32 %v9010_v51, %v1363_v28  ;;  %9017 = vrsqrt.f32 %v1367_v59  ;;  %v1411_v60 = vmul.f32 0.996, %v9010_v51 }
 0x3b7   :  { %v11671_v14 = vmul.f32 %v9012_v16, %v1362_v37  ;;  %v1366_v48 = vmax.f32 %v1340_v43, 1e-30  ;;  %v1410_v15 = vmul.f32 0.996, %v9012_v16 }
 0x3b8   :  { %vm1399_vm8 = vcmp.gt.f32.partialorder %v1387_v1, 0.996  ;;  %v1423_v47 = vmul.f32 %v1411_v60, %v11565_v46 }
 0x3b9   :  { %vm1398_vm7 = vcmp.gt.f32.partialorder %v11671_v14, 0.996  ;;  %v1349_v18 = vpop.xlane.xlu1 %1348  ;;  %v11677_v45 = vpop.eup %9013  ;;  %9019 = vrsqrt.f32 %v1366_v48  ;;  %v1471_v62 = vsel %vm1399_vm8, 0.996, %v1387_v1  ;;  %v1422_v33 = vmul.f32 %v1410_v15, %v11569_v7 }
 0x3ba   :  { %v1470_v53 = vsel %vm1398_vm7, 0.996, %v11671_v14  ;;  %v1369_v57 = vmax.f32 %v1349_v18, 1e-30  ;;  %v11685_v13 = vmul.f32 %v11677_v45, %v1365_v55  ;;  %v11699_v12 = vclamps-f32 %v1471_v62, 0.9999999 }
 0x3bb   :  { %v11679_v24 = vclamps-f32 %v1470_v53, 0.9999999  ;;  %v11715_v27 = vsel %vm1399_vm8, 1.004016, %v9010_v51  ;;  %v11732_v17 = vsel %vm1399_vm8, %v1423_v47, %v11565_v46  ;;  %v11753_v46 = vsel %vm1398_vm7, 1.004016, %v9012_v16 }
 0x3bc   :  { %9021 = vrsqrt.f32 %v1369_v57  ;;  %v1346_v19 = vpop.xlane.xlu0 %1345  ;;  %vm1401_vm9 = vcmp.gt.f32.partialorder %v11685_v13, 0.996  ;;  %v1527_v58 = vadd.f32 1.0, %v11699_v12  ;;  %v1530_v4 = vmul.f32 -0.5, %v11699_v12 }
 0x3bd   :  { %v11682_v41 = vsub.f32 0.0, %v11679_v24  ;;  %v11687_v40 = vpop.eup %9015  ;;  %v1368_v3 = vmax.f32 %v1346_v19, 1e-30  ;;  %v1518_v0 = vadd.f32 1.0, %v11679_v24  ;;  %v1473_v20 = vsel %vm1401_vm9, 0.996, %v11685_v13 }
 0x3be   :  { %v11692_v44 = vmul.f32 %v11687_v40, %v1364_v35  ;;  %v1521_v36 = vmul.f32 -0.5, %v11679_v24  ;;  %v11724_v56 = vclamps-f32 %v1473_v20, 0.9999999  ;;  %v1524_v21 = vand.u32 2147483647, %v11679_v24 }
 0x3bf   :  { %9023 = vrsqrt.f32 %v1368_v3  ;;  %v11694_v54 = vpop.xlane.xlu1 %1354  ;;  %v1638_v31 = vadd.f32 1.0, %v11682_v41  ;;  %v11745_v55 = vsub.f32 0.0, %v11699_v12  ;;  %v1641_v35 = vmul.f32 -0.5, %v11682_v41 }
 0x3c0   :  { %v1371_v8 = vmax.f32 %v11694_v54, 1e-30  ;;  %9025 = vlog2.f32 %v1518_v0  ;;  %v11704_v9 = vpop.eup %9017  ;;  %vm1400_vm10 = vcmp.gt.f32.partialorder %v11692_v44, 0.996  ;;  %v11761_v51 = vsel %vm1401_vm9, 1.004016, %v11677_v45 }
 0x3c1   :  { %v1472_v6 = vsel %vm1400_vm10, 0.996, %v11692_v44  ;;  %v11735_v28 = vmul.f32 %v11704_v9, %v1367_v59  ;;  %v11767_v1 = vadd.f32 1.0, %v11724_v56  ;;  %v11772_v16 = vsel %vm1400_vm10, 1.004016, %v11687_v40 }
 0x3c2   :  { %9027 = vrsqrt.f32 %v1371_v8  ;;  %v11701_v30 = vpop.xlane.xlu0 %1351  ;;  %v11763_v59 = vclamps-f32 %v1472_v6, 0.9999999  ;;  %v1531_v53 = vadd.f32 1.0, %v1530_v4  ;;  %vm11782_vm15 = vcmp.lt.f32.partialorder %v1524_v21, 0.0004427343 }
 0x3c3   :  { %v1370_v29 = vmax.f32 %v11701_v30, 1e-30  ;;  %9029 = vlog2.f32 %v1638_v31  ;;  %v11711_v50 = vpop.eup %9019  ;;  %vm1403_vm12 = vcmp.gt.f32.partialorder %v11735_v28, 0.996  ;;  %v1642_v60 = vadd.f32 1.0, %v1641_v35 }
 0x3c4   :  { %v11738_v32 = vmul.f32 %v11711_v50, %v1366_v48  ;;  %v1522_v48 = vadd.f32 1.0, %v1521_v36  ;;  %v1647_v54 = vadd.f32 1.0, %v11745_v55  ;;  %v11795_v14 = vsub.f32 0.0, %v11724_v56 }
 0x3c5   :  { %9031 = vrsqrt.f32 %v1370_v29  ;;  %v11717_v5 = vpop.xlane.xlu1 %1360  ;;  %v1533_v31 = vand.u32 2147483647, %v11699_v12  ;;  %v1644_v30 = vand.u32 2147483647, %v11682_v41  ;;  %v11801_v47 = vsub.f32 0.0, %v11763_v59 }
 0x3c6   :  { %v11722_v22 = vpop.eup %9021  ;;  %v17325_v26 = vmax.f32 %v11717_v5, 1e-30  ;;  %vm1402_vm11 = vcmp.gt.f32.partialorder %v11738_v32, 0.996  ;;  %v1523_v21 = vmul.f32 %v11679_v24, %v1522_v48  ;;  %v1412_v34 = vmul.f32 0.996, %v11687_v40 }
 0x3c7   :  { %v11741_v37 = vmul.f32 %v11722_v22, %v1369_v57  ;;  %v11780_v57 = vsel %vm1398_vm7, %v1422_v33, %v11569_v7  ;;  %v1536_v7 = vadd.f32 1.0, %v11763_v59  ;;  %vm11831_vm2 = vcmp.lt.f32.partialorder %v1644_v30, 0.0004427343 }
 0x3c8   :  { %9033 = vrsqrt.f32 %v17325_v26  ;;  %v11749_v63 = vpop.xlane.xlu0 %1357  ;;  %v1532_v26 = vmul.f32 %v11699_v12, %v1531_v53  ;;  %vm11840_vm4 = vcmp.lt.f32.partialorder %v1533_v31, 0.0004427343  ;;  %v1650_v53 = vmul.f32 -0.5, %v11745_v55 }
 0x3c9   :  { %v11756_v42 = vpop.eup %9023  ;;  %v17324_v43 = vmax.f32 %v11749_v63, 1e-30  ;;  %9035 = vlog2.f32 %v1527_v58  ;;  %vm1405_vm14 = vcmp.gt.f32.partialorder %v11741_v37, 0.996  ;;  %v1474_v58 = vsel %vm1402_vm11, 0.996, %v11738_v32 }
 0x3ca   :  { %v9026_v18 = vpop.eup %9025  ;;  %v11789_v62 = vmul.f32 %v11756_v42, %v1368_v3  ;;  %v1475_v3 = vsel %vm1403_vm12, 0.996, %v11735_v28  ;;  %v1477_v4 = vsel %vm1405_vm14, 0.996, %v11741_v37  ;;  %v11855_v31 = vsel %vm1402_vm11, 1.004016, %v11711_v50 }
 0x3cb   :  { %9037 = vrsqrt.f32 %v17324_v43  ;;  %v1520_v6 = vmul.f32 0.6931472, %v9026_v18  ;;  %v11828_v43 = vclamps-f32 %v1475_v3, 0.9999999  ;;  %v17449_v30 = vmax.f32 %v11717_v5, 1e-30 }
 0x3cc   :  { %v11786_v0 = vpop.eup %9027  ;;  %vm1404_vm1 = vcmp.gt.f32.partialorder %v11789_v62, 0.996  ;;  %9039 = vlog2.f32 %v1647_v54  ;;  %v11846_v54 = vclamps-f32 %v1477_v4, 0.9999999  ;;  %v1671_v13 = vand.u32 2147483647, %v11795_v14 }
 0x3cd   :  { %17440 = vst [vmem:[#allocation13_spill] sm:$0xff] %v11786_v0  ;;  %v9030_v15 = vpop.eup %9029  ;;  %v11807_v20 = vmul.f32 %v11786_v0, %v1371_v8  ;;  %v1643_v8 = vmul.f32 %v1642_v60, %v11682_v41  ;;  %v1476_v12 = vsel %vm1404_vm1, 0.996, %v11789_v62  ;;  %9041 = vlog2.f32 %v1536_v7 }
 0x3ce   :  { %v1640_v33 = vmul.f32 0.6931472, %v9030_v15  ;;  %v11826_v15 = vsel %vm1403_vm12, 1.004016, %v11704_v9  ;;  %v11869_v7 = vsub.f32 0.0, %v11828_v43  ;;  %v11888_v61 = vadd.f32 1.0, %v11846_v54 }
 0x3cf   :  { %17441 = vst [vmem:[#allocation14_spill] sm:$0xff] %v11807_v20  ;;  %v11809_v36 = vpop.eup %9031  ;;  %vm1407_vm3 = vcmp.gt.f32.partialorder %v11807_v20, 0.996  ;;  %v11880_v19 = vclamps-f32 %v1476_v12, 0.9999999  ;;  %9043 = vlog2.f32 %v11767_v1 }
 0x3d0   :  { %17442 = vst [vmem:[#allocation15_spill] sm:$0xff] %v11809_v36  ;;  %v11820_v35 = vmul.f32 %v11809_v36, %v1370_v29  ;;  %v11837_v29 = vclamps-f32 %v1474_v58, 0.9999999  ;;  %v1646_v48 = vsel %vm11831_vm2, %v1643_v8, %v1640_v33  ;;  %v1526_v33 = vsel %vm11782_vm15, %v1523_v21, %v1520_v6 }
 0x3d1   :  { %v11866_v58 = vadd.f32 1.0, %v11828_v43  ;;  %v1479_v4 = vsel %vm1407_vm3, 0.996, %v11807_v20  ;;  %v1746_v8 = vsub.f32 %v1526_v33, %v1646_v48  ;;  %v11885_v21 = vsel %vm1405_vm14, 1.004016, %v11722_v22 }
 0x3d2   :  { %17443 = vst [vmem:[#allocation16_spill] sm:$0xff] %v11820_v35  ;;  %v11835_v24 = vpop.eup %9033  ;;  %vm1406_vm5 = vcmp.gt.f32.partialorder %v11820_v35, 0.996  ;;  %v1554_v5 = vadd.f32 1.0, %v11837_v29  ;;  %17452 = vst [vmem:[#allocation20_spill] sm:$0xff] %v11885_v21  ;;  %v1651_v33 = vadd.f32 1.0, %v1650_v53 }
 0x3d3   :  { %17446 = vst [vmem:[#allocation17_spill] sm:$0xff] %v11835_v24  ;;  %v9036_v60 = vpop.eup %9035  ;;  %v11861_v3 = vmul.f32 %v11835_v24, %v17449_v30  ;;  %v11878_v30 = vsub.f32 0.0, %v11837_v29  ;;  %v1478_v48 = vsel %vm1406_vm5, 0.996, %v11820_v35  ;;  %v11893_v10 = vclamps-f32 %v1479_v4, 0.9999999 }
 0x3d4   :  { %v1529_v6 = vmul.f32 0.6931472, %v9036_v60  ;;  %v1653_v12 = vand.u32 2147483647, %v11745_v55  ;;  %v11899_v60 = vsub.f32 0.0, %v11846_v54  ;;  %v1758_v4 = vmul.f32 0.5, %v1746_v8 }
 0x3d5   :  { %17450 = vst [vmem:[#allocation18_spill] sm:$0xff] %v11861_v3  ;;  %v11874_v18 = vpop.eup %9037  ;;  %17453 = vst [vmem:[#allocation21_spill] sm:$0xff] %v11893_v10  ;;  %vm1409_vm7 = vcmp.gt.f32.partialorder %v11861_v3, 0.996  ;;  %v11904_v39 = vsel %vm1404_vm1, 1.004016, %v11756_v42 }
 0x3d6   :  { %17451 = vst [vmem:[#allocation19_spill] sm:$0xff] %v11874_v18  ;;  %17454 = vst [vmem:[#allocation22_spill] sm:$0xff] %v11904_v39  ;;  %v17455_v24 = vmax.f32 %v11749_v63, 1e-30  ;;  %v9040_v35 = vpop.eup %9039  ;;  %v11912_v20 = vadd.f32 1.0, %v11880_v19  ;;  %v1535_v1 = vsel %vm11840_vm4, %v1532_v26, %v1529_v6  ;;  %v11931_v41 = vsub.f32 0.0, %v11893_v10 }
 0x3d7   :  { %v11914_v21 = vclamps-f32 %v1478_v48, 0.9999999  ;;  %v1481_v39 = vsel %vm1409_vm7, 0.996, %v11861_v3  ;;  %v1649_v63 = vmul.f32 0.6931472, %v9040_v35  ;;  %v9042_v40 = vpop.eup %9041  ;;  %v1770_v35 = vmul.f32 %v1758_v4, %v11753_v46 }
 0x3d8   :  { %v11909_v53 = vmul.f32 %v11874_v18, %v17455_v24  ;;  %v1652_v24 = vmul.f32 %v1651_v33, %v11745_v55  ;;  %v1413_v8 = vmul.f32 0.996, %v11677_v45  ;;  %v11925_v18 = vsub.f32 0.0, %v11880_v19 }
 0x3d9   :  { %v11928_v48 = vadd.f32 1.0, %v11893_v10  ;;  %vm1654_vm8 = vcmp.lt.f32.partialorder %v1653_v12, 0.0004427343  ;;  %v1539_v55 = vmul.f32 -0.5, %v11763_v59  ;;  %v11937_v45 = vadd.f32 1.0, %v11914_v21  ;;  %v9044_v0 = vpop.eup %9043 }
 0x3da   :  { %17456 = vst [vmem:[#allocation23_spill] sm:$0xff] %v11909_v53  ;;  %vm1408_vm15 = vcmp.gt.f32.partialorder %v11909_v53, 0.996  ;;  %v1655_v26 = vsel %vm1654_vm8, %v1652_v24, %v1649_v63  ;;  %v11939_v6 = vclamps-f32 %v1481_v39, 0.9999999  ;;  %v1656_v3 = vadd.f32 1.0, %v11801_v47 }
 0x3db   :  { %v1747_v33 = vsub.f32 %v1535_v1, %v1655_v26  ;;  %v11943_v25 = vsub.f32 0.0, %v11914_v21  ;;  %v1424_v12 = vmul.f32 %v1412_v34, %v11595_v49  ;;  %v1425_v10 = vmul.f32 %v1413_v8, %v11584_v38 }
 0x3dc   :  { %v1665_v63 = vadd.f32 1.0, %v11795_v14  ;;  %v1480_v46 = vsel %vm1408_vm15, 0.996, %v11909_v53  ;;  %v1548_v39 = vmul.f32 -0.5, %v11724_v56  ;;  %9045 = vlog2.f32 %v1656_v3 }
 0x3dd   :  { %v1759_v4 = vmul.f32 0.5, %v1747_v33  ;;  %v1782_v1 = vmul.f32 %v1770_v35, %v11780_v57  ;;  %v1538_v24 = vmul.f32 0.6931472, %v9042_v40  ;;  %v1540_v26 = vadd.f32 1.0, %v1539_v55 }
 0x3de   :  { %9047 = vlog2.f32 %v1665_v63  ;;  %v11954_v34 = vadd.f32 1.0, %v11939_v6  ;;  %v11957_v8 = vsub.f32 0.0, %v11939_v6  ;;  %v1542_v53 = vand.u32 2147483647, %v11763_v59 }
 0x3df   :  { %v1771_v36 = vmul.f32 %v1759_v4, %v11715_v27  ;;  %v11961_v33 = vclamps-f32 %v1480_v46, 0.9999999  ;;  %v11966_v57 = vsel %vm1400_vm10, %v1424_v12, %v11595_v49  ;;  %v11971_v3 = vsel %vm1401_vm9, %v1425_v10, %v11584_v38 }
 0x3e0   :  { %v1659_v40 = vmul.f32 -0.5, %v11801_v47  ;;  %v1549_v55 = vadd.f32 1.0, %v1548_v39  ;;  %v1668_v27 = vmul.f32 -0.5, %v11795_v14  ;;  %9049 = vlog2.f32 %v1554_v5 }
 0x3e1   :  { %v1783_v35 = vmul.f32 %v1771_v36, %v11732_v17  ;;  %v1541_v63 = vmul.f32 %v11763_v59, %v1540_v26  ;;  %v1551_v46 = vand.u32 2147483647, %v11724_v56  ;;  %v1662_v49 = vand.u32 2147483647, %v11801_v47 }
 0x3e2   :  { %9051 = vlog2.f32 %v11866_v58  ;;  %vm11980_vm10 = vcmp.lt.f32.partialorder %v1542_v53, 0.0004427343  ;;  %v1547_v10 = vmul.f32 0.6931472, %v9044_v0  ;;  %v11986_v17 = vadd.f32 1.0, %v11961_v33 }
 0x3e3   :  { %v8673_v44 = vpack.c.bf16 %v1783_v35, %v1782_v1  ;;  %v1544_v59 = vsel %vm11980_vm10, %v1541_v63, %v1538_v24  ;;  %v1660_v36 = vadd.f32 1.0, %v1659_v40  ;;  %v1674_v5 = vadd.f32 1.0, %v11878_v30 }
 0x3e4   :  { %v1550_v58 = vmul.f32 %v11724_v56, %v1549_v55  ;;  %v1669_v12 = vadd.f32 1.0, %v1668_v27  ;;  %v1557_v53 = vmul.f32 -0.5, %v11837_v29  ;;  %v1683_v4 = vadd.f32 1.0, %v11869_v7 }
 0x3e5   :  { %8674 = vmatprep.subr.bf16.mxu1 %v8673_v44  ;;  %vm11994_vm9 = vcmp.lt.f32.partialorder %v1551_v46, 0.0004427343  ;;  %vm11998_vm2 = vcmp.lt.f32.partialorder %v1662_v49, 0.0004427343  ;;  %v1566_v1 = vmul.f32 -0.5, %v11828_v43  ;;  %9053 = vlog2.f32 %v1674_v5 }
 0x3e6   :  { %8676 = vmatpush3.bf16.msra.mxu1 %v8673_v44  ;;  %v9046_v24 = vpop.eup %9045  ;;  %v1553_v56 = vsel %vm11994_vm9, %v1550_v58, %v1547_v10  ;;  %vm12005_vm4 = vcmp.lt.f32.partialorder %v1671_v13, 0.0004427343  ;;  %v1414_v40 = vmul.f32 0.996, %v11711_v50  ;;  %9055 = vlog2.f32 %v1683_v4 }
 0x3e7   :  { %v1658_v55 = vmul.f32 0.6931472, %v9046_v24  ;;  %v1661_v27 = vmul.f32 %v1660_v36, %v11801_v47  ;;  %v1560_v63 = vand.u32 2147483647, %v11837_v29  ;;  %v1677_v46 = vmul.f32 -0.5, %v11878_v30 }
 0x3e8   :  { %v9048_v35 = vpop.eup %9047  ;;  %v1670_v44 = vmul.f32 %v1669_v12, %v11795_v14  ;;  %v1558_v38 = vadd.f32 1.0, %v1557_v53  ;;  %v1686_v10 = vmul.f32 -0.5, %v11869_v7  ;;  %v1567_v5 = vadd.f32 1.0, %v1566_v1 }
 0x3e9   :  { %v1667_v49 = vmul.f32 0.6931472, %v9048_v35  ;;  %v1664_v13 = vsel %vm11998_vm2, %v1661_v27, %v1658_v55  ;;  %v1569_v50 = vand.u32 2147483647, %v11828_v43  ;;  %v1680_v58 = vand.u32 2147483647, %v11878_v30 }
 0x3ea   :  { %v9050_v4 = vpop.eup %9049  ;;  %v1748_v36 = vsub.f32 %v1544_v59, %v1664_v13  ;;  %v1415_v0 = vmul.f32 0.996, %v11704_v9  ;;  %v1426_v14 = vmul.f32 %v1414_v40, %v11615_v2  ;;  %vm12023_vm8 = vcmp.lt.f32.partialorder %v1560_v63, 0.0004427343 }
 0x3eb   :  { %v1673_v47 = vsel %vm12005_vm4, %v1670_v44, %v1667_v49  ;;  %v1678_v39 = vadd.f32 1.0, %v1677_v46  ;;  %v1689_v1 = vand.u32 2147483647, %v11869_v7  ;;  %v1559_v55 = vmul.f32 %v11837_v29, %v1558_v38 }
 0x3ec   :  { %v9052_v12 = vpop.eup %9051  ;;  %v1749_v53 = vsub.f32 %v1553_v56, %v1673_v47  ;;  %v1760_v35 = vmul.f32 0.5, %v1748_v36  ;;  %v1687_v27 = vadd.f32 1.0, %v1686_v10  ;;  %9057 = vlog2.f32 %v11912_v20 }
 0x3ed   :  { %v1568_v9 = vmul.f32 %v11828_v43, %v1567_v5  ;;  %vm12031_vm10 = vcmp.lt.f32.partialorder %v1569_v50, 0.0004427343  ;;  %vm12035_vm9 = vcmp.lt.f32.partialorder %v1680_v58, 0.0004427343  ;;  %v1556_v63 = vmul.f32 0.6931472, %v9050_v4 }
 0x3ee   :  { %v1761_v59 = vmul.f32 0.5, %v1749_v53  ;;  %v1772_v40 = vmul.f32 %v1760_v35, %v11772_v16  ;;  %v1565_v46 = vmul.f32 0.6931472, %v9052_v12  ;;  %v1416_v29 = vmul.f32 0.996, %v11756_v42 }
 0x3ef   :  { %v9054_v49 = vpop.eup %9053  ;;  %v1679_v44 = vmul.f32 %v1678_v39, %v11878_v30  ;;  %vm12043_vm2 = vcmp.lt.f32.partialorder %v1689_v1, 0.0004427343  ;;  %v1692_v38 = vadd.f32 1.0, %v11925_v18  ;;  %v1688_v16 = vmul.f32 %v1687_v27, %v11869_v7 }
 0x3f0   :  { %v1773_v20 = vmul.f32 %v1761_v59, %v11761_v51  ;;  %v9056_v10 = vpop.eup %9055  ;;  %v1784_v13 = vmul.f32 %v1772_v40, %v11966_v57  ;;  %v1676_v5 = vmul.f32 0.6931472, %v9054_v49  ;;  %v1417_v50 = vmul.f32 0.996, %v11722_v22 }
 0x3f1   :  { %v1685_v58 = vmul.f32 0.6931472, %v9056_v10  ;;  %v1575_v51 = vmul.f32 -0.5, %v11880_v19  ;;  %9059 = vlog2.f32 %v1692_v38  ;;  %v1562_v30 = vsel %vm12023_vm8, %v1559_v55, %v1556_v63 }
 0x3f2   :  { %v1785_v42 = vmul.f32 %v1773_v20, %v11971_v3  ;;  %v1571_v4 = vsel %vm12031_vm10, %v1568_v9, %v1565_v46  ;;  %v1682_v57 = vsel %vm12035_vm9, %v1679_v44, %v1676_v5  ;;  %9061 = vlog2.f32 %v11888_v61  ;;  %v17477_v5 = vld [vmem:[#allocation15_spill] sm:$0xff] }
 0x3f3   :  { %v1691_v22 = vsel %vm12043_vm2, %v1688_v16, %v1685_v58  ;;  %v1750_v3 = vsub.f32 %v1562_v30, %v1682_v57  ;;  %v1695_v47 = vmul.f32 -0.5, %v11925_v18  ;;  %v12064_v36 = vsub.f32 0.0, %v11961_v33  ;;  %v17479_v30 = vld [vmem:[#allocation21_spill] sm:$0xff] }
 0x3f4   :  { %v8677_v7 = vpack.c.bf16 %v1785_v42, %v1784_v13  ;;  %v1427_v12 = vmul.f32 %v1415_v0, %v11605_v11  ;;  %v1751_v53 = vsub.f32 %v1571_v4, %v1691_v22  ;;  %v1701_v24 = vadd.f32 1.0, %v11899_v60  ;;  %v79_v22 = vld [vmem:[%s17298_s2 + $0x38] sm:$0xff] }
 0x3f5   :  { %v1462_v61 = vsel %vm1402_vm11, %v1426_v14, %v11615_v2  ;;  %v1762_v39 = vmul.f32 0.5, %v1750_v3  ;;  %v1428_v1 = vmul.f32 %v1416_v29, %v11631_v23  ;;  %v1429_v35 = vmul.f32 %v1417_v50, %v11623_v52  ;;  %v17478_v50 = vld [vmem:[#allocation13_spill] sm:$0xff] }
 0x3f6   :  { %8678 = vmatprep.subr.bf16.mxu1 %v8677_v7  ;;  %v9058_v55 = vpop.eup %9057  ;;  %v1763_v27 = vmul.f32 0.5, %v1751_v53  ;;  %v1576_v59 = vadd.f32 1.0, %v1575_v51  ;;  %v1578_v9 = vand.u32 2147483647, %v11880_v19  ;;  %9063 = vlog2.f32 %v1701_v24 }
 0x3f7   :  { %8680 = vmatpush3.bf16.msra.mxu1 %v8677_v7  ;;  %v1774_v0 = vmul.f32 %v1762_v39, %v11855_v31  ;;  %v1584_v26 = vmul.f32 -0.5, %v11846_v54  ;;  %v1696_v56 = vadd.f32 1.0, %v1695_v47  ;;  %v1698_v32 = vand.u32 2147483647, %v11925_v18 }
 0x3f8   :  { %v1463_v2 = vsel %vm1403_vm12, %v1427_v12, %v11605_v11  ;;  %v1775_v14 = vmul.f32 %v1763_v27, %v11826_v15  ;;  %v1704_v40 = vmul.f32 -0.5, %v11899_v60  ;;  %9065 = vlog2.f32 %v11937_v45 }
 0x3f9   :  { %v1786_v63 = vmul.f32 %v1774_v0, %v1462_v61  ;;  %v12086_v31 = vsel %vm1404_vm1, %v1428_v1, %v11631_v23  ;;  %v12091_v46 = vsel %vm1405_vm14, %v1429_v35, %v11623_v52  ;;  %v1574_v29 = vmul.f32 0.6931472, %v9058_v55  ;;  %v17482_v1 = vld [vmem:[#allocation9_spill] sm:$0xff] }
 0x3fa   :  { %v1787_v28 = vmul.f32 %v1775_v14, %v1463_v2  ;;  %v1577_v11 = vmul.f32 %v11880_v19, %v1576_v59  ;;  %vm12094_vm12 = vcmp.lt.f32.partialorder %v1578_v9, 0.0004427343  ;;  %9067 = vlog2.f32 %v11928_v48 }
 0x3fb   :  { %v9060_v45 = vpop.eup %9059  ;;  %v1585_v49 = vadd.f32 1.0, %v1584_v26  ;;  %v1587_v23 = vand.u32 2147483647, %v11846_v54  ;;  %v1697_v62 = vmul.f32 %v1696_v56, %v11925_v18  ;;  %vm12101_vm11 = vcmp.lt.f32.partialorder %v1698_v32, 0.0004427343  ;;  %v17484_v32 = vld [vmem:[#allocation22_spill] sm:$0xff] }
 0x3fc   :  { %v9062_v52 = vpop.eup %9061  ;;  %v8681_v20 = vpack.c.bf16 %v1787_v28, %v1786_v63  ;;  %v1694_v44 = vmul.f32 0.6931472, %v9060_v45  ;;  %v1705_v19 = vadd.f32 1.0, %v1704_v40  ;;  %v1710_v43 = vadd.f32 1.0, %v11943_v25 }
 0x3fd   :  { %v1580_v38 = vsel %vm12094_vm12, %v1577_v11, %v1574_v29  ;;  %v1707_v48 = vand.u32 2147483647, %v11899_v60  ;;  %v1593_v10 = vmul.f32 -0.5, %v11914_v21  ;;  %v1719_v13 = vadd.f32 1.0, %v11931_v41 }
 0x3fe   :  { %8682 = vmatprep.subr.bf16.mxu1 %v8681_v20  ;;  %v1700_v18 = vsel %vm12101_vm11, %v1697_v62, %v1694_v44  ;;  %v1418_v16 = vmul.f32 0.996, %v17477_v5  ;;  %v1419_v42 = vmul.f32 0.996, %v17478_v50  ;;  %9069 = vlog2.f32 %v1710_v43 }
 0x3ff   :  { %8684 = vmatpush3.bf16.msra.mxu1 %v8681_v20  ;;  %v1583_v58 = vmul.f32 0.6931472, %v9062_v52  ;;  %v1752_v51 = vsub.f32 %v1580_v38, %v1700_v18  ;;  %v1602_v4 = vmul.f32 -0.5, %v17479_v30  ;;  %9071 = vlog2.f32 %v1719_v13  ;;  %v17489_v52 = vld [vmem:[#allocation20_spill] sm:$0xff] }
 0x400   :  { %v9064_v57 = vpop.eup %9063  ;;  %v1586_v7 = vmul.f32 %v11846_v54, %v1585_v49  ;;  %vm12117_vm14 = vcmp.lt.f32.partialorder %v1587_v23, 0.0004427343  ;;  %v1706_v3 = vmul.f32 %v1705_v19, %v11899_v60  ;;  %v1713_v47 = vmul.f32 -0.5, %v11943_v25  ;;  %v17483_v60 = vld [vmem:[#allocation8_spill] sm:$0xff] }
 0x401   :  { %v1703_v12 = vmul.f32 0.6931472, %v9064_v57  ;;  %v1764_v53 = vmul.f32 0.5, %v1752_v51  ;;  %v1594_v24 = vadd.f32 1.0, %v1593_v10  ;;  %v1596_v61 = vand.u32 2147483647, %v11914_v21 }
 0x402   :  { %v9066_v39 = vpop.eup %9065  ;;  %vm1708_vm1 = vcmp.lt.f32.partialorder %v1707_v48, 0.0004427343  ;;  %v1430_v35 = vmul.f32 %v1418_v16, %v17482_v1  ;;  %v1605_v55 = vand.u32 2147483647, %v17479_v30  ;;  %v1722_v54 = vmul.f32 -0.5, %v11931_v41 }
 0x403   :  { %v1589_v27 = vsel %vm12117_vm14, %v1586_v7, %v1583_v58  ;;  %v1709_v59 = vsel %vm1708_vm1, %v1706_v3, %v1703_v12  ;;  %v1431_v9 = vmul.f32 %v1419_v42, %v17483_v60  ;;  %v1603_v0 = vadd.f32 1.0, %v1602_v4 }
 0x404   :  { %v9068_v26 = vpop.eup %9067  ;;  %v1753_v56 = vsub.f32 %v1589_v27, %v1709_v59  ;;  %v1776_v2 = vmul.f32 %v1764_v53, %v17484_v32  ;;  %v1714_v14 = vadd.f32 1.0, %v1713_v47  ;;  %v1716_v40 = vand.u32 2147483647, %v11943_v25  ;;  %v81_v47 = vld [vmem:[%s17298_s2 + $0x48] sm:$0xff] }
 0x405   :  { %v1592_v63 = vmul.f32 0.6931472, %v9066_v39  ;;  %v1595_v29 = vmul.f32 %v11914_v21, %v1594_v24  ;;  %vm12133_vm4 = vcmp.lt.f32.partialorder %v1596_v61, 0.0004427343  ;;  %9073 = vlog2.f32 %v11986_v17 }
 0x406   :  { %v1765_v11 = vmul.f32 0.5, %v1753_v56  ;;  %vm12138_vm8 = vcmp.lt.f32.partialorder %v1605_v55, 0.0004427343  ;;  %v1723_v45 = vadd.f32 1.0, %v1722_v54  ;;  %v1725_v49 = vand.u32 2147483647, %v11931_v41 }
 0x407   :  { %v1601_v23 = vmul.f32 0.6931472, %v9068_v26  ;;  %v1604_v62 = vmul.f32 %v17479_v30, %v1603_v0  ;;  %9075 = vlog2.f32 %v11954_v34  ;;  %v1728_v21 = vadd.f32 1.0, %v12064_v36  ;;  %v17494_v56 = vld [vmem:[#allocation19_spill] sm:$0xff] }
 0x408   :  { %v9070_v37 = vpop.eup %9069  ;;  %v1777_v20 = vmul.f32 %v1765_v11, %v17489_v52  ;;  %v1788_v17 = vmul.f32 %v1776_v2, %v12086_v31  ;;  %v1715_v44 = vmul.f32 %v1714_v14, %v11943_v25  ;;  %vm12149_vm10 = vcmp.lt.f32.partialorder %v1716_v40, 0.0004427343  ;;  %v17495_v40 = vld [vmem:[#allocation17_spill] sm:$0xff] }
 0x409   :  { %v9072_v43 = vpop.eup %9071  ;;  %v1598_v38 = vsel %vm12133_vm4, %v1595_v29, %v1592_v63  ;;  %v1712_v48 = vmul.f32 0.6931472, %v9070_v37  ;;  %9077 = vlog2.f32 %v1728_v21  ;;  %v1737_v34 = vadd.f32 1.0, %v11957_v8 }
 0x40a   :  { %v1789_v10 = vmul.f32 %v1777_v20, %v12091_v46  ;;  %v1721_v13 = vmul.f32 0.6931472, %v9072_v43  ;;  %v1724_v18 = vmul.f32 %v1723_v45, %v11931_v41  ;;  %vm1726_vm9 = vcmp.lt.f32.partialorder %v1725_v49, 0.0004427343 }
 0x40b   :  { %v1607_v25 = vsel %vm12138_vm8, %v1604_v62, %v1601_v23  ;;  %v1718_v31 = vsel %vm12149_vm10, %v1715_v44, %v1712_v48  ;;  %v1611_v16 = vmul.f32 -0.5, %v11961_v33  ;;  %9079 = vlog2.f32 %v1737_v34  ;;  %v17498_v48 = vld [vmem:[#allocation10_spill] sm:$0xff] }
 0x40c   :  { %v8685_v42 = vpack.c.bf16 %v1789_v10, %v1788_v17  ;;  %v1727_v58 = vsel %vm1726_vm9, %v1724_v18, %v1721_v13  ;;  %v1754_v51 = vsub.f32 %v1598_v38, %v1718_v31  ;;  %v1731_v30 = vmul.f32 -0.5, %v12064_v36 }
 0x40d   :  { %v1755_v4 = vsub.f32 %v1607_v25, %v1727_v58  ;;  %v1620_v46 = vmul.f32 -0.5, %v11939_v6  ;;  %v1740_v57 = vmul.f32 -0.5, %v11957_v8  ;;  %v1491_v3 = vsel %vm1407_vm3, 1.004016, %v17478_v50 }
 0x40e   :  { %8686 = vmatprep.subr.bf16.mxu1 %v8685_v42  ;;  %v1766_v41 = vmul.f32 0.5, %v1754_v51  ;;  %v1490_v12 = vsel %vm1406_vm5, 1.004016, %v17477_v5  ;;  %v1466_v53 = vsel %vm1406_vm5, %v1430_v35, %v17482_v1  ;;  %v1467_v61 = vsel %vm1407_vm3, %v1431_v9, %v17483_v60 }
 0x40f   :  { %v9074_v7 = vpop.eup %9073  ;;  %8688 = vmatpush3.bf16.msra.mxu1 %v8685_v42  ;;  %v1767_v24 = vmul.f32 0.5, %v1755_v4  ;;  %v1612_v55 = vadd.f32 1.0, %v1611_v16  ;;  %v1732_v54 = vadd.f32 1.0, %v1731_v30  ;;  %v1614_v50 = vand.u32 2147483647, %v11961_v33  ;;  %v73_v30 = vld [vmem:[%s17298_s2 + $0x8] sm:$0xff] }
 0x410   :  { %v1778_v39 = vmul.f32 %v1766_v41, %v1490_v12  ;;  %v1621_v0 = vadd.f32 1.0, %v1620_v46  ;;  %v1734_v5 = vand.u32 2147483647, %v12064_v36  ;;  %v1420_v32 = vmul.f32 0.996, %v17494_v56  ;;  %v74_v4 = vld [vmem:[%s17298_s2 + $0x10] sm:$0xff] }
 0x411   :  { %v9076_v27 = vpop.eup %9075  ;;  %v1779_v59 = vmul.f32 %v1767_v24, %v1491_v3  ;;  %v1610_v2 = vmul.f32 0.6931472, %v9074_v7  ;;  %v1741_v1 = vadd.f32 1.0, %v1740_v57  ;;  %v1421_v63 = vmul.f32 0.996, %v17495_v40  ;;  %v75_v46 = vld [vmem:[%s17298_s2 + $0x18] sm:$0xff] }
 0x412   :  { %v1790_v26 = vmul.f32 %v1778_v39, %v1466_v53  ;;  %v1623_v60 = vand.u32 2147483647, %v11939_v6  ;;  %v1743_v9 = vand.u32 2147483647, %v11957_v8  ;;  %v1613_v29 = vmul.f32 %v11961_v33, %v1612_v55  ;;  %v17496_v33 = vld [vmem:[#allocation11_spill] sm:$0xff]  ;;  %v77_v57 = vld [vmem:[%s17298_s2 + $0x28] sm:$0xff] }
 0x413   :  { %v9078_v35 = vpop.eup %9077  ;;  %v1791_v14 = vmul.f32 %v1779_v59, %v1467_v61  ;;  %v1619_v28 = vmul.f32 0.6931472, %v9076_v27  ;;  %v1733_v15 = vmul.f32 %v1732_v54, %v12064_v36  ;;  %vm1615_vm3 = vcmp.lt.f32.partialorder %v1614_v50, 0.0004427343  ;;  %v76_v41 = vld [vmem:[%s17298_s2 + $0x20] sm:$0xff]  ;;  %v78_v7 = vld [vmem:[%s17298_s2 + $0x30] sm:$0xff] }
 0x414   :  { %v1730_v11 = vmul.f32 0.6931472, %v9078_v35  ;;  %v1622_v23 = vmul.f32 %v11939_v6, %v1621_v0  ;;  %vm1735_vm5 = vcmp.lt.f32.partialorder %v1734_v5, 0.0004427343  ;;  %v1616_v62 = vsel %vm1615_vm3, %v1613_v29, %v1610_v2  ;;  %v80_v3 = vld [vmem:[%s17298_s2 + $0x40] sm:$0xff]  ;;  %v82_v12 = vld [vmem:[%s17298_s2 + $0x50] sm:$0xff] }
 0x415   :  { %v9080_v45 = vpop.eup %9079  ;;  %v8689_v49 = vpack.c.bf16 %v1791_v14, %v1790_v26  ;;  %v1742_v52 = vmul.f32 %v1741_v1, %v11957_v8  ;;  %vm1624_vm2 = vcmp.lt.f32.partialorder %v1623_v60, 0.0004427343  ;;  %vm1744_vm12 = vcmp.lt.f32.partialorder %v1743_v9, 0.0004427343  ;;  %v83_v53 = vld [vmem:[%s17298_s2 + $0x58] sm:$0xff]  ;;  %v17500_v24 = vld [vmem:[#allocation12_spill] sm:$0xff] }
 0x416   :  { %v1736_v21 = vsel %vm1735_vm5, %v1733_v15, %v1730_v11  ;;  %v1739_v37 = vmul.f32 0.6931472, %v9080_v45  ;;  %v1432_v17 = vmul.f32 %v1420_v32, %v17496_v33  ;;  %v1625_v44 = vsel %vm1624_vm2, %v1622_v23, %v1619_v28 }
 0x417   :  { %8690 = vmatprep.subr.bf16.mxu1 %v8689_v49  ;;  %v1756_v20 = vsub.f32 %v1616_v62, %v1736_v21  ;;  %v1492_v6 = vsel %vm1408_vm15, 1.004016, %v17494_v56  ;;  %v1433_v34 = vmul.f32 %v1421_v63, %v17498_v48  ;;  %v1493_v18 = vsel %vm1409_vm7, 1.004016, %v17495_v40 }
 0x418   :  { %8692 = vmatpush3.bf16.msra.mxu1 %v8689_v49  ;;  %v1745_v36 = vsel %vm1744_vm12, %v1742_v52, %v1739_v37  ;;  %v1468_v25 = vsel %vm1408_vm15, %v1432_v17, %v17496_v33 }
 0x419   :  { %v1757_v19 = vsub.f32 %v1625_v44, %v1745_v36  ;;  %v1768_v43 = vmul.f32 0.5, %v1756_v20  ;;  %v1469_v42 = vsel %vm1409_vm7, %v1433_v34, %v17498_v48 }
 0x41b   :  { %v1769_v10 = vmul.f32 0.5, %v1757_v19  ;;  %v1780_v13 = vmul.f32 %v1768_v43, %v1492_v6 }
 0x41d   :  { %v1781_v31 = vmul.f32 %v1769_v10, %v1493_v18  ;;  %v1792_v16 = vmul.f32 %v1780_v13, %v1468_v25 }
 0x41f   :  { %v1793_v58 = vmul.f32 %v1781_v31, %v1469_v42 }
 0x421   :  { %v8693_v51 = vpack.c.bf16 %v1793_v58, %v1792_v16 }
 0x423   :  { %8694 = vmatprep.subr.bf16.mxu1 %v8693_v51 }
 0x424   :  { %8696 = vmatpush3.bf16.msra.mxu1 %v8693_v51 }
 0x427   :  { %8471 = vmatmul.mubr.msk.f32.vlgmr.msra.gmra.mrb[0].mxu1 %vm1794_vm6, %v73_v30 }
 0x428   :  { %8473 = vmatprep.mubr.msk.f32.mxu1 %vm1794_vm6, %v74_v4 }
 0x42b   :  { %8474 = vmatmul.mubr.msk.f32.gmra.mrb[2].mxu1 %vm1794_vm6, %v75_v46 }
 0x42c   :  { %8476 = vmatprep.mubr.msk.f32.mxu1 %vm1794_vm6, %v76_v41 }
 0x42f   :  { %8477 = vmatmul.mubr.msk.f32.gmra.mrb[4].mxu1 %vm1794_vm6, %v77_v57 }
 0x430   :  { %8479 = vmatprep.mubr.msk.f32.mxu1 %vm1794_vm6, %v78_v7 }
 0x433   :  { %8480 = vmatmul.mubr.msk.f32.gmra.mrb[6].mxu1 %vm1794_vm6, %v79_v22 }
 0x434   :  { %8482 = vmatprep.mubr.msk.f32.mxu1 %vm1794_vm6, %v80_v3 }
 0x437   :  { %8483 = vmatmul.mubr.msk.f32.gmra.mrb[8].mxu1 %vm1794_vm6, %v81_v47 }
 0x438   :  { %8485 = vmatprep.mubr.msk.f32.mxu1 %vm1794_vm6, %v82_v12 }
 0x43b   :  { %8486 = vmatmul.mubr.msk.f32.gmra.mrb[10].mxu1 %vm1794_vm6, %v83_v53 }
 0x43c   :  { %8538 = vmatprep.mubr.msk.f32.mxu1 %vm1794_vm6, %v17500_v24 }
 0x4fa   :  { %v12248_v61 = vpop.f32.mrb[0].mxu1 }
 0x4fb   :  { %v1957_v39 = vmul.f32 %v12248_v61, %v12248_v61  ;;  %v12252_v55 = vpop.f32.mrb[1].mxu1 }
 0x4fc   :  { %v1956_v54 = vmul.f32 %v12252_v55, %v12252_v55 }
 0x4fd   :  { %v1971_v27 = vsel %vm490_vm13, %v1957_v39, 0.0 }
 0x4fe   :  { %1972 = vadd.xlane.f32.xlu1 %v1971_v27  ;;  %v12257_v59 = vpop.f32.mrb[2].mxu1  ;;  %v1968_v50 = vsel %vm490_vm13, %v1956_v54, 0.0 }
 0x4ff   :  { %v1959_v0 = vmul.f32 %v12257_v59, %v12257_v59  ;;  %1969 = vadd.xlane.f32.xlu0 %v1968_v50  ;;  %v12262_v5 = vpop.f32.mrb[3].mxu1 }
 0x500   :  { %v1958_v26 = vmul.f32 %v12262_v5, %v12262_v5 }
 0x501   :  { %v1977_v56 = vsel %vm490_vm13, %v1959_v0, 0.0 }
 0x502   :  { %1978 = vadd.xlane.f32.xlu1 %v1977_v56  ;;  %v12267_v32 = vpop.f32.mrb[4].mxu1  ;;  %v1974_v2 = vsel %vm490_vm13, %v1958_v26, 0.0 }
 0x503   :  { %v1961_v1 = vmul.f32 %v12267_v32, %v12267_v32  ;;  %1975 = vadd.xlane.f32.xlu0 %v1974_v2  ;;  %v12272_v35 = vpop.f32.mrb[5].mxu1 }
 0x504   :  { %v1960_v14 = vmul.f32 %v12272_v35, %v12272_v35 }
 0x505   :  { %v1983_v40 = vsel %vm490_vm13, %v1961_v1, 0.0 }
 0x506   :  { %1984 = vadd.xlane.f32.xlu1 %v1983_v40  ;;  %v12277_v63 = vpop.f32.mrb[6].mxu1  ;;  %v1980_v60 = vsel %vm490_vm13, %v1960_v14, 0.0 }
 0x507   :  { %v1963_v9 = vmul.f32 %v12277_v63, %v12277_v63  ;;  %1981 = vadd.xlane.f32.xlu0 %v1980_v60  ;;  %v12282_v29 = vpop.f32.mrb[7].mxu1 }
 0x508   :  { %v1962_v28 = vmul.f32 %v12282_v29, %v12282_v29 }
 0x509   :  { %v1989_v11 = vsel %vm490_vm13, %v1963_v9, 0.0 }
 0x50a   :  { %1990 = vadd.xlane.f32.xlu1 %v1989_v11  ;;  %v12287_v15 = vpop.f32.mrb[8].mxu1  ;;  %v1986_v45 = vsel %vm490_vm13, %v1962_v28, 0.0 }
 0x50b   :  { %v1965_v49 = vmul.f32 %v12287_v15, %v12287_v15  ;;  %1987 = vadd.xlane.f32.xlu0 %v1986_v45  ;;  %v12292_v23 = vpop.f32.mrb[9].mxu1 }
 0x50c   :  { %v1964_v62 = vmul.f32 %v12292_v23, %v12292_v23 }
 0x50d   :  { %v1995_v21 = vsel %vm490_vm13, %v1965_v49, 0.0 }
 0x50e   :  { %1996 = vadd.xlane.f32.xlu1 %v1995_v21  ;;  %v12297_v37 = vpop.f32.mrb[10].mxu1  ;;  %v1992_v52 = vsel %vm490_vm13, %v1964_v62, 0.0 }
 0x50f   :  { %v1967_v20 = vmul.f32 %v12297_v37, %v12297_v37  ;;  %1993 = vadd.xlane.f32.xlu0 %v1992_v52  ;;  %v12302_v33 = vpop.f32.mrb[11].mxu1 }
 0x510   :  { %v1966_v17 = vmul.f32 %v12302_v33, %v12302_v33 }
 0x511   :  { %v2001_v44 = vsel %vm490_vm13, %v1967_v20, 0.0 }
 0x512   :  { %2002 = vadd.xlane.f32.xlu1 %v2001_v44  ;;  %v1998_v36 = vsel %vm490_vm13, %v1966_v17, 0.0 }
 0x513   :  { %1999 = vadd.xlane.f32.xlu0 %v1998_v36 }
 0x58b   :  { %v1973_v19 = vpop.xlane.xlu1 %1972 }
 0x58c   :  { %v2005_v43 = vmax.f32 %v1973_v19, 1e-30  ;;  %v1970_v38 = vpop.xlane.xlu0 %1969 }
 0x58d   :  { %v2004_v6 = vmax.f32 %v1970_v38, 1e-30 }
 0x58e   :  { %9081 = vrsqrt.f32 %v2005_v43 }
 0x58f   :  { %9083 = vrsqrt.f32 %v2004_v6  ;;  %v1979_v48 = vpop.xlane.xlu1 %1978 }
 0x590   :  { %v2007_v34 = vmax.f32 %v1979_v48, 1e-30  ;;  %v1976_v10 = vpop.xlane.xlu0 %1975 }
 0x591   :  { %v2006_v13 = vmax.f32 %v1976_v10, 1e-30 }
 0x592   :  { %9085 = vrsqrt.f32 %v2007_v34 }
 0x593   :  { %v1985_v8 = vpop.xlane.xlu1 %1984  ;;  %9087 = vrsqrt.f32 %v2006_v13 }
 0x594   :  { %v1982_v18 = vpop.xlane.xlu0 %1981  ;;  %v2009_v25 = vmax.f32 %v1985_v8, 1e-30 }
 0x595   :  { %v2008_v31 = vmax.f32 %v1982_v18, 1e-30 }
 0x596   :  { %9089 = vrsqrt.f32 %v2009_v25 }
 0x597   :  { %v1991_v16 = vpop.xlane.xlu1 %1990  ;;  %9091 = vrsqrt.f32 %v2008_v31 }
 0x598   :  { %v12308_v42 = vpop.eup %9081  ;;  %v2011_v58 = vmax.f32 %v1991_v16, 1e-30  ;;  %v1988_v51 = vpop.xlane.xlu0 %1987 }
 0x599   :  { %v12310_v30 = vpop.eup %9083  ;;  %v2029_v4 = vmul.f32 %v12308_v42, %v2005_v43  ;;  %v2010_v57 = vmax.f32 %v1988_v51, 1e-30 }
 0x59a   :  { %v2028_v46 = vmul.f32 %v12310_v30, %v2004_v6  ;;  %9093 = vrsqrt.f32 %v2011_v58 }
 0x59b   :  { %v8037_v41 = vclamps-f32 %v2029_v4, 15.0  ;;  %v1997_v7 = vpop.xlane.xlu1 %1996 }
 0x59c   :  { %v12314_v22 = vpop.eup %9085  ;;  %v8036_v3 = vclamps-f32 %v2028_v46, 15.0  ;;  %v1994_v47 = vpop.xlane.xlu0 %1993  ;;  %v2013_v12 = vmax.f32 %v1997_v7, 1e-30 }
 0x59d   :  { %9095 = vtanh.f32 %v8037_v41  ;;  %v2031_v53 = vmul.f32 %v12314_v22, %v2007_v34  ;;  %v2012_v24 = vmax.f32 %v1994_v47, 1e-30  ;;  %v12317_v39 = vpop.eup %9087 }
 0x59e   :  { %9097 = vtanh.f32 %v8036_v3  ;;  %v2030_v0 = vmul.f32 %v12317_v39, %v2006_v13 }
 0x59f   :  { %9099 = vrsqrt.f32 %v2010_v57  ;;  %v2003_v54 = vpop.xlane.xlu1 %2002  ;;  %v8039_v50 = vclamps-f32 %v2031_v53, 15.0 }
 0x5a0   :  { %9101 = vrsqrt.f32 %v2013_v12  ;;  %v12319_v27 = vpop.eup %9089  ;;  %v2015_v26 = vmax.f32 %v2003_v54, 1e-30  ;;  %v12324_v2 = vpop.xlane.xlu0 %1999  ;;  %v8038_v60 = vclamps-f32 %v2030_v0, 15.0 }
 0x5a1   :  { %9103 = vrsqrt.f32 %v2012_v24  ;;  %v12322_v56 = vpop.eup %9091  ;;  %v2033_v14 = vmul.f32 %v12319_v27, %v2009_v25  ;;  %v2014_v28 = vmax.f32 %v12324_v2, 1e-30 }
 0x5a2   :  { %9105 = vtanh.f32 %v8039_v50  ;;  %v2032_v62 = vmul.f32 %v12322_v56, %v2008_v31 }
 0x5a3   :  { %9107 = vrsqrt.f32 %v2015_v26  ;;  %v8041_v49 = vclamps-f32 %v2033_v14, 15.0 }
 0x5a4   :  { %v12326_v1 = vpop.eup %9093  ;;  %9109 = vtanh.f32 %v8038_v60  ;;  %v8040_v6 = vclamps-f32 %v2032_v62, 15.0 }
 0x5a5   :  { %v2035_v20 = vmul.f32 %v12326_v1, %v2011_v58  ;;  %9111 = vrsqrt.f32 %v2014_v28 }
 0x5a6   :  { %9113 = vtanh.f32 %v8041_v49 }
 0x5a7   :  { %v12329_v40 = vpop.eup %9095  ;;  %v8043_v10 = vclamps-f32 %v2035_v20, 15.0 }
 0x5a8   :  { %v12331_v9 = vpop.eup %9097  ;;  %vm2077_vm7 = vcmp.gt.f32.partialorder %v12329_v40, 0.996  ;;  %v2125_v17 = vmax.f32 %v12329_v40, 1e-15 }
 0x5a9   :  { %v12335_v11 = vpop.eup %9099  ;;  %v2089_v45 = vsel %vm2077_vm7, 0.996, %v12329_v40  ;;  %vm2076_vm15 = vcmp.gt.f32.partialorder %v12331_v9, 0.996 }
 0x5aa   :  { %v12342_v21 = vclamps-f32 %v2089_v45, 0.9999999  ;;  %v12344_v52 = vpop.eup %9101  ;;  %v2088_v44 = vsel %vm2076_vm15, 0.996, %v12331_v9  ;;  %v2034_v36 = vmul.f32 %v12335_v11, %v2010_v57  ;;  %9115 = vrcp.f32 %v2125_v17 }
 0x5ab   :  { %v12355_v43 = vpop.eup %9103  ;;  %v2037_v48 = vmul.f32 %v12344_v52, %v2013_v12  ;;  %v12359_v34 = vclamps-f32 %v2088_v44, 0.9999999  ;;  %v2101_v31 = vmul.f32 %v12308_v42, %v2089_v45  ;;  %v2124_v42 = vmax.f32 %v12331_v9, 1e-15 }
 0x5ac   :  { %v2205_v19 = vadd.f32 1.0, %v12342_v21  ;;  %v2305_v38 = vsub.f32 0.0, %v12342_v21  ;;  %v8042_v8 = vclamps-f32 %v2034_v36, 15.0  ;;  %v2036_v18 = vmul.f32 %v12355_v43, %v2012_v24  ;;  %v12362_v25 = vpop.eup %9105 }
 0x5ad   :  { %v12365_v16 = vpop.eup %9107  ;;  %v8045_v58 = vclamps-f32 %v2037_v48, 15.0  ;;  %v2208_v51 = vmul.f32 -0.5, %v12342_v21  ;;  %v2196_v4 = vadd.f32 1.0, %v12359_v34  ;;  %v2211_v46 = vand.u32 2147483647, %v12342_v21 }
 0x5ae   :  { %v2325_v13 = vadd.f32 1.0, %v2305_v38  ;;  %9117 = vlog2.f32 %v2205_v19  ;;  %v2328_v41 = vmul.f32 -0.5, %v2305_v38  ;;  %v12371_v57 = vsub.f32 0.0, %v12359_v34  ;;  %v12375_v3 = vpop.eup %9109 }
 0x5af   :  { %v8044_v7 = vclamps-f32 %v2036_v18, 15.0  ;;  %vm2079_vm11 = vcmp.gt.f32.partialorder %v12362_v25, 0.996  ;;  %v12378_v47 = vmul.f32 %v12365_v16, %v2015_v26  ;;  %v12381_v12 = vmul.f32 %v12248_v61, %v2101_v31  ;;  %v12384_v24 = vpop.eup %9111 }
 0x5b0   :  { %9119 = vlog2.f32 %v2325_v13  ;;  %v2316_v53 = vadd.f32 1.0, %v12371_v57  ;;  %v2209_v54 = vadd.f32 1.0, %v2208_v51  ;;  %v2100_v50 = vmul.f32 %v12310_v30, %v2088_v44  ;;  %v12394_v60 = vpop.eup %9113 }
 0x5b1   :  { %9121 = vtanh.f32 %v8040_v6  ;;  %v2091_v0 = vsel %vm2079_vm11, 0.996, %v12362_v25  ;;  %vm12390_vm14 = vcmp.lt.f32.partialorder %v2211_v46, 0.0004427343  ;;  %v2329_v26 = vadd.f32 1.0, %v2328_v41 }
 0x5b2   :  { %9123 = vtanh.f32 %v8043_v10  ;;  %v2331_v61 = vand.u32 2147483647, %v2305_v38  ;;  %v2199_v45 = vmul.f32 -0.5, %v12359_v34  ;;  %v12397_v49 = vclamps-f32 %v2091_v0, 0.9999999 }
 0x5b3   :  { %9125 = vtanh.f32 %v8042_v8  ;;  %vm2078_vm1 = vcmp.gt.f32.partialorder %v12375_v3, 0.996  ;;  %v8047_v62 = vclamps-f32 %v12378_v47, 15.0  ;;  %v12404_v20 = vmul.f32 %v12384_v24, %v2014_v28 }
 0x5b4   :  { %9127 = vlog2.f32 %v2196_v4  ;;  %v9116_v30 = vpop.eup %9115  ;;  %v2202_v17 = vand.u32 2147483647, %v12359_v34  ;;  %v2090_v44 = vsel %vm2078_vm1, 0.996, %v12375_v3  ;;  %v2319_v19 = vmul.f32 -0.5, %v12371_v57 }
 0x5b5   :  { %9129 = vtanh.f32 %v8045_v58  ;;  %v2223_v6 = vadd.f32 1.0, %v12397_v49  ;;  %v12413_v48 = vsub.f32 0.0, %v12397_v49  ;;  %v2210_v28 = vmul.f32 %v12342_v21, %v2209_v54 }
 0x5b6   :  { %9131 = vlog2.f32 %v2316_v53  ;;  %v2330_v13 = vmul.f32 %v2329_v26, %v2305_v38  ;;  %vm12416_vm4 = vcmp.lt.f32.partialorder %v2331_v61, 0.0004427343  ;;  %v2200_v58 = vadd.f32 1.0, %v2199_v45 }
 0x5b7   :  { %9133 = vtanh.f32 %v8044_v7  ;;  %v12422_v51 = vclamps-f32 %v2090_v44, 0.9999999  ;;  %v12427_v46 = vmul.f32 %v2100_v50, %v12252_v55  ;;  %vm12429_vm8 = vcmp.lt.f32.partialorder %v2202_v17, 0.0004427343 }
 0x5b8   :  { %v9118_v36 = vpop.eup %9117  ;;  %9135 = vrcp.f32 %v2124_v42  ;;  %v2127_v21 = vmax.f32 %v12362_v25, 1e-15  ;;  %v2343_v38 = vadd.f32 1.0, %v12413_v48  ;;  %v2161_v42 = vsel %vm2077_vm7, 1.004016, %v9116_v30 }
 0x5b9   :  { %v2207_v2 = vmul.f32 0.6931472, %v9118_v36  ;;  %9137 = vlog2.f32 %v2223_v6  ;;  %v2320_v54 = vadd.f32 1.0, %v2319_v19  ;;  %v2322_v61 = vand.u32 2147483647, %v12371_v57 }
 0x5ba   :  { %v9120_v10 = vpop.eup %9119  ;;  %v2103_v45 = vmul.f32 %v12314_v22, %v2091_v0  ;;  %9139 = vlog2.f32 %v2343_v38  ;;  %v2201_v40 = vmul.f32 %v12359_v34, %v2200_v58  ;;  %v2226_v30 = vmul.f32 -0.5, %v12397_v49 }
 0x5bb   :  { %v12420_v18 = vpop.eup %9121  ;;  %v2327_v31 = vmul.f32 0.6931472, %v9120_v10  ;;  %v2213_v53 = vsel %vm12390_vm14, %v2210_v28, %v2207_v2  ;;  %v2214_v14 = vadd.f32 1.0, %v12422_v51  ;;  %9141 = vrcp.f32 %v2127_v21 }
 0x5bc   :  { %v12424_v4 = vpop.eup %9123  ;;  %v2229_v19 = vand.u32 2147483647, %v12397_v49  ;;  %v12452_v2 = vsub.f32 0.0, %v12422_v51  ;;  %v2321_v0 = vmul.f32 %v2320_v54, %v12371_v57  ;;  %vm2323_vm10 = vcmp.lt.f32.partialorder %v2322_v61, 0.0004427343 }
 0x5bd   :  { %v12435_v7 = vpop.eup %9125  ;;  %v2333_v55 = vsel %vm12416_vm4, %v2330_v13, %v2327_v31  ;;  %v2346_v13 = vmul.f32 -0.5, %v12413_v48  ;;  %9143 = vlog2.f32 %v2214_v14  ;;  %v12459_v8 = vmul.f32 %v12257_v59, %v2103_v45 }
 0x5be   :  { %v9128_v50 = vpop.eup %9127  ;;  %v2425_v26 = vsub.f32 %v2213_v53, %v2333_v55  ;;  %v2334_v31 = vadd.f32 1.0, %v12452_v2  ;;  %v2227_v53 = vadd.f32 1.0, %v2226_v30  ;;  %v2126_v55 = vmax.f32 %v12375_v3, 1e-15 }
 0x5bf   :  { %v12445_v17 = vpop.eup %9129  ;;  %v2198_v36 = vmul.f32 0.6931472, %v9128_v50  ;;  %vm12466_vm9 = vcmp.lt.f32.partialorder %v2229_v19, 0.0004427343  ;;  %v2102_v61 = vmul.f32 %v12317_v39, %v2090_v44  ;;  %vm2081_vm3 = vcmp.gt.f32.partialorder %v12394_v60, 0.996 }
 0x5c0   :  { %v9132_v6 = vpop.eup %9131  ;;  %v2437_v10 = vmul.f32 0.5, %v2425_v26  ;;  %9145 = vlog2.f32 %v2334_v31  ;;  %v2349_v26 = vand.u32 2147483647, %v12413_v48  ;;  %v2228_v30 = vmul.f32 %v12397_v49, %v2227_v53 }
 0x5c1   :  { %v12454_v28 = vpop.eup %9133  ;;  %v2318_v22 = vmul.f32 0.6931472, %v9132_v6  ;;  %v2204_v21 = vsel %vm12429_vm8, %v2201_v40, %v2198_v36  ;;  %v2217_v36 = vmul.f32 -0.5, %v12422_v51  ;;  %v2337_v14 = vmul.f32 -0.5, %v12452_v2 }
 0x5c2   :  { %v2449_v34 = vmul.f32 %v2437_v10, %v2161_v42  ;;  %v9136_v58 = vpop.eup %9135  ;;  %v2347_v42 = vadd.f32 1.0, %v2346_v13  ;;  %v12483_v6 = vsel %vm2081_vm3, 0.996, %v12394_v60  ;;  %9147 = vrcp.f32 %v2126_v55 }
 0x5c3   :  { %v2324_v38 = vsel %vm2323_vm10, %v2321_v0, %v2318_v22  ;;  %v9138_v59 = vpop.eup %9137  ;;  %v2160_v45 = vsel %vm2076_vm15, 1.004016, %v9136_v58  ;;  %v2220_v9 = vand.u32 2147483647, %v12422_v51  ;;  %vm2350_vm5 = vcmp.lt.f32.partialorder %v2349_v26, 0.0004427343 }
 0x5c4   :  { %v2461_v57 = vmul.f32 %v2449_v34, %v12381_v12  ;;  %v2424_v54 = vsub.f32 %v2204_v21, %v2324_v38  ;;  %v2225_v40 = vmul.f32 0.6931472, %v9138_v59  ;;  %v9140_v39 = vpop.eup %9139  ;;  %v2348_v22 = vmul.f32 %v2347_v42, %v12413_v48 }
 0x5c5   :  { %v2345_v19 = vmul.f32 0.6931472, %v9140_v39  ;;  %v12490_v49 = vclamps-f32 %v12483_v6, 0.9999999  ;;  %v9142_v0 = vpop.eup %9141  ;;  %v2218_v31 = vadd.f32 1.0, %v2217_v36  ;;  %v2338_v53 = vadd.f32 1.0, %v2337_v14 }
 0x5c6   :  { %v12473_v41 = vmax.f32 %v2461_v57, 0.0  ;;  %v2436_v12 = vmul.f32 0.5, %v2424_v54  ;;  %vm2080_vm2 = vcmp.gt.f32.partialorder %v12420_v18, 0.996  ;;  %v2231_v21 = vsel %vm12466_vm9, %v2228_v30, %v2225_v40 }
 0x5c7   :  { %v9144_v58 = vpop.eup %9143  ;;  %v2351_v38 = vsel %vm2350_vm5, %v2348_v22, %v2345_v19  ;;  %v2241_v48 = vadd.f32 1.0, %v12490_v49  ;;  %vm12500_vm12 = vcmp.lt.f32.partialorder %v2220_v9, 0.0004427343  ;;  %v2309_v42 = vsub.f32 0.0, %v12490_v49 }
 0x5c8   :  { %v2485_v44 = vmul.f32 %v12473_v41, %v12473_v41  ;;  %v2448_v10 = vmul.f32 %v2436_v12, %v2160_v45  ;;  %v2427_v57 = vsub.f32 %v2231_v21, %v2351_v38  ;;  %v2216_v59 = vmul.f32 0.6931472, %v9144_v58 }
 0x5c9   :  { %9149 = vlog2.f32 %v2241_v48  ;;  %v2092_v50 = vsel %vm2080_vm2, 0.996, %v12420_v18  ;;  %v2163_v12 = vsel %vm2079_vm11, 1.004016, %v9142_v0  ;;  %v2219_v40 = vmul.f32 %v12422_v51, %v2218_v31 }
 0x5ca   :  { %v2499_v13 = vsel %vm490_vm13, %v2485_v44, 0.0  ;;  %v2460_v34 = vmul.f32 %v2448_v10, %v12427_v46  ;;  %v2340_v46 = vand.u32 2147483647, %v12452_v2  ;;  %v9146_v26 = vpop.eup %9145  ;;  %v2439_v36 = vmul.f32 0.5, %v2427_v57 }
 0x5cb   :  { %2500 = vadd.xlane.f32.xlu1 %v2499_v13  ;;  %v2336_v30 = vmul.f32 0.6931472, %v9146_v26  ;;  %v2339_v14 = vmul.f32 %v2338_v53, %v12452_v2  ;;  %v2129_v39 = vmax.f32 %v12394_v60, 1e-15  ;;  %v2361_v44 = vadd.f32 1.0, %v2309_v42 }
 0x5cc   :  { %v12498_v55 = vmax.f32 %v2460_v34, 0.0  ;;  %v2451_v9 = vmul.f32 %v2439_v36, %v2163_v12  ;;  %vm2341_vm7 = vcmp.lt.f32.partialorder %v2340_v46, 0.0004427343  ;;  %v12517_v19 = vclamps-f32 %v2092_v50, 0.9999999  ;;  %v9148_v51 = vpop.eup %9147 }
 0x5cd   :  { %v8046_v22 = vclamps-f32 %v12404_v20, 15.0  ;;  %v2222_v25 = vsel %vm12500_vm12, %v2219_v40, %v2216_v59  ;;  %v2342_v0 = vsel %vm2341_vm7, %v2339_v14, %v2336_v30  ;;  %9151 = vlog2.f32 %v2361_v44 }
 0x5ce   :  { %v2484_v45 = vmul.f32 %v12498_v55, %v12498_v55  ;;  %9153 = vtanh.f32 %v8047_v62  ;;  %v2463_v2 = vmul.f32 %v2451_v9, %v12459_v8  ;;  %v2426_v13 = vsub.f32 %v2222_v25, %v2342_v0 }
 0x5cf   :  { %v2244_v34 = vmul.f32 -0.5, %v12490_v49  ;;  %v2114_v31 = vmul.f32 %v2102_v61, %v12262_v5  ;;  %9155 = vrcp.f32 %v2129_v39  ;;  %v2364_v58 = vmul.f32 -0.5, %v2309_v42 }
 0x5d0   :  { %v2496_v10 = vsel %vm490_vm13, %v2484_v45, 0.0  ;;  %v2232_v21 = vadd.f32 1.0, %v12517_v19  ;;  %v12528_v38 = vmax.f32 %v2463_v2, 0.0  ;;  %v2438_v53 = vmul.f32 0.5, %v2426_v13 }
 0x5d1   :  { %2497 = vadd.xlane.f32.xlu0 %v2496_v10  ;;  %v12531_v48 = vsub.f32 0.0, %v12517_v19  ;;  %vm2083_vm15 = vcmp.gt.f32.partialorder %v12424_v4, 0.996  ;;  %v2162_v47 = vsel %vm2078_vm1, 1.004016, %v9148_v51  ;;  %v2245_v57 = vadd.f32 1.0, %v2244_v34 }
 0x5d2   :  { %v2247_v62 = vand.u32 2147483647, %v12490_v49  ;;  %v2128_v8 = vmax.f32 %v12420_v18, 1e-15  ;;  %9157 = vlog2.f32 %v2232_v21  ;;  %v2487_v5 = vmul.f32 %v12528_v38, %v12528_v38 }
 0x5d3   :  { %v2450_v61 = vmul.f32 %v2438_v53, %v2162_v47  ;;  %v2352_v54 = vadd.f32 1.0, %v12531_v48  ;;  %v9150_v46 = vpop.eup %9149  ;;  %v2105_v59 = vmul.f32 %v12319_v27, %v12483_v6  ;;  %v2365_v26 = vadd.f32 1.0, %v2364_v58 }
 0x5d4   :  { %v2367_v45 = vand.u32 2147483647, %v2309_v42  ;;  %v12546_v3 = vsel %vm2083_vm15, 0.996, %v12424_v4  ;;  %v2505_v12 = vsel %vm490_vm13, %v2487_v5, 0.0  ;;  %v2235_v40 = vmul.f32 -0.5, %v12517_v19 }
 0x5d5   :  { %v2462_v36 = vmul.f32 %v2450_v61, %v2114_v31  ;;  %9159 = vlog2.f32 %v2352_v54  ;;  %2506 = vadd.xlane.f32.xlu1 %v2505_v12  ;;  %v2243_v30 = vmul.f32 0.6931472, %v9150_v46  ;;  %v2104_v14 = vmul.f32 %v12322_v56, %v2092_v50 }
 0x5d6   :  { %9161 = vrcp.f32 %v2128_v8  ;;  %v2355_v27 = vmul.f32 -0.5, %v12531_v48  ;;  %v2246_v39 = vmul.f32 %v12490_v49, %v2245_v57  ;;  %vm12555_vm11 = vcmp.lt.f32.partialorder %v2247_v62, 0.0004427343 }
 0x5d7   :  { %v12552_v6 = vmax.f32 %v2462_v36, 0.0  ;;  %v12560_v10 = vclamps-f32 %v12546_v3, 0.9999999  ;;  %v9152_v9 = vpop.eup %9151  ;;  %v2366_v25 = vmul.f32 %v2365_v26, %v2309_v42  ;;  %vm12562_vm14 = vcmp.lt.f32.partialorder %v2367_v45, 0.0004427343 }
 0x5d8   :  { %v2238_v56 = vand.u32 2147483647, %v12517_v19  ;;  %vm2082_vm1 = vcmp.gt.f32.partialorder %v12435_v7, 0.996  ;;  %v12568_v50 = vpop.eup %9153  ;;  %v2363_v51 = vmul.f32 0.6931472, %v9152_v9  ;;  %v2249_v42 = vsel %vm12555_vm11, %v2246_v39, %v2243_v30 }
 0x5d9   :  { %v2486_v49 = vmul.f32 %v12552_v6, %v12552_v6  ;;  %v2236_v2 = vadd.f32 1.0, %v2235_v40  ;;  %v2259_v13 = vadd.f32 1.0, %v12560_v10  ;;  %v9156_v34 = vpop.eup %9155  ;;  %v2356_v31 = vadd.f32 1.0, %v2355_v27 }
 0x5da   :  { %v2358_v58 = vand.u32 2147483647, %v12531_v48  ;;  %v12577_v21 = vsub.f32 0.0, %v12560_v10  ;;  %v2369_v47 = vsel %vm12562_vm14, %v2366_v25, %v2363_v51  ;;  %v12585_v62 = vsel %vm2082_vm1, 0.996, %v12435_v7 }
 0x5db   :  { %v2502_v53 = vsel %vm490_vm13, %v2486_v49, 0.0  ;;  %9163 = vlog2.f32 %v2259_v13  ;;  %v2429_v5 = vsub.f32 %v2249_v42, %v2369_v47  ;;  %v2117_v57 = vmul.f32 %v12267_v32, %v2105_v59 }
 0x5dc   :  { %v9158_v8 = vpop.eup %9157  ;;  %9165 = vtanh.f32 %v8046_v22  ;;  %2503 = vadd.xlane.f32.xlu0 %v2502_v53  ;;  %v2379_v61 = vadd.f32 1.0, %v12577_v21  ;;  %v2165_v54 = vsel %vm2081_vm3, 1.004016, %v9156_v34  ;;  %v2116_v46 = vmul.f32 %v2104_v14, %v12272_v35 }
 0x5dd   :  { %v2131_v26 = vmax.f32 %v12424_v4, 1e-15  ;;  %v2441_v45 = vmul.f32 0.5, %v2429_v5  ;;  %v2234_v12 = vmul.f32 0.6931472, %v9158_v8  ;;  %v2237_v22 = vmul.f32 %v12517_v19, %v2236_v2 }
 0x5de   :  { %9167 = vlog2.f32 %v2379_v61  ;;  %v12596_v36 = vclamps-f32 %v12585_v62, 0.9999999  ;;  %vm12599_vm4 = vcmp.lt.f32.partialorder %v2238_v56, 0.0004427343  ;;  %v2357_v32 = vmul.f32 %v2356_v31, %v12531_v48 }
 0x5df   :  { %v9160_v20 = vpop.eup %9159  ;;  %vm2359_vm8 = vcmp.lt.f32.partialorder %v2358_v58, 0.0004427343  ;;  %v2453_v35 = vmul.f32 %v2441_v45, %v2165_v54  ;;  %v2262_v30 = vmul.f32 -0.5, %v12560_v10  ;;  %9169 = vrcp.f32 %v2131_v26 }
 0x5e0   :  { %v9162_v60 = vpop.eup %9161  ;;  %v2354_v59 = vmul.f32 0.6931472, %v9160_v20  ;;  %v2250_v14 = vadd.f32 1.0, %v12596_v36  ;;  %v2382_v27 = vmul.f32 -0.5, %v12577_v21  ;;  %v12608_v39 = vsub.f32 0.0, %v12596_v36 }
 0x5e1   :  { %vm2085_vm10 = vcmp.gt.f32.partialorder %v12445_v17, 0.996  ;;  %v2465_v19 = vmul.f32 %v2453_v35, %v2117_v57  ;;  %v2240_v48 = vsel %vm12599_vm4, %v2237_v22, %v2234_v12  ;;  %v2265_v25 = vand.u32 2147483647, %v12560_v10 }
 0x5e2   :  { %v2360_v44 = vsel %vm2359_vm8, %v2357_v32, %v2354_v59  ;;  %9171 = vlog2.f32 %v2250_v14  ;;  %v2130_v0 = vmax.f32 %v12435_v7, 1e-15  ;;  %v2370_v56 = vadd.f32 1.0, %v12608_v39 }
 0x5e3   :  { %v2428_v9 = vsub.f32 %v2240_v48, %v2360_v44  ;;  %v12616_v49 = vmax.f32 %v2465_v19, 0.0  ;;  %v2263_v51 = vadd.f32 1.0, %v2262_v30  ;;  %v2385_v2 = vand.u32 2147483647, %v12577_v21 }
 0x5e4   :  { %v12622_v13 = vsel %vm2085_vm10, 0.996, %v12445_v17  ;;  %v2164_v42 = vsel %vm2080_vm2, 1.004016, %v9162_v60  ;;  %v2383_v58 = vadd.f32 1.0, %v2382_v27  ;;  %9173 = vlog2.f32 %v2370_v56 }
 0x5e5   :  { %v9164_v34 = vpop.eup %9163  ;;  %v2440_v31 = vmul.f32 0.5, %v2428_v9  ;;  %v2489_v47 = vmul.f32 %v12616_v49, %v12616_v49  ;;  %v2107_v8 = vmul.f32 %v12326_v1, %v12546_v3  ;;  %v2253_v5 = vmul.f32 -0.5, %v12596_v36 }
 0x5e6   :  { %v12626_v53 = vpop.eup %9165  ;;  %v2373_v61 = vmul.f32 -0.5, %v12608_v39  ;;  %v2261_v54 = vmul.f32 0.6931472, %v9164_v34  ;;  %9175 = vrcp.f32 %v2130_v0  ;;  %v12635_v18 = vclamps-f32 %v12622_v13, 0.9999999 }
 0x5e7   :  { %v2452_v57 = vmul.f32 %v2440_v31, %v2164_v42  ;;  %v2511_v45 = vsel %vm490_vm13, %v2489_v47, 0.0  ;;  %v2264_v12 = vmul.f32 %v12560_v10, %v2263_v51  ;;  %vm12639_vm9 = vcmp.lt.f32.partialorder %v2265_v25, 0.0004427343 }
 0x5e8   :  { %v9168_v26 = vpop.eup %9167  ;;  %vm12643_vm3 = vcmp.lt.f32.partialorder %v2385_v2, 0.0004427343  ;;  %2512 = vadd.xlane.f32.xlu1 %v2511_v45  ;;  %v2384_v40 = vmul.f32 %v2383_v58, %v12577_v21  ;;  %v2277_v32 = vadd.f32 1.0, %v12635_v18  ;;  %v2254_v60 = vadd.f32 1.0, %v2253_v5 }
 0x5e9   :  { %v2464_v3 = vmul.f32 %v2452_v57, %v2116_v46  ;;  %v2381_v22 = vmul.f32 0.6931472, %v9168_v26  ;;  %v2374_v35 = vadd.f32 1.0, %v2373_v61  ;;  %v12650_v59 = vsub.f32 0.0, %v12635_v18  ;;  %v9170_v10 = vpop.eup %9169 }
 0x5ea   :  { %vm2084_vm5 = vcmp.gt.f32.partialorder %v12454_v28, 0.996  ;;  %v2267_v14 = vsel %vm12639_vm9, %v2264_v12, %v2261_v54  ;;  %9177 = vlog2.f32 %v2277_v32  ;;  %v2119_v27 = vmul.f32 %v12277_v63, %v2107_v8 }
 0x5eb   :  { %v12653_v30 = vmax.f32 %v2464_v3, 0.0  ;;  %v2387_v46 = vsel %vm12643_vm3, %v2384_v40, %v2381_v22  ;;  %v2133_v48 = vmax.f32 %v12445_v17, 1e-15  ;;  %v2397_v44 = vadd.f32 1.0, %v12650_v59 }
 0x5ec   :  { %v9172_v21 = vpop.eup %9171  ;;  %v2431_v19 = vsub.f32 %v2267_v14, %v2387_v46  ;;  %v2256_v25 = vand.u32 2147483647, %v12596_v36  ;;  %v2376_v0 = vand.u32 2147483647, %v12608_v39  ;;  %v12669_v56 = vsel %vm2084_vm5, 0.996, %v12454_v28 }
 0x5ed   :  { %v2488_v9 = vmul.f32 %v12653_v30, %v12653_v30  ;;  %v2106_v63 = vmul.f32 %v12335_v11, %v12585_v62  ;;  %v2252_v2 = vmul.f32 0.6931472, %v9172_v21  ;;  %9179 = vlog2.f32 %v2397_v44 }
 0x5ee   :  { %v2443_v51 = vmul.f32 0.5, %v2431_v19  ;;  %v9174_v34 = vpop.eup %9173  ;;  %v2167_v31 = vsel %vm2083_vm15, 1.004016, %v9170_v10  ;;  %v2255_v58 = vmul.f32 %v12596_v36, %v2254_v60  ;;  %v2375_v47 = vmul.f32 %v2374_v35, %v12608_v39 }
 0x5ef   :  { %v2508_v42 = vsel %vm490_vm13, %v2488_v9, 0.0  ;;  %v2372_v5 = vmul.f32 0.6931472, %v9174_v34  ;;  %v2280_v61 = vmul.f32 -0.5, %v12635_v18  ;;  %v12680_v57 = vclamps-f32 %v12669_v56, 0.9999999 }
 0x5f0   :  { %2509 = vadd.xlane.f32.xlu0 %v2508_v42  ;;  %v2455_v8 = vmul.f32 %v2443_v51, %v2167_v31  ;;  %v9176_v11 = vpop.eup %9175  ;;  %vm2257_vm2 = vcmp.lt.f32.partialorder %v2256_v25, 0.0004427343  ;;  %vm2377_vm12 = vcmp.lt.f32.partialorder %v2376_v0, 0.0004427343  ;;  %9181 = vrcp.f32 %v2133_v48 }
 0x5f1   :  { %v2400_v62 = vmul.f32 -0.5, %v12650_v59  ;;  %v2258_v54 = vsel %vm2257_vm2, %v2255_v58, %v2252_v2  ;;  %v2378_v26 = vsel %vm2377_vm12, %v2375_v47, %v2372_v5  ;;  %v2268_v36 = vadd.f32 1.0, %v12680_v57 }
 0x5f2   :  { %v2467_v4 = vmul.f32 %v2455_v8, %v2119_v27  ;;  %v2118_v39 = vmul.f32 %v2106_v63, %v12282_v29  ;;  %v2430_v45 = vsub.f32 %v2258_v54, %v2378_v26  ;;  %v2283_v12 = vand.u32 2147483647, %v12635_v18 }
 0x5f3   :  { %v12687_v20 = vsub.f32 0.0, %v12680_v57  ;;  %v2281_v3 = vadd.f32 1.0, %v2280_v61  ;;  %9183 = vlog2.f32 %v2268_v36  ;;  %vm2087_vm7 = vcmp.gt.f32.partialorder %v12568_v50, 0.996 }
 0x5f4   :  { %v12689_v1 = vmax.f32 %v2467_v4, 0.0  ;;  %v9178_v22 = vpop.eup %9177  ;;  %v2166_v40 = vsel %vm2082_vm1, 1.004016, %v9176_v11  ;;  %v2442_v32 = vmul.f32 0.5, %v2430_v45  ;;  %v2401_v60 = vadd.f32 1.0, %v2400_v62 }
 0x5f5   :  { %v2388_v29 = vadd.f32 1.0, %v12687_v20  ;;  %v2403_v10 = vand.u32 2147483647, %v12650_v59  ;;  %v2132_v14 = vmax.f32 %v12454_v28, 1e-15  ;;  %v2282_v48 = vmul.f32 %v12635_v18, %v2281_v3 }
 0x5f6   :  { %v2491_v35 = vmul.f32 %v12689_v1, %v12689_v1  ;;  %vm2086_vm15 = vcmp.gt.f32.partialorder %v12626_v53, 0.996  ;;  %v2454_v46 = vmul.f32 %v2442_v32, %v2166_v40  ;;  %v2279_v21 = vmul.f32 0.6931472, %v9178_v22 }
 0x5f7   :  { %9185 = vlog2.f32 %v2388_v29  ;;  %v12703_v7 = vsel %vm2087_vm7, 0.996, %v12568_v50  ;;  %v9180_v27 = vpop.eup %9179  ;;  %vm12707_vm11 = vcmp.lt.f32.partialorder %v2283_v12, 0.0004427343  ;;  %v2402_v0 = vmul.f32 %v2401_v60, %v12650_v59 }
 0x5f8   :  { %v2517_v19 = vsel %vm490_vm13, %v2491_v35, 0.0  ;;  %v2466_v9 = vmul.f32 %v2454_v46, %v2118_v39  ;;  %v2399_v25 = vmul.f32 0.6931472, %v9180_v27  ;;  %v12715_v51 = vsel %vm2086_vm15, 0.996, %v12626_v53 }
 0x5f9   :  { %2518 = vadd.xlane.f32.xlu1 %v2517_v19  ;;  %vm2404_vm14 = vcmp.lt.f32.partialorder %v2403_v10, 0.0004427343  ;;  %v2271_v63 = vmul.f32 -0.5, %v12680_v57  ;;  %v2391_v2 = vmul.f32 -0.5, %v12687_v20  ;;  %v12720_v18 = vclamps-f32 %v12703_v7, 0.9999999 }
 0x5fa   :  { %v9182_v34 = vpop.eup %9181  ;;  %v12722_v42 = vmax.f32 %v2466_v9, 0.0  ;;  %v2285_v31 = vsel %vm12707_vm11, %v2282_v48, %v2279_v21  ;;  %v2405_v59 = vsel %vm2404_vm14, %v2402_v0, %v2399_v25  ;;  %9187 = vrcp.f32 %v2132_v14 }
 0x5fb   :  { %v2109_v58 = vmul.f32 %v12344_v52, %v12622_v13  ;;  %v2433_v47 = vsub.f32 %v2285_v31, %v2405_v59  ;;  %v2295_v8 = vadd.f32 1.0, %v12720_v18  ;;  %v12730_v5 = vclamps-f32 %v12715_v51, 0.9999999 }
 0x5fc   :  { %v2490_v61 = vmul.f32 %v12722_v42, %v12722_v42  ;;  %v2274_v11 = vand.u32 2147483647, %v12680_v57  ;;  %v12736_v62 = vsub.f32 0.0, %v12720_v18  ;;  %v2272_v26 = vadd.f32 1.0, %v2271_v63 }
 0x5fd   :  { %v9184_v4 = vpop.eup %9183  ;;  %v2445_v54 = vmul.f32 0.5, %v2433_v47  ;;  %v2392_v36 = vadd.f32 1.0, %v2391_v2  ;;  %9189 = vlog2.f32 %v2295_v8  ;;  %v2169_v13 = vsel %vm2085_vm10, 1.004016, %v9182_v34 }
 0x5fe   :  { %v2514_v52 = vsel %vm490_vm13, %v2490_v61, 0.0  ;;  %v2394_v39 = vand.u32 2147483647, %v12687_v20  ;;  %v2415_v45 = vadd.f32 1.0, %v12736_v62  ;;  %v2121_v12 = vmul.f32 %v12287_v15, %v2109_v58 }
 0x5ff   :  { %2515 = vadd.xlane.f32.xlu0 %v2514_v52  ;;  %v2457_v3 = vmul.f32 %v2445_v54, %v2169_v13  ;;  %v2270_v22 = vmul.f32 0.6931472, %v9184_v4  ;;  %v2286_v40 = vadd.f32 1.0, %v12730_v5  ;;  %vm12745_vm1 = vcmp.lt.f32.partialorder %v2274_v11, 0.0004427343 }
 0x600   :  { %v2135_v29 = vmax.f32 %v12568_v50, 1e-15  ;;  %9191 = vlog2.f32 %v2415_v45  ;;  %v2273_v35 = vmul.f32 %v12680_v57, %v2272_v26  ;;  %v2393_v14 = vmul.f32 %v2392_v36, %v12687_v20 }
 0x601   :  { %v9186_v32 = vpop.eup %9185  ;;  %v2469_v17 = vmul.f32 %v2457_v3, %v2121_v12  ;;  %vm2395_vm4 = vcmp.lt.f32.partialorder %v2394_v39, 0.0004427343  ;;  %v2298_v15 = vmul.f32 -0.5, %v12720_v18  ;;  %9193 = vlog2.f32 %v2286_v40 }
 0x602   :  { %v2390_v10 = vmul.f32 0.6931472, %v9186_v32  ;;  %v2314_v46 = vsub.f32 0.0, %v12730_v5  ;;  %v2276_v27 = vsel %vm12745_vm1, %v2273_v35, %v2270_v22  ;;  %v2418_v48 = vmul.f32 -0.5, %v12736_v62 }
 0x603   :  { %v12754_v21 = vmax.f32 %v2469_v17, 0.0  ;;  %v2108_v57 = vmul.f32 %v12355_v43, %v12669_v56  ;;  %9195 = vrcp.f32 %v2135_v29  ;;  %v2134_v63 = vmax.f32 %v12626_v53, 1e-15 }
 0x604   :  { %v2396_v19 = vsel %vm2395_vm4, %v2393_v14, %v2390_v10  ;;  %v9188_v44 = vpop.eup %9187  ;;  %v2406_v20 = vadd.f32 1.0, %v2314_v46  ;;  %v2299_v59 = vadd.f32 1.0, %v2298_v15  ;;  %v2419_v58 = vadd.f32 1.0, %v2418_v48 }
 0x605   :  { %v2432_v9 = vsub.f32 %v2276_v27, %v2396_v19  ;;  %v2493_v25 = vmul.f32 %v12754_v21, %v12754_v21  ;;  %v2168_v31 = vsel %vm2084_vm5, 1.004016, %v9188_v44  ;;  %v2120_v43 = vmul.f32 %v2108_v57, %v12292_v23 }
 0x606   :  { %9197 = vlog2.f32 %v2406_v20  ;;  %v2301_v47 = vand.u32 2147483647, %v12720_v18  ;;  %v2421_v8 = vand.u32 2147483647, %v12736_v62  ;;  %v2289_v11 = vmul.f32 -0.5, %v12730_v5 }
 0x607   :  { %v2444_v0 = vmul.f32 0.5, %v2432_v9  ;;  %v9190_v2 = vpop.eup %9189  ;;  %v2523_v34 = vsel %vm490_vm13, %v2493_v25, 0.0  ;;  %v2409_v4 = vmul.f32 -0.5, %v2314_v46  ;;  %9199 = vrcp.f32 %v2134_v63 }
 0x608   :  { %2524 = vadd.xlane.f32.xlu1 %v2523_v34  ;;  %v2297_v61 = vmul.f32 0.6931472, %v9190_v2  ;;  %v2300_v28 = vmul.f32 %v12720_v18, %v2299_v59  ;;  %v2420_v52 = vmul.f32 %v2419_v58, %v12736_v62  ;;  %v2111_v23 = vmul.f32 %v12365_v16, %v12703_v7 }
 0x609   :  { %v2456_v56 = vmul.f32 %v2444_v0, %v2168_v31  ;;  %vm2302_vm8 = vcmp.lt.f32.partialorder %v2301_v47, 0.0004427343  ;;  %vm2422_vm10 = vcmp.lt.f32.partialorder %v2421_v8, 0.0004427343  ;;  %v2290_v3 = vadd.f32 1.0, %v2289_v11 }
 0x60a   :  { %v9192_v54 = vpop.eup %9191  ;;  %v2303_v45 = vsel %vm2302_vm8, %v2300_v28, %v2297_v61  ;;  %v2410_v22 = vadd.f32 1.0, %v2409_v4  ;;  %v2292_v60 = vand.u32 2147483647, %v12730_v5  ;;  %v2412_v62 = vand.u32 2147483647, %v2314_v46 }
 0x60b   :  { %v2468_v26 = vmul.f32 %v2456_v56, %v2120_v43  ;;  %v2417_v36 = vmul.f32 0.6931472, %v9192_v54  ;;  %v9194_v13 = vpop.eup %9193  ;;  %v2291_v7 = vmul.f32 %v12730_v5, %v2290_v3  ;;  %v2123_v27 = vmul.f32 %v12297_v37, %v2111_v23  ;;  %v2700_v37 = vld [vmem:[%s17302_s6] sm:$0xff]  ;;  %v2703_v43 = vld [vmem:[%s17302_s6 + $0x18] sm:$0xff] }
 0x60c   :  { %v2288_v29 = vmul.f32 0.6931472, %v9194_v13  ;;  %v2411_v15 = vmul.f32 %v2410_v22, %v2314_v46  ;;  %vm2293_vm9 = vcmp.lt.f32.partialorder %v2292_v60, 0.0004427343  ;;  %vm2413_vm3 = vcmp.lt.f32.partialorder %v2412_v62, 0.0004427343 }
 0x60d   :  { %v12773_v39 = vmax.f32 %v2468_v26, 0.0  ;;  %v2423_v12 = vsel %vm2422_vm10, %v2420_v52, %v2417_v36  ;;  %v9196_v40 = vpop.eup %9195  ;;  %v2110_v20 = vmul.f32 %v12384_v24, %v12715_v51  ;;  %v2701_v46 = vld [vmem:[%s17302_s6 + $0x8] sm:$0xff] }
 0x60e   :  { %v2435_v18 = vsub.f32 %v2303_v45, %v2423_v12  ;;  %v2171_v16 = vsel %vm2087_vm7, 1.004016, %v9196_v40  ;;  %v2294_v48 = vsel %vm2293_vm9, %v2291_v7, %v2288_v29  ;;  %v8697_v2 = vpack.c.bf16 %v2701_v46, %v2700_v37 }
 0x60f   :  { %v2492_v32 = vmul.f32 %v12773_v39, %v12773_v39  ;;  %v2122_v24 = vmul.f32 %v2110_v20, %v12302_v33  ;;  %v2702_v33 = vld [vmem:[%s17302_s6 + $0x10] sm:$0xff] }
 0x610   :  { %v9198_v17 = vpop.eup %9197  ;;  %v2447_v10 = vmul.f32 0.5, %v2435_v18  ;;  %8698 = vmatprep.subr.bf16.mxu0 %v8697_v2  ;;  %v8701_v56 = vpack.c.bf16 %v2703_v43, %v2702_v33 }
 0x611   :  { %v2520_v35 = vsel %vm490_vm13, %v2492_v32, 0.0  ;;  %v2408_v14 = vmul.f32 0.6931472, %v9198_v17  ;;  %v9200_v57 = vpop.eup %9199  ;;  %8700 = vmatpush3.bf16.msra.mxu0 %v8697_v2 }
 0x612   :  { %2521 = vadd.xlane.f32.xlu0 %v2520_v35  ;;  %v2459_v19 = vmul.f32 %v2447_v10, %v2171_v16  ;;  %v2170_v5 = vsel %vm2086_vm15, 1.004016, %v9200_v57  ;;  %8702 = vmatprep.subr.bf16.mxu0 %v8701_v56 }
 0x613   :  { %v2414_v44 = vsel %vm2413_vm3, %v2411_v15, %v2408_v14 }
 0x614   :  { %v2471_v9 = vmul.f32 %v2459_v19, %v2123_v27  ;;  %v2434_v25 = vsub.f32 %v2294_v48, %v2414_v44 }
 0x615   :  { %8704 = vmatpush3.bf16.msra.mxu0 %v8701_v56 }
 0x616   :  { %v12787_v0 = vmax.f32 %v2471_v9, 0.0  ;;  %v2446_v50 = vmul.f32 0.5, %v2434_v25 }
 0x618   :  { %v2495_v63 = vmul.f32 %v12787_v0, %v12787_v0  ;;  %v2458_v51 = vmul.f32 %v2446_v50, %v2170_v5 }
 0x61a   :  { %v2529_v34 = vsel %vm490_vm13, %v2495_v63, 0.0  ;;  %v2470_v31 = vmul.f32 %v2458_v51, %v2122_v24 }
 0x61b   :  { %2530 = vadd.xlane.f32.xlu1 %v2529_v34 }
 0x61c   :  { %v12801_v53 = vmax.f32 %v2470_v31, 0.0 }
 0x61e   :  { %v2494_v59 = vmul.f32 %v12801_v53, %v12801_v53 }
 0x620   :  { %v2526_v58 = vsel %vm490_vm13, %v2494_v59, 0.0 }
 0x621   :  { %2527 = vadd.xlane.f32.xlu0 %v2526_v58 }
 0x658   :  { %v2501_v47 = vpop.xlane.xlu1 %2500 }
 0x659   :  { %v2533_v8 = vmax.f32 %v2501_v47, 1e-30 }
 0x65b   :  { %9201 = vrsqrt.f32 %v2533_v8 }
 0x65e   :  { %v2498_v61 = vpop.xlane.xlu0 %2497 }
 0x65f   :  { %v2532_v11 = vmax.f32 %v2498_v61, 1e-30 }
 0x661   :  { %9203 = vrsqrt.f32 %v2532_v11 }
 0x662   :  { %v2507_v26 = vpop.xlane.xlu1 %2506 }
 0x663   :  { %v2535_v28 = vmax.f32 %v2507_v26, 1e-30 }
 0x665   :  { %v9202_v4 = vpop.eup %9201  ;;  %9205 = vrsqrt.f32 %v2535_v28 }
 0x666   :  { %v2557_v54 = vmul.f32 %v9202_v4, %v2533_v8 }
 0x668   :  { %v8061_v36 = vclamps-f32 %v2557_v54, 15.0 }
 0x669   :  { %v2504_v23 = vpop.xlane.xlu0 %2503 }
 0x66a   :  { %9207 = vtanh.f32 %v8061_v36  ;;  %v2534_v45 = vmax.f32 %v2504_v23, 1e-30 }
 0x66b   :  { %v9204_v52 = vpop.eup %9203 }
 0x66c   :  { %v2556_v13 = vmul.f32 %v9204_v52, %v2532_v11  ;;  %9209 = vrsqrt.f32 %v2534_v45 }
 0x66e   :  { %v8060_v12 = vclamps-f32 %v2556_v13, 15.0 }
 0x66f   :  { %v9206_v3 = vpop.eup %9205 }
 0x670   :  { %9211 = vtanh.f32 %v8060_v12  ;;  %v2559_v40 = vmul.f32 %v9206_v3, %v2535_v28 }
 0x672   :  { %v8063_v18 = vclamps-f32 %v2559_v40, 15.0 }
 0x674   :  { %v9208_v22 = vpop.eup %9207 }
 0x675   :  { %v2653_v32 = vmax.f32 %v9208_v22, 1e-15  ;;  %vm2605_vm5 = vcmp.gt.f32.partialorder %v9208_v22, 0.996  ;;  %v2513_v29 = vpop.xlane.xlu1 %2512 }
 0x676   :  { %v9210_v60 = vpop.eup %9209  ;;  %v12813_v62 = vsel %vm2605_vm5, 0.996, %v9208_v22  ;;  %v2537_v10 = vmax.f32 %v2513_v29, 1e-30 }
 0x677   :  { %9213 = vrcp.f32 %v2653_v32  ;;  %v2558_v35 = vmul.f32 %v9210_v60, %v2534_v45  ;;  %v2629_v16 = vmul.f32 %v9202_v4, %v12813_v62 }
 0x678   :  { %9215 = vtanh.f32 %v8063_v18 }
 0x679   :  { %v8062_v7 = vclamps-f32 %v2558_v35, 15.0  ;;  %9217 = vrsqrt.f32 %v2537_v10  ;;  %v2641_v48 = vmul.f32 %v2629_v16, %v12473_v41 }
 0x67a   :  { %v9212_v17 = vpop.eup %9211 }
 0x67b   :  { %vm2604_vm2 = vcmp.gt.f32.partialorder %v9212_v17, 0.996  ;;  %9219 = vtanh.f32 %v8062_v7  ;;  %v2652_v27 = vmax.f32 %v9212_v17, 1e-15 }
 0x67c   :  { %v12817_v14 = vsel %vm2604_vm2, 0.996, %v9212_v17 }
 0x67d   :  { %v2628_v15 = vmul.f32 %v9204_v52, %v12817_v14  ;;  %v2510_v44 = vpop.xlane.xlu0 %2509  ;;  %9221 = vrcp.f32 %v2652_v27 }
 0x67e   :  { %v2536_v9 = vmax.f32 %v2510_v44, 1e-30 }
 0x67f   :  { %v2640_v19 = vmul.f32 %v2628_v15, %v12498_v55 }
 0x680   :  { %9223 = vrsqrt.f32 %v2536_v9 }
 0x681   :  { %v9214_v57 = vpop.eup %9213  ;;  %8496 = vmatprep.mubr.msk.f32.mxu0 %vm490_vm13, %v2640_v19 }
 0x682   :  { %v9216_v20 = vpop.eup %9215  ;;  %8497 = vmatmul.mubr.msk.f32.vlgmr.msra.gmra.mrb[12].mxu0 %vm490_vm13, %v2641_v48  ;;  %v12825_v25 = vsel %vm2605_vm5, 1.004016, %v9214_v57 }
 0x683   :  { %vm2607_vm12 = vcmp.gt.f32.partialorder %v9216_v20, 0.996  ;;  %v2655_v50 = vmax.f32 %v9216_v20, 1e-15  ;;  %v9218_v5 = vpop.eup %9217 }
 0x684   :  { %v2561_v55 = vmul.f32 %v9218_v5, %v2537_v10  ;;  %v12828_v41 = vsel %vm2607_vm12, 0.996, %v9216_v20 }
 0x685   :  { %9225 = vrcp.f32 %v2655_v50  ;;  %v9220_v37 = vpop.eup %9219  ;;  %v2631_v34 = vmul.f32 %v9206_v3, %v12828_v41 }
 0x686   :  { %v8065_v46 = vclamps-f32 %v2561_v55, 15.0  ;;  %v2519_v63 = vpop.xlane.xlu1 %2518  ;;  %vm2606_vm7 = vcmp.gt.f32.partialorder %v9220_v37, 0.996  ;;  %v2654_v58 = vmax.f32 %v9220_v37, 1e-15 }
 0x687   :  { %v9222_v24 = vpop.eup %9221  ;;  %v2539_v51 = vmax.f32 %v2519_v63, 1e-30  ;;  %v12831_v2 = vsel %vm2606_vm7, 0.996, %v9220_v37  ;;  %v2643_v47 = vmul.f32 %v2631_v34, %v12528_v38 }
 0x688   :  { %9227 = vtanh.f32 %v8065_v46  ;;  %v2630_v31 = vmul.f32 %v9210_v60, %v12831_v2  ;;  %v12836_v59 = vsel %vm2604_vm2, 1.004016, %v9222_v24 }
 0x689   :  { %9229 = vrsqrt.f32 %v2539_v51 }
 0x68a   :  { %v9224_v33 = vpop.eup %9223  ;;  %v2642_v43 = vmul.f32 %v2630_v31, %v12552_v6  ;;  %9231 = vrcp.f32 %v2654_v58 }
 0x68b   :  { %v2560_v56 = vmul.f32 %v9224_v33, %v2536_v9 }
 0x68c   :  { %8499 = vmatprep.mubr.msk.f32.mxu0 %vm490_vm13, %v2642_v43  ;;  %v2516_v11 = vpop.xlane.xlu0 %2515 }
 0x68d   :  { %v8064_v61 = vclamps-f32 %v2560_v56, 15.0  ;;  %8500 = vmatmul.mubr.msk.f32.gmra.mrb[14].mxu0 %vm490_vm13, %v2643_v47  ;;  %v2538_v4 = vmax.f32 %v2516_v11, 1e-30 }
 0x68f   :  { %v9226_v8 = vpop.eup %9225  ;;  %9233 = vtanh.f32 %v8064_v61 }
 0x690   :  { %v12843_v54 = vsel %vm2607_vm12, 1.004016, %v9226_v8  ;;  %9235 = vrsqrt.f32 %v2538_v4 }
 0x692   :  { %v9228_v26 = vpop.eup %9227 }
 0x693   :  { %v9230_v28 = vpop.eup %9229  ;;  %vm2609_vm15 = vcmp.gt.f32.partialorder %v9228_v26, 0.996  ;;  %v2657_v36 = vmax.f32 %v9228_v26, 1e-15 }
 0x694   :  { %v2563_v6 = vmul.f32 %v9230_v28, %v2539_v51  ;;  %v9232_v13 = vpop.eup %9231  ;;  %v12846_v45 = vsel %vm2609_vm15, 0.996, %v9228_v26 }
 0x695   :  { %v2525_v52 = vpop.xlane.xlu1 %2524  ;;  %9237 = vrcp.f32 %v2657_v36  ;;  %v12849_v12 = vsel %vm2606_vm7, 1.004016, %v9232_v13  ;;  %v2633_v18 = vmul.f32 %v9218_v5, %v12846_v45 }
 0x696   :  { %v8067_v38 = vclamps-f32 %v2563_v6, 15.0  ;;  %v2541_v23 = vmax.f32 %v2525_v52, 1e-30 }
 0x697   :  { %v2645_v16 = vmul.f32 %v2633_v18, %v12616_v49 }
 0x698   :  { %9239 = vtanh.f32 %v8067_v38 }
 0x699   :  { %v9234_v3 = vpop.eup %9233  ;;  %9241 = vrsqrt.f32 %v2541_v23 }
 0x69a   :  { %v9236_v22 = vpop.eup %9235  ;;  %vm2608_vm11 = vcmp.gt.f32.partialorder %v9234_v3, 0.996  ;;  %v2656_v17 = vmax.f32 %v9234_v3, 1e-15 }
 0x69b   :  { %v2562_v40 = vmul.f32 %v9236_v22, %v2538_v4  ;;  %v12852_v32 = vsel %vm2608_vm11, 0.996, %v9234_v3 }
 0x69c   :  { %v2632_v60 = vmul.f32 %v9224_v33, %v12852_v32 }
 0x69d   :  { %v8066_v29 = vclamps-f32 %v2562_v40, 15.0 }
 0x69e   :  { %v2644_v35 = vmul.f32 %v2632_v60, %v12653_v30 }
 0x69f   :  { %9243 = vtanh.f32 %v8066_v29  ;;  %v2522_v10 = vpop.xlane.xlu0 %2521  ;;  %v9238_v15 = vpop.eup %9237 }
 0x6a0   :  { %v2540_v7 = vmax.f32 %v2522_v10, 1e-30  ;;  %8502 = vmatprep.mubr.msk.f32.mxu0 %vm490_vm13, %v2644_v35  ;;  %9245 = vrcp.f32 %v2656_v17  ;;  %v12861_v19 = vsel %vm2609_vm15, 1.004016, %v9238_v15 }
 0x6a1   :  { %8503 = vmatmul.mubr.msk.f32.gmra.mrb[16].mxu0 %vm490_vm13, %v2645_v16 }
 0x6a2   :  { %v9240_v27 = vpop.eup %9239  ;;  %9247 = vrsqrt.f32 %v2540_v7 }
 0x6a3   :  { %v9242_v48 = vpop.eup %9241  ;;  %vm2611_vm14 = vcmp.gt.f32.partialorder %v9240_v27, 0.996  ;;  %v2659_v30 = vmax.f32 %v9240_v27, 1e-15 }
 0x6a4   :  { %v2565_v44 = vmul.f32 %v9242_v48, %v2541_v23  ;;  %v12864_v49 = vsel %vm2611_vm14, 0.996, %v9240_v27 }
 0x6a5   :  { %9249 = vrcp.f32 %v2659_v30  ;;  %v2635_v37 = vmul.f32 %v9230_v28, %v12864_v49 }
 0x6a6   :  { %v8069_v57 = vclamps-f32 %v2565_v44, 15.0 }
 0x6a7   :  { %v2647_v33 = vmul.f32 %v2635_v37, %v12689_v1 }
 0x6a8   :  { %v2531_v20 = vpop.xlane.xlu1 %2530  ;;  %9251 = vtanh.f32 %v8069_v57 }
 0x6a9   :  { %v9244_v9 = vpop.eup %9243  ;;  %v2543_v5 = vmax.f32 %v2531_v20, 1e-30 }
 0x6aa   :  { %v9246_v50 = vpop.eup %9245  ;;  %vm2610_vm1 = vcmp.gt.f32.partialorder %v9244_v9, 0.996  ;;  %v2658_v43 = vmax.f32 %v9244_v9, 1e-15 }
 0x6ab   :  { %v12867_v55 = vsel %vm2610_vm1, 0.996, %v9244_v9  ;;  %v12871_v46 = vsel %vm2608_vm11, 1.004016, %v9246_v50  ;;  %9253 = vrsqrt.f32 %v2543_v5 }
 0x6ac   :  { %v9248_v63 = vpop.eup %9247  ;;  %v2634_v24 = vmul.f32 %v9236_v22, %v12867_v55 }
 0x6ad   :  { %v2564_v51 = vmul.f32 %v9248_v63, %v2540_v7 }
 0x6ae   :  { %v2646_v34 = vmul.f32 %v2634_v24, %v12722_v42  ;;  %v2528_v58 = vpop.xlane.xlu0 %2527 }
 0x6af   :  { %v8068_v31 = vclamps-f32 %v2564_v51, 15.0  ;;  %v2542_v56 = vmax.f32 %v2528_v58, 1e-30  ;;  %v9250_v47 = vpop.eup %9249 }
 0x6b0   :  { %8505 = vmatprep.mubr.msk.f32.mxu0 %vm490_vm13, %v2646_v34  ;;  %v12879_v8 = vsel %vm2611_vm14, 1.004016, %v9250_v47 }
 0x6b1   :  { %9255 = vtanh.f32 %v8068_v31  ;;  %8506 = vmatmul.mubr.msk.f32.gmra.mrb[18].mxu0 %vm490_vm13, %v2647_v33 }
 0x6b2   :  { %9257 = vrsqrt.f32 %v2542_v56  ;;  %v9252_v61 = vpop.eup %9251 }
 0x6b3   :  { %9259 = vrcp.f32 %v2658_v43  ;;  %vm2613_vm4 = vcmp.gt.f32.partialorder %v9252_v61, 0.996  ;;  %v2661_v26 = vmax.f32 %v9252_v61, 1e-15 }
 0x6b4   :  { %v12882_v1 = vsel %vm2613_vm4, 0.996, %v9252_v61 }
 0x6b5   :  { %v9254_v11 = vpop.eup %9253  ;;  %v2637_v13 = vmul.f32 %v9242_v48, %v12882_v1 }
 0x6b6   :  { %v2567_v42 = vmul.f32 %v9254_v11, %v2543_v5 }
 0x6b7   :  { %v2649_v60 = vmul.f32 %v2637_v13, %v12754_v21 }
 0x6b8   :  { %v8071_v4 = vclamps-f32 %v2567_v42, 15.0 }
 0x6ba   :  { %9261 = vtanh.f32 %v8071_v4 }
 0x6bb   :  { %v9256_v28 = vpop.eup %9255  ;;  %9263 = vrcp.f32 %v2661_v26 }
 0x6bc   :  { %v9258_v6 = vpop.eup %9257  ;;  %vm2612_vm8 = vcmp.gt.f32.partialorder %v9256_v28, 0.996  ;;  %v2660_v18 = vmax.f32 %v9256_v28, 1e-15 }
 0x6bd   :  { %v9260_v36 = vpop.eup %9259  ;;  %v2566_v38 = vmul.f32 %v9258_v6, %v2542_v56  ;;  %v12885_v52 = vsel %vm2612_vm8, 0.996, %v9256_v28 }
 0x6be   :  { %v2636_v23 = vmul.f32 %v9248_v63, %v12885_v52  ;;  %v12890_v3 = vsel %vm2610_vm1, 1.004016, %v9260_v36 }
 0x6bf   :  { %v8070_v22 = vclamps-f32 %v2566_v38, 15.0 }
 0x6c0   :  { %v2648_v40 = vmul.f32 %v2636_v23, %v12773_v39 }
 0x6c1   :  { %9265 = vtanh.f32 %v8070_v22 }
 0x6c2   :  { %8508 = vmatprep.mubr.msk.f32.mxu0 %vm490_vm13, %v2648_v40  ;;  %9267 = vrcp.f32 %v2660_v18 }
 0x6c3   :  { %8509 = vmatmul.mubr.msk.f32.gmra.mrb[20].mxu0 %vm490_vm13, %v2649_v60 }
 0x6c4   :  { %v9262_v29 = vpop.eup %9261 }
 0x6c5   :  { %v9264_v17 = vpop.eup %9263  ;;  %vm2615_vm10 = vcmp.gt.f32.partialorder %v9262_v29, 0.996  ;;  %v2663_v10 = vmax.f32 %v9262_v29, 1e-15 }
 0x6c6   :  { %v12897_v35 = vsel %vm2613_vm4, 1.004016, %v9264_v17  ;;  %v12900_v16 = vsel %vm2615_vm10, 0.996, %v9262_v29 }
 0x6c7   :  { %9269 = vrcp.f32 %v2663_v10  ;;  %v2639_v27 = vmul.f32 %v9254_v11, %v12900_v16 }
 0x6c9   :  { %v2651_v57 = vmul.f32 %v2639_v27, %v12787_v0 }
 0x6cb   :  { %v9266_v39 = vpop.eup %9265 }
 0x6cc   :  { %vm2614_vm9 = vcmp.gt.f32.partialorder %v9266_v39, 0.996  ;;  %v2662_v7 = vmax.f32 %v9266_v39, 1e-15  ;;  %v9268_v21 = vpop.eup %9267 }
 0x6cd   :  { %v12902_v15 = vsel %vm2614_vm9, 0.996, %v9266_v39  ;;  %v12907_v44 = vsel %vm2612_vm8, 1.004016, %v9268_v21 }
 0x6ce   :  { %v2638_v48 = vmul.f32 %v9258_v6, %v12902_v15  ;;  %9271 = vrcp.f32 %v2662_v7 }
 0x6d0   :  { %v2650_v30 = vmul.f32 %v2638_v48, %v12801_v53 }
 0x6d1   :  { %v9270_v9 = vpop.eup %9269 }
 0x6d2   :  { %8511 = vmatprep.mubr.msk.f32.mxu0 %vm490_vm13, %v2650_v30  ;;  %v12914_v20 = vsel %vm2615_vm10, 1.004016, %v9270_v9  ;;  %v8086_v30 = vclamps-f32 %v12813_v62, 0.9999999 }
 0x6d3   :  { %8512 = vmatmul.mubr.msk.f32.gmra.mrb[22].mxu0 %vm490_vm13, %v2651_v57  ;;  %v8085_v57 = vclamps-f32 %v12817_v14, 0.9999999 }
 0x6d4   :  { %v3096_v9 = vsub.f32 0.0, %v8086_v30 }
 0x6d6   :  { %v3119_v62 = vmul.f32 -0.5, %v3096_v9 }
 0x6d8   :  { %v9272_v50 = vpop.eup %9271 }
 0x6d9   :  { %v12916_v5 = vsel %vm2614_vm9, 1.004016, %v9272_v50  ;;  %v12981_v50 = vclamps-f32 %v12828_v41, 0.9999999  ;;  %v12989_v41 = vclamps-f32 %v12831_v2, 0.9999999 }
 0x6db   :  { %v3014_v14 = vadd.f32 1.0, %v12981_v50 }
 0x755   :  { %v12918_v37 = vpop.f32.mrb[12].mxu0 }
 0x756   :  { %v2868_v63 = vmul.f32 %v12918_v37, %v12918_v37  ;;  %v12922_v53 = vpop.f32.mrb[13].mxu0 }
 0x757   :  { %v2867_v0 = vmul.f32 %v12922_v53, %v12922_v53 }
 0x758   :  { %v2882_v24 = vsel %vm490_vm13, %v2868_v63, 0.0  ;;  %v3116_v63 = vadd.f32 1.0, %v3096_v9 }
 0x759   :  { %2883 = vadd.xlane.f32.xlu1 %v2882_v24  ;;  %v2879_v51 = vsel %vm490_vm13, %v2867_v0, 0.0  ;;  %v3095_v0 = vsub.f32 0.0, %v8085_v57  ;;  %v2996_v24 = vadd.f32 1.0, %v8086_v30 }
 0x75a   :  { %2880 = vadd.xlane.f32.xlu0 %v2879_v51  ;;  %9273 = vlog2.f32 %v3116_v63 }
 0x75b   :  { %v3107_v51 = vadd.f32 1.0, %v3095_v0  ;;  %9275 = vlog2.f32 %v2996_v24 }
 0x75d   :  { %9277 = vlog2.f32 %v3107_v51 }
 0x760   :  { %v12928_v34 = vpop.f32.mrb[14].mxu0 }
 0x761   :  { %v2870_v31 = vmul.f32 %v12928_v34, %v12928_v34  ;;  %v12932_v58 = vpop.f32.mrb[15].mxu0 }
 0x762   :  { %v2869_v33 = vmul.f32 %v12932_v58, %v12932_v58 }
 0x763   :  { %v2888_v43 = vsel %vm490_vm13, %v2870_v31, 0.0  ;;  %v12984_v31 = vsub.f32 0.0, %v12981_v50 }
 0x764   :  { %2889 = vadd.xlane.f32.xlu1 %v2888_v43  ;;  %v2885_v56 = vsel %vm490_vm13, %v2869_v33, 0.0  ;;  %v2987_v33 = vadd.f32 1.0, %v8085_v57 }
 0x765   :  { %2886 = vadd.xlane.f32.xlu0 %v2885_v56  ;;  %v3134_v43 = vadd.f32 1.0, %v12984_v31  ;;  %v2999_v56 = vmul.f32 -0.5, %v8086_v30 }
 0x766   :  { %9279 = vlog2.f32 %v2987_v33  ;;  %v3017_v33 = vmul.f32 -0.5, %v12981_v50 }
 0x767   :  { %9281 = vlog2.f32 %v3134_v43  ;;  %v3000_v2 = vadd.f32 1.0, %v2999_v56 }
 0x768   :  { %9283 = vlog2.f32 %v3014_v14  ;;  %v3137_v14 = vmul.f32 -0.5, %v12984_v31 }
 0x774   :  { %v12938_v47 = vpop.f32.mrb[16].mxu0 }
 0x775   :  { %v2872_v61 = vmul.f32 %v12938_v47, %v12938_v47  ;;  %v12942_v11 = vpop.f32.mrb[17].mxu0 }
 0x776   :  { %v2871_v42 = vmul.f32 %v12942_v11, %v12942_v11 }
 0x777   :  { %v2894_v4 = vsel %vm490_vm13, %v2872_v61, 0.0  ;;  %v9274_v61 = vpop.eup %9273 }
 0x778   :  { %2895 = vadd.xlane.f32.xlu1 %v2894_v4  ;;  %v2891_v26 = vsel %vm490_vm13, %v2871_v42, 0.0  ;;  %v12992_v42 = vclamps-f32 %v12846_v45, 0.9999999  ;;  %v2990_v4 = vmul.f32 -0.5, %v8085_v57  ;;  %v3113_v45 = vand.u32 2147483647, %v3095_v0 }
 0x779   :  { %2892 = vadd.xlane.f32.xlu0 %v2891_v26  ;;  %v3110_v26 = vmul.f32 -0.5, %v3095_v0 }
 0x77a   :  { %vm13018_vm12 = vcmp.lt.f32.partialorder %v3113_v45, 0.0004427343 }
 0x784   :  { %v12948_v28 = vpop.f32.mrb[18].mxu0 }
 0x785   :  { %v2874_v6 = vmul.f32 %v12948_v28, %v12948_v28  ;;  %v12952_v36 = vpop.f32.mrb[19].mxu0 }
 0x786   :  { %v2873_v38 = vmul.f32 %v12952_v36, %v12952_v36 }
 0x787   :  { %v2900_v13 = vsel %vm490_vm13, %v2874_v6, 0.0  ;;  %v3002_v6 = vand.u32 2147483647, %v8086_v30 }
 0x788   :  { %2901 = vadd.xlane.f32.xlu1 %v2900_v13  ;;  %v2897_v23 = vsel %vm490_vm13, %v2873_v38, 0.0  ;;  %v3120_v38 = vadd.f32 1.0, %v3119_v62  ;;  %v9276_v13 = vpop.eup %9275  ;;  %v3018_v62 = vadd.f32 1.0, %v3017_v33  ;;  %v13036_v33 = vclamps-f32 %v12864_v49, 0.9999999 }
 0x789   :  { %2898 = vadd.xlane.f32.xlu0 %v2897_v23  ;;  %v3122_v23 = vand.u32 2147483647, %v3096_v9  ;;  %v2998_v63 = vmul.f32 0.6931472, %v9276_v13  ;;  %vm13001_vm3 = vcmp.lt.f32.partialorder %v3002_v6, 0.0004427343 }
 0x78a   :  { %v3121_v51 = vmul.f32 %v3120_v38, %v3096_v9 }
 0x78b   :  { %vm13006_vm5 = vcmp.lt.f32.partialorder %v3122_v23, 0.0004427343 }
 0x796   :  { %v12958_v22 = vpop.f32.mrb[20].mxu0 }
 0x797   :  { %v2876_v40 = vmul.f32 %v12958_v22, %v12958_v22  ;;  %v12962_v18 = vpop.f32.mrb[21].mxu0 }
 0x798   :  { %v2875_v60 = vmul.f32 %v12962_v18, %v12962_v18 }
 0x799   :  { %v2906_v29 = vsel %vm490_vm13, %v2876_v40, 0.0  ;;  %v3005_v40 = vadd.f32 1.0, %v12989_v41 }
 0x79a   :  { %2907 = vadd.xlane.f32.xlu1 %v2906_v29  ;;  %v2903_v17 = vsel %vm490_vm13, %v2875_v60, 0.0  ;;  %v12996_v60 = vsub.f32 0.0, %v12989_v41  ;;  %v3118_v29 = vmul.f32 0.6931472, %v9274_v61  ;;  %v3001_v61 = vmul.f32 %v8086_v30, %v3000_v2 }
 0x79b   :  { %2904 = vadd.xlane.f32.xlu0 %v2903_v17  ;;  %v2993_v17 = vand.u32 2147483647, %v8085_v57  ;;  %9285 = vlog2.f32 %v3005_v40 }
 0x79c   :  { %v3125_v56 = vadd.f32 1.0, %v12996_v60  ;;  %v3004_v30 = vsel %vm13001_vm3, %v3001_v61, %v2998_v63  ;;  %v3008_v61 = vmul.f32 -0.5, %v12989_v41  ;;  %v3128_v49 = vmul.f32 -0.5, %v12996_v60 }
 0x79d   :  { %vm13014_vm2 = vcmp.lt.f32.partialorder %v2993_v17, 0.0004427343 }
 0x79e   :  { %9287 = vlog2.f32 %v3125_v56 }
 0x7a6   :  { %v12968_v10 = vpop.f32.mrb[22].mxu0 }
 0x7a7   :  { %17525 = vst [vmem:[#allocation15_spill] sm:$0xff] %v12968_v10  ;;  %v2878_v39 = vmul.f32 %v12968_v10, %v12968_v10  ;;  %v12972_v7 = vpop.f32.mrb[23].mxu0  ;;  %v3053_v10 = vmul.f32 -0.5, %v13036_v33 }
 0x7a8   :  { %17526 = vst [vmem:[#allocation13_spill] sm:$0xff] %v12972_v7  ;;  %v2877_v21 = vmul.f32 %v12972_v7, %v12972_v7 }
 0x7a9   :  { %v2912_v27 = vsel %vm490_vm13, %v2878_v39, 0.0  ;;  %v9278_v39 = vpop.eup %9277 }
 0x7aa   :  { %2913 = vadd.xlane.f32.xlu1 %v2912_v27  ;;  %v2909_v48 = vsel %vm490_vm13, %v2877_v21, 0.0  ;;  %v2991_v21 = vadd.f32 1.0, %v2990_v4  ;;  %v3111_v27 = vadd.f32 1.0, %v3110_v26  ;;  %v9280_v43 = vpop.eup %9279  ;;  %v3124_v4 = vsel %vm13006_vm5, %v3121_v51, %v3118_v29 }
 0x7ab   :  { %2910 = vadd.xlane.f32.xlu0 %v2909_v48  ;;  %v12999_v48 = vsub.f32 0.0, %v12992_v42  ;;  %v3109_v9 = vmul.f32 0.6931472, %v9278_v39  ;;  %v9282_v6 = vpop.eup %9281  ;;  %v2989_v2 = vmul.f32 0.6931472, %v9280_v43  ;;  %v3216_v17 = vsub.f32 %v3004_v30, %v3124_v4 }
 0x7ac   :  { %v2992_v38 = vmul.f32 %v8085_v57, %v2991_v21  ;;  %v3112_v13 = vmul.f32 %v3111_v27, %v3095_v0  ;;  %v3020_v29 = vand.u32 2147483647, %v12981_v50  ;;  %v3138_v39 = vadd.f32 1.0, %v3137_v14  ;;  %v9284_v0 = vpop.eup %9283 }
 0x7ad   :  { %v3152_v40 = vadd.f32 1.0, %v12999_v48  ;;  %v3140_v57 = vand.u32 2147483647, %v12984_v31  ;;  %v13030_v21 = vclamps-f32 %v12852_v32, 0.9999999  ;;  %v3032_v14 = vadd.f32 1.0, %v12992_v42  ;;  %v9286_v26 = vpop.eup %9285 }
 0x7ae   :  { %v3115_v45 = vsel %vm13018_vm12, %v3112_v13, %v3109_v9  ;;  %v3136_v24 = vmul.f32 0.6931472, %v9282_v6  ;;  %v2995_v56 = vsel %vm13014_vm2, %v2992_v38, %v2989_v2  ;;  %vm13041_vm7 = vcmp.lt.f32.partialorder %v3020_v29, 0.0004427343 }
 0x7af   :  { %9289 = vlog2.f32 %v3152_v40  ;;  %v3016_v4 = vmul.f32 0.6931472, %v9284_v0  ;;  %v3139_v9 = vmul.f32 %v3138_v39, %v12984_v31  ;;  %v3215_v6 = vsub.f32 %v2995_v56, %v3115_v45 }
 0x7b0   :  { %v3019_v13 = vmul.f32 %v12981_v50, %v3018_v62  ;;  %vm3141_vm15 = vcmp.lt.f32.partialorder %v3140_v57, 0.0004427343  ;;  %v13050_v23 = vsub.f32 0.0, %v13030_v21  ;;  %v3023_v40 = vadd.f32 1.0, %v13030_v21 }
 0x7b1   :  { %v3142_v38 = vsel %vm3141_vm15, %v3139_v9, %v3136_v24  ;;  %v13054_v30 = vsub.f32 0.0, %v13036_v33  ;;  %v3009_v2 = vadd.f32 1.0, %v3008_v61  ;;  %v3011_v31 = vand.u32 2147483647, %v12989_v41 }
 0x7b2   :  { %v3131_v29 = vand.u32 2147483647, %v12996_v60  ;;  %v3022_v50 = vsel %vm13041_vm7, %v3019_v13, %v3016_v4  ;;  %v3129_v62 = vadd.f32 1.0, %v3128_v49  ;;  %v3228_v39 = vmul.f32 0.5, %v3216_v17 }
 0x7b3   :  { %v3218_v57 = vsub.f32 %v3022_v50, %v3142_v38  ;;  %v3007_v0 = vmul.f32 0.6931472, %v9286_v26  ;;  %v3143_v45 = vadd.f32 1.0, %v13050_v23  ;;  %v3227_v24 = vmul.f32 0.5, %v3215_v6 }
 0x7b4   :  { %v3170_v56 = vadd.f32 1.0, %v13054_v30  ;;  %v3010_v61 = vmul.f32 %v12989_v41, %v3009_v2  ;;  %vm13065_vm11 = vcmp.lt.f32.partialorder %v3011_v31, 0.0004427343  ;;  %vm13069_vm14 = vcmp.lt.f32.partialorder %v3131_v29, 0.0004427343 }
 0x7b5   :  { %v3155_v17 = vmul.f32 -0.5, %v12999_v48  ;;  %v3130_v49 = vmul.f32 %v3129_v62, %v12996_v60  ;;  %v3026_v13 = vmul.f32 -0.5, %v13030_v21  ;;  %v3050_v26 = vadd.f32 1.0, %v13036_v33 }
 0x7b6   :  { %v13079_v41 = vmul.f32 0.5, %v3218_v57  ;;  %v13086_v29 = vclamps-f32 %v12867_v55, 0.9999999  ;;  %v3176_v62 = vand.u32 2147483647, %v13054_v30 }
 0x7b7   :  { %v3156_v55 = vadd.f32 1.0, %v3155_v17  ;;  %v3027_v32 = vadd.f32 1.0, %v3026_v13 }
 0x7b8   :  { %vm13171_vm9 = vcmp.lt.f32.partialorder %v3176_v62, 0.0004427343 }
 0x7e6   :  { %v13026_v51 = vpop.xlane.xlu1 %2883 }
 0x7e7   :  { %v2916_v27 = vmax.f32 %v13026_v51, 1e-30  ;;  %v2881_v63 = vpop.xlane.xlu0 %2880  ;;  %v3035_v51 = vmul.f32 -0.5, %v12992_v42 }
 0x7e8   :  { %v2915_v43 = vmax.f32 %v2881_v63, 1e-30  ;;  %v9288_v63 = vpop.eup %9287 }
 0x7e9   :  { %9291 = vrsqrt.f32 %v2916_v27  ;;  %v9290_v9 = vpop.eup %9289  ;;  %v3036_v6 = vadd.f32 1.0, %v3035_v51  ;;  %v3127_v2 = vmul.f32 0.6931472, %v9288_v63  ;;  %v3029_v51 = vand.u32 2147483647, %v13030_v21 }
 0x7ea   :  { %9293 = vrsqrt.f32 %v2915_v43 }
 0x7eb   :  { %9295 = vlog2.f32 %v3032_v14  ;;  %v3038_v14 = vand.u32 2147483647, %v12992_v42  ;;  %vm13112_vm4 = vcmp.lt.f32.partialorder %v3029_v51, 0.0004427343 }
 0x7ec   :  { %9297 = vlog2.f32 %v3023_v40  ;;  %v3013_v40 = vsel %vm13065_vm11, %v3010_v61, %v3007_v0 }
 0x7ed   :  { %9299 = vlog2.f32 %v3143_v45  ;;  %vm13093_vm1 = vcmp.lt.f32.partialorder %v3038_v14, 0.0004427343 }
 0x7ee   :  { %9301 = vlog2.f32 %v3170_v56 }
 0x7ef   :  { %9303 = vlog2.f32 %v3050_v26 }
 0x7f1   :  { %v13091_v50 = vpop.xlane.xlu1 %2889 }
 0x7f2   :  { %v2918_v0 = vmax.f32 %v13091_v50, 1e-30  ;;  %v13102_v45 = vpop.xlane.xlu0 %2886  ;;  %v3154_v50 = vmul.f32 0.6931472, %v9290_v9 }
 0x7f3   :  { %v13077_v38 = vpop.eup %9291  ;;  %v2917_v61 = vmax.f32 %v13102_v45, 1e-30  ;;  %v13118_v45 = vsub.f32 0.0, %v13086_v29 }
 0x7f4   :  { %v13083_v31 = vpop.eup %9293  ;;  %v13089_v60 = vmul.f32 %v13077_v38, %v2916_v27  ;;  %v3158_v27 = vand.u32 2147483647, %v12999_v48  ;;  %9305 = vrsqrt.f32 %v2918_v0 }
 0x7f5   :  { %v13099_v57 = vmul.f32 %v13083_v31, %v2915_v43  ;;  %v9296_v63 = vpop.eup %9295  ;;  %v3133_v43 = vsel %vm13069_vm14, %v3130_v49, %v3127_v2  ;;  %9307 = vrsqrt.f32 %v2917_v61  ;;  %v3149_v2 = vand.u32 2147483647, %v13050_v23 }
 0x7f6   :  { %v2952_v14 = vmul.f32 %v13089_v60, %v12825_v25  ;;  %v3146_v25 = vmul.f32 -0.5, %v13050_v23  ;;  %v3034_v26 = vmul.f32 0.6931472, %v9296_v63  ;;  %v9298_v4 = vpop.eup %9297  ;;  %vm13123_vm8 = vcmp.lt.f32.partialorder %v3158_v27, 0.0004427343 }
 0x7f7   :  { %v2951_v56 = vmul.f32 %v13099_v57, %v12836_v59  ;;  %v3157_v59 = vmul.f32 %v3156_v55, %v12999_v48  ;;  %v3173_v63 = vmul.f32 -0.5, %v13054_v30  ;;  %v13132_v48 = vmul.f32 %v13030_v21, %v3027_v32 }
 0x7f8   :  { %v3240_v7 = vmul.f32 %v3228_v39, %v2952_v14  ;;  %v3037_v39 = vmul.f32 %v12992_v42, %v3036_v6  ;;  %v3217_v14 = vsub.f32 %v3013_v40, %v3133_v43  ;;  %v3161_v42 = vadd.f32 1.0, %v13118_v45  ;;  %v9300_v6 = vpop.eup %9299 }
 0x7f9   :  { %v3239_v13 = vmul.f32 %v3227_v24, %v2951_v56  ;;  %v3160_v24 = vsel %vm13123_vm8, %v3157_v59, %v3154_v50  ;;  %v13137_v27 = vmul.f32 0.6931472, %v9298_v4  ;;  %v3054_v40 = vadd.f32 1.0, %v3053_v10  ;;  %v9302_v56 = vpop.eup %9301 }
 0x7fa   :  { %v8098_v49 = vclamps-f32 %v3240_v7, 15.0  ;;  %v3147_v7 = vadd.f32 1.0, %v3146_v25  ;;  %v3040_v55 = vsel %vm13093_vm1, %v3037_v39, %v3034_v26  ;;  %v13140_v43 = vclamps-f32 %v12882_v1, 0.9999999  ;;  %v9304_v26 = vpop.eup %9303 }
 0x7fb   :  { %v8097_v51 = vclamps-f32 %v3239_v13, 15.0  ;;  %v3220_v50 = vsub.f32 %v3040_v55, %v3160_v24  ;;  %vm13142_vm10 = vcmp.lt.f32.partialorder %v3149_v2, 0.0004427343  ;;  %v3041_v21 = vadd.f32 1.0, %v13086_v29 }
 0x7fc   :  { %9309 = vtanh.f32 %v8098_v49  ;;  %v3229_v32 = vmul.f32 0.5, %v3217_v14  ;;  %v3056_v25 = vand.u32 2147483647, %v13036_v33  ;;  %v3174_v59 = vadd.f32 1.0, %v3173_v63 }
 0x7fd   :  { %9311 = vtanh.f32 %v8097_v51  ;;  %v3145_v4 = vmul.f32 0.6931472, %v9300_v6  ;;  %v3148_v10 = vmul.f32 %v3147_v7, %v13050_v23  ;;  %v3044_v1 = vmul.f32 -0.5, %v13086_v29 }
 0x7fe   :  { %9313 = vlog2.f32 %v3161_v42  ;;  %v13151_v49 = vpop.eup %9305  ;;  %v3031_v39 = vsel %vm13112_vm4, %v13132_v48, %v13137_v27  ;;  %v3055_v9 = vmul.f32 %v13036_v33, %v3054_v40  ;;  %v3172_v2 = vmul.f32 0.6931472, %v9302_v56 }
 0x7ff   :  { %v3164_v51 = vmul.f32 -0.5, %v13118_v45  ;;  %v13159_v14 = vpop.eup %9307  ;;  %v13162_v24 = vmul.f32 %v13151_v49, %v2918_v0  ;;  %v13164_v23 = vmul.f32 0.5, %v3220_v50  ;;  %9315 = vlog2.f32 %v3041_v21 }
 0x800   :  { %v3068_v63 = vadd.f32 1.0, %v13140_v43  ;;  %v13168_v7 = vmul.f32 %v13159_v14, %v2917_v61  ;;  %v3175_v17 = vmul.f32 %v3174_v59, %v13054_v30  ;;  %v3047_v48 = vand.u32 2147483647, %v13086_v29 }
 0x801   :  { %v2954_v0 = vmul.f32 %v13162_v24, %v12843_v54  ;;  %v3151_v42 = vsel %vm13142_vm10, %v3148_v10, %v3145_v4  ;;  %v3052_v6 = vmul.f32 0.6931472, %v9304_v26  ;;  %vm13180_vm3 = vcmp.lt.f32.partialorder %v3056_v25, 0.0004427343 }
 0x802   :  { %v3045_v61 = vadd.f32 1.0, %v3044_v1  ;;  %v2953_v30 = vmul.f32 %v13168_v7, %v12849_v12  ;;  %v3178_v27 = vsel %vm13171_vm9, %v3175_v17, %v3172_v2  ;;  %v3165_v40 = vadd.f32 1.0, %v3164_v51 }
 0x803   :  { %v3167_v56 = vand.u32 2147483647, %v13118_v45  ;;  %vm3312_vm5 = vcmp.le.f32.partialorder %v13089_v60, 1e-15  ;;  %v3242_v54 = vmul.f32 %v13079_v41, %v2954_v0  ;;  %9317 = vlog2.f32 %v3068_v63 }
 0x804   :  { %v3071_v13 = vmul.f32 -0.5, %v13140_v43  ;;  %vm3311_vm2 = vcmp.le.f32.partialorder %v13099_v57, 1e-15  ;;  %v3241_v12 = vmul.f32 %v3229_v32, %v2953_v30  ;;  %v13207_v10 = vclamps-f32 %v12885_v52, 0.9999999 }
 0x805   :  { %v8100_v41 = vclamps-f32 %v3242_v54, 15.0  ;;  %v13203_v4 = vpop.xlane.xlu1 %2895  ;;  %v13222_v0 = vsub.f32 0.0, %v13140_v43  ;;  %v3219_v30 = vsub.f32 %v3031_v39, %v3151_v42  ;;  %v3166_v39 = vmul.f32 %v3165_v40, %v13118_v45 }
 0x806   :  { %v9310_v50 = vpop.eup %9309  ;;  %v8099_v2 = vclamps-f32 %v3241_v12, 15.0  ;;  %v13210_v32 = vpop.xlane.xlu0 %2892  ;;  %v2920_v63 = vmax.f32 %v13203_v4, 1e-30  ;;  %v13234_v12 = vsub.f32 0.0, %v13207_v10  ;;  %vm13243_vm15 = vcmp.lt.f32.partialorder %v3047_v48, 0.0004427343 }
 0x807   :  { %v9312_v21 = vpop.eup %9311  ;;  %v13194_v25 = vsel %vm3312_vm5, 0.0, %v9310_v50  ;;  %v3288_v59 = vmul.f32 %v9310_v50, %v13077_v38  ;;  %v2919_v52 = vmax.f32 %v13210_v32, 1e-30  ;;  %v3191_v55 = vmul.f32 -0.5, %v13222_v0 }
 0x808   :  { %v3384_v62 = vmax.f32 %v13194_v25, 1e-15  ;;  %v13201_v26 = vsel %vm3311_vm2, 0.0, %v9312_v21  ;;  %vm3372_vm12 = vcmp.gt.f32.partialorder %v13194_v25, 0.996  ;;  %v9314_v51 = vpop.eup %9313  ;;  %v3287_v33 = vmul.f32 %v9312_v21, %v13083_v31 }
 0x809   :  { %v3383_v1 = vmax.f32 %v13201_v26, 1e-15  ;;  %v3300_v38 = vmul.f32 %v12918_v37, %v3288_v59  ;;  %v13217_v17 = vsel %vm3372_vm12, 0.996, %v13194_v25  ;;  %vm3371_vm7 = vcmp.gt.f32.partialorder %v13201_v26, 0.996  ;;  %v9316_v37 = vpop.eup %9315 }
 0x80a   :  { %9319 = vrcp.f32 %v3384_v62  ;;  %v3299_v50 = vmul.f32 %v3287_v33, %v12922_v53  ;;  %v13229_v54 = vsel %vm3371_vm7, 0.996, %v13201_v26  ;;  %v3058_v31 = vsel %vm13180_vm3, %v3055_v9, %v3052_v6 }
 0x80b   :  { %9321 = vrcp.f32 %v3383_v1  ;;  %v3163_v21 = vmul.f32 0.6931472, %v9314_v51  ;;  %v3222_v59 = vsub.f32 %v3058_v31, %v3178_v27  ;;  %v3072_v53 = vadd.f32 1.0, %v3071_v13 }
 0x80c   :  { %9323 = vtanh.f32 %v8100_v41  ;;  %v3043_v42 = vmul.f32 0.6931472, %v9316_v37  ;;  %v3188_v62 = vadd.f32 1.0, %v13222_v0  ;;  %vm13247_vm11 = vcmp.lt.f32.partialorder %v3167_v56, 0.0004427343 }
 0x80d   :  { %9325 = vtanh.f32 %v8099_v2  ;;  %v9318_v9 = vpop.eup %9317  ;;  %v3059_v45 = vadd.f32 1.0, %v13207_v10  ;;  %v3062_v27 = vmul.f32 -0.5, %v13207_v10  ;;  %v13253_v40 = vmul.f32 0.5, %v3219_v30 }
 0x80e   :  { %9327 = vrsqrt.f32 %v2920_v63  ;;  %v3046_v13 = vmul.f32 %v13086_v29, %v3045_v61  ;;  %v3169_v1 = vsel %vm13247_vm11, %v3166_v39, %v3163_v21  ;;  %v3179_v48 = vadd.f32 1.0, %v13234_v12 }
 0x80f   :  { %9329 = vrsqrt.f32 %v2919_v52  ;;  %v13259_v2 = vmul.f32 0.5, %v3222_v59  ;;  %v13262_v56 = vmul.f32 %v13140_v43, %v3072_v53  ;;  %v3074_v51 = vand.u32 2147483647, %v13140_v43 }
 0x810   :  { %v3182_v33 = vmul.f32 -0.5, %v13234_v12  ;;  %v3049_v37 = vsel %vm13243_vm15, %v3046_v13, %v3043_v42  ;;  %9331 = vlog2.f32 %v3188_v62  ;;  %v13268_v30 = vadd.f32 1.0, %v3191_v55 }
 0x811   :  { %v3194_v29 = vand.u32 2147483647, %v13222_v0  ;;  %v13271_v31 = vsub.f32 %v3049_v37, %v3169_v1  ;;  %9333 = vlog2.f32 %v3059_v45  ;;  %v13273_v21 = vadd.f32 1.0, %v3062_v27 }
 0x812   :  { %v13277_v43 = vclamps-f32 %v12900_v16, 0.9999999  ;;  %v13279_v53 = vmul.f32 0.6931472, %v9318_v9  ;;  %9335 = vlog2.f32 %v3179_v48  ;;  %vm3314_vm14 = vcmp.le.f32.partialorder %v13162_v24, 1e-15 }
 0x813   :  { %v13282_v55 = vadd.f32 1.0, %v3182_v33  ;;  %v3348_v6 = vsel %vm3312_vm5, 0.0, %v3300_v38  ;;  %vm3313_vm1 = vcmp.le.f32.partialorder %v13168_v7, 1e-15  ;;  %v3347_v9 = vsel %vm3311_vm2, 0.0, %v3299_v50 }
 0x814   :  { %v9320_v61 = vpop.eup %9319  ;;  %vm13333_vm4 = vcmp.lt.f32.partialorder %v3074_v51, 0.0004427343  ;;  %v13343_v32 = vclamps-f32 %v12902_v15, 0.9999999  ;;  %vm13380_vm9 = vcmp.lt.f32.partialorder %v3194_v29, 0.0004427343 }
 0x815   :  { %v9322_v39 = vpop.eup %9321  ;;  %v3398_v42 = vmul.f32 0.996, %v9320_v61  ;;  %v13300_v38 = vpop.xlane.xlu1 %2901  ;;  %v13399_v29 = vmul.f32 %v13282_v55, %v13234_v12 }
 0x816   :  { %v9324_v62 = vpop.eup %9323  ;;  %v3396_v41 = vmul.f32 0.996, %v9322_v39  ;;  %v17356_v50 = vmax.f32 %v13300_v38, 1e-30  ;;  %v13312_v39 = vpop.xlane.xlu0 %2898  ;;  %v3080_v24 = vmul.f32 -0.5, %v13343_v32 }
 0x817   :  { %v9326_v45 = vpop.eup %9325  ;;  %v13288_v27 = vsel %vm3314_vm14, 0.0, %v9324_v62  ;;  %v3420_v16 = vmul.f32 %v3398_v42, %v3348_v6  ;;  %v3290_v33 = vmul.f32 %v9324_v62, %v13151_v49  ;;  %v13317_v42 = vld [vmem:[%s17303_s7] ss:$0 sm:$0xff]  ;;  %s8072_s7 = sld [smem:[#allocation2 + $0x1]] }
 0x818   :  { %v13293_v13 = vpop.eup %9327  ;;  %v3386_v1 = vmax.f32 %v13288_v27, 1e-15  ;;  %v13298_v60 = vsel %vm3313_vm1, 0.0, %v9326_v45  ;;  %v3419_v48 = vmul.f32 %v3396_v41, %v3347_v9  ;;  %vm3374_vm8 = vcmp.gt.f32.partialorder %v13288_v27, 0.996 }
 0x819   :  { %v13303_v37 = vpop.eup %9329  ;;  %v3385_v61 = vmax.f32 %v13298_v60, 1e-15  ;;  %v13309_v57 = vmul.f32 %v13293_v13, %v2920_v63  ;;  %v13321_v49 = vsel %vm3372_vm12, %v3420_v16, %v3348_v6  ;;  %v17355_v63 = vmax.f32 %v13312_v39, 1e-30 }
 0x81a   :  { %9337 = vrcp.f32 %v3386_v1  ;;  %v13326_v4 = vmul.f32 %v13303_v37, %v2919_v52  ;;  %v3498_v62 = vmul.f32 %v13317_v42, %v13321_v49  ;;  %v13339_v25 = vsel %vm3371_vm7, %v3419_v48, %v3347_v9  ;;  %v9332_v51 = vpop.eup %9331 }
 0x81b   :  { %9339 = vrcp.f32 %v3385_v61  ;;  %v2956_v41 = vmul.f32 %v13309_v57, %v12861_v19  ;;  %v3497_v26 = vmul.f32 %v13317_v42, %v13339_v25  ;;  %v3302_v15 = vmul.f32 %v12928_v34, %v3290_v33  ;;  %v9334_v16 = vpop.eup %9333 }
 0x81c   :  { %v2955_v52 = vmul.f32 %v13326_v4, %v12871_v46  ;;  %9341 = vrsqrt.f32 %v17356_v50  ;;  %v3512_v19 = vsel %vm490_vm13, %v3498_v62, 0.0  ;;  %v13360_v9 = vsel %vm3374_vm8, 0.996, %v13288_v27 }
 0x81d   :  { %v3244_v6 = vmul.f32 %v13164_v23, %v2956_v41  ;;  %9343 = vrsqrt.f32 %v17355_v63  ;;  %3513 = vadd.xlane.f32.xlu1 %v3512_v19  ;;  %v3289_v1 = vmul.f32 %v9326_v45, %v13159_v14  ;;  %vm3373_vm10 = vcmp.gt.f32.partialorder %v13298_v60, 0.996  ;;  %v9336_v23 = vpop.eup %9335 }
 0x81e   :  { %v3243_v46 = vmul.f32 %v13253_v40, %v2955_v52  ;;  %v3086_v61 = vadd.f32 1.0, %v13277_v43  ;;  %v13366_v62 = vsub.f32 0.0, %v13277_v43  ;;  %v3509_v34 = vsel %vm490_vm13, %v3497_v26, 0.0 }
 0x81f   :  { %v8102_v48 = vclamps-f32 %v3244_v6, 15.0  ;;  %v3089_v40 = vmul.f32 -0.5, %v13277_v43  ;;  %3510 = vadd.xlane.f32.xlu0 %v3509_v34  ;;  %v3301_v41 = vmul.f32 %v3289_v1, %v12932_v58  ;;  %v13374_v14 = vsel %vm3373_vm10, 0.996, %v13298_v60 }
 0x820   :  { %v8101_v33 = vclamps-f32 %v3243_v46, 15.0  ;;  %v13376_v45 = vmul.f32 0.6931472, %v9332_v51  ;;  %v13385_v19 = vsub.f32 0.0, %v13343_v32  ;;  %v13389_v58 = vmul.f32 %v13268_v30, %v13222_v0 }
 0x821   :  { %9345 = vtanh.f32 %v8102_v48  ;;  %v13393_v6 = vmul.f32 %v13207_v10, %v13273_v21  ;;  %v3065_v51 = vand.u32 2147483647, %v13207_v10  ;;  %v3233_v26 = vmul.f32 0.5, %v13271_v31 }
 0x822   :  { %9347 = vtanh.f32 %v8101_v33  ;;  %v17561_v46 = vand.u32 2147483647, %v13234_v12  ;;  %v3206_v0 = vadd.f32 1.0, %v13366_v62  ;;  %v13412_v31 = vadd.f32 1.0, %v3089_v40 }
 0x823   :  { %9349 = vlog2.f32 %v3086_v61  ;;  %v3077_v21 = vadd.f32 1.0, %v13343_v32  ;;  %v3196_v12 = vsel %vm13380_vm9, %v13389_v58, %v13376_v45  ;;  %v13419_v48 = vmul.f32 0.6931472, %v9336_v23 }
 0x824   :  { %vm13403_vm3 = vcmp.lt.f32.partialorder %v17561_v46, 0.0004427343  ;;  %v9338_v30 = vpop.eup %9337  ;;  %v3197_v34 = vadd.f32 1.0, %v13385_v19  ;;  %v13424_v63 = vmul.f32 0.6931472, %v9334_v16  ;;  %v3209_v61 = vmul.f32 -0.5, %v13366_v62 }
 0x825   :  { %v9340_v55 = vpop.eup %9339  ;;  %v3402_v33 = vmul.f32 0.996, %v9338_v30  ;;  %v3350_v40 = vsel %vm3314_vm14, 0.0, %v3302_v15  ;;  %v17564_v52 = vmax.f32 %v13300_v38, 1e-30  ;;  %9351 = vlog2.f32 %v3206_v0 }
 0x826   :  { %v13422_v46 = vpop.eup %9341  ;;  %v3400_v10 = vmul.f32 0.996, %v9340_v55  ;;  %v3349_v58 = vsel %vm3313_vm1, 0.0, %v3301_v41  ;;  %v17565_v16 = vmax.f32 %v13312_v39, 1e-30  ;;  %9353 = vlog2.f32 %v3077_v21 }
 0x827   :  { %v13429_v50 = vpop.eup %9343  ;;  %v13434_v23 = vmul.f32 %v13422_v46, %v17564_v52  ;;  %v3422_v45 = vmul.f32 %v3402_v33, %v3350_v40  ;;  %vm13446_vm5 = vcmp.lt.f32.partialorder %v3065_v51, 0.0004427343  ;;  %v3187_v7 = vsel %vm13403_vm3, %v13399_v29, %v13419_v48 }
 0x828   :  { %v13441_v30 = vmul.f32 %v13429_v50, %v17565_v16  ;;  %v3421_v15 = vmul.f32 %v3400_v10, %v3349_v58  ;;  %9355 = vlog2.f32 %v3197_v34  ;;  %vm3316_vm2 = vcmp.le.f32.partialorder %v13309_v57, 1e-15  ;;  %v2905_v10 = vpop.xlane.xlu0 %2904 }
 0x829   :  { %v2958_v38 = vmul.f32 %v13434_v23, %v12879_v8  ;;  %v13456_v39 = vsel %vm3374_vm8, %v3422_v45, %v3350_v40  ;;  %v2908_v8 = vpop.xlane.xlu1 %2907  ;;  %vm3315_vm12 = vcmp.le.f32.partialorder %v13326_v4, 1e-15  ;;  %v2923_v33 = vmax.f32 %v2905_v10, 1e-30 }
 0x82a   :  { %v2957_v41 = vmul.f32 %v13441_v30, %v12890_v3  ;;  %v3500_v51 = vmul.f32 %v13317_v42, %v13456_v39  ;;  %v13465_v0 = vsel %vm3373_vm10, %v3421_v15, %v3349_v58  ;;  %v2924_v29 = vmax.f32 %v2908_v8, 1e-30 }
 0x82b   :  { %v9346_v1 = vpop.eup %9345  ;;  %v3246_v27 = vmul.f32 %v13259_v2, %v2958_v38  ;;  %v3499_v21 = vmul.f32 %v13317_v42, %v13465_v0  ;;  %vm3318_vm14 = vcmp.le.f32.partialorder %v13434_v23, 1e-15 }
 0x82c   :  { %v9348_v48 = vpop.eup %9347  ;;  %v13473_v3 = vsel %vm3316_vm2, 0.0, %v9346_v1  ;;  %v3245_v34 = vmul.f32 %v3233_v26, %v2957_v41  ;;  %v3518_v60 = vsel %vm490_vm13, %v3500_v51, 0.0  ;;  %9357 = vrsqrt.f32 %v2924_v29 }
 0x82d   :  { %v3388_v40 = vmax.f32 %v13473_v3, 1e-15  ;;  %v13479_v52 = vsel %vm3315_vm12, 0.0, %v9348_v48  ;;  %v8104_v2 = vclamps-f32 %v3246_v27, 15.0  ;;  %3519 = vadd.xlane.f32.xlu1 %v3518_v60  ;;  %v9350_v45 = vpop.eup %9349  ;;  %9359 = vrsqrt.f32 %v2923_v33 }
 0x82e   :  { %v3387_v58 = vmax.f32 %v13479_v52, 1e-15  ;;  %v8103_v16 = vclamps-f32 %v3245_v34, 15.0  ;;  %v3515_v15 = vsel %vm490_vm13, %v3499_v21, 0.0  ;;  %v3292_v26 = vmul.f32 %v9346_v1, %v13293_v13 }
 0x82f   :  { %9361 = vrcp.f32 %v3388_v40  ;;  %3516 = vadd.xlane.f32.xlu0 %v3515_v15  ;;  %vm3376_vm7 = vcmp.gt.f32.partialorder %v13473_v3, 0.996  ;;  %v3291_v38 = vmul.f32 %v9348_v48, %v13303_v37  ;;  %v3200_v41 = vmul.f32 -0.5, %v13385_v19  ;;  %v9352_v51 = vpop.eup %9351 }
 0x830   :  { %9363 = vrcp.f32 %v3387_v58  ;;  %v13490_v8 = vsel %vm3376_vm7, 0.996, %v13473_v3  ;;  %vm3375_vm15 = vcmp.gt.f32.partialorder %v13479_v52, 0.996  ;;  %v17568_v13 = vsel %vm13333_vm4, %v13262_v56, %v13279_v53  ;;  %v9354_v10 = vpop.eup %9353 }
 0x831   :  { %9365 = vtanh.f32 %v8104_v2  ;;  %v3224_v1 = vsub.f32 %v17568_v13, %v3196_v12  ;;  %v3304_v37 = vmul.f32 %v12938_v47, %v3292_v26  ;;  %v3303_v27 = vmul.f32 %v3291_v38, %v12942_v11 }
 0x832   :  { %9367 = vtanh.f32 %v8103_v16  ;;  %v3067_v21 = vsel %vm13446_vm5, %v13393_v6, %v13424_v63  ;;  %v3210_v48 = vadd.f32 1.0, %v3209_v61  ;;  %v13507_v59 = vsel %vm3375_vm15, 0.996, %v13479_v52  ;;  %v9356_v34 = vpop.eup %9355 }
 0x833   :  { %v3223_v56 = vsub.f32 %v3067_v21, %v3187_v7  ;;  %v3212_v53 = vand.u32 2147483647, %v13366_v62  ;;  %v3081_v47 = vadd.f32 1.0, %v3080_v24  ;;  %v13510_v12 = vmul.f32 0.6931472, %v9352_v51 }
 0x834   :  { %v3201_v11 = vadd.f32 1.0, %v3200_v41  ;;  %v3203_v60 = vand.u32 2147483647, %v13385_v19  ;;  %v3236_v40 = vmul.f32 0.5, %v3224_v1  ;;  %v13515_v63 = vmul.f32 %v13277_v43, %v13412_v31 }
 0x835   :  { %v3092_v6 = vand.u32 2147483647, %v13277_v43  ;;  %v13519_v61 = vmul.f32 %v3210_v48, %v13366_v62  ;;  %v3235_v7 = vmul.f32 0.5, %v3223_v56  ;;  %vm13523_vm11 = vcmp.lt.f32.partialorder %v3212_v53, 0.0004427343 }
 0x836   :  { %v13521_v55 = vpop.eup %9357  ;;  %v13528_v2 = vmul.f32 %v13343_v32, %v3081_v47  ;;  %v3083_v58 = vand.u32 2147483647, %v13343_v32  ;;  %v3088_v43 = vmul.f32 0.6931472, %v9350_v45  ;;  %v3202_v15 = vmul.f32 %v3201_v11, %v13385_v19 }
 0x837   :  { %v13531_v16 = vpop.eup %9359  ;;  %v13534_v31 = vmul.f32 %v13521_v55, %v2924_v29  ;;  %v3214_v62 = vsel %vm13523_vm11, %v13519_v61, %v13510_v12  ;;  %v3079_v32 = vmul.f32 0.6931472, %v9354_v10  ;;  %v3199_v41 = vmul.f32 0.6931472, %v9356_v34  ;;  %v2914_v13 = vpop.xlane.xlu1 %2913 }
 0x838   :  { %v13543_v38 = vmul.f32 %v13531_v16, %v2923_v33  ;;  %vm13545_vm1 = vcmp.lt.f32.partialorder %v3203_v60, 0.0004427343  ;;  %vm3317_vm4 = vcmp.le.f32.partialorder %v13441_v30, 1e-15  ;;  %v3352_v19 = vsel %vm3316_vm2, 0.0, %v3304_v37  ;;  %v2911_v48 = vpop.xlane.xlu0 %2910 }
 0x839   :  { %v9362_v26 = vpop.eup %9361  ;;  %v2960_v45 = vmul.f32 %v13534_v31, %v12897_v35  ;;  %v2926_v10 = vmax.f32 %v2914_v13, 1e-30  ;;  %v3351_v34 = vsel %vm3315_vm12, 0.0, %v3303_v27  ;;  %v2925_v12 = vmax.f32 %v2911_v48, 1e-30 }
 0x83a   :  { %v9364_v29 = vpop.eup %9363  ;;  %v3406_v1 = vmul.f32 0.996, %v9362_v26  ;;  %v2959_v33 = vmul.f32 %v13543_v38, %v12907_v44  ;;  %vm3093_vm10 = vcmp.lt.f32.partialorder %v3092_v6, 0.0004427343  ;;  %vm3084_vm9 = vcmp.lt.f32.partialorder %v3083_v58, 0.0004427343 }
 0x83b   :  { %v9366_v21 = vpop.eup %9365  ;;  %v3404_v56 = vmul.f32 0.996, %v9364_v29  ;;  %v3248_v35 = vmul.f32 %v3236_v40, %v2960_v45  ;;  %9369 = vrsqrt.f32 %v2926_v10  ;;  %vm3320_vm5 = vcmp.le.f32.partialorder %v13534_v31, 1e-15 }
 0x83c   :  { %v9368_v53 = vpop.eup %9367  ;;  %v13560_v47 = vsel %vm3318_vm14, 0.0, %v9366_v21  ;;  %v3424_v57 = vmul.f32 %v3406_v1, %v3352_v19  ;;  %v3247_v44 = vmul.f32 %v3235_v7, %v2959_v33  ;;  %9371 = vrsqrt.f32 %v2925_v12 }
 0x83d   :  { %v3390_v37 = vmax.f32 %v13560_v47, 1e-15  ;;  %v13565_v11 = vsel %vm3317_vm4, 0.0, %v9368_v53  ;;  %v8106_v27 = vclamps-f32 %v3248_v35, 15.0  ;;  %v3423_v24 = vmul.f32 %v3404_v56, %v3351_v34 }
 0x83e   :  { %v3389_v4 = vmax.f32 %v13565_v11, 1e-15  ;;  %v13570_v60 = vsel %vm3376_vm7, %v3424_v57, %v3352_v19  ;;  %v8105_v40 = vclamps-f32 %v3247_v44, 15.0  ;;  %v3294_v26 = vmul.f32 %v9366_v21, %v13422_v46 }
 0x83f   :  { %9373 = vrcp.f32 %v3390_v37  ;;  %v3502_v61 = vmul.f32 %v13317_v42, %v13570_v60  ;;  %vm3378_vm8 = vcmp.gt.f32.partialorder %v13560_v47, 0.996  ;;  %v3293_v7 = vmul.f32 %v9368_v53, %v13429_v50 }
 0x840   :  { %9375 = vrcp.f32 %v3389_v4  ;;  %v13580_v3 = vsel %vm3375_vm15, %v3423_v24, %v3351_v34  ;;  %v13585_v45 = vsel %vm3378_vm8, 0.996, %v13560_v47  ;;  %v3205_v46 = vsel %vm13545_vm1, %v3202_v15, %v3199_v41 }
 0x841   :  { %9377 = vtanh.f32 %v8106_v27  ;;  %v3524_v29 = vsel %vm490_vm13, %v3502_v61, 0.0  ;;  %v3501_v50 = vmul.f32 %v13317_v42, %v13580_v3  ;;  %v3306_v13 = vmul.f32 %v12948_v28, %v3294_v26 }
 0x842   :  { %9379 = vtanh.f32 %v8105_v40  ;;  %3525 = vadd.xlane.f32.xlu1 %v3524_v29  ;;  %v3305_v52 = vmul.f32 %v3293_v7, %v12952_v36  ;;  %vm3377_vm3 = vcmp.gt.f32.partialorder %v13565_v11, 0.996  ;;  %v3094_v19 = vsel %vm3093_vm10, %v13515_v63, %v3088_v43 }
 0x843   :  { %v3085_v1 = vsel %vm3084_vm9, %v13528_v2, %v3079_v32  ;;  %v3521_v21 = vsel %vm490_vm13, %v3501_v50, 0.0  ;;  %v13600_v15 = vsel %vm3377_vm3, 0.996, %v13565_v11  ;;  %v3226_v41 = vsub.f32 %v3094_v19, %v3214_v62 }
 0x844   :  { %v3225_v51 = vsub.f32 %v3085_v1, %v3205_v46  ;;  %3522 = vadd.xlane.f32.xlu0 %v3521_v21  ;;  %vm3319_vm2 = vcmp.le.f32.partialorder %v13543_v38, 1e-15  ;;  %v3354_v34 = vsel %vm3318_vm14, 0.0, %v3306_v13  ;;  %v3353_v56 = vsel %vm3317_vm4, 0.0, %v3305_v52 }
 0x845   :  { %v9370_v28 = vpop.eup %9369  ;;  %v3238_v33 = vmul.f32 0.5, %v3226_v41 }
 0x846   :  { %v13602_v6 = vpop.eup %9371  ;;  %v13604_v36 = vmul.f32 %v9370_v28, %v2926_v10  ;;  %v3237_v63 = vmul.f32 0.5, %v3225_v51 }
 0x847   :  { %v13607_v2 = vmul.f32 %v13602_v6, %v2925_v12 }
 0x848   :  { %v2962_v62 = vmul.f32 %v13604_v36, %v12914_v20  ;;  %vm3322_vm15 = vcmp.le.f32.partialorder %v13604_v36, 1e-15 }
 0x849   :  { %v9374_v58 = vpop.eup %9373  ;;  %v2961_v10 = vmul.f32 %v13607_v2, %v12916_v5  ;;  %vm3321_vm11 = vcmp.le.f32.partialorder %v13607_v2, 1e-15  ;;  %v3480_v2 = vmul.f32 %v13217_v17, %v13217_v17 }
 0x84a   :  { %v9376_v43 = vpop.eup %9375  ;;  %v3410_v32 = vmul.f32 0.996, %v9374_v58  ;;  %v3250_v57 = vmul.f32 %v3238_v33, %v2962_v62 }
 0x84b   :  { %v9378_v48 = vpop.eup %9377  ;;  %v3408_v53 = vmul.f32 0.996, %v9376_v43  ;;  %v3249_v5 = vmul.f32 %v3237_v63, %v2961_v10 }
 0x84c   :  { %v9380_v35 = vpop.eup %9379  ;;  %v3368_v12 = vsel %vm3320_vm5, 0.0, %v9378_v48  ;;  %v3426_v37 = vmul.f32 %v3410_v32, %v3354_v34  ;;  %v3296_v20 = vmul.f32 %v9378_v48, %v13521_v55  ;;  %v8108_v40 = vclamps-f32 %v3250_v57, 15.0  ;;  %v17573_v48 = vld [vmem:[#allocation15_spill] sm:$0xff]  ;;  %v17574_v57 = vld [vmem:[#allocation13_spill] sm:$0xff] }
 0x84d   :  { %v3392_v44 = vmax.f32 %v3368_v12, 1e-15  ;;  %v3367_v4 = vsel %vm3319_vm2, 0.0, %v9380_v35  ;;  %v3425_v27 = vmul.f32 %v3408_v53, %v3353_v56  ;;  %v8107_v24 = vclamps-f32 %v3249_v5, 15.0 }
 0x84e   :  { %v3391_v23 = vmax.f32 %v3367_v4, 1e-15  ;;  %v13626_v30 = vsel %vm3378_vm8, %v3426_v37, %v3354_v34  ;;  %v3308_v61 = vmul.f32 %v12958_v22, %v3296_v20  ;;  %vm3380_vm12 = vcmp.gt.f32.partialorder %v3368_v12, 0.996 }
 0x84f   :  { %9381 = vrcp.f32 %v3392_v44  ;;  %v3504_v26 = vmul.f32 %v13317_v42, %v13626_v30  ;;  %v13633_v55 = vsel %vm3377_vm3, %v3425_v27, %v3353_v56  ;;  %v13639_v29 = vsel %vm3380_vm12, 0.996, %v3368_v12 }
 0x850   :  { %9383 = vrcp.f32 %v3391_v23  ;;  %v3503_v7 = vmul.f32 %v13317_v42, %v13633_v55  ;;  %v3295_v22 = vmul.f32 %v9380_v35, %v13531_v16  ;;  %vm3379_vm7 = vcmp.gt.f32.partialorder %v3367_v4, 0.996 }
 0x851   :  { %9385 = vtanh.f32 %v8108_v40  ;;  %v3530_v47 = vsel %vm490_vm13, %v3504_v26, 0.0  ;;  %v13645_v50 = vsel %vm3379_vm7, 0.996, %v3367_v4  ;;  %v3356_v16 = vsel %vm3320_vm5, 0.0, %v3308_v61 }
 0x852   :  { %9387 = vtanh.f32 %v8107_v24  ;;  %3531 = vadd.xlane.f32.xlu1 %v3530_v47  ;;  %v3527_v46 = vsel %vm490_vm13, %v3503_v7, 0.0  ;;  %v3307_v11 = vmul.f32 %v3295_v22, %v12962_v18 }
 0x853   :  { %3528 = vadd.xlane.f32.xlu0 %v3527_v46  ;;  %v13696_v46 = vstv %s8072_s7 }
 0x854   :  { %v3355_v58 = vsel %vm3319_vm2, 0.0, %v3307_v11 }
 0x859   :  { %v9382_v13 = vpop.eup %9381 }
 0x85a   :  { %v9384_v52 = vpop.eup %9383  ;;  %v3414_v19 = vmul.f32 0.996, %v9382_v13 }
 0x85b   :  { %v9386_v1 = vpop.eup %9385  ;;  %v3412_v21 = vmul.f32 0.996, %v9384_v52  ;;  %v3479_v52 = vmul.f32 %v13229_v54, %v13229_v54 }
 0x85c   :  { %v9388_v41 = vpop.eup %9387  ;;  %v3370_v51 = vsel %vm3322_vm15, 0.0, %v9386_v1  ;;  %v3428_v18 = vmul.f32 %v3414_v19, %v3356_v16  ;;  %v3298_v33 = vmul.f32 %v9386_v1, %v9370_v28  ;;  %v3631_v19 = vmul.f32 %v13696_v46, %v3480_v2 }
 0x85d   :  { %v3394_v63 = vmax.f32 %v3370_v51, 1e-15  ;;  %v3369_v43 = vsel %vm3321_vm11, 0.0, %v9388_v41  ;;  %v3427_v62 = vmul.f32 %v3412_v21, %v3355_v58  ;;  %vm3382_vm14 = vcmp.gt.f32.partialorder %v3370_v51, 0.996 }
 0x85e   :  { %v3393_v32 = vmax.f32 %v3369_v43, 1e-15  ;;  %v13658_v31 = vsel %vm3380_vm12, %v3428_v18, %v3356_v16  ;;  %v3310_v10 = vmul.f32 %v17573_v48, %v3298_v33  ;;  %v13662_v34 = vsel %vm3382_vm14, 0.996, %v3370_v51 }
 0x85f   :  { %9389 = vrcp.f32 %v3394_v63  ;;  %v3506_v38 = vmul.f32 %v13317_v42, %v13658_v31  ;;  %v13667_v28 = vsel %vm3379_vm7, %v3427_v62, %v3355_v58  ;;  %v3297_v53 = vmul.f32 %v9388_v41, %v13602_v6 }
 0x860   :  { %9391 = vrcp.f32 %v3393_v32  ;;  %v3505_v56 = vmul.f32 %v13317_v42, %v13667_v28  ;;  %vm3381_vm1 = vcmp.gt.f32.partialorder %v3369_v43, 0.996  ;;  %v3358_v27 = vsel %vm3322_vm15, 0.0, %v3310_v10 }
 0x861   :  { %v3536_v35 = vsel %vm490_vm13, %v3506_v38, 0.0  ;;  %v3309_v37 = vmul.f32 %v3297_v53, %v17574_v57  ;;  %v13676_v20 = vsel %vm3381_vm1, 0.996, %v3369_v43  ;;  %v3630_v51 = vmul.f32 %v13696_v46, %v3479_v52 }
 0x862   :  { %3537 = vadd.xlane.f32.xlu1 %v3536_v35  ;;  %v3533_v12 = vsel %vm490_vm13, %v3505_v56, 0.0  ;;  %v3595_v43 = vsub.f32 1.0, %v3480_v2  ;;  %v3482_v32 = vmul.f32 %v13360_v9, %v13360_v9  ;;  %v3594_v48 = vsub.f32 1.0, %v3479_v52 }
 0x863   :  { %3534 = vadd.xlane.f32.xlu0 %v3533_v12  ;;  %v3357_v40 = vsel %vm3321_vm11, 0.0, %v3309_v37  ;;  %v3481_v56 = vmul.f32 %v13374_v14, %v13374_v14 }
 0x864   :  { %v3607_v10 = vmul.f32 %v13317_v42, %v3595_v43 }
 0x869   :  { %v9390_v44 = vpop.eup %9389 }
 0x86a   :  { %v9392_v4 = vpop.eup %9391  ;;  %v3418_v5 = vmul.f32 0.996, %v9390_v44 }
 0x86b   :  { %v3416_v23 = vmul.f32 0.996, %v9392_v4 }
 0x86c   :  { %v3430_v6 = vmul.f32 %v3418_v5, %v3358_v27  ;;  %v3606_v5 = vmul.f32 %v13317_v42, %v3594_v48 }
 0x86d   :  { %v3429_v61 = vmul.f32 %v3416_v23, %v3357_v40  ;;  %v3632_v23 = vmul.f32 %v13696_v46, %v3481_v56 }
 0x86e   :  { %v13683_v24 = vsel %vm3382_vm14, %v3430_v6, %v3358_v27 }
 0x86f   :  { %v3508_v26 = vmul.f32 %v13317_v42, %v13683_v24  ;;  %v13688_v7 = vsel %vm3381_vm1, %v3429_v61, %v3357_v40 }
 0x870   :  { %v3507_v47 = vmul.f32 %v13317_v42, %v13688_v7 }
 0x871   :  { %v3542_v36 = vsel %vm490_vm13, %v3508_v26, 0.0 }
 0x872   :  { %3543 = vadd.xlane.f32.xlu1 %v3542_v36  ;;  %v3539_v22 = vsel %vm490_vm13, %v3507_v47, 0.0 }
 0x873   :  { %3540 = vadd.xlane.f32.xlu0 %v3539_v22 }
 0x8aa   :  { %v3514_v11 = vpop.xlane.xlu1 %3513 }
 0x8ab   :  { %v3546_v13 = vmul.f32 2.0, %v3514_v11 }
 0x8ac   :  { %v3511_v16 = vpop.xlane.xlu0 %3510 }
 0x8ad   :  { %v3558_v1 = vadd.f32 1.0, %v3546_v13  ;;  %v3545_v21 = vmul.f32 2.0, %v3511_v16  ;;  %v3597_v13 = vsub.f32 1.0, %v3482_v32 }
 0x8af   :  { %v3643_v41 = vadd.f32 %v3631_v19, %v3558_v1  ;;  %v3557_v18 = vadd.f32 1.0, %v3545_v21  ;;  %v3571_v17 = vadd.f32 %v13696_v46, %v3558_v1  ;;  %v3596_v1 = vsub.f32 1.0, %v3481_v56 }
 0x8b0   :  { %v3609_v21 = vmul.f32 %v13317_v42, %v3597_v13 }
 0x8b1   :  { %v3655_v58 = vmax.f32 %v3643_v41, 1e-15  ;;  %v3642_v33 = vadd.f32 %v3630_v51, %v3557_v18  ;;  %v3583_v62 = vmul.f32 %v3571_v17, %v13321_v49  ;;  %v3570_v54 = vadd.f32 %v13696_v46, %v3557_v18 }
 0x8b2   :  { %v3633_v49 = vmul.f32 %v13696_v46, %v3482_v32  ;;  %v3608_v18 = vmul.f32 %v13317_v42, %v3596_v1 }
 0x8b3   :  { %9393 = vrcp.f32 %v3655_v58  ;;  %v3654_v63 = vmax.f32 %v3642_v33, 1e-15  ;;  %v3619_v35 = vadd.f32 %v3607_v10, %v3583_v62  ;;  %v3582_v12 = vmul.f32 %v3570_v54, %v13339_v25 }
 0x8b4   :  { %v3484_v33 = vmul.f32 %v13490_v8, %v13490_v8 }
 0x8b5   :  { %9395 = vrcp.f32 %v3654_v63  ;;  %v3618_v14 = vadd.f32 %v3606_v5, %v3582_v12 }
 0x8b6   :  { %v3635_v48 = vmul.f32 %v13696_v46, %v3484_v33  ;;  %v3599_v5 = vsub.f32 1.0, %v3484_v33 }
 0x8ba   :  { %v3520_v38 = vpop.xlane.xlu1 %3519 }
 0x8bb   :  { %v3548_v53 = vmul.f32 2.0, %v3520_v38 }
 0x8bc   :  { %v3517_v57 = vpop.xlane.xlu0 %3516 }
 0x8bd   :  { %v9394_v37 = vpop.eup %9393  ;;  %v3560_v44 = vadd.f32 1.0, %v3548_v53  ;;  %v3547_v4 = vmul.f32 2.0, %v3517_v57 }
 0x8be   :  { %v13713_v9 = vmul.f32 %v9394_v37, %v3619_v35 }
 0x8bf   :  { %v3645_v27 = vadd.f32 %v3633_v49, %v3560_v44  ;;  %v3559_v6 = vadd.f32 1.0, %v3547_v4  ;;  %v9396_v40 = vpop.eup %9395  ;;  %v3573_v2 = vadd.f32 %v13696_v46, %v3560_v44 }
 0x8c0   :  { %v3703_v61 = vmul.f32 %v13713_v9, %v13713_v9  ;;  %v13719_v36 = vmul.f32 %v9396_v40, %v3618_v14  ;;  %v3486_v40 = vmul.f32 %v13585_v45, %v13585_v45  ;;  %v3485_v14 = vmul.f32 %v13600_v15, %v13600_v15 }
 0x8c1   :  { %v3657_v25 = vmax.f32 %v3645_v27, 1e-15  ;;  %v3644_v26 = vadd.f32 %v3632_v23, %v3559_v6  ;;  %v3572_v52 = vadd.f32 %v13696_v46, %v3559_v6  ;;  %v3585_v16 = vmul.f32 %v3573_v2, %v13456_v39 }
 0x8c2   :  { %v3717_v47 = vsel %vm490_vm13, %v3703_v61, 0.0  ;;  %v3702_v11 = vmul.f32 %v13719_v36, %v13719_v36  ;;  %v3611_v61 = vmul.f32 %v13317_v42, %v3599_v5  ;;  %v3636_v45 = vmul.f32 %v13696_v46, %v3485_v14 }
 0x8c3   :  { %9397 = vrcp.f32 %v3657_v25  ;;  %v3656_v22 = vmax.f32 %v3644_v26, 1e-15  ;;  %3718 = vadd.xlane.f32.xlu1 %v3717_v47  ;;  %v3584_v41 = vmul.f32 %v3572_v52, %v13465_v0  ;;  %v3621_v51 = vadd.f32 %v3609_v21, %v3585_v16 }
 0x8c4   :  { %v3714_v19 = vsel %vm490_vm13, %v3702_v11, 0.0  ;;  %v3483_v0 = vmul.f32 %v13507_v59, %v13507_v59 }
 0x8c5   :  { %9399 = vrcp.f32 %v3656_v22  ;;  %3715 = vadd.xlane.f32.xlu0 %v3714_v19  ;;  %v3620_v17 = vadd.f32 %v3608_v18, %v3584_v41 }
 0x8c6   :  { %v3634_v57 = vmul.f32 %v13696_v46, %v3483_v0  ;;  %v3598_v6 = vsub.f32 1.0, %v3483_v0  ;;  %v3601_v0 = vsub.f32 1.0, %v3486_v40 }
 0x8c8   :  { %v3610_v52 = vmul.f32 %v13317_v42, %v3598_v6 }
 0x8cd   :  { %v9398_v58 = vpop.eup %9397 }
 0x8ce   :  { %v13732_v63 = vmul.f32 %v9398_v58, %v3621_v51 }
 0x8cf   :  { %v9400_v43 = vpop.eup %9399  ;;  %v3526_v62 = vpop.xlane.xlu1 %3525 }
 0x8d0   :  { %v3550_v54 = vmul.f32 2.0, %v3526_v62  ;;  %v3705_v39 = vmul.f32 %v13732_v63, %v13732_v63  ;;  %v13736_v32 = vmul.f32 %v9400_v43, %v3620_v17 }
 0x8d1   :  { %v3523_v38 = vpop.xlane.xlu0 %3522 }
 0x8d2   :  { %v3562_v10 = vadd.f32 1.0, %v3550_v54  ;;  %v3723_v8 = vsel %vm490_vm13, %v3705_v39, 0.0  ;;  %v3704_v56 = vmul.f32 %v13736_v32, %v13736_v32  ;;  %v3549_v53 = vmul.f32 2.0, %v3523_v38 }
 0x8d3   :  { %3724 = vadd.xlane.f32.xlu1 %v3723_v8  ;;  %v3488_v38 = vmul.f32 %v13639_v29, %v13639_v29 }
 0x8d4   :  { %v3647_v35 = vadd.f32 %v3635_v48, %v3562_v10  ;;  %v3720_v12 = vsel %vm490_vm13, %v3704_v56, 0.0  ;;  %v3561_v37 = vadd.f32 1.0, %v3549_v53  ;;  %v3575_v44 = vadd.f32 %v13696_v46, %v3562_v10 }
 0x8d5   :  { %3721 = vadd.xlane.f32.xlu0 %v3720_v12  ;;  %v3600_v48 = vsub.f32 1.0, %v3485_v14  ;;  %v3487_v56 = vmul.f32 %v13645_v50, %v13645_v50  ;;  %v3613_v53 = vmul.f32 %v13317_v42, %v3601_v0 }
 0x8d6   :  { %v3659_v49 = vmax.f32 %v3647_v35, 1e-15  ;;  %v3646_v59 = vadd.f32 %v3634_v57, %v3561_v37  ;;  %v3574_v27 = vadd.f32 %v13696_v46, %v3561_v37  ;;  %v3587_v23 = vmul.f32 %v3575_v44, %v13570_v60 }
 0x8d7   :  { %v3637_v60 = vmul.f32 %v13696_v46, %v3486_v40  ;;  %v3612_v12 = vmul.f32 %v13317_v42, %v3600_v48 }
 0x8d8   :  { %9401 = vrcp.f32 %v3659_v49  ;;  %v3658_v4 = vmax.f32 %v3646_v59, 1e-15  ;;  %v3586_v26 = vmul.f32 %v3574_v27, %v13580_v3  ;;  %v3623_v2 = vadd.f32 %v3611_v61, %v3587_v23 }
 0x8da   :  { %9403 = vrcp.f32 %v3658_v4  ;;  %v3622_v15 = vadd.f32 %v3610_v52, %v3586_v26  ;;  %v3602_v52 = vsub.f32 1.0, %v3487_v56 }
 0x8df   :  { %v3532_v25 = vpop.xlane.xlu1 %3531 }
 0x8e0   :  { %v3552_v47 = vmul.f32 2.0, %v3532_v25  ;;  %v3529_v22 = vpop.xlane.xlu0 %3528 }
 0x8e1   :  { %v3551_v11 = vmul.f32 2.0, %v3529_v22 }
 0x8e2   :  { %v9402_v13 = vpop.eup %9401  ;;  %v3564_v19 = vadd.f32 1.0, %v3552_v47 }
 0x8e3   :  { %v3563_v1 = vadd.f32 1.0, %v3551_v11  ;;  %v13758_v16 = vmul.f32 %v9402_v13, %v3623_v2  ;;  %v3603_v13 = vsub.f32 1.0, %v3488_v38 }
 0x8e4   :  { %v3649_v21 = vadd.f32 %v3637_v60, %v3564_v19  ;;  %v9404_v41 = vpop.eup %9403  ;;  %v3577_v62 = vadd.f32 %v13696_v46, %v3564_v19  ;;  %v3490_v19 = vmul.f32 %v13662_v34, %v13662_v34 }
 0x8e5   :  { %v3648_v51 = vadd.f32 %v3636_v45, %v3563_v1  ;;  %v3707_v3 = vmul.f32 %v13758_v16, %v13758_v16  ;;  %v13762_v58 = vmul.f32 %v9404_v41, %v3622_v15  ;;  %v3576_v54 = vadd.f32 %v13696_v46, %v3563_v1 }
 0x8e6   :  { %v3661_v18 = vmax.f32 %v3649_v21, 1e-15  ;;  %v3589_v10 = vmul.f32 %v3577_v62, %v13626_v30  ;;  %v3639_v30 = vmul.f32 %v13696_v46, %v3488_v38  ;;  %v3489_v1 = vmul.f32 %v13676_v20, %v13676_v20 }
 0x8e7   :  { %v3660_v33 = vmax.f32 %v3648_v51, 1e-15  ;;  %v3729_v17 = vsel %vm490_vm13, %v3707_v3, 0.0  ;;  %v3706_v43 = vmul.f32 %v13762_v58, %v13762_v58  ;;  %v3588_v8 = vmul.f32 %v3576_v54, %v13633_v55 }
 0x8e8   :  { %9405 = vrcp.f32 %v3661_v18  ;;  %3730 = vadd.xlane.f32.xlu1 %v3729_v17  ;;  %v3625_v49 = vadd.f32 %v3613_v53, %v3589_v10  ;;  %v3638_v55 = vmul.f32 %v13696_v46, %v3487_v56  ;;  %v3615_v15 = vmul.f32 %v13317_v42, %v3603_v13 }
 0x8e9   :  { %9407 = vrcp.f32 %v3660_v33  ;;  %v3726_v39 = vsel %vm490_vm13, %v3706_v43, 0.0  ;;  %v3624_v4 = vadd.f32 %v3612_v12, %v3588_v8  ;;  %v3614_v41 = vmul.f32 %v13317_v42, %v3602_v52 }
 0x8ea   :  { %3727 = vadd.xlane.f32.xlu0 %v3726_v39 }
 0x8ef   :  { %v3538_v35 = vpop.xlane.xlu1 %3537 }
 0x8f0   :  { %v3554_v57 = vmul.f32 2.0, %v3538_v35  ;;  %v3535_v37 = vpop.xlane.xlu0 %3534 }
 0x8f1   :  { %v3553_v59 = vmul.f32 2.0, %v3535_v37  ;;  %v3605_v37 = vsub.f32 1.0, %v3490_v19 }
 0x8f2   :  { %v9406_v44 = vpop.eup %9405  ;;  %v3566_v5 = vadd.f32 1.0, %v3554_v57 }
 0x8f3   :  { %v9408_v29 = vpop.eup %9407  ;;  %v3565_v27 = vadd.f32 1.0, %v3553_v59  ;;  %v13780_v23 = vmul.f32 %v9406_v44, %v3625_v49  ;;  %v3604_v49 = vsub.f32 1.0, %v3489_v1 }
 0x8f4   :  { %v3651_v50 = vadd.f32 %v3639_v30, %v3566_v5  ;;  %v13782_v6 = vmul.f32 %v9408_v29, %v3624_v4  ;;  %v3579_v2 = vadd.f32 %v13696_v46, %v3566_v5  ;;  %v3617_v4 = vmul.f32 %v13317_v42, %v3605_v37 }
 0x8f5   :  { %v3650_v40 = vadd.f32 %v3638_v55, %v3565_v27  ;;  %v3709_v14 = vmul.f32 %v13780_v23, %v13780_v23  ;;  %v3578_v11 = vadd.f32 %v13696_v46, %v3565_v27  ;;  %v3616_v30 = vmul.f32 %v13317_v42, %v3604_v49 }
 0x8f6   :  { %v3663_v61 = vmax.f32 %v3651_v50, 1e-15  ;;  %v3708_v25 = vmul.f32 %v13782_v6, %v13782_v6  ;;  %v3591_v60 = vmul.f32 %v3579_v2, %v13658_v31  ;;  %v3641_v31 = vmul.f32 %v13696_v46, %v3490_v19 }
 0x8f7   :  { %v3662_v26 = vmax.f32 %v3650_v40, 1e-15  ;;  %v3735_v47 = vsel %vm490_vm13, %v3709_v14, 0.0  ;;  %v3590_v45 = vmul.f32 %v3578_v11, %v13667_v28  ;;  %v3640_v28 = vmul.f32 %v13696_v46, %v3489_v1 }
 0x8f8   :  { %9409 = vrcp.f32 %v3663_v61  ;;  %3736 = vadd.xlane.f32.xlu1 %v3735_v47  ;;  %v3732_v22 = vsel %vm490_vm13, %v3708_v25, 0.0  ;;  %v3627_v18 = vadd.f32 %v3615_v15, %v3591_v60 }
 0x8f9   :  { %9411 = vrcp.f32 %v3662_v26  ;;  %3733 = vadd.xlane.f32.xlu0 %v3732_v22  ;;  %v3626_v43 = vadd.f32 %v3614_v41, %v3590_v45 }
 0x8ff   :  { %v3544_v21 = vpop.xlane.xlu1 %3543 }
 0x900   :  { %v3556_v51 = vmul.f32 2.0, %v3544_v21  ;;  %v3541_v3 = vpop.xlane.xlu0 %3540 }
 0x901   :  { %v3555_v33 = vmul.f32 2.0, %v3541_v3 }
 0x902   :  { %v9410_v17 = vpop.eup %9409  ;;  %v3568_v62 = vadd.f32 1.0, %v3556_v51 }
 0x903   :  { %v9412_v34 = vpop.eup %9411  ;;  %v3567_v54 = vadd.f32 1.0, %v3555_v33  ;;  %v13802_v39 = vmul.f32 %v9410_v17, %v3627_v18 }
 0x904   :  { %v3653_v20 = vadd.f32 %v3641_v31, %v3568_v62  ;;  %v13804_v0 = vmul.f32 %v9412_v34, %v3626_v43  ;;  %v3581_v12 = vadd.f32 %v13696_v46, %v3568_v62 }
 0x905   :  { %v3652_v48 = vadd.f32 %v3640_v28, %v3567_v54  ;;  %v3711_v10 = vmul.f32 %v13802_v39, %v13802_v39  ;;  %v3580_v57 = vadd.f32 %v13696_v46, %v3567_v54 }
 0x906   :  { %v3665_v38 = vmax.f32 %v3653_v20, 1e-15  ;;  %v3710_v8 = vmul.f32 %v13804_v0, %v13804_v0  ;;  %v3593_v59 = vmul.f32 %v3581_v12, %v13683_v24 }
 0x907   :  { %v3664_v56 = vmax.f32 %v3652_v48, 1e-15  ;;  %v3741_v53 = vsel %vm490_vm13, %v3711_v10, 0.0  ;;  %v3592_v44 = vmul.f32 %v3580_v57, %v13688_v7 }
 0x908   :  { %9413 = vrcp.f32 %v3665_v38  ;;  %3742 = vadd.xlane.f32.xlu1 %v3741_v53  ;;  %v3738_v35 = vsel %vm490_vm13, %v3710_v8, 0.0  ;;  %v3629_v5 = vadd.f32 %v3617_v4, %v3593_v59 }
 0x909   :  { %9415 = vrcp.f32 %v3664_v56  ;;  %3739 = vadd.xlane.f32.xlu0 %v3738_v35  ;;  %v3628_v55 = vadd.f32 %v3616_v30, %v3592_v44 }
 0x912   :  { %v9414_v29 = vpop.eup %9413 }
 0x913   :  { %v9416_v27 = vpop.eup %9415  ;;  %v13818_v50 = vmul.f32 %v9414_v29, %v3629_v5 }
 0x914   :  { %v13820_v40 = vmul.f32 %v9416_v27, %v3628_v55 }
 0x915   :  { %v3713_v46 = vmul.f32 %v13818_v50, %v13818_v50 }
 0x916   :  { %v3712_v24 = vmul.f32 %v13820_v40, %v13820_v40 }
 0x917   :  { %v3747_v7 = vsel %vm490_vm13, %v3713_v46, 0.0 }
 0x918   :  { %3748 = vadd.xlane.f32.xlu1 %v3747_v7  ;;  %v3744_v14 = vsel %vm490_vm13, %v3712_v24, 0.0 }
 0x919   :  { %3745 = vadd.xlane.f32.xlu0 %v3744_v14 }
 0x950   :  { %v3719_v42 = vpop.xlane.xlu1 %3718 }
 0x951   :  { %v3751_v61 = vmax.f32 %v3719_v42, 1e-30 }
 0x952   :  { %v3716_v25 = vpop.xlane.xlu0 %3715 }
 0x953   :  { %9417 = vrsqrt.f32 %v3751_v61  ;;  %v3750_v26 = vmax.f32 %v3716_v25, 1e-30 }
 0x955   :  { %9419 = vrsqrt.f32 %v3750_v26 }
 0x95d   :  { %v13828_v47 = vpop.eup %9417 }
 0x95e   :  { %v13831_v22 = vmul.f32 %v13828_v47, %v3751_v61  ;;  %v3799_v24 = vmul.f32 0.996, %v13828_v47 }
 0x95f   :  { %v13834_v11 = vpop.eup %9419 }
 0x960   :  { %vm3787_vm4 = vcmp.gt.f32.partialorder %v13831_v22, 0.996  ;;  %v3725_v2 = vpop.xlane.xlu1 %3724  ;;  %v13840_v19 = vmul.f32 %v13834_v11, %v3750_v26 }
 0x961   :  { %v3859_v13 = vsel %vm3787_vm4, 0.996, %v13831_v22  ;;  %v3753_v52 = vmax.f32 %v3725_v2, 1e-30 }
 0x962   :  { %v8111_v60 = vclamps-f32 %v3859_v13, 0.9999999  ;;  %v3722_v45 = vpop.xlane.xlu0 %3721  ;;  %vm3786_vm8 = vcmp.gt.f32.partialorder %v13840_v19, 0.996 }
 0x963   :  { %9421 = vrsqrt.f32 %v3753_v52  ;;  %v3752_v1 = vmax.f32 %v3722_v45, 1e-30  ;;  %v3858_v51 = vsel %vm3786_vm8, 0.996, %v13840_v19 }
 0x964   :  { %v3915_v15 = vadd.f32 1.0, %v8111_v60  ;;  %v4015_v21 = vsub.f32 0.0, %v8111_v60  ;;  %v8110_v3 = vclamps-f32 %v3858_v51, 0.9999999  ;;  %v3918_v17 = vmul.f32 -0.5, %v8111_v60 }
 0x965   :  { %9423 = vrsqrt.f32 %v3752_v1  ;;  %v3921_v20 = vand.u32 2147483647, %v8111_v60  ;;  %v3811_v51 = vmul.f32 %v3799_v24, %v13713_v9 }
 0x966   :  { %9425 = vlog2.f32 %v3915_v15  ;;  %v4035_v41 = vadd.f32 1.0, %v4015_v21  ;;  %v3906_v18 = vadd.f32 1.0, %v8110_v3  ;;  %v4014_v33 = vsub.f32 0.0, %v8110_v3 }
 0x967   :  { %v4038_v43 = vmul.f32 -0.5, %v4015_v21  ;;  %v3919_v54 = vadd.f32 1.0, %v3918_v17  ;;  %v4041_v38 = vand.u32 2147483647, %v4015_v21  ;;  %v3909_v53 = vmul.f32 -0.5, %v8110_v3 }
 0x968   :  { %9427 = vlog2.f32 %v4035_v41  ;;  %v4026_v31 = vadd.f32 1.0, %v4014_v33  ;;  %v4029_v35 = vmul.f32 -0.5, %v4014_v33  ;;  %vm3922_vm3 = vcmp.lt.f32.partialorder %v3921_v20, 0.0004427343 }
 0x969   :  { %9429 = vlog2.f32 %v3906_v18  ;;  %v4039_v48 = vadd.f32 1.0, %v4038_v43  ;;  %v3920_v49 = vmul.f32 %v8111_v60, %v3919_v54  ;;  %vm4042_vm5 = vcmp.lt.f32.partialorder %v4041_v38, 0.0004427343 }
 0x96a   :  { %9431 = vlog2.f32 %v4026_v31  ;;  %v3910_v55 = vadd.f32 1.0, %v3909_v53  ;;  %v4030_v27 = vadd.f32 1.0, %v4029_v35  ;;  %v3912_v14 = vand.u32 2147483647, %v8110_v3 }
 0x96b   :  { %v4040_v44 = vmul.f32 %v4039_v48, %v4015_v21  ;;  %v4032_v42 = vand.u32 2147483647, %v4014_v33  ;;  %v3871_v18 = vsel %vm3787_vm4, 1.004016, %v13828_v47  ;;  %v3870_v53 = vsel %vm3786_vm8, 1.004016, %v13834_v11 }
 0x96c   :  { %v3911_v60 = vmul.f32 %v8110_v3, %v3910_v55  ;;  %vm3913_vm2 = vcmp.lt.f32.partialorder %v3912_v14, 0.0004427343 }
 0x96d   :  { %v13846_v62 = vpop.eup %9421  ;;  %vm4033_vm12 = vcmp.lt.f32.partialorder %v4032_v42, 0.0004427343 }
 0x96e   :  { %v13849_v34 = vmul.f32 %v13846_v62, %v3753_v52  ;;  %v3798_v52 = vmul.f32 0.996, %v13834_v11 }
 0x96f   :  { %v13851_v28 = vpop.eup %9423 }
 0x970   :  { %v9426_v10 = vpop.eup %9425  ;;  %vm3789_vm10 = vcmp.gt.f32.partialorder %v13849_v34, 0.996  ;;  %v13855_v8 = vmul.f32 %v13851_v28, %v3752_v1  ;;  %v4031_v1 = vmul.f32 %v4030_v27, %v4014_v33  ;;  %v3810_v48 = vmul.f32 %v3798_v52, %v13719_v36 }
 0x971   :  { %v3917_v56 = vmul.f32 0.6931472, %v9426_v10  ;;  %v3861_v12 = vsel %vm3789_vm10, 0.996, %v13849_v34 }
 0x972   :  { %v9428_v57 = vpop.eup %9427  ;;  %v13860_v37 = vclamps-f32 %v3861_v12, 0.9999999  ;;  %vm3788_vm9 = vcmp.gt.f32.partialorder %v13855_v8, 0.996 }
 0x973   :  { %v4037_v59 = vmul.f32 0.6931472, %v9428_v57  ;;  %v3860_v30 = vsel %vm3788_vm9, 0.996, %v13855_v8  ;;  %v3923_v5 = vsel %vm3922_vm3, %v3920_v49, %v3917_v56  ;;  %v9430_v46 = vpop.eup %9429  ;;  %v3847_v56 = vsel %vm3787_vm4, %v3811_v51, %v13713_v9 }
 0x974   :  { %v13864_v4 = vsub.f32 0.0, %v13860_v37  ;;  %v3908_v61 = vmul.f32 0.6931472, %v9430_v46  ;;  %v13871_v26 = vclamps-f32 %v3860_v30, 0.9999999  ;;  %v9432_v2 = vpop.eup %9431  ;;  %v3933_v15 = vadd.f32 1.0, %v13860_v37 }
 0x975   :  { %v4043_v29 = vsel %vm4042_vm5, %v4040_v44, %v4037_v59  ;;  %v4028_v45 = vmul.f32 0.6931472, %v9432_v2  ;;  %v3731_v21 = vpop.xlane.xlu1 %3730  ;;  %v3846_v57 = vsel %vm3786_vm8, %v3810_v48, %v13719_v36  ;;  %v3936_v49 = vmul.f32 -0.5, %v13860_v37 }
 0x976   :  { %v4135_v7 = vsub.f32 %v3923_v5, %v4043_v29  ;;  %v4053_v25 = vadd.f32 1.0, %v13864_v4  ;;  %v3914_v17 = vsel %vm3913_vm2, %v3911_v60, %v3908_v61  ;;  %v13880_v31 = vsub.f32 0.0, %v13871_v26 }
 0x977   :  { %v3728_v41 = vpop.xlane.xlu0 %3727  ;;  %v4034_v43 = vsel %vm4033_vm12, %v4031_v1, %v4028_v45  ;;  %v3755_v54 = vmax.f32 %v3731_v21, 1e-30  ;;  %v3924_v47 = vadd.f32 1.0, %v13871_v26  ;;  %v4056_v59 = vmul.f32 -0.5, %v13864_v4 }
 0x978   :  { %v4147_v13 = vmul.f32 0.5, %v4135_v7  ;;  %9433 = vlog2.f32 %v4053_v25  ;;  %v4134_v33 = vsub.f32 %v3914_v17, %v4034_v43  ;;  %v3754_v20 = vmax.f32 %v3728_v41, 1e-30 }
 0x979   :  { %9435 = vlog2.f32 %v3933_v15  ;;  %v4044_v10 = vadd.f32 1.0, %v13880_v31  ;;  %v3939_v30 = vand.u32 2147483647, %v13860_v37  ;;  %v3937_v11 = vadd.f32 1.0, %v3936_v49 }
 0x97a   :  { %v4159_v3 = vmul.f32 %v4147_v13, %v3871_v18  ;;  %v4146_v38 = vmul.f32 0.5, %v4134_v33  ;;  %9437 = vrsqrt.f32 %v3755_v54  ;;  %v4057_v29 = vadd.f32 1.0, %v4056_v59 }
 0x97b   :  { %9439 = vlog2.f32 %v4044_v10  ;;  %v4059_v55 = vand.u32 2147483647, %v13864_v4  ;;  %v4047_v19 = vmul.f32 -0.5, %v13880_v31  ;;  %v3927_v42 = vmul.f32 -0.5, %v13871_v26 }
 0x97c   :  { %v4158_v35 = vmul.f32 %v4146_v38, %v3870_v53  ;;  %9441 = vrsqrt.f32 %v3754_v20  ;;  %v4171_v12 = vmul.f32 %v4159_v3, %v3847_v56  ;;  %vm13905_vm7 = vcmp.lt.f32.partialorder %v3939_v30, 0.0004427343 }
 0x97d   :  { %9443 = vlog2.f32 %v3924_v47  ;;  %v3938_v60 = vmul.f32 %v13860_v37, %v3937_v11  ;;  %v4058_v45 = vmul.f32 %v4057_v29, %v13864_v4  ;;  %vm13916_vm15 = vcmp.lt.f32.partialorder %v4059_v55, 0.0004427343 }
 0x97e   :  { %v4170_v44 = vmul.f32 %v4158_v35, %v3846_v57  ;;  %v4048_v15 = vadd.f32 1.0, %v4047_v19  ;;  %v3928_v37 = vadd.f32 1.0, %v3927_v42  ;;  %v4050_v4 = vand.u32 2147483647, %v13880_v31 }
 0x97f   :  { %v3801_v3 = vmul.f32 0.996, %v13846_v62 }
 0x980   :  { %v8705_v22 = vpack.c.bf16 %v4171_v12, %v4170_v44  ;;  %v4049_v38 = vmul.f32 %v4048_v15, %v13880_v31  ;;  %vm13944_vm1 = vcmp.lt.f32.partialorder %v4050_v4, 0.0004427343  ;;  %v3929_v12 = vmul.f32 %v13871_v26, %v3928_v37 }
 0x981   :  { %v3800_v31 = vmul.f32 0.996, %v13851_v28 }
 0x982   :  { %v9434_v9 = vpop.eup %9433  ;;  %8706 = vmatprep.subr.bf16.mxu1 %v8705_v22 }
 0x983   :  { %v9436_v36 = vpop.eup %9435  ;;  %8708 = vmatpush3.bf16.msra.mxu1 %v8705_v22  ;;  %v4055_v14 = vmul.f32 0.6931472, %v9434_v9  ;;  %v3813_v22 = vmul.f32 %v3801_v3, %v13732_v63  ;;  %v3812_v42 = vmul.f32 %v3800_v31, %v13736_v32 }
 0x984   :  { %v13902_v7 = vpop.eup %9437  ;;  %v3935_v52 = vmul.f32 0.6931472, %v9436_v36  ;;  %v3872_v36 = vsel %vm3788_vm9, 1.004016, %v13851_v28 }
 0x985   :  { %v3737_v5 = vpop.xlane.xlu1 %3736  ;;  %v9440_v61 = vpop.eup %9439  ;;  %v13910_v2 = vmul.f32 %v13902_v7, %v3755_v54  ;;  %v4061_v51 = vsel %vm13916_vm15, %v4058_v45, %v4055_v14  ;;  %v3930_v54 = vand.u32 2147483647, %v13871_v26  ;;  %v3873_v26 = vsel %vm3789_vm10, 1.004016, %v13846_v62 }
 0x986   :  { %v3757_v27 = vmax.f32 %v3737_v5, 1e-30  ;;  %v13898_v46 = vpop.xlane.xlu0 %3733  ;;  %v13912_v13 = vpop.eup %9441  ;;  %v4046_v17 = vmul.f32 0.6931472, %v9440_v61  ;;  %v3941_v33 = vsel %vm13905_vm7, %v3938_v60, %v3935_v52  ;;  %v3803_v62 = vmul.f32 0.996, %v13902_v7 }
 0x987   :  { %v3756_v24 = vmax.f32 %v13898_v46, 1e-30  ;;  %vm3791_vm11 = vcmp.gt.f32.partialorder %v13910_v2, 0.996  ;;  %v13922_v21 = vmul.f32 %v13912_v13, %v3754_v20  ;;  %v9444_v41 = vpop.eup %9443  ;;  %v4137_v48 = vsub.f32 %v3941_v33, %v4061_v51 }
 0x988   :  { %9445 = vrsqrt.f32 %v3757_v27  ;;  %v3863_v18 = vsel %vm3791_vm11, 0.996, %v13910_v2  ;;  %v3926_v10 = vmul.f32 0.6931472, %v9444_v41  ;;  %v4052_v57 = vsel %vm13944_vm1, %v4049_v38, %v4046_v17 }
 0x989   :  { %9447 = vrsqrt.f32 %v3756_v24  ;;  %v13932_v43 = vclamps-f32 %v3863_v18, 0.9999999  ;;  %vm3790_vm14 = vcmp.gt.f32.partialorder %v13922_v21, 0.996  ;;  %vm3931_vm4 = vcmp.lt.f32.partialorder %v3930_v54, 0.0004427343 }
 0x98a   :  { %v3862_v20 = vsel %vm3790_vm14, 0.996, %v13922_v21  ;;  %v4149_v9 = vmul.f32 0.5, %v4137_v48  ;;  %v3932_v30 = vsel %vm3931_vm4, %v3929_v12, %v3926_v10  ;;  %v3849_v15 = vsel %vm3789_vm10, %v3813_v22, %v13732_v63 }
 0x98b   :  { %v3951_v47 = vadd.f32 1.0, %v13932_v43  ;;  %v4019_v53 = vsub.f32 0.0, %v13932_v43  ;;  %v13949_v35 = vclamps-f32 %v3862_v20, 0.9999999  ;;  %v4136_v11 = vsub.f32 %v3932_v30, %v4052_v57 }
 0x98c   :  { %v3954_v19 = vmul.f32 -0.5, %v13932_v43  ;;  %v3957_v60 = vand.u32 2147483647, %v13932_v43  ;;  %v3848_v4 = vsel %vm3788_vm9, %v3812_v42, %v13736_v32  ;;  %v3802_v3 = vmul.f32 0.996, %v13912_v13 }
 0x98d   :  { %9449 = vlog2.f32 %v3951_v47  ;;  %v4071_v59 = vadd.f32 1.0, %v4019_v53  ;;  %v3942_v44 = vadd.f32 1.0, %v13949_v35  ;;  %v13960_v5 = vsub.f32 0.0, %v13949_v35 }
 0x98e   :  { %v4074_v61 = vmul.f32 -0.5, %v4019_v53  ;;  %v3945_v25 = vmul.f32 -0.5, %v13949_v35  ;;  %v4148_v52 = vmul.f32 0.5, %v4136_v11  ;;  %v3955_v41 = vadd.f32 1.0, %v3954_v19 }
 0x98f   :  { %9451 = vlog2.f32 %v4071_v59  ;;  %v4062_v14 = vadd.f32 1.0, %v13960_v5  ;;  %v4065_v45 = vmul.f32 -0.5, %v13960_v5  ;;  %v4077_v51 = vand.u32 2147483647, %v4019_v53 }
 0x990   :  { %9453 = vlog2.f32 %v3942_v44  ;;  %v4075_v18 = vadd.f32 1.0, %v4074_v61  ;;  %v3948_v17 = vand.u32 2147483647, %v13949_v35  ;;  %v3946_v34 = vadd.f32 1.0, %v3945_v25 }
 0x991   :  { %9455 = vlog2.f32 %v4062_v14  ;;  %v4160_v33 = vmul.f32 %v4148_v52, %v3872_v36  ;;  %v4066_v54 = vadd.f32 1.0, %v4065_v45  ;;  %v3956_v48 = vmul.f32 %v13932_v43, %v3955_v41 }
 0x992   :  { %v13954_v49 = vpop.eup %9445  ;;  %vm14008_vm10 = vcmp.lt.f32.partialorder %v3957_v60, 0.0004427343  ;;  %vm14012_vm9 = vcmp.lt.f32.partialorder %v4077_v51, 0.0004427343  ;;  %v4076_v12 = vmul.f32 %v4075_v18, %v4019_v53  ;;  %vm14018_vm5 = vcmp.lt.f32.partialorder %v3948_v17, 0.0004427343 }
 0x993   :  { %v13966_v29 = vmul.f32 %v13954_v49, %v3757_v27  ;;  %v13968_v55 = vpop.eup %9447  ;;  %v4161_v27 = vmul.f32 %v4149_v9, %v3873_v26  ;;  %v3947_v22 = vmul.f32 %v13949_v35, %v3946_v34  ;;  %v4068_v9 = vand.u32 2147483647, %v13960_v5 }
 0x994   :  { %v13987_v1 = vmul.f32 %v13968_v55, %v3756_v24  ;;  %v3815_v24 = vmul.f32 %v3803_v62, %v13758_v16  ;;  %v4067_v53 = vmul.f32 %v4066_v54, %v13960_v5  ;;  %v4172_v19 = vmul.f32 %v4160_v33, %v3848_v4 }
 0x995   :  { %vm3793_vm8 = vcmp.gt.f32.partialorder %v13966_v29, 0.996  ;;  %v4173_v63 = vmul.f32 %v4161_v27, %v3849_v15  ;;  %v14016_v47 = vpop.xlane.xlu1 %3742  ;;  %vm4069_vm2 = vcmp.lt.f32.partialorder %v4068_v9, 0.0004427343  ;;  %v3875_v15 = vsel %vm3791_vm11, 1.004016, %v13902_v7 }
 0x996   :  { %v3865_v28 = vsel %vm3793_vm8, 0.996, %v13966_v29  ;;  %vm3792_vm3 = vcmp.gt.f32.partialorder %v13987_v1, 0.996  ;;  %v14028_v26 = vpop.xlane.xlu0 %3739  ;;  %v3759_v36 = vmax.f32 %v14016_v47, 1e-30  ;;  %v3814_v17 = vmul.f32 %v3802_v3, %v13762_v58 }
 0x997   :  { %v13992_v37 = vclamps-f32 %v3865_v28, 0.9999999  ;;  %v9450_v46 = vpop.eup %9449  ;;  %v3864_v32 = vsel %vm3792_vm3, 0.996, %v13987_v1  ;;  %v3758_v25 = vmax.f32 %v14028_v26, 1e-30  ;;  %v8709_v45 = vpack.c.bf16 %v4173_v63, %v4172_v19 }
 0x998   :  { %v3953_v8 = vmul.f32 0.6931472, %v9450_v46  ;;  %v14026_v30 = vclamps-f32 %v3864_v32, 0.9999999  ;;  %v3851_v7 = vsel %vm3791_vm11, %v3815_v24, %v13758_v16  ;;  %v3874_v63 = vsel %vm3790_vm14, 1.004016, %v13912_v13 }
 0x999   :  { %v14002_v20 = vsub.f32 0.0, %v13992_v37  ;;  %v9452_v56 = vpop.eup %9451  ;;  %v3969_v31 = vadd.f32 1.0, %v13992_v37  ;;  %8710 = vmatprep.subr.bf16.mxu1 %v8709_v45  ;;  %v3972_v33 = vmul.f32 -0.5, %v13992_v37  ;;  %v3975_v2 = vand.u32 2147483647, %v13992_v37 }
 0x99a   :  { %v9454_v59 = vpop.eup %9453  ;;  %v4073_v44 = vmul.f32 0.6931472, %v9452_v56  ;;  %v3959_v42 = vsel %vm14008_vm10, %v3956_v48, %v3953_v8  ;;  %v3960_v35 = vadd.f32 1.0, %v14026_v30  ;;  %v14041_v28 = vsub.f32 0.0, %v14026_v30  ;;  %8712 = vmatpush3.bf16.msra.mxu1 %v8709_v45 }
 0x99b   :  { %v4089_v43 = vadd.f32 1.0, %v14002_v20  ;;  %v3944_v11 = vmul.f32 0.6931472, %v9454_v59  ;;  %v9456_v14 = vpop.eup %9455  ;;  %v4092_v54 = vmul.f32 -0.5, %v14002_v20  ;;  %v3850_v48 = vsel %vm3790_vm14, %v3814_v17, %v13762_v58 }
 0x99c   :  { %v4079_v62 = vsel %vm14012_vm9, %v4076_v12, %v4073_v44  ;;  %v4064_v27 = vmul.f32 0.6931472, %v9456_v14  ;;  %v4080_v51 = vadd.f32 1.0, %v14041_v28  ;;  %v4083_v32 = vmul.f32 -0.5, %v14041_v28 }
 0x99d   :  { %9457 = vlog2.f32 %v4089_v43  ;;  %v4139_v61 = vsub.f32 %v3959_v42, %v4079_v62  ;;  %v3950_v5 = vsel %vm14018_vm5, %v3947_v22, %v3944_v11  ;;  %v3973_v24 = vadd.f32 1.0, %v3972_v33 }
 0x99e   :  { %9459 = vlog2.f32 %v3969_v31  ;;  %v4070_v60 = vsel %vm4069_vm2, %v4067_v53, %v4064_v27  ;;  %v3963_v10 = vmul.f32 -0.5, %v14026_v30  ;;  %v4093_v56 = vadd.f32 1.0, %v4092_v54 }
 0x99f   :  { %9461 = vlog2.f32 %v3960_v35  ;;  %v4151_v52 = vmul.f32 0.5, %v4139_v61  ;;  %v4138_v41 = vsub.f32 %v3950_v5, %v4070_v60  ;;  %v4095_v12 = vand.u32 2147483647, %v14002_v20 }
 0x9a0   :  { %9463 = vrsqrt.f32 %v3759_v36  ;;  %v3805_v31 = vmul.f32 0.996, %v13954_v49  ;;  %v4084_v43 = vadd.f32 1.0, %v4083_v32  ;;  %vm14073_vm12 = vcmp.lt.f32.partialorder %v3975_v2, 0.0004427343 }
 0x9a1   :  { %v4163_v18 = vmul.f32 %v4151_v52, %v3875_v15  ;;  %9465 = vrsqrt.f32 %v3758_v25  ;;  %v4150_v34 = vmul.f32 0.5, %v4138_v41  ;;  %v3974_v9 = vmul.f32 %v13992_v37, %v3973_v24 }
 0x9a2   :  { %9467 = vlog2.f32 %v4080_v51  ;;  %v3964_v26 = vadd.f32 1.0, %v3963_v10  ;;  %v4086_v11 = vand.u32 2147483647, %v14041_v28  ;;  %v4094_v42 = vmul.f32 %v4093_v56, %v14002_v20 }
 0x9a3   :  { %v4162_v3 = vmul.f32 %v4150_v34, %v3874_v63  ;;  %v4175_v8 = vmul.f32 %v4163_v18, %v3851_v7  ;;  %vm14086_vm7 = vcmp.lt.f32.partialorder %v4095_v12, 0.0004427343  ;;  %v3966_v35 = vand.u32 2147483647, %v14026_v30 }
 0x9a4   :  { %v4085_v27 = vmul.f32 %v4084_v43, %v14041_v28  ;;  %v3965_v28 = vmul.f32 %v14026_v30, %v3964_v26  ;;  %vm4087_vm11 = vcmp.lt.f32.partialorder %v4086_v11, 0.0004427343  ;;  %v3804_v63 = vmul.f32 0.996, %v13968_v55 }
 0x9a5   :  { %v14047_v4 = vpop.xlane.xlu1 %3748  ;;  %v4174_v38 = vmul.f32 %v4162_v3, %v3850_v48  ;;  %vm3967_vm1 = vcmp.lt.f32.partialorder %v3966_v35, 0.0004427343  ;;  %v3817_v54 = vmul.f32 %v3805_v31, %v13780_v23  ;;  %v3877_v24 = vsel %vm3793_vm8, 1.004016, %v13954_v49 }
 0x9a6   :  { %v3761_v46 = vmax.f32 %v14047_v4, 1e-30  ;;  %v14067_v13 = vpop.xlane.xlu0 %3745  ;;  %v3816_v4 = vmul.f32 %v3804_v63, %v13782_v6  ;;  %v3876_v56 = vsel %vm3792_vm3, 1.004016, %v13968_v55 }
 0x9a7   :  { %v9458_v16 = vpop.eup %9457  ;;  %v8713_v59 = vpack.c.bf16 %v4175_v8, %v4174_v38  ;;  %v3760_v22 = vmax.f32 %v14067_v13, 1e-30 }
 0x9a8   :  { %9469 = vrsqrt.f32 %v3761_v46  ;;  %v9460_v47 = vpop.eup %9459  ;;  %v4091_v44 = vmul.f32 0.6931472, %v9458_v16  ;;  %v3853_v16 = vsel %vm3793_vm8, %v3817_v54, %v13780_v23  ;;  %v3852_v49 = vsel %vm3792_vm3, %v3816_v4, %v13782_v6 }
 0x9a9   :  { %v9462_v57 = vpop.eup %9461  ;;  %8714 = vmatprep.subr.bf16.mxu1 %v8713_v59  ;;  %v3971_v14 = vmul.f32 0.6931472, %v9460_v47  ;;  %9471 = vrsqrt.f32 %v3760_v22 }
 0x9aa   :  { %v14071_v21 = vpop.eup %9463  ;;  %8716 = vmatpush3.bf16.msra.mxu1 %v8713_v59  ;;  %v3962_v61 = vmul.f32 0.6931472, %v9462_v57  ;;  %v4097_v5 = vsel %vm14086_vm7, %v4094_v42, %v4091_v44 }
 0x9ab   :  { %v14081_v53 = vmul.f32 %v14071_v21, %v3759_v36  ;;  %v14083_v19 = vpop.eup %9465  ;;  %v3807_v29 = vmul.f32 0.996, %v14071_v21 }
 0x9ac   :  { %v9468_v37 = vpop.eup %9467  ;;  %v14094_v36 = vmul.f32 %v14083_v19, %v3758_v25  ;;  %v3977_v25 = vsel %vm14073_vm12, %v3974_v9, %v3971_v14  ;;  %v3968_v18 = vsel %vm3967_vm1, %v3965_v28, %v3962_v61  ;;  %v3806_v59 = vmul.f32 0.996, %v14083_v19 }
 0x9ad   :  { %vm3795_vm15 = vcmp.gt.f32.partialorder %v14081_v53, 0.996  ;;  %v4082_v20 = vmul.f32 0.6931472, %v9468_v37  ;;  %v4141_v51 = vsub.f32 %v3977_v25, %v4097_v5  ;;  %v3819_v62 = vmul.f32 %v3807_v29, %v13802_v39 }
 0x9ae   :  { %v3867_v52 = vsel %vm3795_vm15, 0.996, %v14081_v53  ;;  %vm3794_vm14 = vcmp.gt.f32.partialorder %v14094_v36, 0.996 }
 0x9af   :  { %v8119_v45 = vclamps-f32 %v3867_v52, 0.9999999  ;;  %v4088_v15 = vsel %vm4087_vm11, %v4085_v27, %v4082_v20  ;;  %v3866_v41 = vsel %vm3794_vm14, 0.996, %v14094_v36  ;;  %v4153_v8 = vmul.f32 0.5, %v4141_v51 }
 0x9b0   :  { %v4140_v34 = vsub.f32 %v3968_v18, %v4088_v15  ;;  %v14112_v7 = vclamps-f32 %v3866_v41, 0.9999999 }
 0x9b1   :  { %v3987_v17 = vadd.f32 1.0, %v8119_v45  ;;  %v4023_v33 = vsub.f32 0.0, %v8119_v45  ;;  %v3990_v10 = vmul.f32 -0.5, %v8119_v45  ;;  %v4165_v47 = vmul.f32 %v4153_v8, %v3877_v24 }
 0x9b2   :  { %v14103_v60 = vpop.eup %9469  ;;  %v3978_v32 = vadd.f32 1.0, %v14112_v7  ;;  %v4152_v48 = vmul.f32 0.5, %v4140_v34  ;;  %v14123_v2 = vsub.f32 0.0, %v14112_v7  ;;  %v3993_v43 = vand.u32 2147483647, %v8119_v45 }
 0x9b3   :  { %v14117_v30 = vmul.f32 %v14103_v60, %v3761_v46  ;;  %9473 = vlog2.f32 %v3987_v17  ;;  %v4107_v3 = vadd.f32 1.0, %v4023_v33  ;;  %v14127_v46 = vpop.eup %9471  ;;  %v4110_v12 = vmul.f32 -0.5, %v4023_v33 }
 0x9b4   :  { %v4098_v38 = vadd.f32 1.0, %v14123_v2  ;;  %v4164_v31 = vmul.f32 %v4152_v48, %v3876_v56  ;;  %v14152_v55 = vmul.f32 %v14127_v46, %v3760_v22  ;;  %v3991_v58 = vadd.f32 1.0, %v3990_v10 }
 0x9b5   :  { %9475 = vlog2.f32 %v4107_v3  ;;  %vm3797_vm4 = vcmp.gt.f32.partialorder %v14117_v30, 0.996  ;;  %v4113_v44 = vand.u32 2147483647, %v4023_v33  ;;  %v3981_v9 = vmul.f32 -0.5, %v14112_v7 }
 0x9b6   :  { %9477 = vlog2.f32 %v3978_v32  ;;  %v3869_v57 = vsel %vm3797_vm4, 0.996, %v14117_v30  ;;  %v4111_v14 = vadd.f32 1.0, %v4110_v12  ;;  %v4101_v1 = vmul.f32 -0.5, %v14123_v2  ;;  %v10144_v30 = vld [vmem:[%s17298_s2 + $0x20] sm:$0xff] }
 0x9b7   :  { %9479 = vlog2.f32 %v4098_v38  ;;  %v14142_v23 = vclamps-f32 %v3869_v57, 0.9999999  ;;  %vm3796_vm8 = vcmp.gt.f32.partialorder %v14152_v55, 0.996  ;;  %vm14161_vm3 = vcmp.lt.f32.partialorder %v3993_v43, 0.0004427343 }
 0x9b8   :  { %v4176_v22 = vmul.f32 %v4164_v31, %v3852_v49  ;;  %v4177_v42 = vmul.f32 %v4165_v47, %v3853_v16  ;;  %v3984_v37 = vand.u32 2147483647, %v14112_v7  ;;  %v3992_v5 = vmul.f32 %v8119_v45, %v3991_v58 }
 0x9b9   :  { %v4005_v26 = vadd.f32 1.0, %v14142_v23  ;;  %v14158_v6 = vsub.f32 0.0, %v14142_v23  ;;  %vm14168_vm10 = vcmp.lt.f32.partialorder %v4113_v44, 0.0004427343  ;;  %v3982_v52 = vadd.f32 1.0, %v3981_v9 }
 0x9ba   :  { %v3868_v28 = vsel %vm3796_vm8, 0.996, %v14152_v55  ;;  %v4112_v41 = vmul.f32 %v4111_v14, %v4023_v33  ;;  %v4102_v51 = vadd.f32 1.0, %v4101_v1  ;;  %v4104_v18 = vand.u32 2147483647, %v14123_v2  ;;  %v10146_v55 = vld [vmem:[%s17298_s2 + $0x30] sm:$0xff] }
 0x9bb   :  { %9481 = vlog2.f32 %v4005_v26  ;;  %v4125_v61 = vadd.f32 1.0, %v14158_v6  ;;  %v4008_v17 = vmul.f32 -0.5, %v14142_v23  ;;  %v14177_v34 = vclamps-f32 %v3868_v28, 0.9999999 }
 0x9bc   :  { %v8717_v45 = vpack.c.bf16 %v4177_v42, %v4176_v22  ;;  %v4128_v32 = vmul.f32 -0.5, %v14158_v6  ;;  %v3879_v33 = vsel %vm3795_vm15, 1.004016, %v14071_v21  ;;  %vm14187_vm9 = vcmp.lt.f32.partialorder %v3984_v37, 0.0004427343 }
 0x9bd   :  { %v9474_v11 = vpop.eup %9473  ;;  %9483 = vlog2.f32 %v4125_v61  ;;  %v3996_v16 = vadd.f32 1.0, %v14177_v34  ;;  %v3983_v24 = vmul.f32 %v14112_v7, %v3982_v52  ;;  %v4103_v38 = vmul.f32 %v4102_v51, %v14123_v2 }
 0x9be   :  { %v3989_v35 = vmul.f32 0.6931472, %v9474_v11  ;;  %8718 = vmatprep.subr.bf16.mxu1 %v8717_v45  ;;  %v4024_v47 = vsub.f32 0.0, %v14177_v34  ;;  %vm4105_vm5 = vcmp.lt.f32.partialorder %v4104_v18, 0.0004427343  ;;  %v4009_v12 = vadd.f32 1.0, %v4008_v17 }
 0x9bf   :  { %v9476_v27 = vpop.eup %9475  ;;  %8720 = vmatpush3.bf16.msra.mxu1 %v8717_v45  ;;  %9485 = vlog2.f32 %v3996_v16  ;;  %v4129_v31 = vadd.f32 1.0, %v4128_v32  ;;  %v3818_v7 = vmul.f32 %v3806_v59, %v13804_v0  ;;  %v4011_v2 = vand.u32 2147483647, %v14142_v23 }
 0x9c0   :  { %v9478_v25 = vpop.eup %9477  ;;  %v4109_v15 = vmul.f32 0.6931472, %v9476_v27  ;;  %v3995_v63 = vsel %vm14161_vm3, %v3992_v5, %v3989_v35  ;;  %v4116_v43 = vadd.f32 1.0, %v4024_v47  ;;  %v4131_v44 = vand.u32 2147483647, %v14158_v6 }
 0x9c1   :  { %v3980_v3 = vmul.f32 0.6931472, %v9478_v25  ;;  %v9480_v8 = vpop.eup %9479  ;;  %v3855_v9 = vsel %vm3795_vm15, %v3819_v62, %v13802_v39  ;;  %v3878_v1 = vsel %vm3794_vm14, 1.004016, %v14083_v19  ;;  %v4010_v13 = vmul.f32 %v14142_v23, %v4009_v12  ;;  %v10148_v12 = vld [vmem:[%s17298_s2 + $0x40] sm:$0xff] }
 0x9c2   :  { %v4115_v54 = vsel %vm14168_vm10, %v4112_v41, %v4109_v15  ;;  %v4100_v10 = vmul.f32 0.6931472, %v9480_v8  ;;  %9487 = vlog2.f32 %v4116_v43  ;;  %v4130_v59 = vmul.f32 %v4129_v31, %v14158_v6  ;;  %v10151_v31 = vld [vmem:[%s17298_s2 + $0x58] sm:$0xff]  ;;  %v10152_v43 = vld [vmem:[%s17298_s2] sm:$0xff] }
 0x9c3   :  { %v4143_v48 = vsub.f32 %v3995_v63, %v4115_v54  ;;  %v3986_v21 = vsel %vm14187_vm9, %v3983_v24, %v3980_v3  ;;  %v3999_v22 = vmul.f32 -0.5, %v14177_v34  ;;  %v4119_v37 = vmul.f32 -0.5, %v4024_v47 }
 0x9c4   :  { %v4106_v57 = vsel %vm4105_vm5, %v4103_v38, %v4100_v10  ;;  %v3854_v39 = vsel %vm3794_vm14, %v3818_v7, %v13804_v0  ;;  %vm4012_vm2 = vcmp.lt.f32.partialorder %v4011_v2, 0.0004427343  ;;  %vm4132_vm12 = vcmp.lt.f32.partialorder %v4131_v44, 0.0004427343 }
 0x9c5   :  { %v4155_v56 = vmul.f32 0.5, %v4143_v48  ;;  %v9482_v49 = vpop.eup %9481  ;;  %v4142_v58 = vsub.f32 %v3986_v21, %v4106_v57  ;;  %v4000_v23 = vadd.f32 1.0, %v3999_v22  ;;  %v4120_v20 = vadd.f32 1.0, %v4119_v37  ;;  %v10149_v21 = vld [vmem:[%s17298_s2 + $0x48] sm:$0xff]  ;;  %v10150_v57 = vld [vmem:[%s17298_s2 + $0x50] sm:$0xff] }
 0x9c6   :  { %v4007_v11 = vmul.f32 0.6931472, %v9482_v49  ;;  %v4002_v52 = vand.u32 2147483647, %v14177_v34  ;;  %v4122_v28 = vand.u32 2147483647, %v4024_v47 }
 0x9c7   :  { %v4167_v29 = vmul.f32 %v4155_v56, %v3879_v33  ;;  %v4154_v26 = vmul.f32 0.5, %v4142_v58  ;;  %v9484_v14 = vpop.eup %9483  ;;  %v3809_v25 = vmul.f32 0.996, %v14103_v60  ;;  %v3808_v0 = vmul.f32 0.996, %v14127_v46  ;;  %v10147_v56 = vld [vmem:[%s17298_s2 + $0x38] sm:$0xff] }
 0x9c8   :  { %v4127_v35 = vmul.f32 0.6931472, %v9484_v14  ;;  %v4013_v53 = vsel %vm4012_vm2, %v4010_v13, %v4007_v11  ;;  %v4001_v51 = vmul.f32 %v14177_v34, %v4000_v23  ;;  %v4121_v17 = vmul.f32 %v4120_v20, %v4024_v47  ;;  %v10141_v47 = vld [vmem:[%s17298_s2 + $0x8] sm:$0xff] }
 0x9c9   :  { %v4166_v42 = vmul.f32 %v4154_v26, %v3878_v1  ;;  %v4179_v61 = vmul.f32 %v4167_v29, %v3855_v9  ;;  %v9486_v5 = vpop.eup %9485  ;;  %vm4003_vm7 = vcmp.lt.f32.partialorder %v4002_v52, 0.0004427343  ;;  %vm4123_vm15 = vcmp.lt.f32.partialorder %v4122_v28, 0.0004427343 }
 0x9ca   :  { %v4133_v62 = vsel %vm4132_vm12, %v4130_v59, %v4127_v35  ;;  %v3998_v15 = vmul.f32 0.6931472, %v9486_v5  ;;  %v3821_v45 = vmul.f32 %v3809_v25, %v13818_v50  ;;  %v3881_v63 = vsel %vm3797_vm4, 1.004016, %v14103_v60 }
 0x9cb   :  { %v4178_v27 = vmul.f32 %v4166_v42, %v3854_v39  ;;  %v4145_v19 = vsub.f32 %v4013_v53, %v4133_v62  ;;  %v3820_v33 = vmul.f32 %v3808_v0, %v13820_v40  ;;  %v3880_v4 = vsel %vm3796_vm8, 1.004016, %v14127_v46  ;;  %v10145_v46 = vld [vmem:[%s17298_s2 + $0x28] sm:$0xff] }
 0x9cc   :  { %v9488_v41 = vpop.eup %9487  ;;  %v4004_v54 = vsel %vm4003_vm7, %v4001_v51, %v3998_v15  ;;  %v3857_v34 = vsel %vm3797_vm4, %v3821_v45, %v13818_v50  ;;  %v10142_v50 = vld [vmem:[%s17298_s2 + $0x10] sm:$0xff] }
 0x9cd   :  { %v8721_v6 = vpack.c.bf16 %v4179_v61, %v4178_v27  ;;  %v4157_v36 = vmul.f32 0.5, %v4145_v19  ;;  %v4118_v18 = vmul.f32 0.6931472, %v9488_v41  ;;  %v3856_v60 = vsel %vm3796_vm8, %v3820_v33, %v13820_v40  ;;  %v10143_v40 = vld [vmem:[%s17298_s2 + $0x18] sm:$0xff] }
 0x9cf   :  { %8722 = vmatprep.subr.bf16.mxu1 %v8721_v6  ;;  %v4124_v3 = vsel %vm4123_vm15, %v4121_v17, %v4118_v18  ;;  %v4169_v32 = vmul.f32 %v4157_v36, %v3881_v63 }
 0x9d0   :  { %8724 = vmatpush3.bf16.msra.mxu1 %v8721_v6  ;;  %v4144_v8 = vsub.f32 %v4004_v54, %v4124_v3 }
 0x9d1   :  { %v4181_v24 = vmul.f32 %v4169_v32, %v3857_v34 }
 0x9d2   :  { %v4156_v48 = vmul.f32 0.5, %v4144_v8 }
 0x9d4   :  { %v4168_v16 = vmul.f32 %v4156_v48, %v3880_v4 }
 0x9d6   :  { %v4180_v10 = vmul.f32 %v4168_v16, %v3856_v60 }
 0x9d8   :  { %v8725_v38 = vpack.c.bf16 %v4181_v24, %v4180_v10 }
 0x9da   :  { %8726 = vmatprep.subr.bf16.mxu1 %v8725_v38 }
 0x9db   :  { %8728 = vmatpush3.bf16.msra.mxu1 %v8725_v38 }
 0x9de   :  { %8539 = vmatmul.mubr.msk.f32.vlgmr.msra.gmra.mrb[12].mxu1 %vm1794_vm6, %v10141_v47 }
 0x9df   :  { %8541 = vmatprep.mubr.msk.f32.mxu1 %vm1794_vm6, %v10142_v50 }
 0x9e2   :  { %8542 = vmatmul.mubr.msk.f32.gmra.mrb[14].mxu1 %vm1794_vm6, %v10143_v40 }
 0x9e3   :  { %8544 = vmatprep.mubr.msk.f32.mxu1 %vm1794_vm6, %v10144_v30 }
 0x9e6   :  { %8545 = vmatmul.mubr.msk.f32.gmra.mrb[16].mxu1 %vm1794_vm6, %v10145_v46 }
 0x9e7   :  { %8547 = vmatprep.mubr.msk.f32.mxu1 %vm1794_vm6, %v10146_v55 }
 0x9ea   :  { %8548 = vmatmul.mubr.msk.f32.gmra.mrb[18].mxu1 %vm1794_vm6, %v10147_v56 }
 0x9eb   :  { %8550 = vmatprep.mubr.msk.f32.mxu1 %vm1794_vm6, %v10148_v12 }
 0x9ee   :  { %8551 = vmatmul.mubr.msk.f32.gmra.mrb[20].mxu1 %vm1794_vm6, %v10149_v21 }
 0x9ef   :  { %8553 = vmatprep.mubr.msk.f32.mxu1 %vm1794_vm6, %v10150_v57 }
 0x9f2   :  { %8554 = vmatmul.mubr.msk.f32.gmra.mrb[22].mxu1 %vm1794_vm6, %v10151_v31 }
 0x9f3   :  { %8606 = vmatprep.mubr.msk.f32.mxu1 %vm1794_vm6, %v10152_v43 }
 0xab1   :  { %v14278_v49 = vpop.f32.mrb[12].mxu1 }
 0xab2   :  { %v4308_v29 = vmul.f32 %v14278_v49, %v14278_v49  ;;  %v14282_v58 = vpop.f32.mrb[13].mxu1 }
 0xab3   :  { %v4307_v7 = vmul.f32 %v14282_v58, %v14282_v58 }
 0xab4   :  { %v4322_v2 = vsel %vm490_vm13, %v4308_v29, 0.0 }
 0xab5   :  { %4323 = vadd.xlane.f32.xlu1 %v4322_v2  ;;  %v14287_v44 = vpop.f32.mrb[14].mxu1  ;;  %v4319_v9 = vsel %vm490_vm13, %v4307_v7, 0.0 }
 0xab6   :  { %v4310_v26 = vmul.f32 %v14287_v44, %v14287_v44  ;;  %4320 = vadd.xlane.f32.xlu0 %v4319_v9  ;;  %v14292_v11 = vpop.f32.mrb[15].mxu1 }
 0xab7   :  { %v4309_v14 = vmul.f32 %v14292_v11, %v14292_v11 }
 0xab8   :  { %v4328_v1 = vsel %vm490_vm13, %v4310_v26, 0.0 }
 0xab9   :  { %4329 = vadd.xlane.f32.xlu1 %v4328_v1  ;;  %v14297_v13 = vpop.f32.mrb[16].mxu1  ;;  %v4325_v59 = vsel %vm490_vm13, %v4309_v14, 0.0 }
 0xaba   :  { %v4312_v22 = vmul.f32 %v14297_v13, %v14297_v13  ;;  %4326 = vadd.xlane.f32.xlu0 %v4325_v59  ;;  %v14302_v42 = vpop.f32.mrb[17].mxu1 }
 0xabb   :  { %v4311_v35 = vmul.f32 %v14302_v42, %v14302_v42 }
 0xabc   :  { %v4334_v37 = vsel %vm490_vm13, %v4312_v22, 0.0 }
 0xabd   :  { %4335 = vadd.xlane.f32.xlu1 %v4334_v37  ;;  %v14307_v61 = vpop.f32.mrb[18].mxu1  ;;  %v4331_v39 = vsel %vm490_vm13, %v4311_v35, 0.0 }
 0xabe   :  { %v4314_v53 = vmul.f32 %v14307_v61, %v14307_v61  ;;  %4332 = vadd.xlane.f32.xlu0 %v4331_v39  ;;  %v14312_v62 = vpop.f32.mrb[19].mxu1 }
 0xabf   :  { %v4313_v27 = vmul.f32 %v14312_v62, %v14312_v62 }
 0xac0   :  { %v4340_v19 = vsel %vm490_vm13, %v4314_v53, 0.0 }
 0xac1   :  { %4341 = vadd.xlane.f32.xlu1 %v4340_v19  ;;  %v14317_v5 = vpop.f32.mrb[20].mxu1  ;;  %v4337_v23 = vsel %vm490_vm13, %v4313_v27, 0.0 }
 0xac2   :  { %v4316_v20 = vmul.f32 %v14317_v5, %v14317_v5  ;;  %4338 = vadd.xlane.f32.xlu0 %v4337_v23  ;;  %v14322_v6 = vpop.f32.mrb[21].mxu1 }
 0xac3   :  { %v4315_v52 = vmul.f32 %v14322_v6, %v14322_v6 }
 0xac4   :  { %v4346_v28 = vsel %vm490_vm13, %v4316_v20, 0.0 }
 0xac5   :  { %4347 = vadd.xlane.f32.xlu1 %v4346_v28  ;;  %v14327_v25 = vpop.f32.mrb[22].mxu1  ;;  %v4343_v15 = vsel %vm490_vm13, %v4315_v52, 0.0 }
 0xac6   :  { %v4318_v41 = vmul.f32 %v14327_v25, %v14327_v25  ;;  %4344 = vadd.xlane.f32.xlu0 %v4343_v15  ;;  %v14332_v36 = vpop.f32.mrb[23].mxu1 }
 0xac7   :  { %v4317_v0 = vmul.f32 %v14332_v36, %v14332_v36 }
 0xac8   :  { %v4352_v51 = vsel %vm490_vm13, %v4318_v41, 0.0 }
 0xac9   :  { %4353 = vadd.xlane.f32.xlu1 %v4352_v51  ;;  %v4349_v18 = vsel %vm490_vm13, %v4317_v0, 0.0 }
 0xaca   :  { %4350 = vadd.xlane.f32.xlu0 %v4349_v18 }
 0xb42   :  { %v4324_v17 = vpop.xlane.xlu1 %4323 }
 0xb43   :  { %v4356_v45 = vmax.f32 %v4324_v17, 1e-30  ;;  %v4321_v63 = vpop.xlane.xlu0 %4320 }
 0xb44   :  { %v4355_v54 = vmax.f32 %v4321_v63, 1e-30 }
 0xb45   :  { %9489 = vrsqrt.f32 %v4356_v45 }
 0xb46   :  { %9491 = vrsqrt.f32 %v4355_v54  ;;  %v4330_v3 = vpop.xlane.xlu1 %4329 }
 0xb47   :  { %v4358_v32 = vmax.f32 %v4330_v3, 1e-30  ;;  %v4327_v8 = vpop.xlane.xlu0 %4326 }
 0xb48   :  { %v4357_v33 = vmax.f32 %v4327_v8, 1e-30 }
 0xb49   :  { %9493 = vrsqrt.f32 %v4358_v32 }
 0xb4a   :  { %v4336_v48 = vpop.xlane.xlu1 %4335  ;;  %9495 = vrsqrt.f32 %v4357_v33 }
 0xb4b   :  { %v4333_v34 = vpop.xlane.xlu0 %4332  ;;  %v4360_v4 = vmax.f32 %v4336_v48, 1e-30 }
 0xb4c   :  { %v4359_v16 = vmax.f32 %v4333_v34, 1e-30 }
 0xb4d   :  { %9497 = vrsqrt.f32 %v4360_v4 }
 0xb4e   :  { %v4342_v24 = vpop.xlane.xlu1 %4341  ;;  %9499 = vrsqrt.f32 %v4359_v16 }
 0xb4f   :  { %v14338_v60 = vpop.eup %9489  ;;  %v4362_v10 = vmax.f32 %v4342_v24, 1e-30  ;;  %v4339_v38 = vpop.xlane.xlu0 %4338 }
 0xb50   :  { %v14340_v47 = vpop.eup %9491  ;;  %v4380_v50 = vmul.f32 %v14338_v60, %v4356_v45  ;;  %v4361_v46 = vmax.f32 %v4339_v38, 1e-30 }
 0xb51   :  { %v4379_v40 = vmul.f32 %v14340_v47, %v4355_v54  ;;  %9501 = vrsqrt.f32 %v4362_v10 }
 0xb52   :  { %v8135_v30 = vclamps-f32 %v4380_v50, 15.0  ;;  %v4348_v55 = vpop.xlane.xlu1 %4347 }
 0xb53   :  { %v14344_v56 = vpop.eup %9493  ;;  %v8134_v12 = vclamps-f32 %v4379_v40, 15.0  ;;  %v4345_v21 = vpop.xlane.xlu0 %4344  ;;  %v4364_v57 = vmax.f32 %v4348_v55, 1e-30 }
 0xb54   :  { %9503 = vtanh.f32 %v8135_v30  ;;  %v4382_v31 = vmul.f32 %v14344_v56, %v4358_v32  ;;  %v4363_v43 = vmax.f32 %v4345_v21, 1e-30  ;;  %v14347_v29 = vpop.eup %9495 }
 0xb55   :  { %9505 = vtanh.f32 %v8134_v12  ;;  %v4381_v26 = vmul.f32 %v14347_v29, %v4357_v33 }
 0xb56   :  { %9507 = vrsqrt.f32 %v4361_v46  ;;  %v4354_v7 = vpop.xlane.xlu1 %4353  ;;  %v8137_v9 = vclamps-f32 %v4382_v31, 15.0 }
 0xb57   :  { %9509 = vrsqrt.f32 %v4364_v57  ;;  %v14349_v2 = vpop.eup %9497  ;;  %v4366_v14 = vmax.f32 %v4354_v7, 1e-30  ;;  %v14354_v59 = vpop.xlane.xlu0 %4350  ;;  %v8136_v39 = vclamps-f32 %v4381_v26, 15.0 }
 0xb58   :  { %9511 = vrsqrt.f32 %v4363_v43  ;;  %v14352_v1 = vpop.eup %9499  ;;  %v4384_v35 = vmul.f32 %v14349_v2, %v4360_v4  ;;  %v4365_v27 = vmax.f32 %v14354_v59, 1e-30 }
 0xb59   :  { %9513 = vtanh.f32 %v8137_v9  ;;  %v4383_v52 = vmul.f32 %v14352_v1, %v4359_v16 }
 0xb5a   :  { %9515 = vrsqrt.f32 %v4366_v14  ;;  %v8139_v20 = vclamps-f32 %v4384_v35, 15.0 }
 0xb5b   :  { %v14356_v22 = vpop.eup %9501  ;;  %9517 = vtanh.f32 %v8136_v39  ;;  %v8138_v54 = vclamps-f32 %v4383_v52, 15.0 }
 0xb5c   :  { %v4386_v41 = vmul.f32 %v14356_v22, %v4362_v10  ;;  %9519 = vrsqrt.f32 %v4365_v27 }
 0xb5d   :  { %9521 = vtanh.f32 %v8139_v20 }
 0xb5e   :  { %v14359_v37 = vpop.eup %9503  ;;  %v8141_v8 = vclamps-f32 %v4386_v41, 15.0 }
 0xb5f   :  { %v14361_v53 = vpop.eup %9505  ;;  %vm4428_vm11 = vcmp.gt.f32.partialorder %v14359_v37, 0.996  ;;  %v4476_v0 = vmax.f32 %v14359_v37, 1e-15 }
 0xb60   :  { %v14365_v19 = vpop.eup %9507  ;;  %v4440_v23 = vsel %vm4428_vm11, 0.996, %v14359_v37  ;;  %vm4427_vm14 = vcmp.gt.f32.partialorder %v14361_v53, 0.996 }
 0xb61   :  { %v14372_v28 = vclamps-f32 %v4440_v23, 0.9999999  ;;  %v14374_v15 = vpop.eup %9509  ;;  %v4439_v51 = vsel %vm4427_vm14, 0.996, %v14361_v53  ;;  %v4385_v18 = vmul.f32 %v14365_v19, %v4361_v46  ;;  %9523 = vrcp.f32 %v4476_v0 }
 0xb62   :  { %v14385_v45 = vpop.eup %9511  ;;  %v4388_v3 = vmul.f32 %v14374_v15, %v4364_v57  ;;  %v14389_v32 = vclamps-f32 %v4439_v51, 0.9999999  ;;  %v4452_v16 = vmul.f32 %v14338_v60, %v4440_v23  ;;  %v4475_v60 = vmax.f32 %v14361_v53, 1e-15 }
 0xb63   :  { %v4556_v17 = vadd.f32 1.0, %v14372_v28  ;;  %v4656_v63 = vsub.f32 0.0, %v14372_v28  ;;  %v8140_v48 = vclamps-f32 %v4385_v18, 15.0  ;;  %v4387_v34 = vmul.f32 %v14385_v45, %v4363_v43  ;;  %v14392_v4 = vpop.eup %9513 }
 0xb64   :  { %v14395_v24 = vpop.eup %9515  ;;  %v8143_v10 = vclamps-f32 %v4388_v3, 15.0  ;;  %v4559_v38 = vmul.f32 -0.5, %v14372_v28  ;;  %v4547_v50 = vadd.f32 1.0, %v14389_v32  ;;  %v4562_v40 = vand.u32 2147483647, %v14372_v28 }
 0xb65   :  { %v4676_v33 = vadd.f32 1.0, %v4656_v63  ;;  %9525 = vlog2.f32 %v4556_v17  ;;  %v4679_v30 = vmul.f32 -0.5, %v4656_v63  ;;  %v14401_v46 = vsub.f32 0.0, %v14389_v32  ;;  %v14405_v12 = vpop.eup %9517 }
 0xb66   :  { %v8142_v55 = vclamps-f32 %v4387_v34, 15.0  ;;  %vm4430_vm1 = vcmp.gt.f32.partialorder %v14392_v4, 0.996  ;;  %v14408_v21 = vmul.f32 %v14395_v24, %v4366_v14  ;;  %v14411_v57 = vmul.f32 %v14278_v49, %v4452_v16  ;;  %v14414_v43 = vpop.eup %9519 }
 0xb67   :  { %9527 = vlog2.f32 %v4676_v33  ;;  %v4667_v31 = vadd.f32 1.0, %v14401_v46  ;;  %v4560_v7 = vadd.f32 1.0, %v4559_v38  ;;  %v4451_v9 = vmul.f32 %v14340_v47, %v4439_v51  ;;  %v14424_v39 = vpop.eup %9521 }
 0xb68   :  { %9529 = vtanh.f32 %v8138_v54  ;;  %v4442_v26 = vsel %vm4430_vm1, 0.996, %v14392_v4  ;;  %vm14420_vm4 = vcmp.lt.f32.partialorder %v4562_v40, 0.0004427343  ;;  %v4680_v14 = vadd.f32 1.0, %v4679_v30 }
 0xb69   :  { %9531 = vtanh.f32 %v8141_v8  ;;  %v4682_v49 = vand.u32 2147483647, %v4656_v63  ;;  %v4550_v23 = vmul.f32 -0.5, %v14389_v32  ;;  %v14427_v20 = vclamps-f32 %v4442_v26, 0.9999999 }
 0xb6a   :  { %9533 = vtanh.f32 %v8140_v48  ;;  %vm4429_vm8 = vcmp.gt.f32.partialorder %v14405_v12, 0.996  ;;  %v8145_v52 = vclamps-f32 %v14408_v21, 15.0  ;;  %v14434_v41 = vmul.f32 %v14414_v43, %v4365_v27 }
 0xb6b   :  { %9535 = vlog2.f32 %v4547_v50  ;;  %v9524_v47 = vpop.eup %9523  ;;  %v4553_v0 = vand.u32 2147483647, %v14389_v32  ;;  %v4441_v51 = vsel %vm4429_vm8, 0.996, %v14405_v12  ;;  %v4670_v17 = vmul.f32 -0.5, %v14401_v46 }
 0xb6c   :  { %9537 = vtanh.f32 %v8143_v10  ;;  %v4574_v54 = vadd.f32 1.0, %v14427_v20  ;;  %v14443_v3 = vsub.f32 0.0, %v14427_v20  ;;  %v4561_v27 = vmul.f32 %v14372_v28, %v4560_v7 }
 0xb6d   :  { %9539 = vlog2.f32 %v4667_v31  ;;  %v4681_v33 = vmul.f32 %v4680_v14, %v4656_v63  ;;  %vm14446_vm3 = vcmp.lt.f32.partialorder %v4682_v49, 0.0004427343  ;;  %v4551_v10 = vadd.f32 1.0, %v4550_v23 }
 0xb6e   :  { %9541 = vtanh.f32 %v8142_v55  ;;  %v14452_v38 = vclamps-f32 %v4441_v51, 0.9999999  ;;  %v14457_v40 = vmul.f32 %v4451_v9, %v14282_v58  ;;  %vm14459_vm10 = vcmp.lt.f32.partialorder %v4553_v0, 0.0004427343 }
 0xb6f   :  { %v9526_v18 = vpop.eup %9525  ;;  %9543 = vrcp.f32 %v4475_v60  ;;  %v4478_v28 = vmax.f32 %v14392_v4, 1e-15  ;;  %v4694_v63 = vadd.f32 1.0, %v14443_v3  ;;  %v4512_v60 = vsel %vm4428_vm11, 1.004016, %v9524_v47 }
 0xb70   :  { %v4558_v59 = vmul.f32 0.6931472, %v9526_v18  ;;  %9545 = vlog2.f32 %v4574_v54  ;;  %v4671_v7 = vadd.f32 1.0, %v4670_v17  ;;  %v4673_v49 = vand.u32 2147483647, %v14401_v46 }
 0xb71   :  { %v9528_v8 = vpop.eup %9527  ;;  %v4454_v23 = vmul.f32 %v14344_v56, %v4442_v26  ;;  %9547 = vlog2.f32 %v4694_v63  ;;  %v4552_v37 = vmul.f32 %v14389_v32, %v4551_v10  ;;  %v4577_v47 = vmul.f32 -0.5, %v14427_v20 }
 0xb72   :  { %v14450_v34 = vpop.eup %9529  ;;  %v4678_v16 = vmul.f32 0.6931472, %v9528_v8  ;;  %v4564_v31 = vsel %vm14420_vm4, %v4561_v27, %v4558_v59  ;;  %v4565_v35 = vadd.f32 1.0, %v14452_v38  ;;  %9549 = vrcp.f32 %v4478_v28 }
 0xb73   :  { %v14454_v50 = vpop.eup %9531  ;;  %v4580_v17 = vand.u32 2147483647, %v14427_v20  ;;  %v14482_v59 = vsub.f32 0.0, %v14452_v38  ;;  %v4672_v26 = vmul.f32 %v4671_v7, %v14401_v46  ;;  %vm4674_vm9 = vcmp.lt.f32.partialorder %v4673_v49, 0.0004427343 }
 0xb74   :  { %v14465_v55 = vpop.eup %9533  ;;  %v4684_v58 = vsel %vm14446_vm3, %v4681_v33, %v4678_v16  ;;  %v4697_v33 = vmul.f32 -0.5, %v14443_v3  ;;  %9551 = vlog2.f32 %v4565_v35  ;;  %v14489_v48 = vmul.f32 %v14287_v44, %v4454_v23 }
 0xb75   :  { %v9536_v9 = vpop.eup %9535  ;;  %v4776_v14 = vsub.f32 %v4564_v31, %v4684_v58  ;;  %v4685_v16 = vadd.f32 1.0, %v14482_v59  ;;  %v4578_v31 = vadd.f32 1.0, %v4577_v47  ;;  %v4477_v58 = vmax.f32 %v14405_v12, 1e-15 }
 0xb76   :  { %v14475_v0 = vpop.eup %9537  ;;  %v4549_v18 = vmul.f32 0.6931472, %v9536_v9  ;;  %vm14496_vm5 = vcmp.lt.f32.partialorder %v4580_v17, 0.0004427343  ;;  %v4453_v49 = vmul.f32 %v14347_v29, %v4441_v51  ;;  %vm4432_vm2 = vcmp.gt.f32.partialorder %v14424_v39, 0.996 }
 0xb77   :  { %v9540_v54 = vpop.eup %9539  ;;  %v4788_v8 = vmul.f32 0.5, %v4776_v14  ;;  %9553 = vlog2.f32 %v4685_v16  ;;  %v4700_v14 = vand.u32 2147483647, %v14443_v3  ;;  %v4579_v47 = vmul.f32 %v14427_v20, %v4578_v31 }
 0xb78   :  { %v14484_v27 = vpop.eup %9541  ;;  %v4669_v56 = vmul.f32 0.6931472, %v9540_v54  ;;  %v4555_v28 = vsel %vm14459_vm10, %v4552_v37, %v4549_v18  ;;  %v4568_v18 = vmul.f32 -0.5, %v14452_v38  ;;  %v4688_v35 = vmul.f32 -0.5, %v14482_v59 }
 0xb79   :  { %v4800_v32 = vmul.f32 %v4788_v8, %v4512_v60  ;;  %v9544_v10 = vpop.eup %9543  ;;  %v4698_v60 = vadd.f32 1.0, %v4697_v33  ;;  %v14513_v54 = vsel %vm4432_vm2, 0.996, %v14424_v39  ;;  %9555 = vrcp.f32 %v4477_v58 }
 0xb7a   :  { %v4675_v63 = vsel %vm4674_vm9, %v4672_v26, %v4669_v56  ;;  %v9546_v44 = vpop.eup %9545  ;;  %v4511_v23 = vsel %vm4427_vm14, 1.004016, %v9544_v10  ;;  %v4571_v53 = vand.u32 2147483647, %v14452_v38  ;;  %vm4701_vm12 = vcmp.lt.f32.partialorder %v4700_v14, 0.0004427343 }
 0xb7b   :  { %v4812_v46 = vmul.f32 %v4800_v32, %v14411_v57  ;;  %v4775_v7 = vsub.f32 %v4555_v28, %v4675_v63  ;;  %v4576_v37 = vmul.f32 0.6931472, %v9546_v44  ;;  %v9548_v29 = vpop.eup %9547  ;;  %v4699_v56 = vmul.f32 %v4698_v60, %v14443_v3 }
 0xb7c   :  { %v4696_v17 = vmul.f32 0.6931472, %v9548_v29  ;;  %v14520_v20 = vclamps-f32 %v14513_v54, 0.9999999  ;;  %v9550_v26 = vpop.eup %9549  ;;  %v4569_v16 = vadd.f32 1.0, %v4568_v18  ;;  %v4689_v31 = vadd.f32 1.0, %v4688_v35 }
 0xb7d   :  { %v14503_v30 = vmax.f32 %v4812_v46, 0.0  ;;  %v4787_v57 = vmul.f32 0.5, %v4775_v7  ;;  %vm4431_vm7 = vcmp.gt.f32.partialorder %v14450_v34, 0.996  ;;  %v4582_v28 = vsel %vm14496_vm5, %v4579_v47, %v4576_v37 }
 0xb7e   :  { %v9552_v10 = vpop.eup %9551  ;;  %v4702_v63 = vsel %vm4701_vm12, %v4699_v56, %v4696_v17  ;;  %v4592_v3 = vadd.f32 1.0, %v14520_v20  ;;  %vm14530_vm15 = vcmp.lt.f32.partialorder %v4571_v53, 0.0004427343  ;;  %v4660_v60 = vsub.f32 0.0, %v14520_v20 }
 0xb7f   :  { %v4836_v51 = vmul.f32 %v14503_v30, %v14503_v30  ;;  %v4799_v8 = vmul.f32 %v4787_v57, %v4511_v23  ;;  %v4778_v46 = vsub.f32 %v4582_v28, %v4702_v63  ;;  %v4567_v44 = vmul.f32 0.6931472, %v9552_v10 }
 0xb80   :  { %9557 = vlog2.f32 %v4592_v3  ;;  %v4443_v9 = vsel %vm4431_vm7, 0.996, %v14450_v34  ;;  %v4514_v57 = vsel %vm4430_vm1, 1.004016, %v9550_v26  ;;  %v4570_v37 = vmul.f32 %v14452_v38, %v4569_v16 }
 0xb81   :  { %v4850_v33 = vsel %vm490_vm13, %v4836_v51, 0.0  ;;  %v4811_v32 = vmul.f32 %v4799_v8, %v14457_v40  ;;  %v4691_v40 = vand.u32 2147483647, %v14482_v59  ;;  %v9554_v14 = vpop.eup %9553  ;;  %v4790_v18 = vmul.f32 0.5, %v4778_v46 }
 0xb82   :  { %4851 = vadd.xlane.f32.xlu1 %v4850_v33  ;;  %v4687_v47 = vmul.f32 0.6931472, %v9554_v14  ;;  %v4690_v35 = vmul.f32 %v4689_v31, %v14482_v59  ;;  %v4480_v29 = vmax.f32 %v14424_v39, 1e-15  ;;  %v4712_v51 = vadd.f32 1.0, %v4660_v60 }
 0xb83   :  { %v14528_v58 = vmax.f32 %v4811_v32, 0.0  ;;  %v4802_v53 = vmul.f32 %v4790_v18, %v4514_v57  ;;  %vm4692_vm11 = vcmp.lt.f32.partialorder %v4691_v40, 0.0004427343  ;;  %v14547_v17 = vclamps-f32 %v4443_v9, 0.9999999  ;;  %v9556_v38 = vpop.eup %9555 }
 0xb84   :  { %v8144_v56 = vclamps-f32 %v14434_v41, 15.0  ;;  %v4573_v4 = vsel %vm14530_vm15, %v4570_v37, %v4567_v44  ;;  %v4693_v26 = vsel %vm4692_vm11, %v4690_v35, %v4687_v47  ;;  %9559 = vlog2.f32 %v4712_v51 }
 0xb85   :  { %v4835_v23 = vmul.f32 %v14528_v58, %v14528_v58  ;;  %9561 = vtanh.f32 %v8145_v52  ;;  %v4814_v59 = vmul.f32 %v4802_v53, %v14489_v48  ;;  %v4777_v33 = vsub.f32 %v4573_v4, %v4693_v26 }
 0xb86   :  { %v4595_v32 = vmul.f32 -0.5, %v14520_v20  ;;  %v4465_v16 = vmul.f32 %v4453_v49, %v14292_v11  ;;  %9563 = vrcp.f32 %v4480_v29  ;;  %v4715_v10 = vmul.f32 -0.5, %v4660_v60 }
 0xb87   :  { %v4847_v8 = vsel %vm490_vm13, %v4835_v23, 0.0  ;;  %v4583_v28 = vadd.f32 1.0, %v14547_v17  ;;  %v14558_v63 = vmax.f32 %v4814_v59, 0.0  ;;  %v4789_v31 = vmul.f32 0.5, %v4777_v33 }
 0xb88   :  { %4848 = vadd.xlane.f32.xlu0 %v4847_v8  ;;  %v14561_v3 = vsub.f32 0.0, %v14547_v17  ;;  %vm4434_vm14 = vcmp.gt.f32.partialorder %v14454_v50, 0.996  ;;  %v4513_v21 = vsel %vm4429_vm8, 1.004016, %v9556_v38  ;;  %v4596_v46 = vadd.f32 1.0, %v4595_v32 }
 0xb89   :  { %v4598_v52 = vand.u32 2147483647, %v14520_v20  ;;  %v4479_v48 = vmax.f32 %v14450_v34, 1e-15  ;;  %9565 = vlog2.f32 %v4583_v28  ;;  %v4838_v11 = vmul.f32 %v14558_v63, %v14558_v63 }
 0xb8a   :  { %v4801_v49 = vmul.f32 %v4789_v31, %v4513_v21  ;;  %v4703_v7 = vadd.f32 1.0, %v14561_v3  ;;  %v9558_v40 = vpop.eup %9557  ;;  %v4456_v44 = vmul.f32 %v14349_v2, %v14513_v54  ;;  %v4716_v14 = vadd.f32 1.0, %v4715_v10 }
 0xb8b   :  { %v4718_v23 = vand.u32 2147483647, %v4660_v60  ;;  %v14576_v12 = vsel %vm4434_vm14, 0.996, %v14454_v50  ;;  %v4856_v57 = vsel %vm490_vm13, %v4838_v11, 0.0  ;;  %v4586_v37 = vmul.f32 -0.5, %v14547_v17 }
 0xb8c   :  { %v4813_v18 = vmul.f32 %v4801_v49, %v4465_v16  ;;  %9567 = vlog2.f32 %v4703_v7  ;;  %4857 = vadd.xlane.f32.xlu1 %v4856_v57  ;;  %v4594_v47 = vmul.f32 0.6931472, %v9558_v40  ;;  %v4455_v35 = vmul.f32 %v14352_v1, %v4443_v9 }
 0xb8d   :  { %9569 = vrcp.f32 %v4479_v48  ;;  %v4706_v2 = vmul.f32 -0.5, %v14561_v3  ;;  %v4597_v29 = vmul.f32 %v14520_v20, %v4596_v46  ;;  %vm14585_vm1 = vcmp.lt.f32.partialorder %v4598_v52, 0.0004427343 }
 0xb8e   :  { %v14582_v54 = vmax.f32 %v4813_v18, 0.0  ;;  %v14590_v8 = vclamps-f32 %v14576_v12, 0.9999999  ;;  %v9560_v53 = vpop.eup %9559  ;;  %v4717_v4 = vmul.f32 %v4716_v14, %v4660_v60  ;;  %vm14592_vm4 = vcmp.lt.f32.partialorder %v4718_v23, 0.0004427343 }
 0xb8f   :  { %v4589_v1 = vand.u32 2147483647, %v14547_v17  ;;  %vm4433_vm8 = vcmp.gt.f32.partialorder %v14465_v55, 0.996  ;;  %v14598_v9 = vpop.eup %9561  ;;  %v4714_v38 = vmul.f32 0.6931472, %v9560_v53  ;;  %v4600_v60 = vsel %vm14585_vm1, %v4597_v29, %v4594_v47 }
 0xb90   :  { %v4837_v20 = vmul.f32 %v14582_v54, %v14582_v54  ;;  %v4587_v59 = vadd.f32 1.0, %v4586_v37  ;;  %v4610_v33 = vadd.f32 1.0, %v14590_v8  ;;  %v9564_v32 = vpop.eup %9563  ;;  %v4707_v16 = vadd.f32 1.0, %v4706_v2 }
 0xb91   :  { %v4709_v10 = vand.u32 2147483647, %v14561_v3  ;;  %v14607_v28 = vsub.f32 0.0, %v14590_v8  ;;  %v4720_v21 = vsel %vm14592_vm4, %v4717_v4, %v4714_v38  ;;  %v14615_v52 = vsel %vm4433_vm8, 0.996, %v14465_v55 }
 0xb92   :  { %v4853_v31 = vsel %vm490_vm13, %v4837_v20, 0.0  ;;  %9571 = vlog2.f32 %v4610_v33  ;;  %v4780_v11 = vsub.f32 %v4600_v60, %v4720_v21  ;;  %v4468_v46 = vmul.f32 %v14297_v13, %v4456_v44 }
 0xb93   :  { %v9566_v48 = vpop.eup %9565  ;;  %9573 = vtanh.f32 %v8144_v56  ;;  %4854 = vadd.xlane.f32.xlu0 %v4853_v31  ;;  %v4730_v49 = vadd.f32 1.0, %v14607_v28  ;;  %v4516_v7 = vsel %vm4432_vm2, 1.004016, %v9564_v32  ;;  %v4467_v40 = vmul.f32 %v4455_v35, %v14302_v42 }
 0xb94   :  { %v4482_v14 = vmax.f32 %v14454_v50, 1e-15  ;;  %v4792_v23 = vmul.f32 0.5, %v4780_v11  ;;  %v4585_v57 = vmul.f32 0.6931472, %v9566_v48  ;;  %v4588_v56 = vmul.f32 %v14547_v17, %v4587_v59 }
 0xb95   :  { %9575 = vlog2.f32 %v4730_v49  ;;  %v14626_v18 = vclamps-f32 %v14615_v52, 0.9999999  ;;  %vm14629_vm3 = vcmp.lt.f32.partialorder %v4589_v1, 0.0004427343  ;;  %v4708_v13 = vmul.f32 %v4707_v16, %v14561_v3 }
 0xb96   :  { %v9568_v41 = vpop.eup %9567  ;;  %vm4710_vm10 = vcmp.lt.f32.partialorder %v4709_v10, 0.0004427343  ;;  %v4804_v42 = vmul.f32 %v4792_v23, %v4516_v7  ;;  %v4613_v47 = vmul.f32 -0.5, %v14590_v8  ;;  %9577 = vrcp.f32 %v4482_v14 }
 0xb97   :  { %v9570_v39 = vpop.eup %9569  ;;  %v4705_v44 = vmul.f32 0.6931472, %v9568_v41  ;;  %v4601_v35 = vadd.f32 1.0, %v14626_v18  ;;  %v4733_v2 = vmul.f32 -0.5, %v14607_v28  ;;  %v14638_v29 = vsub.f32 0.0, %v14626_v18 }
 0xb98   :  { %vm4436_vm9 = vcmp.gt.f32.partialorder %v14475_v0, 0.996  ;;  %v4816_v17 = vmul.f32 %v4804_v42, %v4468_v46  ;;  %v4591_v3 = vsel %vm14629_vm3, %v4588_v56, %v4585_v57  ;;  %v4616_v4 = vand.u32 2147483647, %v14590_v8 }
 0xb99   :  { %v4711_v51 = vsel %vm4710_vm10, %v4708_v13, %v4705_v44  ;;  %9579 = vlog2.f32 %v4601_v35  ;;  %v4481_v26 = vmax.f32 %v14465_v55, 1e-15  ;;  %v4721_v1 = vadd.f32 1.0, %v14638_v29 }
 0xb9a   :  { %v4779_v53 = vsub.f32 %v4591_v3, %v4711_v51  ;;  %v14646_v20 = vmax.f32 %v4816_v17, 0.0  ;;  %v4614_v38 = vadd.f32 1.0, %v4613_v47  ;;  %v4736_v59 = vand.u32 2147483647, %v14607_v28 }
 0xb9b   :  { %v14652_v33 = vsel %vm4436_vm9, 0.996, %v14475_v0  ;;  %v4515_v60 = vsel %vm4431_vm7, 1.004016, %v9570_v39  ;;  %v4734_v10 = vadd.f32 1.0, %v4733_v2  ;;  %9581 = vlog2.f32 %v4721_v1 }
 0xb9c   :  { %v9572_v32 = vpop.eup %9571  ;;  %v4791_v16 = vmul.f32 0.5, %v4779_v53  ;;  %v4840_v21 = vmul.f32 %v14646_v20, %v14646_v20  ;;  %v4458_v48 = vmul.f32 %v14356_v22, %v14576_v12  ;;  %v4604_v11 = vmul.f32 -0.5, %v14626_v18 }
 0xb9d   :  { %v14656_v31 = vpop.eup %9573  ;;  %v4724_v49 = vmul.f32 -0.5, %v14638_v29  ;;  %v4612_v7 = vmul.f32 0.6931472, %v9572_v32  ;;  %9583 = vrcp.f32 %v4481_v26  ;;  %v14665_v34 = vclamps-f32 %v14652_v33, 0.9999999 }
 0xb9e   :  { %v4803_v46 = vmul.f32 %v4791_v16, %v4515_v60  ;;  %v4862_v23 = vsel %vm490_vm13, %v4840_v21, 0.0  ;;  %v4615_v57 = vmul.f32 %v14590_v8, %v4614_v38  ;;  %vm14669_vm5 = vcmp.lt.f32.partialorder %v4616_v4, 0.0004427343 }
 0xb9f   :  { %v9576_v14 = vpop.eup %9575  ;;  %vm14673_vm2 = vcmp.lt.f32.partialorder %v4736_v59, 0.0004427343  ;;  %4863 = vadd.xlane.f32.xlu1 %v4862_v23  ;;  %v4735_v37 = vmul.f32 %v4734_v10, %v14607_v28  ;;  %v4628_v13 = vadd.f32 1.0, %v14665_v34  ;;  %v4605_v39 = vadd.f32 1.0, %v4604_v11 }
 0xba0   :  { %v4815_v12 = vmul.f32 %v4803_v46, %v4467_v40  ;;  %v4732_v56 = vmul.f32 0.6931472, %v9576_v14  ;;  %v4725_v42 = vadd.f32 1.0, %v4724_v49  ;;  %v14680_v44 = vsub.f32 0.0, %v14665_v34  ;;  %v9578_v8 = vpop.eup %9577 }
 0xba1   :  { %vm4435_vm12 = vcmp.gt.f32.partialorder %v14484_v27, 0.996  ;;  %v4618_v35 = vsel %vm14669_vm5, %v4615_v57, %v4612_v7  ;;  %9585 = vlog2.f32 %v4628_v13  ;;  %v4470_v2 = vmul.f32 %v14307_v61, %v4458_v48 }
 0xba2   :  { %v14683_v47 = vmax.f32 %v4815_v12, 0.0  ;;  %v4738_v40 = vsel %vm14673_vm2, %v4735_v37, %v4732_v56  ;;  %v4484_v3 = vmax.f32 %v14475_v0, 1e-15  ;;  %v4748_v51 = vadd.f32 1.0, %v14680_v44 }
 0xba3   :  { %v9580_v28 = vpop.eup %9579  ;;  %v4782_v17 = vsub.f32 %v4618_v35, %v4738_v40  ;;  %v4607_v4 = vand.u32 2147483647, %v14626_v18  ;;  %v4727_v26 = vand.u32 2147483647, %v14638_v29  ;;  %v14699_v1 = vsel %vm4435_vm12, 0.996, %v14484_v27 }
 0xba4   :  { %v4839_v53 = vmul.f32 %v14683_v47, %v14683_v47  ;;  %v4457_v61 = vmul.f32 %v14365_v19, %v14615_v52  ;;  %v4603_v59 = vmul.f32 0.6931472, %v9580_v28  ;;  %9587 = vlog2.f32 %v4748_v51 }
 0xba5   :  { %v4794_v38 = vmul.f32 0.5, %v4782_v17  ;;  %v9582_v32 = vpop.eup %9581  ;;  %v4518_v16 = vsel %vm4434_vm14, 1.004016, %v9578_v8  ;;  %v4606_v10 = vmul.f32 %v14626_v18, %v4605_v39  ;;  %v4726_v21 = vmul.f32 %v4725_v42, %v14638_v29 }
 0xba6   :  { %v4859_v60 = vsel %vm490_vm13, %v4839_v53, 0.0  ;;  %v4723_v11 = vmul.f32 0.6931472, %v9582_v32  ;;  %v4631_v49 = vmul.f32 -0.5, %v14665_v34  ;;  %v14710_v46 = vclamps-f32 %v14699_v1, 0.9999999 }
 0xba7   :  { %4860 = vadd.xlane.f32.xlu0 %v4859_v60  ;;  %v4806_v48 = vmul.f32 %v4794_v38, %v4518_v16  ;;  %v9584_v19 = vpop.eup %9583  ;;  %vm4608_vm7 = vcmp.lt.f32.partialorder %v4607_v4, 0.0004427343  ;;  %vm4728_vm15 = vcmp.lt.f32.partialorder %v4727_v26, 0.0004427343  ;;  %9589 = vrcp.f32 %v4484_v3 }
 0xba8   :  { %v4751_v52 = vmul.f32 -0.5, %v14680_v44  ;;  %v4609_v7 = vsel %vm4608_vm7, %v4606_v10, %v4603_v59  ;;  %v4729_v14 = vsel %vm4728_vm15, %v4726_v21, %v4723_v11  ;;  %v4619_v18 = vadd.f32 1.0, %v14710_v46 }
 0xba9   :  { %v4818_v50 = vmul.f32 %v4806_v48, %v4470_v2  ;;  %v4469_v29 = vmul.f32 %v4457_v61, %v14312_v62  ;;  %v4781_v23 = vsub.f32 %v4609_v7, %v4729_v14  ;;  %v4634_v57 = vand.u32 2147483647, %v14665_v34 }
 0xbaa   :  { %v14717_v41 = vsub.f32 0.0, %v14710_v46  ;;  %v4632_v12 = vadd.f32 1.0, %v4631_v49  ;;  %9591 = vlog2.f32 %v4619_v18  ;;  %vm4438_vm11 = vcmp.gt.f32.partialorder %v14598_v9, 0.996 }
 0xbab   :  { %v14719_v22 = vmax.f32 %v4818_v50, 0.0  ;;  %v9586_v56 = vpop.eup %9585  ;;  %v4517_v37 = vsel %vm4433_vm8, 1.004016, %v9584_v19  ;;  %v4793_v13 = vmul.f32 0.5, %v4781_v23  ;;  %v4752_v39 = vadd.f32 1.0, %v4751_v52 }
 0xbac   :  { %v4739_v62 = vadd.f32 1.0, %v14717_v41  ;;  %v4754_v8 = vand.u32 2147483647, %v14680_v44  ;;  %v4483_v35 = vmax.f32 %v14484_v27, 1e-15  ;;  %v4633_v3 = vmul.f32 %v14665_v34, %v4632_v12 }
 0xbad   :  { %v4842_v42 = vmul.f32 %v14719_v22, %v14719_v22  ;;  %vm4437_vm14 = vcmp.gt.f32.partialorder %v14656_v31, 0.996  ;;  %v4805_v40 = vmul.f32 %v4793_v13, %v4517_v37  ;;  %v4630_v28 = vmul.f32 0.6931472, %v9586_v56 }
 0xbae   :  { %9593 = vlog2.f32 %v4739_v62  ;;  %v14733_v55 = vsel %vm4438_vm11, 0.996, %v14598_v9  ;;  %v9588_v2 = vpop.eup %9587  ;;  %vm14737_vm1 = vcmp.lt.f32.partialorder %v4634_v57, 0.0004427343  ;;  %v4753_v26 = vmul.f32 %v4752_v39, %v14680_v44 }
 0xbaf   :  { %v4868_v17 = vsel %vm490_vm13, %v4842_v42, 0.0  ;;  %v4817_v53 = vmul.f32 %v4805_v40, %v4469_v29  ;;  %v4750_v4 = vmul.f32 0.6931472, %v9588_v2  ;;  %v14745_v38 = vsel %vm4437_vm14, 0.996, %v14656_v31 }
 0xbb0   :  { %4869 = vadd.xlane.f32.xlu1 %v4868_v17  ;;  %vm4755_vm4 = vcmp.lt.f32.partialorder %v4754_v8, 0.0004427343  ;;  %v4622_v61 = vmul.f32 -0.5, %v14710_v46  ;;  %v4742_v59 = vmul.f32 -0.5, %v14717_v41  ;;  %v14750_v34 = vclamps-f32 %v14733_v55, 0.9999999 }
 0xbb1   :  { %v9590_v32 = vpop.eup %9589  ;;  %v14752_v60 = vmax.f32 %v4817_v53, 0.0  ;;  %v4636_v16 = vsel %vm14737_vm1, %v4633_v3, %v4630_v28  ;;  %v4756_v44 = vsel %vm4755_vm4, %v4753_v26, %v4750_v4  ;;  %9595 = vrcp.f32 %v4483_v35 }
 0xbb2   :  { %v4460_v10 = vmul.f32 %v14374_v15, %v14652_v33  ;;  %v4784_v21 = vsub.f32 %v4636_v16, %v4756_v44  ;;  %v4646_v48 = vadd.f32 1.0, %v14750_v34  ;;  %v14760_v11 = vclamps-f32 %v14745_v38, 0.9999999 }
 0xbb3   :  { %v4841_v49 = vmul.f32 %v14752_v60, %v14752_v60  ;;  %v4625_v19 = vand.u32 2147483647, %v14710_v46  ;;  %v14766_v52 = vsub.f32 0.0, %v14750_v34  ;;  %v4623_v14 = vadd.f32 1.0, %v4622_v61 }
 0xbb4   :  { %v9592_v50 = vpop.eup %9591  ;;  %v4796_v7 = vmul.f32 0.5, %v4784_v21  ;;  %v4743_v18 = vadd.f32 1.0, %v4742_v59  ;;  %9597 = vlog2.f32 %v4646_v48  ;;  %v4520_v33 = vsel %vm4436_vm9, 1.004016, %v9590_v32 }
 0xbb5   :  { %v4865_v15 = vsel %vm490_vm13, %v4841_v49, 0.0  ;;  %v4745_v29 = vand.u32 2147483647, %v14717_v41  ;;  %v4766_v23 = vadd.f32 1.0, %v14766_v52  ;;  %v4472_v57 = vmul.f32 %v14317_v5, %v4460_v10 }
 0xbb6   :  { %4866 = vadd.xlane.f32.xlu0 %v4865_v15  ;;  %v4808_v12 = vmul.f32 %v4796_v7, %v4520_v33  ;;  %v4621_v56 = vmul.f32 0.6931472, %v9592_v50  ;;  %v4637_v37 = vadd.f32 1.0, %v14760_v11  ;;  %vm14775_vm8 = vcmp.lt.f32.partialorder %v4625_v19, 0.0004427343 }
 0xbb7   :  { %v4486_v62 = vmax.f32 %v14598_v9, 1e-15  ;;  %9599 = vlog2.f32 %v4766_v23  ;;  %v4624_v42 = vmul.f32 %v14710_v46, %v4623_v14  ;;  %v4744_v35 = vmul.f32 %v4743_v18, %v14717_v41 }
 0xbb8   :  { %v9594_v13 = vpop.eup %9593  ;;  %v4820_v0 = vmul.f32 %v4808_v12, %v4472_v57  ;;  %vm4746_vm3 = vcmp.lt.f32.partialorder %v4745_v29, 0.0004427343  ;;  %v4649_v5 = vmul.f32 -0.5, %v14750_v34  ;;  %9601 = vlog2.f32 %v4637_v37 }
 0xbb9   :  { %v4741_v8 = vmul.f32 0.6931472, %v9594_v13  ;;  %v4665_v40 = vsub.f32 0.0, %v14760_v11  ;;  %v4627_v2 = vsel %vm14775_vm8, %v4624_v42, %v4621_v56  ;;  %v4769_v3 = vmul.f32 -0.5, %v14766_v52 }
 0xbba   :  { %v14784_v28 = vmax.f32 %v4820_v0, 0.0  ;;  %v4459_v46 = vmul.f32 %v14385_v45, %v14699_v1  ;;  %9603 = vrcp.f32 %v4486_v62  ;;  %v4485_v61 = vmax.f32 %v14656_v31, 1e-15 }
 0xbbb   :  { %v4747_v17 = vsel %vm4746_vm3, %v4744_v35, %v4741_v8  ;;  %v9596_v51 = vpop.eup %9595  ;;  %v4757_v41 = vadd.f32 1.0, %v4665_v40  ;;  %v4650_v44 = vadd.f32 1.0, %v4649_v5  ;;  %v4770_v10 = vadd.f32 1.0, %v4769_v3 }
 0xbbc   :  { %v4783_v53 = vsub.f32 %v4627_v2, %v4747_v17  ;;  %v4844_v4 = vmul.f32 %v14784_v28, %v14784_v28  ;;  %v4519_v16 = vsel %vm4435_vm12, 1.004016, %v9596_v51  ;;  %v4471_v45 = vmul.f32 %v4459_v46, %v14322_v6 }
 0xbbd   :  { %9605 = vlog2.f32 %v4757_v41  ;;  %v4652_v21 = vand.u32 2147483647, %v14750_v34  ;;  %v4772_v48 = vand.u32 2147483647, %v14766_v52  ;;  %v4640_v19 = vmul.f32 -0.5, %v14760_v11 }
 0xbbe   :  { %v4795_v26 = vmul.f32 0.5, %v4783_v53  ;;  %v9598_v59 = vpop.eup %9597  ;;  %v4874_v32 = vsel %vm490_vm13, %v4844_v4, 0.0  ;;  %v4760_v50 = vmul.f32 -0.5, %v4665_v40  ;;  %9607 = vrcp.f32 %v4485_v61 }
 0xbbf   :  { %4875 = vadd.xlane.f32.xlu1 %v4874_v32  ;;  %v4648_v49 = vmul.f32 0.6931472, %v9598_v59  ;;  %v4651_v27 = vmul.f32 %v14750_v34, %v4650_v44  ;;  %v4771_v15 = vmul.f32 %v4770_v10, %v14766_v52  ;;  %v4462_v6 = vmul.f32 %v14395_v24, %v14733_v55 }
 0xbc0   :  { %v4807_v1 = vmul.f32 %v4795_v26, %v4519_v16  ;;  %vm4653_vm10 = vcmp.lt.f32.partialorder %v4652_v21, 0.0004427343  ;;  %vm4773_vm9 = vcmp.lt.f32.partialorder %v4772_v48, 0.0004427343  ;;  %v4641_v12 = vadd.f32 1.0, %v4640_v19 }
 0xbc1   :  { %v9600_v7 = vpop.eup %9599  ;;  %v4654_v23 = vsel %vm4653_vm10, %v4651_v27, %v4648_v49  ;;  %v4761_v56 = vadd.f32 1.0, %v4760_v50  ;;  %v4643_v39 = vand.u32 2147483647, %v14760_v11  ;;  %v4763_v52 = vand.u32 2147483647, %v4665_v40 }
 0xbc2   :  { %v4819_v14 = vmul.f32 %v4807_v1, %v4471_v45  ;;  %v4768_v18 = vmul.f32 0.6931472, %v9600_v7  ;;  %v9602_v33 = vpop.eup %9601  ;;  %v4642_v55 = vmul.f32 %v14760_v11, %v4641_v12  ;;  %v4474_v2 = vmul.f32 %v14327_v25, %v4462_v6  ;;  %v5051_v25 = vld [vmem:[%s17304_s8] sm:$0xff]  ;;  %v5054_v45 = vld [vmem:[%s17304_s8 + $0x18] sm:$0xff] }
 0xbc3   :  { %v4639_v62 = vmul.f32 0.6931472, %v9602_v33  ;;  %v4762_v5 = vmul.f32 %v4761_v56, %v4665_v40  ;;  %vm4644_vm5 = vcmp.lt.f32.partialorder %v4643_v39, 0.0004427343  ;;  %vm4764_vm2 = vcmp.lt.f32.partialorder %v4763_v52, 0.0004427343 }
 0xbc4   :  { %v14803_v29 = vmax.f32 %v4819_v14, 0.0  ;;  %v4774_v57 = vsel %vm4773_vm9, %v4771_v15, %v4768_v18  ;;  %v9604_v37 = vpop.eup %9603  ;;  %v4461_v41 = vmul.f32 %v14414_v43, %v14745_v38  ;;  %v5052_v40 = vld [vmem:[%s17304_s8 + $0x8] sm:$0xff] }
 0xbc5   :  { %v4786_v34 = vsub.f32 %v4654_v23, %v4774_v57  ;;  %v4522_v24 = vsel %vm4438_vm11, 1.004016, %v9604_v37  ;;  %v4645_v3 = vsel %vm4644_vm5, %v4642_v55, %v4639_v62  ;;  %v8729_v59 = vpack.c.bf16 %v5052_v40, %v5051_v25 }
 0xbc6   :  { %v4843_v13 = vmul.f32 %v14803_v29, %v14803_v29  ;;  %v4473_v43 = vmul.f32 %v4461_v41, %v14332_v36  ;;  %v5053_v36 = vld [vmem:[%s17304_s8 + $0x10] sm:$0xff] }
 0xbc7   :  { %v9606_v0 = vpop.eup %9605  ;;  %v4798_v8 = vmul.f32 0.5, %v4786_v34  ;;  %8730 = vmatprep.subr.bf16.mxu0 %v8729_v59  ;;  %v8733_v1 = vpack.c.bf16 %v5054_v45, %v5053_v36 }
 0xbc8   :  { %v4871_v42 = vsel %vm490_vm13, %v4843_v13, 0.0  ;;  %v4759_v35 = vmul.f32 0.6931472, %v9606_v0  ;;  %v9608_v46 = vpop.eup %9607  ;;  %8732 = vmatpush3.bf16.msra.mxu0 %v8729_v59 }
 0xbc9   :  { %4872 = vadd.xlane.f32.xlu0 %v4871_v42  ;;  %v4810_v17 = vmul.f32 %v4798_v8, %v4522_v24  ;;  %v4521_v11 = vsel %vm4437_vm14, 1.004016, %v9608_v46  ;;  %8734 = vmatprep.subr.bf16.mxu0 %v8733_v1 }
 0xbca   :  { %v4765_v51 = vsel %vm4764_vm2, %v4762_v5, %v4759_v35 }
 0xbcb   :  { %v4822_v53 = vmul.f32 %v4810_v17, %v4474_v2  ;;  %v4785_v4 = vsub.f32 %v4645_v3, %v4765_v51 }
 0xbcc   :  { %8736 = vmatpush3.bf16.msra.mxu0 %v8733_v1 }
 0xbcd   :  { %v14817_v26 = vmax.f32 %v4822_v53, 0.0  ;;  %v4797_v9 = vmul.f32 0.5, %v4785_v4 }
 0xbcf   :  { %v4846_v61 = vmul.f32 %v14817_v26, %v14817_v26  ;;  %v4809_v38 = vmul.f32 %v4797_v9, %v4521_v11 }
 0xbd1   :  { %v4880_v32 = vsel %vm490_vm13, %v4846_v61, 0.0  ;;  %v4821_v16 = vmul.f32 %v4809_v38, %v4473_v43 }
 0xbd2   :  { %4881 = vadd.xlane.f32.xlu1 %v4880_v32 }
 0xbd3   :  { %v14831_v31 = vmax.f32 %v4821_v16, 0.0 }
 0xbd5   :  { %v4845_v44 = vmul.f32 %v14831_v31, %v14831_v31 }
 0xbd7   :  { %v4877_v10 = vsel %vm490_vm13, %v4845_v44, 0.0 }
 0xbd8   :  { %4878 = vadd.xlane.f32.xlu0 %v4877_v10 }
 0xc0f   :  { %v4852_v21 = vpop.xlane.xlu1 %4851 }
 0xc10   :  { %v4884_v48 = vmax.f32 %v4852_v21, 1e-30 }
 0xc12   :  { %9609 = vrsqrt.f32 %v4884_v48 }
 0xc15   :  { %v4849_v49 = vpop.xlane.xlu0 %4848 }
 0xc16   :  { %v4883_v19 = vmax.f32 %v4849_v49, 1e-30 }
 0xc18   :  { %9611 = vrsqrt.f32 %v4883_v19 }
 0xc19   :  { %v4858_v14 = vpop.xlane.xlu1 %4857 }
 0xc1a   :  { %v4886_v27 = vmax.f32 %v4858_v14, 1e-30 }
 0xc1c   :  { %v9610_v50 = vpop.eup %9609  ;;  %9613 = vrsqrt.f32 %v4886_v27 }
 0xc1d   :  { %v4908_v7 = vmul.f32 %v9610_v50, %v4884_v48 }
 0xc1f   :  { %v8159_v18 = vclamps-f32 %v4908_v7, 15.0 }
 0xc20   :  { %v4855_v6 = vpop.xlane.xlu0 %4854 }
 0xc21   :  { %9615 = vtanh.f32 %v8159_v18  ;;  %v4885_v23 = vmax.f32 %v4855_v6, 1e-30 }
 0xc22   :  { %v9612_v15 = vpop.eup %9611 }
 0xc23   :  { %v4907_v33 = vmul.f32 %v9612_v15, %v4883_v19  ;;  %9617 = vrsqrt.f32 %v4885_v23 }
 0xc25   :  { %v8158_v57 = vclamps-f32 %v4907_v33, 15.0 }
 0xc26   :  { %v9614_v12 = vpop.eup %9613 }
 0xc27   :  { %9619 = vtanh.f32 %v8158_v57  ;;  %v4910_v37 = vmul.f32 %v9614_v12, %v4886_v27 }
 0xc29   :  { %v8161_v34 = vclamps-f32 %v4910_v37, 15.0 }
 0xc2b   :  { %v9616_v56 = vpop.eup %9615 }
 0xc2c   :  { %v5004_v13 = vmax.f32 %v9616_v56, 1e-15  ;;  %vm4956_vm12 = vcmp.gt.f32.partialorder %v9616_v56, 0.996  ;;  %v4864_v62 = vpop.xlane.xlu1 %4863 }
 0xc2d   :  { %v9618_v39 = vpop.eup %9617  ;;  %v14843_v52 = vsel %vm4956_vm12, 0.996, %v9616_v56  ;;  %v4888_v8 = vmax.f32 %v4864_v62, 1e-30 }
 0xc2e   :  { %9621 = vrcp.f32 %v5004_v13  ;;  %v4909_v42 = vmul.f32 %v9618_v39, %v4885_v23  ;;  %v4980_v24 = vmul.f32 %v9610_v50, %v14843_v52 }
 0xc2f   :  { %9623 = vtanh.f32 %v8161_v34 }
 0xc30   :  { %v8160_v55 = vclamps-f32 %v4909_v42, 15.0  ;;  %9625 = vrsqrt.f32 %v4888_v8  ;;  %v4992_v3 = vmul.f32 %v4980_v24, %v14503_v30 }
 0xc31   :  { %v9620_v0 = vpop.eup %9619 }
 0xc32   :  { %vm4955_vm7 = vcmp.gt.f32.partialorder %v9620_v0, 0.996  ;;  %9627 = vtanh.f32 %v8160_v55  ;;  %v5003_v2 = vmax.f32 %v9620_v0, 1e-15 }
 0xc33   :  { %v14847_v35 = vsel %vm4955_vm7, 0.996, %v9620_v0 }
 0xc34   :  { %v4979_v5 = vmul.f32 %v9612_v15, %v14847_v35  ;;  %v4861_v51 = vpop.xlane.xlu0 %4860  ;;  %9629 = vrcp.f32 %v5003_v2 }
 0xc35   :  { %v4887_v53 = vmax.f32 %v4861_v51, 1e-30 }
 0xc36   :  { %v4991_v17 = vmul.f32 %v4979_v5, %v14528_v58 }
 0xc37   :  { %9631 = vrsqrt.f32 %v4887_v53 }
 0xc38   :  { %v9622_v46 = vpop.eup %9621  ;;  %8564 = vmatprep.mubr.msk.f32.mxu0 %vm490_vm13, %v4991_v17 }
 0xc39   :  { %v9624_v41 = vpop.eup %9623  ;;  %8565 = vmatmul.mubr.msk.f32.vlgmr.msra.gmra.mrb[24].mxu0 %vm490_vm13, %v4992_v3  ;;  %v14855_v4 = vsel %vm4956_vm12, 1.004016, %v9622_v46 }
 0xc3a   :  { %vm4958_vm15 = vcmp.gt.f32.partialorder %v9624_v41, 0.996  ;;  %v5006_v9 = vmax.f32 %v9624_v41, 1e-15  ;;  %v9626_v11 = vpop.eup %9625 }
 0xc3b   :  { %v4912_v58 = vmul.f32 %v9626_v11, %v4888_v8  ;;  %v14858_v30 = vsel %vm4958_vm15, 0.996, %v9624_v41 }
 0xc3c   :  { %9633 = vrcp.f32 %v5006_v9  ;;  %v9628_v25 = vpop.eup %9627  ;;  %v4982_v32 = vmul.f32 %v9614_v12, %v14858_v30 }
 0xc3d   :  { %v8163_v40 = vclamps-f32 %v4912_v58, 15.0  ;;  %v4870_v61 = vpop.xlane.xlu1 %4869  ;;  %vm4957_vm11 = vcmp.gt.f32.partialorder %v9628_v25, 0.996  ;;  %v5005_v10 = vmax.f32 %v9628_v25, 1e-15 }
 0xc3e   :  { %v9630_v43 = vpop.eup %9629  ;;  %v4890_v38 = vmax.f32 %v4870_v61, 1e-30  ;;  %v14861_v59 = vsel %vm4957_vm11, 0.996, %v9628_v25  ;;  %v4994_v21 = vmul.f32 %v4982_v32, %v14558_v63 }
 0xc3f   :  { %9635 = vtanh.f32 %v8163_v40  ;;  %v4981_v16 = vmul.f32 %v9618_v39, %v14861_v59  ;;  %v14866_v44 = vsel %vm4955_vm7, 1.004016, %v9630_v43 }
 0xc40   :  { %9637 = vrsqrt.f32 %v4890_v38 }
 0xc41   :  { %v9632_v36 = vpop.eup %9631  ;;  %v4993_v45 = vmul.f32 %v4981_v16, %v14582_v54  ;;  %9639 = vrcp.f32 %v5005_v10 }
 0xc42   :  { %v4911_v1 = vmul.f32 %v9632_v36, %v4887_v53 }
 0xc43   :  { %8567 = vmatprep.mubr.msk.f32.mxu0 %vm490_vm13, %v4993_v45  ;;  %v4867_v19 = vpop.xlane.xlu0 %4866 }
 0xc44   :  { %v8162_v49 = vclamps-f32 %v4911_v1, 15.0  ;;  %8568 = vmatmul.mubr.msk.f32.gmra.mrb[26].mxu0 %vm490_vm13, %v4994_v21  ;;  %v4889_v50 = vmax.f32 %v4867_v19, 1e-30 }
 0xc46   :  { %v9634_v48 = vpop.eup %9633  ;;  %9641 = vtanh.f32 %v8162_v49 }
 0xc47   :  { %v14873_v7 = vsel %vm4958_vm15, 1.004016, %v9634_v48  ;;  %9643 = vrsqrt.f32 %v4889_v50 }
 0xc49   :  { %v9636_v14 = vpop.eup %9635 }
 0xc4a   :  { %v9638_v27 = vpop.eup %9637  ;;  %vm4960_vm14 = vcmp.gt.f32.partialorder %v9636_v14, 0.996  ;;  %v5008_v18 = vmax.f32 %v9636_v14, 1e-15 }
 0xc4b   :  { %v4914_v54 = vmul.f32 %v9638_v27, %v4890_v38  ;;  %v9640_v33 = vpop.eup %9639  ;;  %v14876_v23 = vsel %vm4960_vm14, 0.996, %v9636_v14 }
 0xc4c   :  { %v4876_v15 = vpop.xlane.xlu1 %4875  ;;  %9645 = vrcp.f32 %v5008_v18  ;;  %v14879_v57 = vsel %vm4957_vm11, 1.004016, %v9640_v33  ;;  %v4984_v34 = vmul.f32 %v9626_v11, %v14876_v23 }
 0xc4d   :  { %v8165_v63 = vclamps-f32 %v4914_v54, 15.0  ;;  %v4892_v6 = vmax.f32 %v4876_v15, 1e-30 }
 0xc4e   :  { %v4996_v24 = vmul.f32 %v4984_v34, %v14646_v20 }
 0xc4f   :  { %9647 = vtanh.f32 %v8165_v63 }
 0xc50   :  { %v9642_v12 = vpop.eup %9641  ;;  %9649 = vrsqrt.f32 %v4892_v6 }
 0xc51   :  { %v9644_v56 = vpop.eup %9643  ;;  %vm4959_vm1 = vcmp.gt.f32.partialorder %v9642_v12, 0.996  ;;  %v5007_v0 = vmax.f32 %v9642_v12, 1e-15 }
 0xc52   :  { %v4913_v37 = vmul.f32 %v9644_v56, %v4889_v50  ;;  %v14882_v13 = vsel %vm4959_vm1, 0.996, %v9642_v12 }
 0xc53   :  { %v4983_v39 = vmul.f32 %v9632_v36, %v14882_v13 }
 0xc54   :  { %v8164_v62 = vclamps-f32 %v4913_v37, 15.0 }
 0xc55   :  { %v4995_v42 = vmul.f32 %v4983_v39, %v14683_v47 }
 0xc56   :  { %9651 = vtanh.f32 %v8164_v62  ;;  %v4873_v8 = vpop.xlane.xlu0 %4872  ;;  %v9646_v5 = vpop.eup %9645 }
 0xc57   :  { %v4891_v55 = vmax.f32 %v4873_v8, 1e-30  ;;  %8570 = vmatprep.mubr.msk.f32.mxu0 %vm490_vm13, %v4995_v42  ;;  %9653 = vrcp.f32 %v5007_v0  ;;  %v14891_v17 = vsel %vm4960_vm14, 1.004016, %v9646_v5 }
 0xc58   :  { %8571 = vmatmul.mubr.msk.f32.gmra.mrb[28].mxu0 %vm490_vm13, %v4996_v24 }
 0xc59   :  { %v9648_v2 = vpop.eup %9647  ;;  %9655 = vrsqrt.f32 %v4891_v55 }
 0xc5a   :  { %v9650_v3 = vpop.eup %9649  ;;  %vm4962_vm4 = vcmp.gt.f32.partialorder %v9648_v2, 0.996  ;;  %v5010_v47 = vmax.f32 %v9648_v2, 1e-15 }
 0xc5b   :  { %v4916_v51 = vmul.f32 %v9650_v3, %v4892_v6  ;;  %v14894_v20 = vsel %vm4962_vm4, 0.996, %v9648_v2 }
 0xc5c   :  { %9657 = vrcp.f32 %v5010_v47  ;;  %v4986_v25 = vmul.f32 %v9638_v27, %v14894_v20 }
 0xc5d   :  { %v8167_v46 = vclamps-f32 %v4916_v51, 15.0 }
 0xc5e   :  { %v4998_v36 = vmul.f32 %v4986_v25, %v14719_v22 }
 0xc5f   :  { %v4882_v41 = vpop.xlane.xlu1 %4881  ;;  %9659 = vtanh.f32 %v8167_v46 }
 0xc60   :  { %v9652_v53 = vpop.eup %9651  ;;  %v4894_v11 = vmax.f32 %v4882_v41, 1e-30 }
 0xc61   :  { %v9654_v9 = vpop.eup %9653  ;;  %vm4961_vm8 = vcmp.gt.f32.partialorder %v9652_v53, 0.996  ;;  %v5009_v45 = vmax.f32 %v9652_v53, 1e-15 }
 0xc62   :  { %v14897_v58 = vsel %vm4961_vm8, 0.996, %v9652_v53  ;;  %v14901_v40 = vsel %vm4959_vm1, 1.004016, %v9654_v9  ;;  %9661 = vrsqrt.f32 %v4894_v11 }
 0xc63   :  { %v9656_v61 = vpop.eup %9655  ;;  %v4985_v43 = vmul.f32 %v9644_v56, %v14897_v58 }
 0xc64   :  { %v4915_v38 = vmul.f32 %v9656_v61, %v4891_v55 }
 0xc65   :  { %v4997_v32 = vmul.f32 %v4985_v43, %v14752_v60  ;;  %v4879_v10 = vpop.xlane.xlu0 %4878 }
 0xc66   :  { %v8166_v16 = vclamps-f32 %v4915_v38, 15.0  ;;  %v4893_v1 = vmax.f32 %v4879_v10, 1e-30  ;;  %v9658_v21 = vpop.eup %9657 }
 0xc67   :  { %8573 = vmatprep.mubr.msk.f32.mxu0 %vm490_vm13, %v4997_v32  ;;  %v14909_v48 = vsel %vm4962_vm4, 1.004016, %v9658_v21 }
 0xc68   :  { %9663 = vtanh.f32 %v8166_v16  ;;  %8574 = vmatmul.mubr.msk.f32.gmra.mrb[30].mxu0 %vm490_vm13, %v4998_v36 }
 0xc69   :  { %9665 = vrsqrt.f32 %v4893_v1  ;;  %v9660_v49 = vpop.eup %9659 }
 0xc6a   :  { %9667 = vrcp.f32 %v5009_v45  ;;  %vm4964_vm3 = vcmp.gt.f32.partialorder %v9660_v49, 0.996  ;;  %v5012_v14 = vmax.f32 %v9660_v49, 1e-15 }
 0xc6b   :  { %v14912_v22 = vsel %vm4964_vm3, 0.996, %v9660_v49 }
 0xc6c   :  { %v9662_v19 = vpop.eup %9661  ;;  %v4988_v33 = vmul.f32 %v9650_v3, %v14912_v22 }
 0xc6d   :  { %v4918_v60 = vmul.f32 %v9662_v19, %v4894_v11 }
 0xc6e   :  { %v5000_v39 = vmul.f32 %v4988_v33, %v14784_v28 }
 0xc6f   :  { %v8169_v50 = vclamps-f32 %v4918_v60, 15.0 }
 0xc71   :  { %9669 = vtanh.f32 %v8169_v50 }
 0xc72   :  { %v9664_v27 = vpop.eup %9663  ;;  %9671 = vrcp.f32 %v5012_v14 }
 0xc73   :  { %v9666_v54 = vpop.eup %9665  ;;  %vm4963_vm10 = vcmp.gt.f32.partialorder %v9664_v27, 0.996  ;;  %v5011_v34 = vmax.f32 %v9664_v27, 1e-15 }
 0xc74   :  { %v9668_v18 = vpop.eup %9667  ;;  %v4917_v63 = vmul.f32 %v9666_v54, %v4893_v1  ;;  %v14915_v15 = vsel %vm4963_vm10, 0.996, %v9664_v27 }
 0xc75   :  { %v4987_v6 = vmul.f32 %v9656_v61, %v14915_v15  ;;  %v14920_v12 = vsel %vm4961_vm8, 1.004016, %v9668_v18 }
 0xc76   :  { %v8168_v56 = vclamps-f32 %v4917_v63, 15.0 }
 0xc77   :  { %v4999_v37 = vmul.f32 %v4987_v6, %v14803_v29 }
 0xc78   :  { %9673 = vtanh.f32 %v8168_v56 }
 0xc79   :  { %8576 = vmatprep.mubr.msk.f32.mxu0 %vm490_vm13, %v4999_v37  ;;  %9675 = vrcp.f32 %v5011_v34 }
 0xc7a   :  { %8577 = vmatmul.mubr.msk.f32.gmra.mrb[32].mxu0 %vm490_vm13, %v5000_v39 }
 0xc7b   :  { %v9670_v62 = vpop.eup %9669 }
 0xc7c   :  { %v9672_v0 = vpop.eup %9671  ;;  %vm4966_vm9 = vcmp.gt.f32.partialorder %v9670_v62, 0.996  ;;  %v5014_v8 = vmax.f32 %v9670_v62, 1e-15 }
 0xc7d   :  { %v14927_v42 = vsel %vm4964_vm3, 1.004016, %v9672_v0  ;;  %v14930_v24 = vsel %vm4966_vm9, 0.996, %v9670_v62 }
 0xc7e   :  { %9677 = vrcp.f32 %v5014_v8  ;;  %v4990_v2 = vmul.f32 %v9662_v19, %v14930_v24 }
 0xc80   :  { %v5002_v46 = vmul.f32 %v4990_v2, %v14817_v26 }
 0xc82   :  { %v9674_v29 = vpop.eup %9673 }
 0xc83   :  { %vm4965_vm5 = vcmp.gt.f32.partialorder %v9674_v29, 0.996  ;;  %v5013_v55 = vmax.f32 %v9674_v29, 1e-15  ;;  %v9676_v28 = vpop.eup %9675 }
 0xc84   :  { %v14932_v5 = vsel %vm4965_vm5, 0.996, %v9674_v29  ;;  %v14937_v51 = vsel %vm4963_vm10, 1.004016, %v9676_v28 }
 0xc85   :  { %v4989_v3 = vmul.f32 %v9666_v54, %v14932_v5  ;;  %9679 = vrcp.f32 %v5013_v55 }
 0xc87   :  { %v5001_v47 = vmul.f32 %v4989_v3, %v14831_v31 }
 0xc88   :  { %v9678_v53 = vpop.eup %9677 }
 0xc89   :  { %8579 = vmatprep.mubr.msk.f32.mxu0 %vm490_vm13, %v5001_v47  ;;  %v14944_v41 = vsel %vm4966_vm9, 1.004016, %v9678_v53  ;;  %v8184_v47 = vclamps-f32 %v14843_v52, 0.9999999  ;;  %v15017_v52 = vclamps-f32 %v14861_v59, 0.9999999 }
 0xc8a   :  { %8580 = vmatmul.mubr.msk.f32.gmra.mrb[34].mxu0 %vm490_vm13, %v5002_v46  ;;  %v8183_v46 = vclamps-f32 %v14847_v35, 0.9999999 }
 0xc8b   :  { %v5447_v53 = vsub.f32 0.0, %v8184_v47 }
 0xc8c   :  { %v5344_v59 = vand.u32 2147483647, %v8183_v46 }
 0xc8e   :  { %vm15037_vm7 = vcmp.lt.f32.partialorder %v5344_v59, 0.0004427343 }
 0xc8f   :  { %v9680_v9 = vpop.eup %9679 }
 0xc90   :  { %v14946_v11 = vsel %vm4965_vm5, 1.004016, %v9680_v9  ;;  %v5446_v9 = vsub.f32 0.0, %v8183_v46 }
 0xd0c   :  { %v14948_v25 = vpop.f32.mrb[24].mxu0 }
 0xd0d   :  { %v5219_v61 = vmul.f32 %v14948_v25, %v14948_v25  ;;  %v14952_v31 = vpop.f32.mrb[25].mxu0 }
 0xd0e   :  { %v5218_v26 = vmul.f32 %v14952_v31, %v14952_v31 }
 0xd0f   :  { %v5233_v43 = vsel %vm490_vm13, %v5219_v61, 0.0  ;;  %v5467_v61 = vadd.f32 1.0, %v5447_v53 }
 0xd10   :  { %5234 = vadd.xlane.f32.xlu1 %v5233_v43  ;;  %v5230_v38 = vsel %vm490_vm13, %v5218_v26, 0.0  ;;  %v15011_v26 = vclamps-f32 %v14858_v30, 0.9999999  ;;  %v5347_v43 = vadd.f32 1.0, %v8184_v47 }
 0xd11   :  { %5231 = vadd.xlane.f32.xlu0 %v5230_v38  ;;  %v5458_v38 = vadd.f32 1.0, %v5446_v9  ;;  %9681 = vlog2.f32 %v5467_v61 }
 0xd12   :  { %9683 = vlog2.f32 %v5347_v43  ;;  %v5365_v30 = vadd.f32 1.0, %v15011_v26  ;;  %v15030_v43 = vclamps-f32 %v14876_v23, 0.9999999 }
 0xd13   :  { %9685 = vlog2.f32 %v5458_v38 }
 0xd17   :  { %v14958_v32 = vpop.f32.mrb[26].mxu0 }
 0xd18   :  { %v5221_v16 = vmul.f32 %v14958_v32, %v14958_v32  ;;  %v14962_v10 = vpop.f32.mrb[27].mxu0 }
 0xd19   :  { %v5220_v36 = vmul.f32 %v14962_v10, %v14962_v10 }
 0xd1a   :  { %v5239_v45 = vsel %vm490_vm13, %v5221_v16, 0.0  ;;  %v5338_v16 = vadd.f32 1.0, %v8183_v46 }
 0xd1b   :  { %5240 = vadd.xlane.f32.xlu1 %v5239_v45  ;;  %v5236_v1 = vsel %vm490_vm13, %v5220_v36, 0.0  ;;  %v15014_v36 = vsub.f32 0.0, %v15011_v26  ;;  %v5350_v45 = vmul.f32 -0.5, %v8184_v47 }
 0xd1c   :  { %5237 = vadd.xlane.f32.xlu0 %v5236_v1  ;;  %9687 = vlog2.f32 %v5338_v16  ;;  %v5470_v1 = vmul.f32 -0.5, %v5447_v53 }
 0xd1d   :  { %v5485_v35 = vadd.f32 1.0, %v15014_v36 }
 0xd1f   :  { %9689 = vlog2.f32 %v5485_v35 }
 0xd20   :  { %9691 = vlog2.f32 %v5365_v30 }
 0xd2b   :  { %v14968_v21 = vpop.f32.mrb[28].mxu0 }
 0xd2c   :  { %v5223_v49 = vmul.f32 %v14968_v21, %v14968_v21  ;;  %v14972_v19 = vpop.f32.mrb[29].mxu0 }
 0xd2d   :  { %v5222_v60 = vmul.f32 %v14972_v19, %v14972_v19 }
 0xd2e   :  { %v5245_v50 = vsel %vm490_vm13, %v5223_v49, 0.0  ;;  %v5341_v49 = vmul.f32 -0.5, %v8183_v46 }
 0xd2f   :  { %5246 = vadd.xlane.f32.xlu1 %v5245_v50  ;;  %v5242_v14 = vsel %vm490_vm13, %v5222_v60, 0.0  ;;  %v5461_v60 = vmul.f32 -0.5, %v5446_v9  ;;  %v5351_v50 = vadd.f32 1.0, %v5350_v45 }
 0xd30   :  { %5243 = vadd.xlane.f32.xlu0 %v5242_v14  ;;  %v5353_v14 = vand.u32 2147483647, %v8184_v47 }
 0xd32   :  { %vm15025_vm2 = vcmp.lt.f32.partialorder %v5353_v14, 0.0004427343 }
 0xd3b   :  { %v14978_v27 = vpop.f32.mrb[30].mxu0 }
 0xd3c   :  { %v5225_v54 = vmul.f32 %v14978_v27, %v14978_v27  ;;  %v14982_v18 = vpop.f32.mrb[31].mxu0 }
 0xd3d   :  { %v5224_v63 = vmul.f32 %v14982_v18, %v14982_v18 }
 0xd3e   :  { %v5251_v33 = vsel %vm490_vm13, %v5225_v54, 0.0  ;;  %v9682_v54 = vpop.eup %9681 }
 0xd3f   :  { %5252 = vadd.xlane.f32.xlu1 %v5251_v33  ;;  %v5248_v6 = vsel %vm490_vm13, %v5224_v63, 0.0  ;;  %v5473_v63 = vand.u32 2147483647, %v5447_v53  ;;  %v5356_v33 = vadd.f32 1.0, %v15017_v52 }
 0xd40   :  { %5249 = vadd.xlane.f32.xlu0 %v5248_v6  ;;  %v15023_v6 = vsub.f32 0.0, %v15017_v52 }
 0xd41   :  { %vm15032_vm12 = vcmp.lt.f32.partialorder %v5473_v63, 0.0004427343  ;;  %9693 = vlog2.f32 %v5356_v33 }
 0xd42   :  { %v5476_v16 = vadd.f32 1.0, %v15023_v6 }
 0xd44   :  { %9695 = vlog2.f32 %v5476_v16 }
 0xd4d   :  { %v14988_v56 = vpop.f32.mrb[32].mxu0 }
 0xd4e   :  { %v5227_v37 = vmul.f32 %v14988_v56, %v14988_v56  ;;  %v14992_v34 = vpop.f32.mrb[33].mxu0 }
 0xd4f   :  { %v5226_v39 = vmul.f32 %v14992_v34, %v14992_v34 }
 0xd50   :  { %v5257_v62 = vsel %vm490_vm13, %v5227_v37, 0.0  ;;  %v5471_v37 = vadd.f32 1.0, %v5470_v1  ;;  %v5464_v1 = vand.u32 2147483647, %v5446_v9 }
 0xd51   :  { %5258 = vadd.xlane.f32.xlu1 %v5257_v62  ;;  %v5254_v0 = vsel %vm490_vm13, %v5226_v39, 0.0  ;;  %v9684_v39 = vpop.eup %9683  ;;  %v5342_v62 = vadd.f32 1.0, %v5341_v49 }
 0xd52   :  { %5255 = vadd.xlane.f32.xlu0 %v5254_v0  ;;  %v5462_v0 = vadd.f32 1.0, %v5461_v60  ;;  %v5349_v45 = vmul.f32 0.6931472, %v9684_v39  ;;  %v5472_v35 = vmul.f32 %v5471_v37, %v5447_v53  ;;  %v5488_v53 = vmul.f32 -0.5, %v15014_v36 }
 0xd53   :  { %v5343_v49 = vmul.f32 %v8183_v46, %v5342_v62  ;;  %v15049_v37 = vclamps-f32 %v14882_v13, 0.9999999  ;;  %v15052_v46 = vsub.f32 0.0, %v15030_v43  ;;  %vm15056_vm15 = vcmp.lt.f32.partialorder %v5464_v1, 0.0004427343 }
 0xd54   :  { %v5463_v23 = vmul.f32 %v5462_v0, %v5446_v9  ;;  %v5371_v62 = vand.u32 2147483647, %v15011_v26  ;;  %v5489_v16 = vadd.f32 1.0, %v5488_v53 }
 0xd55   :  { %v5503_v1 = vadd.f32 1.0, %v15052_v46 }
 0xd56   :  { %vm15073_vm11 = vcmp.lt.f32.partialorder %v5371_v62, 0.0004427343 }
 0xd5d   :  { %v14998_v8 = vpop.f32.mrb[34].mxu0 }
 0xd5e   :  { %v5229_v29 = vmul.f32 %v14998_v8, %v14998_v8  ;;  %v15002_v55 = vpop.f32.mrb[35].mxu0 }
 0xd5f   :  { %17621 = vst [vmem:[#allocation21_spill] sm:$0xff] %v15002_v55  ;;  %v5228_v28 = vmul.f32 %v15002_v55, %v15002_v55 }
 0xd60   :  { %v5263_v2 = vsel %vm490_vm13, %v5229_v29, 0.0  ;;  %v9686_v29 = vpop.eup %9685 }
 0xd61   :  { %5264 = vadd.xlane.f32.xlu1 %v5263_v2  ;;  %v5260_v3 = vsel %vm490_vm13, %v5228_v28, 0.0  ;;  %v5352_v28 = vmul.f32 %v8184_v47, %v5351_v50  ;;  %v9688_v61 = vpop.eup %9687  ;;  %v5460_v60 = vmul.f32 0.6931472, %v9686_v29  ;;  %v5368_v50 = vmul.f32 -0.5, %v15011_v26 }
 0xd62   :  { %5261 = vadd.xlane.f32.xlu0 %v5260_v3  ;;  %v5469_v3 = vmul.f32 0.6931472, %v9682_v54  ;;  %v5340_v63 = vmul.f32 0.6931472, %v9688_v61  ;;  %v9690_v0 = vpop.eup %9689  ;;  %v5383_v2 = vadd.f32 1.0, %v15030_v43 }
 0xd63   :  { %v5355_v9 = vsel %vm15025_vm2, %v5352_v28, %v5349_v45  ;;  %v5466_v13 = vsel %vm15056_vm15, %v5463_v23, %v5460_v60  ;;  %v5369_v29 = vadd.f32 1.0, %v5368_v50  ;;  %v9692_v61 = vpop.eup %9691  ;;  %v5479_v28 = vmul.f32 -0.5, %v15023_v6 }
 0xd64   :  { %v5475_v14 = vsel %vm15032_vm12, %v5472_v35, %v5469_v3  ;;  %v5359_v3 = vmul.f32 -0.5, %v15017_v52  ;;  %v5346_v45 = vsel %vm15037_vm7, %v5343_v49, %v5340_v63  ;;  %v5491_v35 = vand.u32 2147483647, %v15014_v36 }
 0xd65   :  { %v5567_v38 = vsub.f32 %v5355_v9, %v5475_v14  ;;  %v5566_v60 = vsub.f32 %v5346_v45, %v5466_v13  ;;  %v5487_v50 = vmul.f32 0.6931472, %v9690_v0  ;;  %v5362_v14 = vand.u32 2147483647, %v15017_v52 }
 0xd66   :  { %v5367_v53 = vmul.f32 0.6931472, %v9692_v61  ;;  %v5370_v47 = vmul.f32 %v15011_v26, %v5369_v29  ;;  %v5360_v49 = vadd.f32 1.0, %v5359_v3  ;;  %v5482_v63 = vand.u32 2147483647, %v15023_v6 }
 0xd67   :  { %v5490_v9 = vmul.f32 %v5489_v16, %v15014_v36  ;;  %v5480_v39 = vadd.f32 1.0, %v5479_v28  ;;  %v5374_v13 = vadd.f32 1.0, %v15049_v37  ;;  %vm15082_vm14 = vcmp.lt.f32.partialorder %v5491_v35, 0.0004427343 }
 0xd68   :  { %v5386_v0 = vmul.f32 -0.5, %v15030_v43  ;;  %v5579_v45 = vmul.f32 0.5, %v5567_v38  ;;  %v5578_v26 = vmul.f32 0.5, %v5566_v60  ;;  %v5373_v16 = vsel %vm15073_vm11, %v5370_v47, %v5367_v53 }
 0xd69   :  { %v5493_v29 = vsel %vm15082_vm14, %v5490_v9, %v5487_v50  ;;  %v5361_v28 = vmul.f32 %v15017_v52, %v5360_v49  ;;  %vm15093_vm1 = vcmp.lt.f32.partialorder %v5362_v14, 0.0004427343  ;;  %vm15097_vm4 = vcmp.lt.f32.partialorder %v5482_v63, 0.0004427343 }
 0xd6a   :  { %v5481_v60 = vmul.f32 %v5480_v39, %v15023_v6  ;;  %v5389_v23 = vand.u32 2147483647, %v15030_v43  ;;  %v5569_v14 = vsub.f32 %v5373_v16, %v5493_v29  ;;  %v5387_v53 = vadd.f32 1.0, %v5386_v0 }
 0xd6b   :  { %v5506_v39 = vmul.f32 -0.5, %v15052_v46 }
 0xd6c   :  { %v15131_v29 = vmul.f32 0.5, %v5569_v14  ;;  %vm15133_vm8 = vcmp.lt.f32.partialorder %v5389_v23, 0.0004427343 }
 0xd6d   :  { %v5507_v14 = vadd.f32 1.0, %v5506_v39 }
 0xd9d   :  { %v15041_v30 = vpop.xlane.xlu1 %5234 }
 0xd9e   :  { %v5267_v54 = vmax.f32 %v15041_v30, 1e-30  ;;  %v5232_v33 = vpop.xlane.xlu0 %5231  ;;  %v15071_v30 = vsub.f32 0.0, %v15049_v37 }
 0xd9f   :  { %v5266_v59 = vmax.f32 %v5232_v33, 1e-30  ;;  %v9694_v33 = vpop.eup %9693 }
 0xda0   :  { %9697 = vrsqrt.f32 %v5267_v54  ;;  %v5494_v61 = vadd.f32 1.0, %v15071_v30  ;;  %v5358_v3 = vmul.f32 0.6931472, %v9694_v33  ;;  %v9696_v36 = vpop.eup %9695  ;;  %v5497_v23 = vmul.f32 -0.5, %v15071_v30 }
 0xda1   :  { %9699 = vrsqrt.f32 %v5266_v59  ;;  %v5478_v49 = vmul.f32 0.6931472, %v9696_v36 }
 0xda2   :  { %9701 = vlog2.f32 %v5383_v2  ;;  %v5364_v6 = vsel %vm15093_vm1, %v5361_v28, %v5358_v3  ;;  %v5509_v28 = vand.u32 2147483647, %v15052_v46 }
 0xda3   :  { %9703 = vlog2.f32 %v5503_v1  ;;  %v15104_v1 = vclamps-f32 %v14894_v20, 0.9999999  ;;  %v5484_v16 = vsel %vm15097_vm4, %v5481_v60, %v5478_v49  ;;  %v5500_v49 = vand.u32 2147483647, %v15071_v30 }
 0xda4   :  { %9705 = vlog2.f32 %v5374_v13  ;;  %v5377_v13 = vmul.f32 -0.5, %v15049_v37  ;;  %vm15154_vm10 = vcmp.lt.f32.partialorder %v5509_v28, 0.0004427343 }
 0xda5   :  { %9707 = vlog2.f32 %v5494_v61  ;;  %v15129_v0 = vsub.f32 0.0, %v15104_v1  ;;  %v5401_v60 = vadd.f32 1.0, %v15104_v1  ;;  %vm15174_vm9 = vcmp.lt.f32.partialorder %v5500_v49, 0.0004427343 }
 0xda7   :  { %v5524_v39 = vmul.f32 -0.5, %v15129_v0 }
 0xda8   :  { %v15113_v33 = vpop.xlane.xlu1 %5240 }
 0xda9   :  { %v5269_v20 = vmax.f32 %v15113_v33, 1e-30  ;;  %v5238_v63 = vpop.xlane.xlu0 %5237  ;;  %v15142_v33 = vclamps-f32 %v14897_v58, 0.9999999 }
 0xdaa   :  { %v15101_v38 = vpop.eup %9697 }
 0xdab   :  { %v15108_v50 = vpop.eup %9699  ;;  %v15111_v52 = vmul.f32 %v15101_v38, %v5267_v54  ;;  %v5268_v54 = vmax.f32 %v5238_v63, 1e-30  ;;  %9709 = vrsqrt.f32 %v5269_v20 }
 0xdac   :  { %v15116_v47 = vmul.f32 %v15108_v50, %v5266_v59  ;;  %v5380_v59 = vand.u32 2147483647, %v15049_v37  ;;  %v9702_v3 = vpop.eup %9701 }
 0xdad   :  { %v5303_v9 = vmul.f32 %v15111_v52, %v14855_v4  ;;  %9711 = vrsqrt.f32 %v5268_v54  ;;  %v9704_v2 = vpop.eup %9703  ;;  %v5385_v35 = vmul.f32 0.6931472, %v9702_v3  ;;  %vm5663_vm5 = vcmp.le.f32.partialorder %v15111_v52, 1e-15 }
 0xdae   :  { %v5302_v62 = vmul.f32 %v15116_v47, %v14866_v44  ;;  %v5388_v44 = vmul.f32 %v15030_v43, %v5387_v53  ;;  %vm15145_vm3 = vcmp.lt.f32.partialorder %v5380_v59, 0.0004427343  ;;  %v5568_v43 = vsub.f32 %v5364_v6, %v5484_v16  ;;  %v9706_v53 = vpop.eup %9705 }
 0xdaf   :  { %v5591_v61 = vmul.f32 %v5579_v45, %v5303_v9  ;;  %v5378_v9 = vadd.f32 1.0, %v5377_v13  ;;  %v5505_v58 = vmul.f32 0.6931472, %v9704_v2  ;;  %v5508_v13 = vmul.f32 %v5507_v14, %v15052_v46 }
 0xdb0   :  { %v5590_v36 = vmul.f32 %v5578_v26, %v5302_v62  ;;  %v5521_v26 = vadd.f32 1.0, %v15129_v0  ;;  %v9708_v62 = vpop.eup %9707  ;;  %v15159_v6 = vsub.f32 0.0, %v15142_v33  ;;  %v5392_v16 = vadd.f32 1.0, %v15142_v33 }
 0xdb1   :  { %v8196_v45 = vclamps-f32 %v5591_v61, 15.0  ;;  %v5498_v61 = vadd.f32 1.0, %v5497_v23  ;;  %v15162_v3 = vmul.f32 %v15049_v37, %v5378_v9  ;;  %v5580_v2 = vmul.f32 0.5, %v5568_v43 }
 0xdb2   :  { %v8195_v63 = vclamps-f32 %v5590_v36, 15.0  ;;  %v5404_v36 = vmul.f32 -0.5, %v15104_v1  ;;  %v5391_v46 = vsel %vm15133_vm8, %v5388_v44, %v5385_v35  ;;  %v15168_v28 = vmul.f32 0.6931472, %v9706_v53 }
 0xdb3   :  { %9713 = vtanh.f32 %v8196_v45  ;;  %v5511_v14 = vsel %vm15154_vm10, %v5508_v13, %v5505_v58  ;;  %v5496_v23 = vmul.f32 0.6931472, %v9708_v62  ;;  %v5499_v4 = vmul.f32 %v5498_v61, %v15071_v30 }
 0xdb4   :  { %9715 = vtanh.f32 %v8195_v63  ;;  %v5525_v63 = vadd.f32 1.0, %v5524_v39  ;;  %v5407_v44 = vand.u32 2147483647, %v15104_v1  ;;  %v5512_v43 = vadd.f32 1.0, %v15159_v6 }
 0xdb5   :  { %9717 = vlog2.f32 %v5521_v26  ;;  %v15170_v45 = vpop.eup %9709  ;;  %v5527_v53 = vand.u32 2147483647, %v15129_v0  ;;  %v5571_v49 = vsub.f32 %v5391_v46, %v5511_v14  ;;  %v5382_v30 = vsel %vm15145_vm3, %v15162_v3, %v15168_v28 }
 0xdb6   :  { %9719 = vlog2.f32 %v5401_v60  ;;  %v15181_v26 = vmul.f32 %v15170_v45, %v5269_v20  ;;  %v5405_v60 = vadd.f32 1.0, %v5404_v36  ;;  %v5395_v20 = vmul.f32 -0.5, %v15142_v33 }
 0xdb7   :  { %v15178_v9 = vpop.eup %9711  ;;  %9721 = vlog2.f32 %v5392_v16  ;;  %v15198_v39 = vclamps-f32 %v14912_v22, 0.9999999  ;;  %v5502_v62 = vsel %vm15174_vm9, %v5499_v4, %v5496_v23  ;;  %v5526_v13 = vmul.f32 %v5525_v63, %v15129_v0 }
 0xdb8   :  { %v15187_v35 = vmul.f32 %v15178_v9, %v5268_v54  ;;  %v5305_v58 = vmul.f32 %v15181_v26, %v14873_v7  ;;  %9723 = vlog2.f32 %v5512_v43  ;;  %v5515_v55 = vmul.f32 -0.5, %v15159_v6 }
 0xdb9   :  { %vm5662_vm2 = vcmp.le.f32.partialorder %v15116_v47, 1e-15  ;;  %vm15214_vm12 = vcmp.lt.f32.partialorder %v5527_v53, 0.0004427343  ;;  %v15227_v14 = vclamps-f32 %v14915_v15, 0.9999999 }
 0xdba   :  { %v5304_v54 = vmul.f32 %v15187_v35, %v14879_v57  ;;  %v5593_v59 = vmul.f32 %v15131_v29, %v5305_v58  ;;  %v5398_v58 = vand.u32 2147483647, %v15142_v33  ;;  %vm5408_vm11 = vcmp.lt.f32.partialorder %v5407_v44, 0.0004427343 }
 0xdbb   :  { %vm5665_vm4 = vcmp.le.f32.partialorder %v15181_v26, 1e-15  ;;  %vm5664_vm8 = vcmp.le.f32.partialorder %v15187_v35, 1e-15 }
 0xdbc   :  { %v5592_v57 = vmul.f32 %v5580_v2, %v5304_v54  ;;  %v15224_v46 = vpop.xlane.xlu1 %5246  ;;  %vm15269_vm14 = vcmp.lt.f32.partialorder %v5398_v58, 0.0004427343 }
 0xdbd   :  { %v9714_v7 = vpop.eup %9713  ;;  %v15231_v63 = vpop.xlane.xlu0 %5243  ;;  %v17359_v43 = vmax.f32 %v15224_v46, 1e-30 }
 0xdbe   :  { %v9716_v61 = vpop.eup %9715  ;;  %v5639_v22 = vmul.f32 %v9714_v7, %v15101_v38  ;;  %v15211_v3 = vsel %vm5663_vm5, 0.0, %v9714_v7  ;;  %v8198_v38 = vclamps-f32 %v5593_v59, 15.0  ;;  %v8197_v37 = vclamps-f32 %v5592_v57, 15.0 }
 0xdbf   :  { %v5735_v36 = vmax.f32 %v15211_v3, 1e-15  ;;  %v5638_v29 = vmul.f32 %v9716_v61, %v15108_v50  ;;  %v15222_v16 = vsel %vm5662_vm2, 0.0, %v9716_v61  ;;  %v9718_v28 = vpop.eup %9717  ;;  %vm5723_vm7 = vcmp.gt.f32.partialorder %v15211_v3, 0.996 }
 0xdc0   :  { %v5651_v2 = vmul.f32 %v14948_v25, %v5639_v22  ;;  %v5734_v23 = vmax.f32 %v15222_v16, 1e-15  ;;  %v9720_v4 = vpop.eup %9719  ;;  %v17358_v53 = vmax.f32 %v15231_v63, 1e-30  ;;  %vm5722_vm15 = vcmp.gt.f32.partialorder %v15222_v16, 0.996 }
 0xdc1   :  { %9725 = vrcp.f32 %v5735_v36  ;;  %v5650_v50 = vmul.f32 %v5638_v29, %v14952_v31  ;;  %v15241_v15 = vsel %vm5723_vm7, 0.996, %v15211_v3  ;;  %v5523_v25 = vmul.f32 0.6931472, %v9718_v28  ;;  %v9722_v54 = vpop.eup %9721 }
 0xdc2   :  { %9727 = vrcp.f32 %v5734_v23  ;;  %v15247_v31 = vsel %vm5722_vm15, 0.996, %v15222_v16  ;;  %v5403_v7 = vmul.f32 0.6931472, %v9720_v4  ;;  %v5396_v59 = vadd.f32 1.0, %v5395_v20  ;;  %v9724_v28 = vpop.eup %9723 }
 0xdc3   :  { %9729 = vtanh.f32 %v8198_v38  ;;  %17648 = vst [vmem:[#allocation9_spill] sm:$0xff] %v15247_v31  ;;  %v15250_v61 = vsub.f32 0.0, %v15198_v39  ;;  %v5570_v22 = vsub.f32 %v5382_v30, %v5502_v62  ;;  %v5518_v57 = vand.u32 2147483647, %v15159_v6 }
 0xdc4   :  { %9731 = vtanh.f32 %v8197_v37  ;;  %v15256_v36 = vsub.f32 0.0, %v15227_v14  ;;  %v5516_v29 = vadd.f32 1.0, %v5515_v55  ;;  %v5419_v38 = vadd.f32 1.0, %v15198_v39 }
 0xdc5   :  { %9733 = vrsqrt.f32 %v17359_v43  ;;  %v5422_v20 = vmul.f32 -0.5, %v15198_v39  ;;  %v5406_v23 = vmul.f32 %v15104_v1, %v5405_v60  ;;  %v5529_v37 = vsel %vm15214_vm12, %v5526_v13, %v5523_v25 }
 0xdc6   :  { %9735 = vrsqrt.f32 %v17358_v53  ;;  %v15265_v30 = vmul.f32 0.6931472, %v9722_v54  ;;  %v5583_v62 = vmul.f32 0.5, %v5571_v49  ;;  %v5539_v55 = vadd.f32 1.0, %v15250_v61 }
 0xdc7   :  { %v5582_v53 = vmul.f32 0.5, %v5570_v22  ;;  %v5409_v43 = vsel %vm5408_vm11, %v5406_v23, %v5403_v7  ;;  %v15275_v31 = vmul.f32 %v15142_v33, %v5396_v59  ;;  %v5530_v60 = vadd.f32 1.0, %v15256_v36 }
 0xdc8   :  { %v15278_v13 = vsub.f32 %v5409_v43, %v5529_v37  ;;  %v15281_v49 = vmul.f32 %v5516_v29, %v15159_v6  ;;  %vm15283_vm1 = vcmp.lt.f32.partialorder %v5518_v57, 0.0004427343  ;;  %9737 = vlog2.f32 %v5419_v38 }
 0xdc9   :  { %v15287_v44 = vadd.f32 1.0, %v5422_v20  ;;  %v5542_v25 = vmul.f32 -0.5, %v15250_v61  ;;  %v15296_v6 = vadd.f32 1.0, %v15227_v14  ;;  %v5514_v7 = vmul.f32 0.6931472, %v9724_v28 }
 0xdca   :  { %9739 = vlog2.f32 %v5539_v55  ;;  %v5699_v22 = vsel %vm5663_vm5, 0.0, %v5651_v2  ;;  %v5698_v20 = vsel %vm5662_vm2, 0.0, %v5650_v50  ;;  %v15343_v33 = vclamps-f32 %v14930_v24, 0.9999999 }
 0xdcb   :  { %v9726_v0 = vpop.eup %9725  ;;  %9741 = vlog2.f32 %v5530_v60 }
 0xdcc   :  { %v9728_v58 = vpop.eup %9727  ;;  %v5749_v54 = vmul.f32 0.996, %v9726_v0  ;;  %v15317_v0 = vpop.xlane.xlu1 %5252 }
 0xdcd   :  { %v9730_v59 = vpop.eup %9729  ;;  %v5747_v57 = vmul.f32 0.996, %v9728_v58  ;;  %v17653_v58 = vmax.f32 %v15224_v46, 1e-30 }
 0xdce   :  { %v9732_v29 = vpop.eup %9731  ;;  %v5771_v38 = vmul.f32 %v5749_v54, %v5699_v22  ;;  %v5641_v23 = vmul.f32 %v9730_v59, %v15170_v45  ;;  %v15307_v37 = vsel %vm5665_vm4, 0.0, %v9730_v59  ;;  %v5273_v59 = vmax.f32 %v15317_v0, 1e-30 }
 0xdcf   :  { %v15309_v28 = vpop.eup %9733  ;;  %v5770_v55 = vmul.f32 %v5747_v57, %v5698_v20  ;;  %v5737_v52 = vmax.f32 %v15307_v37, 1e-15  ;;  %v5640_v2 = vmul.f32 %v9732_v29, %v15178_v9  ;;  %v15315_v60 = vsel %vm5664_vm8, 0.0, %v9732_v29  ;;  %v15329_v9 = vpop.xlane.xlu0 %5249 }
 0xdd0   :  { %v15319_v47 = vpop.eup %9735  ;;  %v5653_v45 = vmul.f32 %v14958_v32, %v5641_v23  ;;  %v5736_v50 = vmax.f32 %v15315_v60, 1e-15  ;;  %v15326_v54 = vmul.f32 %v15309_v28, %v17653_v58  ;;  %v17654_v29 = vmax.f32 %v15231_v63, 1e-30 }
 0xdd1   :  { %9743 = vrcp.f32 %v5737_v52  ;;  %v5652_v57 = vmul.f32 %v5640_v2, %v14962_v10  ;;  %v5272_v32 = vmax.f32 %v15329_v9, 1e-30  ;;  %v5413_v23 = vmul.f32 -0.5, %v15227_v14 }
 0xdd2   :  { %v15335_v43 = vmul.f32 %v15319_v47, %v17654_v29  ;;  %9745 = vrcp.f32 %v5736_v50  ;;  %v5307_v46 = vmul.f32 %v15326_v54, %v14891_v17  ;;  %v5533_v58 = vmul.f32 -0.5, %v15256_v36  ;;  %v9738_v52 = vpop.eup %9737  ;;  %v15357_v17 = vld [vmem:[%s17305_s9] ss:$0 sm:$0xff]  ;;  %s8170_s9 = sld [smem:[#allocation2 + $0x2]] }
 0xdd3   :  { %9747 = vrsqrt.f32 %v5273_v59  ;;  %v5520_v63 = vsel %vm15283_vm1, %v15281_v49, %v5514_v7  ;;  %v15365_v24 = vsel %vm5722_vm15, %v5770_v55, %v5698_v20  ;;  %vm5725_vm3 = vcmp.gt.f32.partialorder %v15307_v37, 0.996 }
 0xdd4   :  { %v5306_v10 = vmul.f32 %v15335_v43, %v14901_v40  ;;  %v5595_v2 = vmul.f32 %v5583_v62, %v5307_v46  ;;  %9749 = vrsqrt.f32 %v5272_v32  ;;  %v15361_v40 = vsel %vm5723_vm7, %v5771_v38, %v5699_v22  ;;  %v9740_v7 = vpop.eup %9739 }
 0xdd5   :  { %v5849_v62 = vmul.f32 %v15357_v17, %v15361_v40  ;;  %v5848_v49 = vmul.f32 %v15357_v17, %v15365_v24  ;;  %v5543_v29 = vadd.f32 1.0, %v5542_v25  ;;  %vm5724_vm10 = vcmp.gt.f32.partialorder %v15315_v60, 0.996  ;;  %v9742_v16 = vpop.eup %9741 }
 0xdd6   :  { %v5594_v1 = vmul.f32 %v5582_v53, %v5306_v10  ;;  %v8200_v50 = vclamps-f32 %v5595_v2, 15.0  ;;  %v15376_v3 = vsel %vm5725_vm3, 0.996, %v15307_v37  ;;  %v5414_v22 = vadd.f32 1.0, %v5413_v23 }
 0xdd7   :  { %v5863_v38 = vsel %vm490_vm13, %v5849_v62, 0.0  ;;  %v5860_v20 = vsel %vm490_vm13, %v5848_v49, 0.0  ;;  %v17655_v25 = vsel %vm15269_vm14, %v15275_v31, %v15265_v30  ;;  %v15386_v46 = vsub.f32 0.0, %v15343_v33 }
 0xdd8   :  { %v8199_v53 = vclamps-f32 %v5594_v1, 15.0  ;;  %9751 = vtanh.f32 %v8200_v50  ;;  %v5572_v55 = vsub.f32 %v17655_v25, %v5520_v63  ;;  %5864 = vadd.xlane.f32.xlu1 %v5863_v38  ;;  %5861 = vadd.xlane.f32.xlu0 %v5860_v20  ;;  %v15391_v23 = vsel %vm5724_vm10, 0.996, %v15315_v60 }
 0xdd9   :  { %v5585_v10 = vmul.f32 0.5, %v15278_v13  ;;  %v5425_v2 = vand.u32 2147483647, %v15198_v39  ;;  %v5534_v4 = vadd.f32 1.0, %v5533_v58  ;;  %v15397_v31 = vmul.f32 %v15198_v39, %v15287_v44 }
 0xdda   :  { %9753 = vtanh.f32 %v8199_v53  ;;  %v15399_v30 = vmul.f32 0.6931472, %v9740_v7  ;;  %v17656_v63 = vand.u32 2147483647, %v15250_v61  ;;  %v5416_v62 = vand.u32 2147483647, %v15227_v14 }
 0xddb   :  { %v9744_v49 = vpop.eup %9743  ;;  %v15409_v13 = vmul.f32 %v5543_v29, %v15250_v61  ;;  %9755 = vlog2.f32 %v15296_v6  ;;  %v15413_v58 = vmul.f32 %v15227_v14, %v5414_v22  ;;  %v5536_v39 = vand.u32 2147483647, %v15256_v36 }
 0xddc   :  { %vm15403_vm9 = vcmp.lt.f32.partialorder %v17656_v63, 0.0004427343  ;;  %v9746_v44 = vpop.eup %9745  ;;  %v15417_v7 = vclamps-f32 %v14932_v5, 0.9999999  ;;  %v5753_v50 = vmul.f32 0.996, %v9744_v49  ;;  %v15425_v14 = vmul.f32 %v5534_v4, %v15256_v36 }
 0xddd   :  { %v5584_v53 = vmul.f32 0.5, %v5572_v55  ;;  %v5557_v38 = vadd.f32 1.0, %v15386_v46  ;;  %v15420_v20 = vpop.eup %9747  ;;  %v5701_v61 = vsel %vm5665_vm4, 0.0, %v5653_v45  ;;  %v5751_v29 = vmul.f32 0.996, %v9746_v44 }
 0xdde   :  { %v5421_v6 = vmul.f32 0.6931472, %v9738_v52  ;;  %v15427_v22 = vpop.eup %9749  ;;  %v5773_v25 = vmul.f32 %v5753_v50, %v5701_v61  ;;  %v5700_v5 = vsel %vm5664_vm8, 0.0, %v5652_v57  ;;  %v15434_v55 = vmul.f32 %v15420_v20, %v5273_v59 }
 0xddf   :  { %v5547_v26 = vsel %vm15403_vm9, %v15409_v13, %v15399_v30  ;;  %v5772_v45 = vmul.f32 %v5751_v29, %v5700_v5  ;;  %v15443_v52 = vmul.f32 %v15427_v22, %v5272_v32  ;;  %v5532_v4 = vmul.f32 0.6931472, %v9742_v16  ;;  %v15470_v37 = vpop.xlane.xlu0 %5255 }
 0xde0   :  { %v5560_v35 = vmul.f32 -0.5, %v15386_v46  ;;  %v5309_v0 = vmul.f32 %v15434_v55, %v14909_v48  ;;  %vm15448_vm5 = vcmp.lt.f32.partialorder %v5425_v2, 0.0004427343  ;;  %9757 = vlog2.f32 %v5557_v38  ;;  %v15463_v48 = vpop.xlane.xlu1 %5258 }
 0xde1   :  { %v15453_v57 = vsub.f32 0.0, %v15417_v7  ;;  %v15457_v9 = vsel %vm5725_vm3, %v5773_v25, %v5701_v61  ;;  %vm5667_vm2 = vcmp.le.f32.partialorder %v15326_v54, 1e-15  ;;  %vm5666_vm12 = vcmp.le.f32.partialorder %v15335_v43, 1e-15 }
 0xde2   :  { %v5308_v32 = vmul.f32 %v15443_v52, %v14920_v12  ;;  %v15467_v16 = vsel %vm5724_vm10, %v5772_v45, %v5700_v5  ;;  %v9752_v2 = vpop.eup %9751  ;;  %v5597_v30 = vmul.f32 %v5585_v10, %v5309_v0  ;;  %v5275_v63 = vmax.f32 %v15463_v48, 1e-30 }
 0xde3   :  { %v5851_v1 = vmul.f32 %v15357_v17, %v15457_v9  ;;  %v5850_v49 = vmul.f32 %v15357_v17, %v15467_v16  ;;  %v5643_v12 = vmul.f32 %v9752_v2, %v15309_v28  ;;  %v15479_v60 = vsel %vm5667_vm2, 0.0, %v9752_v2 }
 0xde4   :  { %v9754_v13 = vpop.eup %9753  ;;  %v5596_v44 = vmul.f32 %v5584_v53, %v5308_v32  ;;  %vm15481_vm7 = vcmp.lt.f32.partialorder %v5416_v62, 0.0004427343  ;;  %v5274_v50 = vmax.f32 %v15470_v37, 1e-30  ;;  %v5739_v38 = vmax.f32 %v15479_v60, 1e-15 }
 0xde5   :  { %v5642_v61 = vmul.f32 %v9754_v13, %v15319_v47  ;;  %v15490_v29 = vsel %vm5666_vm12, 0.0, %v9754_v13  ;;  %v8202_v28 = vclamps-f32 %v5597_v30, 15.0  ;;  %v9756_v25 = vpop.eup %9755  ;;  %v5655_v5 = vmul.f32 %v14968_v21, %v5643_v12 }
 0xde6   :  { %v5738_v53 = vmax.f32 %v15490_v29, 1e-15  ;;  %v8201_v62 = vclamps-f32 %v5596_v44, 15.0  ;;  %9759 = vrsqrt.f32 %v5275_v63  ;;  %v5869_v0 = vsel %vm490_vm13, %v5851_v1, 0.0 }
 0xde7   :  { %9761 = vrcp.f32 %v5739_v38  ;;  %v5654_v45 = vmul.f32 %v5642_v61, %v14972_v19  ;;  %v5866_v32 = vsel %vm490_vm13, %v5850_v49, 0.0  ;;  %v5548_v47 = vadd.f32 1.0, %v15453_v57  ;;  %5870 = vadd.xlane.f32.xlu1 %v5869_v0 }
 0xde8   :  { %9763 = vrcp.f32 %v5738_v53  ;;  %5867 = vadd.xlane.f32.xlu0 %v5866_v32  ;;  %vm5727_vm15 = vcmp.gt.f32.partialorder %v15479_v60, 0.996  ;;  %vm5726_vm11 = vcmp.gt.f32.partialorder %v15490_v29, 0.996  ;;  %v5412_v21 = vmul.f32 0.6931472, %v9756_v25 }
 0xde9   :  { %9765 = vtanh.f32 %v8202_v28  ;;  %v15503_v48 = vsel %vm5727_vm15, 0.996, %v15479_v60  ;;  %v15508_v19 = vsel %vm5726_vm11, 0.996, %v15490_v29  ;;  %v5427_v2 = vsel %vm15448_vm5, %v15397_v31, %v5421_v6 }
 0xdea   :  { %9767 = vtanh.f32 %v8201_v62  ;;  %vm5537_vm14 = vcmp.lt.f32.partialorder %v5536_v39, 0.0004427343  ;;  %v5437_v30 = vadd.f32 1.0, %v15343_v33  ;;  %v9758_v1 = vpop.eup %9757  ;;  %v5575_v49 = vsub.f32 %v5427_v2, %v5547_v26 }
 0xdeb   :  { %v5538_v13 = vsel %vm5537_vm14, %v15425_v14, %v5532_v4  ;;  %9769 = vrsqrt.f32 %v5274_v50  ;;  %v5440_v12 = vmul.f32 -0.5, %v15343_v33  ;;  %v5561_v44 = vadd.f32 1.0, %v5560_v35 }
 0xdec   :  { %v5428_v38 = vadd.f32 1.0, %v15417_v7  ;;  %v5431_v59 = vmul.f32 -0.5, %v15417_v7  ;;  %9771 = vlog2.f32 %v5548_v47  ;;  %v5418_v36 = vsel %vm15481_vm7, %v15413_v58, %v5412_v21 }
 0xded   :  { %v5574_v31 = vsub.f32 %v5418_v36, %v5538_v13  ;;  %v5443_v39 = vand.u32 2147483647, %v15343_v33  ;;  %v5587_v6 = vmul.f32 0.5, %v5575_v49  ;;  %9773 = vlog2.f32 %v5437_v30 }
 0xdee   :  { %v15526_v14 = vadd.f32 1.0, %v5440_v12  ;;  %v5563_v26 = vand.u32 2147483647, %v15386_v46  ;;  %v15532_v35 = vmul.f32 %v5561_v44, %v15386_v46  ;;  %9775 = vlog2.f32 %v5428_v38  ;;  %v15546_v21 = vpop.xlane.xlu1 %5264 }
 0xdef   :  { %v15534_v61 = vadd.f32 1.0, %v5431_v59  ;;  %v5434_v10 = vand.u32 2147483647, %v15417_v7  ;;  %vm5669_vm1 = vcmp.le.f32.partialorder %v15434_v55, 1e-15  ;;  %v5551_v25 = vmul.f32 -0.5, %v15453_v57  ;;  %v15553_v12 = vpop.xlane.xlu0 %5261 }
 0xdf0   :  { %v15529_v4 = vpop.eup %9759  ;;  %v5554_v53 = vand.u32 2147483647, %v15453_v57  ;;  %v5703_v0 = vsel %vm5667_vm2, 0.0, %v5655_v5  ;;  %vm5668_vm4 = vcmp.le.f32.partialorder %v15443_v52, 1e-15  ;;  %v5586_v47 = vmul.f32 0.5, %v5574_v31 }
 0xdf1   :  { %v9762_v58 = vpop.eup %9761  ;;  %v15539_v28 = vmul.f32 %v15529_v4, %v5275_v63  ;;  %v5702_v30 = vsel %vm5666_vm12, 0.0, %v5654_v45  ;;  %v5277_v13 = vmax.f32 %v15546_v21, 1e-30  ;;  %v5276_v59 = vmax.f32 %v15553_v12, 1e-30 }
 0xdf2   :  { %v9764_v62 = vpop.eup %9763  ;;  %v5757_v32 = vmul.f32 0.996, %v9762_v58  ;;  %v5552_v37 = vadd.f32 1.0, %v5551_v25  ;;  %vm5564_vm10 = vcmp.lt.f32.partialorder %v5563_v26, 0.0004427343  ;;  %v5433_v46 = vmul.f32 %v15417_v7, %v15534_v61 }
 0xdf3   :  { %v9766_v2 = vpop.eup %9765  ;;  %v5755_v63 = vmul.f32 0.996, %v9764_v62  ;;  %v5311_v49 = vmul.f32 %v15539_v28, %v14927_v42  ;;  %vm5555_vm9 = vcmp.lt.f32.partialorder %v5554_v53, 0.0004427343  ;;  %vm5444_vm5 = vcmp.lt.f32.partialorder %v5443_v39, 0.0004427343 }
 0xdf4   :  { %v9768_v54 = vpop.eup %9767  ;;  %v5775_v5 = vmul.f32 %v5757_v32, %v5703_v0  ;;  %v5645_v44 = vmul.f32 %v9766_v2, %v15420_v20  ;;  %v15558_v38 = vsel %vm5669_vm1, 0.0, %v9766_v2  ;;  %vm5435_vm2 = vcmp.lt.f32.partialorder %v5434_v10, 0.0004427343 }
 0xdf5   :  { %v15561_v43 = vpop.eup %9769  ;;  %v5774_v45 = vmul.f32 %v5755_v63, %v5702_v30  ;;  %v5741_v36 = vmax.f32 %v15558_v38, 1e-15  ;;  %v5644_v42 = vmul.f32 %v9768_v54, %v15427_v22  ;;  %v15567_v31 = vsel %vm5668_vm4, 0.0, %v9768_v54 }
 0xdf6   :  { %v9772_v58 = vpop.eup %9771  ;;  %v5657_v20 = vmul.f32 %v14978_v27, %v5645_v44  ;;  %v5740_v62 = vmax.f32 %v15567_v31, 1e-15  ;;  %v5599_v32 = vmul.f32 %v5587_v6, %v5311_v49  ;;  %v15574_v2 = vmul.f32 %v15561_v43, %v5274_v50 }
 0xdf7   :  { %9777 = vrcp.f32 %v5741_v36  ;;  %v5656_v63 = vmul.f32 %v5644_v42, %v14982_v18  ;;  %v15579_v22 = vsel %vm5727_vm15, %v5775_v5, %v5703_v0  ;;  %v15583_v54 = vsel %vm5726_vm11, %v5774_v45, %v5702_v30  ;;  %v9774_v49 = vpop.eup %9773 }
 0xdf8   :  { %9779 = vrcp.f32 %v5740_v62  ;;  %v8204_v27 = vclamps-f32 %v5599_v32, 15.0  ;;  %v5310_v6 = vmul.f32 %v15574_v2, %v14937_v51  ;;  %v5559_v50 = vmul.f32 0.6931472, %v9758_v1  ;;  %v9776_v0 = vpop.eup %9775 }
 0xdf9   :  { %9781 = vrsqrt.f32 %v5277_v13  ;;  %v5550_v18 = vmul.f32 0.6931472, %v9772_v58  ;;  %v5853_v60 = vmul.f32 %v15357_v17, %v15579_v22  ;;  %v5852_v30 = vmul.f32 %v15357_v17, %v15583_v54 }
 0xdfa   :  { %9783 = vtanh.f32 %v8204_v27  ;;  %v5598_v29 = vmul.f32 %v5586_v47, %v5310_v6  ;;  %vm5729_vm8 = vcmp.gt.f32.partialorder %v15558_v38, 0.996  ;;  %vm5728_vm3 = vcmp.gt.f32.partialorder %v15567_v31, 0.996 }
 0xdfb   :  { %9785 = vrsqrt.f32 %v5276_v59  ;;  %v5875_v51 = vsel %vm490_vm13, %v5853_v60, 0.0  ;;  %v15601_v1 = vsel %vm5729_vm8, 0.996, %v15558_v38  ;;  %v5439_v5 = vmul.f32 0.6931472, %v9774_v49 }
 0xdfc   :  { %v8203_v25 = vclamps-f32 %v5598_v29, 15.0  ;;  %5876 = vadd.xlane.f32.xlu1 %v5875_v51  ;;  %v5872_v47 = vsel %vm490_vm13, %v5852_v30, 0.0  ;;  %v15607_v44 = vsel %vm5728_vm3, 0.996, %v15567_v31  ;;  %v5430_v45 = vmul.f32 0.6931472, %v9776_v0 }
 0xdfd   :  { %v5553_v36 = vmul.f32 %v5552_v37, %v15453_v57  ;;  %5873 = vadd.xlane.f32.xlu0 %v5872_v47  ;;  %v5442_v42 = vmul.f32 %v15343_v33, %v15526_v14  ;;  %v5565_v58 = vsel %vm5564_vm10, %v15532_v35, %v5559_v50  ;;  %v5705_v57 = vsel %vm5669_vm1, 0.0, %v5657_v20 }
 0xdfe   :  { %9787 = vtanh.f32 %v8203_v25  ;;  %v5436_v6 = vsel %vm5435_vm2, %v5433_v46, %v5430_v45  ;;  %v5704_v61 = vsel %vm5668_vm4, 0.0, %v5656_v63  ;;  %vm5671_vm12 = vcmp.le.f32.partialorder %v15539_v28, 1e-15 }
 0xdff   :  { %v5556_v26 = vsel %vm5555_vm9, %v5553_v36, %v5550_v18  ;;  %v5445_v62 = vsel %vm5444_vm5, %v5442_v42, %v5439_v5  ;;  %vm5670_vm7 = vcmp.le.f32.partialorder %v15574_v2, 1e-15  ;;  %v17663_v2 = vld [vmem:[#allocation21_spill] sm:$0xff] }
 0xe00   :  { %v5577_v27 = vsub.f32 %v5445_v62, %v5565_v58  ;;  %v5576_v35 = vsub.f32 %v5436_v6, %v5556_v26 }
 0xe01   :  { %v9778_v32 = vpop.eup %9777 }
 0xe02   :  { %v9780_v14 = vpop.eup %9779  ;;  %v5761_v37 = vmul.f32 0.996, %v9778_v32  ;;  %v5589_v20 = vmul.f32 0.5, %v5577_v27  ;;  %v5588_v52 = vmul.f32 0.5, %v5576_v35 }
 0xe03   :  { %v9782_v49 = vpop.eup %9781  ;;  %v5759_v33 = vmul.f32 0.996, %v9780_v14 }
 0xe04   :  { %v9784_v39 = vpop.eup %9783  ;;  %v5777_v53 = vmul.f32 %v5761_v37, %v5705_v57  ;;  %v15630_v7 = vmul.f32 %v9782_v49, %v5277_v13 }
 0xe05   :  { %v9786_v10 = vpop.eup %9785  ;;  %v5776_v50 = vmul.f32 %v5759_v33, %v5704_v61  ;;  %v5647_v18 = vmul.f32 %v9784_v39, %v15529_v4  ;;  %v5719_v55 = vsel %vm5671_vm12, 0.0, %v9784_v39 }
 0xe06   :  { %v5743_v60 = vmax.f32 %v5719_v55, 1e-15  ;;  %v5313_v0 = vmul.f32 %v15630_v7, %v14944_v41  ;;  %v15639_v63 = vmul.f32 %v9786_v10, %v5276_v59  ;;  %v15645_v4 = vsel %vm5729_vm8, %v5777_v53, %v5705_v57 }
 0xe07   :  { %v5659_v21 = vmul.f32 %v14988_v56, %v5647_v18  ;;  %v15649_v13 = vsel %vm5728_vm3, %v5776_v50, %v5704_v61  ;;  %vm5731_vm15 = vcmp.gt.f32.partialorder %v5719_v55, 0.996  ;;  %v5855_v38 = vmul.f32 %v15357_v17, %v15645_v4 }
 0xe08   :  { %v9788_v29 = vpop.eup %9787  ;;  %9789 = vrcp.f32 %v5743_v60  ;;  %v5601_v41 = vmul.f32 %v5589_v20, %v5313_v0  ;;  %v5312_v12 = vmul.f32 %v15639_v63, %v14946_v11  ;;  %v5854_v25 = vmul.f32 %v15357_v17, %v15649_v13 }
 0xe09   :  { %v5646_v59 = vmul.f32 %v9788_v29, %v15561_v43  ;;  %v5718_v56 = vsel %vm5670_vm7, 0.0, %v9788_v29  ;;  %v5881_v47 = vsel %vm490_vm13, %v5855_v38, 0.0  ;;  %v15663_v11 = vsel %vm5731_vm15, 0.996, %v5719_v55 }
 0xe0a   :  { %v5742_v30 = vmax.f32 %v5718_v56, 1e-15  ;;  %v8206_v51 = vclamps-f32 %v5601_v41, 15.0  ;;  %v5600_v31 = vmul.f32 %v5588_v52, %v5312_v12  ;;  %vm5730_vm11 = vcmp.gt.f32.partialorder %v5718_v56, 0.996  ;;  %5882 = vadd.xlane.f32.xlu1 %v5881_v47 }
 0xe0b   :  { %v5658_v5 = vmul.f32 %v5646_v59, %v14992_v34  ;;  %v5878_v45 = vsel %vm490_vm13, %v5854_v25, 0.0  ;;  %v15667_v36 = vsel %vm5730_vm11, 0.996, %v5718_v56  ;;  %v5707_v34 = vsel %vm5671_vm12, 0.0, %v5659_v21 }
 0xe0c   :  { %9791 = vrcp.f32 %v5742_v30  ;;  %v8205_v43 = vclamps-f32 %v5600_v31, 15.0  ;;  %5879 = vadd.xlane.f32.xlu0 %v5878_v45  ;;  %vm5673_vm14 = vcmp.le.f32.partialorder %v15630_v7, 1e-15  ;;  %vm5672_vm1 = vcmp.le.f32.partialorder %v15639_v63, 1e-15 }
 0xe0d   :  { %9793 = vtanh.f32 %v8206_v51  ;;  %v5706_v14 = vsel %vm5670_vm7, 0.0, %v5658_v5  ;;  %v5831_v63 = vmul.f32 %v15241_v15, %v15241_v15  ;;  %v17664_v5 = vld [vmem:[#allocation9_spill] sm:$0xff] }
 0xe0e   :  { %9795 = vtanh.f32 %v8205_v43  ;;  %v5830_v47 = vmul.f32 %v17664_v5, %v17664_v5  ;;  %v15719_v43 = vstv %s8170_s9 }
 0xe12   :  { %v9790_v42 = vpop.eup %9789 }
 0xe13   :  { %v5765_v58 = vmul.f32 0.996, %v9790_v42 }
 0xe15   :  { %v5779_v46 = vmul.f32 %v5765_v58, %v5707_v34 }
 0xe16   :  { %v9792_v26 = vpop.eup %9791 }
 0xe17   :  { %v9794_v62 = vpop.eup %9793  ;;  %v5763_v32 = vmul.f32 0.996, %v9792_v26  ;;  %v15674_v27 = vsel %vm5731_vm15, %v5779_v46, %v5707_v34  ;;  %v5982_v46 = vmul.f32 %v15719_v43, %v5831_v63 }
 0xe18   :  { %v9796_v6 = vpop.eup %9795  ;;  %v5649_v37 = vmul.f32 %v9794_v62, %v9782_v49  ;;  %v5721_v28 = vsel %vm5673_vm14, 0.0, %v9794_v62  ;;  %v5857_v35 = vmul.f32 %v15357_v17, %v15674_v27  ;;  %v5981_v62 = vmul.f32 %v15719_v43, %v5830_v47 }
 0xe19   :  { %v5778_v57 = vmul.f32 %v5763_v32, %v5706_v14  ;;  %v5745_v33 = vmax.f32 %v5721_v28, 1e-15  ;;  %v5648_v39 = vmul.f32 %v9796_v6, %v9786_v10  ;;  %v5720_v53 = vsel %vm5672_vm1, 0.0, %v9796_v6 }
 0xe1a   :  { %v5661_v61 = vmul.f32 %v14998_v8, %v5649_v37  ;;  %v5744_v50 = vmax.f32 %v5720_v53, 1e-15  ;;  %v5887_v18 = vsel %vm490_vm13, %v5857_v35, 0.0  ;;  %vm5733_vm4 = vcmp.gt.f32.partialorder %v5721_v28, 0.996 }
 0xe1b   :  { %9797 = vrcp.f32 %v5745_v33  ;;  %v5660_v49 = vmul.f32 %v5648_v39, %v17663_v2  ;;  %5888 = vadd.xlane.f32.xlu1 %v5887_v18  ;;  %v15688_v55 = vsel %vm5730_vm11, %v5778_v57, %v5706_v14  ;;  %vm5732_vm8 = vcmp.gt.f32.partialorder %v5720_v53, 0.996 }
 0xe1c   :  { %9799 = vrcp.f32 %v5744_v50  ;;  %v5856_v10 = vmul.f32 %v15357_v17, %v15688_v55  ;;  %v15693_v20 = vsel %vm5733_vm4, 0.996, %v5721_v28  ;;  %v15696_v8 = vsel %vm5732_vm8, 0.996, %v5720_v53 }
 0xe1d   :  { %v5709_v29 = vsel %vm5673_vm14, 0.0, %v5661_v61  ;;  %v5708_v59 = vsel %vm5672_vm1, 0.0, %v5660_v49  ;;  %v5946_v57 = vsub.f32 1.0, %v5831_v63  ;;  %v5945_v33 = vsub.f32 1.0, %v5830_v47 }
 0xe1e   :  { %v5884_v60 = vsel %vm490_vm13, %v5856_v10, 0.0  ;;  %v5833_v39 = vmul.f32 %v15376_v3, %v15376_v3  ;;  %v5832_v53 = vmul.f32 %v15391_v23, %v15391_v23 }
 0xe1f   :  { %5885 = vadd.xlane.f32.xlu0 %v5884_v60  ;;  %v5958_v60 = vmul.f32 %v15357_v17, %v5946_v57  ;;  %v5834_v57 = vmul.f32 %v15508_v19, %v15508_v19 }
 0xe20   :  { %v5983_v3 = vmul.f32 %v15719_v43, %v5832_v53 }
 0xe25   :  { %v9798_v0 = vpop.eup %9797 }
 0xe26   :  { %v9800_v52 = vpop.eup %9799  ;;  %v5769_v21 = vmul.f32 0.996, %v9798_v0  ;;  %v5957_v0 = vmul.f32 %v15357_v17, %v5945_v33 }
 0xe27   :  { %v5767_v41 = vmul.f32 0.996, %v9800_v52  ;;  %v5984_v52 = vmul.f32 %v15719_v43, %v5833_v39 }
 0xe28   :  { %v5781_v12 = vmul.f32 %v5769_v21, %v5709_v29 }
 0xe29   :  { %v5780_v56 = vmul.f32 %v5767_v41, %v5708_v59 }
 0xe2a   :  { %v15704_v38 = vsel %vm5733_vm4, %v5781_v12, %v5709_v29 }
 0xe2b   :  { %v5859_v30 = vmul.f32 %v15357_v17, %v15704_v38  ;;  %v15709_v51 = vsel %vm5732_vm8, %v5780_v56, %v5708_v59 }
 0xe2c   :  { %v5858_v31 = vmul.f32 %v15357_v17, %v15709_v51 }
 0xe2d   :  { %v5893_v7 = vsel %vm490_vm13, %v5859_v30, 0.0 }
 0xe2e   :  { %5894 = vadd.xlane.f32.xlu1 %v5893_v7  ;;  %v5890_v25 = vsel %vm490_vm13, %v5858_v31, 0.0 }
 0xe2f   :  { %5891 = vadd.xlane.f32.xlu0 %v5890_v25 }
 0xe65   :  { %v5865_v45 = vpop.xlane.xlu1 %5864  ;;  %v5862_v42 = vpop.xlane.xlu0 %5861 }
 0xe66   :  { %v5897_v58 = vmul.f32 2.0, %v5865_v45  ;;  %v5896_v34 = vmul.f32 2.0, %v5862_v42 }
 0xe68   :  { %v5909_v26 = vadd.f32 1.0, %v5897_v58  ;;  %v5908_v32 = vadd.f32 1.0, %v5896_v34  ;;  %v5948_v58 = vsub.f32 1.0, %v5833_v39  ;;  %v5947_v34 = vsub.f32 1.0, %v5832_v53 }
 0xe6a   :  { %v5994_v6 = vadd.f32 %v5982_v46, %v5909_v26  ;;  %v5993_v14 = vadd.f32 %v5981_v62, %v5908_v32  ;;  %v5922_v15 = vadd.f32 %v15719_v43, %v5909_v26  ;;  %v5921_v35 = vadd.f32 %v15719_v43, %v5908_v32 }
 0xe6b   :  { %v5960_v62 = vmul.f32 %v15357_v17, %v5948_v58  ;;  %v5959_v32 = vmul.f32 %v15357_v17, %v5947_v34 }
 0xe6c   :  { %v6006_v37 = vmax.f32 %v5994_v6, 1e-15  ;;  %v6005_v28 = vmax.f32 %v5993_v14, 1e-15  ;;  %v5934_v61 = vmul.f32 %v5922_v15, %v15361_v40  ;;  %v5933_v50 = vmul.f32 %v5921_v35, %v15365_v24 }
 0xe6e   :  { %9801 = vrcp.f32 %v6006_v37  ;;  %v5970_v23 = vadd.f32 %v5958_v60, %v5934_v61  ;;  %v5969_v12 = vadd.f32 %v5957_v0, %v5933_v50 }
 0xe6f   :  { %9803 = vrcp.f32 %v6005_v28  ;;  %v5835_v28 = vmul.f32 %v15503_v48, %v15503_v48 }
 0xe71   :  { %v5986_v50 = vmul.f32 %v15719_v43, %v5835_v28 }
 0xe74   :  { %v5871_v18 = vpop.xlane.xlu1 %5870 }
 0xe75   :  { %v5868_v2 = vpop.xlane.xlu0 %5867  ;;  %v5899_v49 = vmul.f32 2.0, %v5871_v18 }
 0xe76   :  { %v5898_v10 = vmul.f32 2.0, %v5868_v2  ;;  %v5985_v2 = vmul.f32 %v15719_v43, %v5834_v57 }
 0xe77   :  { %v5911_v21 = vadd.f32 1.0, %v5899_v49 }
 0xe78   :  { %v5910_v29 = vadd.f32 1.0, %v5898_v10  ;;  %v9802_v41 = vpop.eup %9801 }
 0xe79   :  { %v9804_v40 = vpop.eup %9803  ;;  %v5996_v59 = vadd.f32 %v5984_v52, %v5911_v21  ;;  %v15735_v56 = vmul.f32 %v9802_v41, %v5970_v23  ;;  %v5924_v5 = vadd.f32 %v15719_v43, %v5911_v21  ;;  %v5950_v41 = vsub.f32 1.0, %v5835_v28 }
 0xe7a   :  { %v5995_v24 = vadd.f32 %v5983_v3, %v5910_v29  ;;  %v15737_v30 = vmul.f32 %v9804_v40, %v5969_v12  ;;  %v5923_v42 = vadd.f32 %v15719_v43, %v5910_v29  ;;  %v5949_v23 = vsub.f32 1.0, %v5834_v57 }
 0xe7b   :  { %v6008_v31 = vmax.f32 %v5996_v59, 1e-15  ;;  %v6054_v25 = vmul.f32 %v15735_v56, %v15735_v56  ;;  %v5936_v46 = vmul.f32 %v5924_v5, %v15457_v9  ;;  %v5837_v59 = vmul.f32 %v15601_v1, %v15601_v1 }
 0xe7c   :  { %v6007_v7 = vmax.f32 %v5995_v24, 1e-15  ;;  %v6053_v63 = vmul.f32 %v15737_v30, %v15737_v30  ;;  %v5935_v26 = vmul.f32 %v5923_v42, %v15467_v16  ;;  %v5962_v24 = vmul.f32 %v15357_v17, %v5950_v41 }
 0xe7d   :  { %9805 = vrcp.f32 %v6008_v31  ;;  %v6068_v47 = vsel %vm490_vm13, %v6054_v25, 0.0  ;;  %v5972_v6 = vadd.f32 %v5960_v62, %v5936_v46  ;;  %v5961_v25 = vmul.f32 %v15357_v17, %v5949_v23 }
 0xe7e   :  { %9807 = vrcp.f32 %v6007_v7  ;;  %v6065_v45 = vsel %vm490_vm13, %v6053_v63, 0.0  ;;  %6069 = vadd.xlane.f32.xlu1 %v6068_v47  ;;  %v5971_v37 = vadd.f32 %v5959_v32, %v5935_v26  ;;  %v5836_v7 = vmul.f32 %v15607_v44, %v15607_v44 }
 0xe7f   :  { %6066 = vadd.xlane.f32.xlu0 %v6065_v45 }
 0xe80   :  { %v5987_v1 = vmul.f32 %v15719_v43, %v5836_v7 }
 0xe87   :  { %v9806_v14 = vpop.eup %9805 }
 0xe88   :  { %v9808_v15 = vpop.eup %9807  ;;  %v15755_v33 = vmul.f32 %v9806_v14, %v5972_v6 }
 0xe89   :  { %v5877_v35 = vpop.xlane.xlu1 %5876  ;;  %v15757_v16 = vmul.f32 %v9808_v15, %v5971_v37 }
 0xe8a   :  { %v5901_v9 = vmul.f32 2.0, %v5877_v35  ;;  %v5874_v39 = vpop.xlane.xlu0 %5873  ;;  %v6056_v61 = vmul.f32 %v15755_v33, %v15755_v33 }
 0xe8b   :  { %v5900_v53 = vmul.f32 2.0, %v5874_v39  ;;  %v6055_v48 = vmul.f32 %v15757_v16, %v15757_v16  ;;  %v5952_v39 = vsub.f32 1.0, %v5837_v59 }
 0xe8c   :  { %v5913_v18 = vadd.f32 1.0, %v5901_v9  ;;  %v6074_v19 = vsel %vm490_vm13, %v6056_v61, 0.0 }
 0xe8d   :  { %v5912_v49 = vadd.f32 1.0, %v5900_v53  ;;  %6075 = vadd.xlane.f32.xlu1 %v6074_v19  ;;  %v6071_v60 = vsel %vm490_vm13, %v6055_v48, 0.0  ;;  %v5951_v53 = vsub.f32 1.0, %v5836_v7 }
 0xe8e   :  { %v5998_v10 = vadd.f32 %v5986_v50, %v5913_v18  ;;  %6072 = vadd.xlane.f32.xlu0 %v6071_v60  ;;  %v5926_v3 = vadd.f32 %v15719_v43, %v5913_v18  ;;  %v5839_v50 = vmul.f32 %v15663_v11, %v15663_v11 }
 0xe8f   :  { %v5997_v0 = vadd.f32 %v5985_v2, %v5912_v49  ;;  %v5925_v29 = vadd.f32 %v15719_v43, %v5912_v49  ;;  %v5964_v2 = vmul.f32 %v15357_v17, %v5952_v39  ;;  %v5963_v19 = vmul.f32 %v15357_v17, %v5951_v53 }
 0xe90   :  { %v6010_v52 = vmax.f32 %v5998_v10, 1e-15  ;;  %v5938_v12 = vmul.f32 %v5926_v3, %v15579_v22  ;;  %v5988_v22 = vmul.f32 %v15719_v43, %v5837_v59  ;;  %v5990_v60 = vmul.f32 %v15719_v43, %v5839_v50 }
 0xe91   :  { %v6009_v21 = vmax.f32 %v5997_v0, 1e-15  ;;  %v5937_v40 = vmul.f32 %v5925_v29, %v15583_v54 }
 0xe92   :  { %9809 = vrcp.f32 %v6010_v52  ;;  %v5974_v47 = vadd.f32 %v5962_v24, %v5938_v12  ;;  %v5838_v52 = vmul.f32 %v15667_v36, %v15667_v36 }
 0xe93   :  { %9811 = vrcp.f32 %v6009_v21  ;;  %v5973_v58 = vadd.f32 %v5961_v25, %v5937_v40 }
 0xe94   :  { %v5989_v40 = vmul.f32 %v15719_v43, %v5838_v52 }
 0xe97   :  { %v5883_v31 = vpop.xlane.xlu1 %5882 }
 0xe98   :  { %v5903_v63 = vmul.f32 2.0, %v5883_v31 }
 0xe99   :  { %v5880_v5 = vpop.xlane.xlu0 %5879 }
 0xe9a   :  { %v5902_v45 = vmul.f32 2.0, %v5880_v5  ;;  %v5915_v54 = vadd.f32 1.0, %v5903_v63 }
 0xe9c   :  { %v9810_v42 = vpop.eup %9809  ;;  %v5914_v46 = vadd.f32 1.0, %v5902_v45  ;;  %v6000_v62 = vadd.f32 %v5988_v22, %v5915_v54  ;;  %v5928_v57 = vadd.f32 %v15719_v43, %v5915_v54  ;;  %v5953_v22 = vsub.f32 1.0, %v5838_v52 }
 0xe9d   :  { %v9812_v34 = vpop.eup %9811  ;;  %v15779_v26 = vmul.f32 %v9810_v42, %v5974_v47  ;;  %v5954_v47 = vsub.f32 1.0, %v5839_v50 }
 0xe9e   :  { %v15781_v32 = vmul.f32 %v9812_v34, %v5973_v58  ;;  %v5999_v44 = vadd.f32 %v5987_v1, %v5914_v46  ;;  %v6012_v14 = vmax.f32 %v6000_v62, 1e-15  ;;  %v5927_v9 = vadd.f32 %v15719_v43, %v5914_v46 }
 0xe9f   :  { %v6058_v6 = vmul.f32 %v15779_v26, %v15779_v26  ;;  %v5940_v61 = vmul.f32 %v5928_v57, %v15645_v4  ;;  %v5966_v58 = vmul.f32 %v15357_v17, %v5954_v47  ;;  %v5841_v1 = vmul.f32 %v15693_v20, %v15693_v20 }
 0xea0   :  { %v6057_v37 = vmul.f32 %v15781_v32, %v15781_v32  ;;  %v6011_v28 = vmax.f32 %v5999_v44, 1e-15  ;;  %9813 = vrcp.f32 %v6012_v14  ;;  %v5939_v18 = vmul.f32 %v5927_v9, %v15649_v13 }
 0xea1   :  { %v6080_v15 = vsel %vm490_vm13, %v6058_v6, 0.0  ;;  %v5976_v10 = vadd.f32 %v5964_v2, %v5940_v61  ;;  %v5840_v44 = vmul.f32 %v15696_v8, %v15696_v8  ;;  %v5965_v6 = vmul.f32 %v15357_v17, %v5953_v22 }
 0xea2   :  { %6081 = vadd.xlane.f32.xlu1 %v6080_v15  ;;  %v6077_v35 = vsel %vm490_vm13, %v6057_v37, 0.0  ;;  %9815 = vrcp.f32 %v6011_v28  ;;  %v5975_v4 = vadd.f32 %v5963_v19, %v5939_v18 }
 0xea3   :  { %6078 = vadd.xlane.f32.xlu0 %v6077_v35  ;;  %v5992_v35 = vmul.f32 %v15719_v43, %v5841_v1  ;;  %v5991_v9 = vmul.f32 %v15719_v43, %v5840_v44 }
 0xea8   :  { %v5889_v48 = vpop.xlane.xlu1 %5888 }
 0xea9   :  { %v5905_v49 = vmul.f32 2.0, %v5889_v48 }
 0xeaa   :  { %v9814_v21 = vpop.eup %9813 }
 0xeab   :  { %v5917_v0 = vadd.f32 1.0, %v5905_v49  ;;  %v15800_v13 = vmul.f32 %v9814_v21, %v5976_v10 }
 0xeac   :  { %v5886_v3 = vpop.xlane.xlu0 %5885  ;;  %v9816_v29 = vpop.eup %9815 }
 0xead   :  { %v6002_v11 = vadd.f32 %v5990_v60, %v5917_v0  ;;  %v5904_v41 = vmul.f32 2.0, %v5886_v3  ;;  %v15802_v23 = vmul.f32 %v9816_v29, %v5975_v4  ;;  %v6060_v24 = vmul.f32 %v15800_v13, %v15800_v13 }
 0xeae   :  { %v5930_v7 = vadd.f32 %v15719_v43, %v5917_v0  ;;  %v5956_v60 = vsub.f32 1.0, %v5841_v1  ;;  %v5955_v0 = vsub.f32 1.0, %v5840_v44 }
 0xeaf   :  { %v6014_v12 = vmax.f32 %v6002_v11, 1e-15  ;;  %v5916_v59 = vadd.f32 1.0, %v5904_v41  ;;  %v6059_v36 = vmul.f32 %v15802_v23, %v15802_v23  ;;  %v6086_v25 = vsel %vm490_vm13, %v6060_v24, 0.0 }
 0xeb0   :  { %6087 = vadd.xlane.f32.xlu1 %v6086_v25  ;;  %v5942_v45 = vmul.f32 %v5930_v7, %v15674_v27  ;;  %v5968_v4 = vmul.f32 %v15357_v17, %v5956_v60  ;;  %v5967_v3 = vmul.f32 %v15357_v17, %v5955_v0 }
 0xeb1   :  { %9817 = vrcp.f32 %v6014_v12  ;;  %v6001_v31 = vadd.f32 %v5989_v40, %v5916_v59  ;;  %v6083_v63 = vsel %vm490_vm13, %v6059_v36, 0.0  ;;  %v5929_v42 = vadd.f32 %v15719_v43, %v5916_v59 }
 0xeb2   :  { %6084 = vadd.xlane.f32.xlu0 %v6083_v63  ;;  %v5978_v54 = vadd.f32 %v5966_v58, %v5942_v45 }
 0xeb3   :  { %v6013_v5 = vmax.f32 %v6001_v31, 1e-15  ;;  %v5941_v34 = vmul.f32 %v5929_v42, %v15688_v55 }
 0xeb5   :  { %9819 = vrcp.f32 %v6013_v5  ;;  %v5977_v15 = vadd.f32 %v5965_v6, %v5941_v34 }
 0xebb   :  { %v9818_v46 = vpop.eup %9817  ;;  %v5895_v62 = vpop.xlane.xlu1 %5894 }
 0xebc   :  { %v5907_v14 = vmul.f32 2.0, %v5895_v62  ;;  %v5892_v27 = vpop.xlane.xlu0 %5891  ;;  %v15821_v37 = vmul.f32 %v9818_v46, %v5978_v54 }
 0xebd   :  { %v5906_v28 = vmul.f32 2.0, %v5892_v27 }
 0xebe   :  { %v5919_v57 = vadd.f32 1.0, %v5907_v14  ;;  %v6062_v55 = vmul.f32 %v15821_v37, %v15821_v37 }
 0xebf   :  { %v9820_v20 = vpop.eup %9819  ;;  %v5918_v39 = vadd.f32 1.0, %v5906_v28 }
 0xec0   :  { %v6004_v53 = vadd.f32 %v5992_v35, %v5919_v57  ;;  %v6092_v8 = vsel %vm490_vm13, %v6062_v55, 0.0  ;;  %v15828_v61 = vmul.f32 %v9820_v20, %v5977_v15  ;;  %v5932_v19 = vadd.f32 %v15719_v43, %v5919_v57 }
 0xec1   :  { %v6003_v50 = vadd.f32 %v5991_v9, %v5918_v39  ;;  %6093 = vadd.xlane.f32.xlu1 %v6092_v8  ;;  %v5931_v10 = vadd.f32 %v15719_v43, %v5918_v39 }
 0xec2   :  { %v6016_v18 = vmax.f32 %v6004_v53, 1e-15  ;;  %v6061_v48 = vmul.f32 %v15828_v61, %v15828_v61  ;;  %v5944_v52 = vmul.f32 %v5932_v19, %v15704_v38 }
 0xec3   :  { %v6015_v2 = vmax.f32 %v6003_v50, 1e-15  ;;  %v5943_v21 = vmul.f32 %v5931_v10, %v15709_v51 }
 0xec4   :  { %9821 = vrcp.f32 %v6016_v18  ;;  %v6089_v49 = vsel %vm490_vm13, %v6061_v48, 0.0  ;;  %v5980_v29 = vadd.f32 %v5968_v4, %v5944_v52 }
 0xec5   :  { %9823 = vrcp.f32 %v6015_v2  ;;  %6090 = vadd.xlane.f32.xlu0 %v6089_v49  ;;  %v5979_v41 = vadd.f32 %v5967_v3, %v5943_v21 }
 0xece   :  { %v9822_v11 = vpop.eup %9821 }
 0xecf   :  { %v9824_v12 = vpop.eup %9823  ;;  %v15839_v40 = vmul.f32 %v9822_v11, %v5980_v29 }
 0xed0   :  { %v15841_v59 = vmul.f32 %v9824_v12, %v5979_v41 }
 0xed1   :  { %v6064_v43 = vmul.f32 %v15839_v40, %v15839_v40 }
 0xed2   :  { %v6063_v38 = vmul.f32 %v15841_v59, %v15841_v59 }
 0xed3   :  { %v6098_v51 = vsel %vm490_vm13, %v6064_v43, 0.0 }
 0xed4   :  { %6099 = vadd.xlane.f32.xlu1 %v6098_v51  ;;  %v6095_v24 = vsel %vm490_vm13, %v6063_v38, 0.0 }
 0xed5   :  { %6096 = vadd.xlane.f32.xlu0 %v6095_v24 }
 0xf0b   :  { %v6070_v17 = vpop.xlane.xlu1 %6069 }
 0xf0c   :  { %v6067_v36 = vpop.xlane.xlu0 %6066  ;;  %v6102_v31 = vmax.f32 %v6070_v17, 1e-30 }
 0xf0d   :  { %v6101_v7 = vmax.f32 %v6067_v36, 1e-30 }
 0xf0e   :  { %9825 = vrsqrt.f32 %v6102_v31 }
 0xf0f   :  { %9827 = vrsqrt.f32 %v6101_v7 }
 0xf18   :  { %v15849_v25 = vpop.eup %9825 }
 0xf19   :  { %v15851_v63 = vpop.eup %9827  ;;  %v15854_v5 = vmul.f32 %v15849_v25, %v6102_v31  ;;  %v6150_v50 = vmul.f32 0.996, %v15849_v25 }
 0xf1a   :  { %v6076_v47 = vpop.xlane.xlu1 %6075  ;;  %v15857_v45 = vmul.f32 %v15851_v63, %v6101_v7  ;;  %v6149_v48 = vmul.f32 0.996, %v15851_v63 }
 0xf1b   :  { %v6104_v42 = vmax.f32 %v6076_v47, 1e-30  ;;  %vm6138_vm3 = vcmp.gt.f32.partialorder %v15854_v5, 0.996  ;;  %v15867_v62 = vpop.xlane.xlu0 %6072 }
 0xf1c   :  { %v6210_v58 = vsel %vm6138_vm3, 0.996, %v15854_v5  ;;  %vm6137_vm10 = vcmp.gt.f32.partialorder %v15857_v45, 0.996  ;;  %v6103_v27 = vmax.f32 %v15867_v62, 1e-30 }
 0xf1d   :  { %v8209_v22 = vclamps-f32 %v6210_v58, 0.9999999  ;;  %v6209_v54 = vsel %vm6137_vm10, 0.996, %v15857_v45  ;;  %9829 = vrsqrt.f32 %v6104_v42 }
 0xf1e   :  { %v8208_v34 = vclamps-f32 %v6209_v54, 0.9999999 }
 0xf1f   :  { %v6266_v1 = vadd.f32 1.0, %v8209_v22  ;;  %v6366_v46 = vsub.f32 0.0, %v8209_v22  ;;  %v6269_v15 = vmul.f32 -0.5, %v8209_v22  ;;  %v6272_v9 = vand.u32 2147483647, %v8209_v22 }
 0xf20   :  { %v6257_v44 = vadd.f32 1.0, %v8208_v34  ;;  %v6365_v6 = vsub.f32 0.0, %v8208_v34  ;;  %v6260_v57 = vmul.f32 -0.5, %v8208_v34  ;;  %v6263_v19 = vand.u32 2147483647, %v8208_v34 }
 0xf21   :  { %9831 = vlog2.f32 %v6266_v1  ;;  %v6386_v14 = vadd.f32 1.0, %v6366_v46  ;;  %v6389_v35 = vmul.f32 -0.5, %v6366_v46  ;;  %v6270_v39 = vadd.f32 1.0, %v6269_v15 }
 0xf22   :  { %9833 = vlog2.f32 %v6257_v44  ;;  %v6377_v28 = vadd.f32 1.0, %v6365_v6  ;;  %v6380_v55 = vmul.f32 -0.5, %v6365_v6  ;;  %v6392_v53 = vand.u32 2147483647, %v6366_v46 }
 0xf23   :  { %9835 = vlog2.f32 %v6386_v14  ;;  %v6390_v18 = vadd.f32 1.0, %v6389_v35  ;;  %v6261_v49 = vadd.f32 1.0, %v6260_v57  ;;  %vm15878_vm5 = vcmp.lt.f32.partialorder %v6272_v9, 0.0004427343 }
 0xf24   :  { %9837 = vlog2.f32 %v6377_v28  ;;  %v6381_v10 = vadd.f32 1.0, %v6380_v55  ;;  %v6271_v3 = vmul.f32 %v8209_v22, %v6270_v39  ;;  %vm15885_vm2 = vcmp.lt.f32.partialorder %v6392_v53, 0.0004427343 }
 0xf25   :  { %9839 = vrsqrt.f32 %v6103_v27  ;;  %v6383_v11 = vand.u32 2147483647, %v6365_v6  ;;  %v6391_v38 = vmul.f32 %v6390_v18, %v6366_v46  ;;  %v6262_v31 = vmul.f32 %v8208_v34, %v6261_v49 }
 0xf26   :  { %v6382_v7 = vmul.f32 %v6381_v10, %v6365_v6  ;;  %vm6264_vm12 = vcmp.lt.f32.partialorder %v6263_v19, 0.0004427343  ;;  %v6162_v15 = vmul.f32 %v6150_v50, %v15735_v56  ;;  %v6222_v35 = vsel %vm6138_vm3, 1.004016, %v15849_v25 }
 0xf27   :  { %v15870_v20 = vpop.eup %9829  ;;  %vm6384_vm7 = vcmp.lt.f32.partialorder %v6383_v11, 0.0004427343  ;;  %v6161_v57 = vmul.f32 %v6149_v48, %v15737_v30  ;;  %v6221_v53 = vsel %vm6137_vm10, 1.004016, %v15851_v63 }
 0xf28   :  { %v15873_v8 = vmul.f32 %v15870_v20, %v6104_v42  ;;  %v6198_v25 = vsel %vm6138_vm3, %v6162_v15, %v15735_v56 }
 0xf29   :  { %v6197_v48 = vsel %vm6137_vm10, %v6161_v57, %v15737_v30 }
 0xf2a   :  { %vm6140_vm9 = vcmp.gt.f32.partialorder %v15873_v8, 0.996 }
 0xf2b   :  { %v9832_v2 = vpop.eup %9831  ;;  %v6212_v21 = vsel %vm6140_vm9, 0.996, %v15873_v8 }
 0xf2c   :  { %v9834_v60 = vpop.eup %9833  ;;  %v6268_v0 = vmul.f32 0.6931472, %v9832_v2  ;;  %v15889_v41 = vclamps-f32 %v6212_v21, 0.9999999 }
 0xf2d   :  { %v9836_v4 = vpop.eup %9835  ;;  %v6259_v51 = vmul.f32 0.6931472, %v9834_v60 }
 0xf2e   :  { %v6388_v43 = vmul.f32 0.6931472, %v9836_v4  ;;  %v9838_v17 = vpop.eup %9837  ;;  %v6274_v36 = vsel %vm15878_vm5, %v6271_v3, %v6268_v0  ;;  %v6284_v47 = vadd.f32 1.0, %v15889_v41  ;;  %v6368_v54 = vsub.f32 0.0, %v15889_v41 }
 0xf2f   :  { %v6082_v12 = vpop.xlane.xlu1 %6081  ;;  %v15894_v42 = vpop.eup %9839  ;;  %v6379_v22 = vmul.f32 0.6931472, %v9838_v17  ;;  %v6265_v46 = vsel %vm6264_vm12, %v6262_v31, %v6259_v51  ;;  %v6287_v60 = vmul.f32 -0.5, %v15889_v41  ;;  %v6290_v56 = vand.u32 2147483647, %v15889_v41 }
 0xf30   :  { %v6106_v24 = vmax.f32 %v6082_v12, 1e-30  ;;  %v6394_v58 = vsel %vm15885_vm2, %v6391_v38, %v6388_v43  ;;  %v6404_v44 = vadd.f32 1.0, %v6368_v54  ;;  %v6079_v14 = vpop.xlane.xlu0 %6078  ;;  %v15900_v28 = vmul.f32 %v15894_v42, %v6103_v27 }
 0xf31   :  { %v6486_v1 = vsub.f32 %v6274_v36, %v6394_v58  ;;  %v6385_v62 = vsel %vm6384_vm7, %v6382_v7, %v6379_v22  ;;  %v6105_v39 = vmax.f32 %v6079_v14, 1e-30  ;;  %v6407_v2 = vmul.f32 -0.5, %v6368_v54 }
 0xf32   :  { %9841 = vrsqrt.f32 %v6106_v24  ;;  %v6485_v6 = vsub.f32 %v6265_v46, %v6385_v62  ;;  %vm6139_vm15 = vcmp.gt.f32.partialorder %v15900_v28, 0.996  ;;  %v6288_v3 = vadd.f32 1.0, %v6287_v60 }
 0xf33   :  { %v6498_v34 = vmul.f32 0.5, %v6486_v1  ;;  %9843 = vlog2.f32 %v6284_v47  ;;  %v6211_v27 = vsel %vm6139_vm15, 0.996, %v15900_v28  ;;  %v6408_v4 = vadd.f32 1.0, %v6407_v2 }
 0xf34   :  { %9845 = vlog2.f32 %v6404_v44  ;;  %v6497_v9 = vmul.f32 0.5, %v6485_v6  ;;  %v8210_v18 = vclamps-f32 %v6211_v27, 0.9999999  ;;  %v6410_v29 = vand.u32 2147483647, %v6368_v54 }
 0xf35   :  { %v6510_v55 = vmul.f32 %v6498_v34, %v6222_v35  ;;  %9847 = vrsqrt.f32 %v6105_v39  ;;  %vm15938_vm14 = vcmp.lt.f32.partialorder %v6290_v56, 0.0004427343  ;;  %v6409_v47 = vmul.f32 %v6408_v4, %v6368_v54 }
 0xf36   :  { %v6509_v50 = vmul.f32 %v6497_v9, %v6221_v53  ;;  %v6275_v49 = vadd.f32 1.0, %v8210_v18  ;;  %v6367_v19 = vsub.f32 0.0, %v8210_v18  ;;  %v6278_v38 = vmul.f32 -0.5, %v8210_v18 }
 0xf37   :  { %v6522_v10 = vmul.f32 %v6510_v55, %v6198_v25  ;;  %v6289_v58 = vmul.f32 %v15889_v41, %v6288_v3  ;;  %vm15943_vm1 = vcmp.lt.f32.partialorder %v6410_v29, 0.0004427343  ;;  %v6281_v1 = vand.u32 2147483647, %v8210_v18 }
 0xf38   :  { %v6521_v0 = vmul.f32 %v6509_v50, %v6197_v48  ;;  %9849 = vlog2.f32 %v6275_v49  ;;  %v6395_v52 = vadd.f32 1.0, %v6367_v19  ;;  %v6398_v51 = vmul.f32 -0.5, %v6367_v19 }
 0xf39   :  { %v6279_v41 = vadd.f32 1.0, %v6278_v38  ;;  %v6401_v6 = vand.u32 2147483647, %v6367_v19  ;;  %v6151_v50 = vmul.f32 0.996, %v15894_v42 }
 0xf3a   :  { %9851 = vlog2.f32 %v6395_v52  ;;  %v8737_v30 = vpack.c.bf16 %v6522_v10, %v6521_v0  ;;  %v6399_v54 = vadd.f32 1.0, %v6398_v51  ;;  %vm6282_vm8 = vcmp.lt.f32.partialorder %v6281_v1, 0.0004427343 }
 0xf3b   :  { %v6280_v48 = vmul.f32 %v8210_v18, %v6279_v41  ;;  %vm6402_vm3 = vcmp.lt.f32.partialorder %v6401_v6, 0.0004427343  ;;  %v6224_v18 = vsel %vm6140_vm9, 1.004016, %v15870_v20  ;;  %v6163_v29 = vmul.f32 %v6151_v50, %v15757_v16 }
 0xf3c   :  { %v15920_v63 = vpop.eup %9841  ;;  %8738 = vmatprep.subr.bf16.mxu1 %v8737_v30  ;;  %v6400_v49 = vmul.f32 %v6399_v54, %v6367_v19  ;;  %v6223_v51 = vsel %vm6139_vm15, 1.004016, %v15894_v42 }
 0xf3d   :  { %v15924_v21 = vmul.f32 %v15920_v63, %v6106_v24  ;;  %v9844_v5 = vpop.eup %9843  ;;  %v15928_v11 = vpop.xlane.xlu1 %6087  ;;  %8740 = vmatpush3.bf16.msra.mxu1 %v8737_v30  ;;  %v6199_v42 = vsel %vm6139_vm15, %v6163_v29, %v15757_v16 }
 0xf3e   :  { %v9846_v45 = vpop.eup %9845  ;;  %v6108_v17 = vmax.f32 %v15928_v11, 1e-30  ;;  %v6286_v31 = vmul.f32 0.6931472, %v9844_v5 }
 0xf3f   :  { %vm6142_vm11 = vcmp.gt.f32.partialorder %v15924_v21, 0.996  ;;  %v6406_v12 = vmul.f32 0.6931472, %v9846_v45  ;;  %v15936_v36 = vpop.eup %9847  ;;  %v15948_v62 = vpop.xlane.xlu0 %6084 }
 0xf40   :  { %v6214_v43 = vsel %vm6142_vm11, 0.996, %v15924_v21  ;;  %v15956_v34 = vmul.f32 %v15936_v36, %v6105_v39  ;;  %9853 = vrsqrt.f32 %v6108_v17  ;;  %v6292_v35 = vsel %vm15938_vm14, %v6289_v58, %v6286_v31 }
 0xf41   :  { %v15933_v24 = vclamps-f32 %v6214_v43, 0.9999999  ;;  %v6412_v44 = vsel %vm15943_vm1, %v6409_v47, %v6406_v12  ;;  %v6107_v55 = vmax.f32 %v15948_v62, 1e-30  ;;  %v6152_v39 = vmul.f32 0.996, %v15870_v20 }
 0xf42   :  { %v9850_v15 = vpop.eup %9849  ;;  %vm6141_vm4 = vcmp.gt.f32.partialorder %v15956_v34, 0.996  ;;  %v6488_v9 = vsub.f32 %v6292_v35, %v6412_v44 }
 0xf43   :  { %v6302_v46 = vadd.f32 1.0, %v15933_v24  ;;  %v15953_v14 = vsub.f32 0.0, %v15933_v24  ;;  %v6277_v53 = vmul.f32 0.6931472, %v9850_v15  ;;  %v6213_v25 = vsel %vm6141_vm4, 0.996, %v15956_v34 }
 0xf44   :  { %v9852_v27 = vpop.eup %9851  ;;  %v15969_v60 = vclamps-f32 %v6213_v25, 0.9999999  ;;  %v6500_v0 = vmul.f32 0.5, %v6488_v9  ;;  %v6305_v4 = vmul.f32 -0.5, %v15933_v24  ;;  %v6164_v45 = vmul.f32 %v6152_v39, %v15755_v33 }
 0xf45   :  { %9855 = vlog2.f32 %v6302_v46  ;;  %v6422_v57 = vadd.f32 1.0, %v15953_v14  ;;  %v6397_v2 = vmul.f32 0.6931472, %v9852_v27  ;;  %v6425_v10 = vmul.f32 -0.5, %v15953_v14 }
 0xf46   :  { %v6283_v52 = vsel %vm6282_vm8, %v6280_v48, %v6277_v53  ;;  %v6293_v30 = vadd.f32 1.0, %v15969_v60  ;;  %v15978_v19 = vsub.f32 0.0, %v15969_v60  ;;  %v6512_v38 = vmul.f32 %v6500_v0, %v6224_v18 }
 0xf47   :  { %9857 = vlog2.f32 %v6422_v57  ;;  %v6403_v5 = vsel %vm6402_vm3, %v6400_v49, %v6397_v2  ;;  %v6426_v12 = vadd.f32 1.0, %v6425_v10  ;;  %v6306_v47 = vadd.f32 1.0, %v6305_v4 }
 0xf48   :  { %9859 = vrsqrt.f32 %v6107_v55  ;;  %v6487_v56 = vsub.f32 %v6283_v52, %v6403_v5  ;;  %v6413_v31 = vadd.f32 1.0, %v15978_v19  ;;  %v6428_v58 = vand.u32 2147483647, %v15953_v14 }
 0xf49   :  { %9861 = vlog2.f32 %v6293_v30  ;;  %v6200_v22 = vsel %vm6140_vm9, %v6164_v45, %v15755_v33  ;;  %v6308_v1 = vand.u32 2147483647, %v15933_v24  ;;  %v6427_v62 = vmul.f32 %v6426_v12, %v15953_v14 }
 0xf4a   :  { %v15980_v3 = vpop.eup %9853  ;;  %v6499_v11 = vmul.f32 0.5, %v6487_v56  ;;  %9863 = vlog2.f32 %v6413_v31  ;;  %v6296_v33 = vmul.f32 -0.5, %v15969_v60  ;;  %v6524_v54 = vmul.f32 %v6512_v38, %v6200_v22 }
 0xf4b   :  { %v15988_v20 = vmul.f32 %v15980_v3, %v6108_v17  ;;  %v6307_v15 = vmul.f32 %v15933_v24, %v6306_v47  ;;  %vm6429_vm9 = vcmp.lt.f32.partialorder %v6428_v58, 0.0004427343  ;;  %v6416_v16 = vmul.f32 -0.5, %v15978_v19 }
 0xf4c   :  { %v6511_v7 = vmul.f32 %v6499_v11, %v6223_v51  ;;  %vm6309_vm5 = vcmp.lt.f32.partialorder %v6308_v1, 0.0004427343  ;;  %v6154_v57 = vmul.f32 0.996, %v15920_v63  ;;  %v6297_v50 = vadd.f32 1.0, %v6296_v33 }
 0xf4d   :  { %vm6144_vm10 = vcmp.gt.f32.partialorder %v15988_v20, 0.996  ;;  %v6299_v49 = vand.u32 2147483647, %v15969_v60  ;;  %v6417_v10 = vadd.f32 1.0, %v6416_v16 }
 0xf4e   :  { %v6216_v44 = vsel %vm6144_vm10, 0.996, %v15988_v20  ;;  %v6523_v28 = vmul.f32 %v6511_v7, %v6199_v42  ;;  %v16010_v35 = vpop.xlane.xlu1 %6093  ;;  %v6419_v5 = vand.u32 2147483647, %v15978_v19  ;;  %v6153_v56 = vmul.f32 0.996, %v15936_v36 }
 0xf4f   :  { %v9856_v43 = vpop.eup %9855  ;;  %v16004_v8 = vclamps-f32 %v6216_v44, 0.9999999  ;;  %v6110_v52 = vmax.f32 %v16010_v35, 1e-30  ;;  %v6298_v18 = vmul.f32 %v15969_v60, %v6297_v50  ;;  %v6418_v12 = vmul.f32 %v6417_v10, %v15978_v19 }
 0xf50   :  { %v6304_v17 = vmul.f32 0.6931472, %v9856_v43  ;;  %v8741_v48 = vpack.c.bf16 %v6524_v54, %v6523_v28  ;;  %v6166_v38 = vmul.f32 %v6154_v57, %v15779_v26  ;;  %vm6300_vm12 = vcmp.lt.f32.partialorder %v6299_v49, 0.0004427343 }
 0xf51   :  { %v9858_v46 = vpop.eup %9857  ;;  %v16014_v53 = vsub.f32 0.0, %v16004_v8  ;;  %v6320_v25 = vadd.f32 1.0, %v16004_v8  ;;  %vm6420_vm7 = vcmp.lt.f32.partialorder %v6419_v5, 0.0004427343  ;;  %v6226_v60 = vsel %vm6142_vm11, 1.004016, %v15920_v63 }
 0xf52   :  { %v6424_v41 = vmul.f32 0.6931472, %v9858_v46  ;;  %v16006_v6 = vpop.eup %9859  ;;  %v6310_v9 = vsel %vm6309_vm5, %v6307_v15, %v6304_v17  ;;  %v16019_v39 = vpop.xlane.xlu0 %6090  ;;  %8742 = vmatprep.subr.bf16.mxu1 %v8741_v48  ;;  %v6165_v22 = vmul.f32 %v6153_v56, %v15781_v32  ;;  %v6323_v1 = vmul.f32 -0.5, %v16004_v8 }
 0xf53   :  { %v16017_v27 = vmul.f32 %v16006_v6, %v6107_v55  ;;  %v9862_v2 = vpop.eup %9861  ;;  %v6440_v0 = vadd.f32 1.0, %v16014_v53  ;;  %v6109_v55 = vmax.f32 %v16019_v39, 1e-30  ;;  %8744 = vmatpush3.bf16.msra.mxu1 %v8741_v48  ;;  %v6443_v46 = vmul.f32 -0.5, %v16014_v53 }
 0xf54   :  { %v6430_v14 = vsel %vm6429_vm9, %v6427_v62, %v6424_v41  ;;  %v6295_v4 = vmul.f32 0.6931472, %v9862_v2  ;;  %v9864_v30 = vpop.eup %9863  ;;  %v6202_v62 = vsel %vm6142_vm11, %v6166_v38, %v15779_v26  ;;  %v6225_v44 = vsel %vm6141_vm4, 1.004016, %v15936_v36 }
 0xf55   :  { %v6490_v24 = vsub.f32 %v6310_v9, %v6430_v14  ;;  %vm6143_vm2 = vcmp.gt.f32.partialorder %v16017_v27, 0.996  ;;  %9865 = vlog2.f32 %v6440_v0  ;;  %v6415_v11 = vmul.f32 0.6931472, %v9864_v30 }
 0xf56   :  { %9867 = vlog2.f32 %v6320_v25  ;;  %v6215_v29 = vsel %vm6143_vm2, 0.996, %v16017_v27  ;;  %v6301_v51 = vsel %vm6300_vm12, %v6298_v18, %v6295_v4  ;;  %v6201_v28 = vsel %vm6141_vm4, %v6165_v22, %v15781_v32 }
 0xf57   :  { %v6502_v45 = vmul.f32 0.5, %v6490_v24  ;;  %v16034_v43 = vclamps-f32 %v6215_v29, 0.9999999  ;;  %9869 = vrsqrt.f32 %v6110_v52  ;;  %v6421_v31 = vsel %vm6420_vm7, %v6418_v12, %v6415_v11 }
 0xf58   :  { %9871 = vrsqrt.f32 %v6109_v55  ;;  %v6489_v58 = vsub.f32 %v6301_v51, %v6421_v31  ;;  %v6324_v14 = vadd.f32 1.0, %v6323_v1  ;;  %v6444_v35 = vadd.f32 1.0, %v6443_v46 }
 0xf59   :  { %v6311_v7 = vadd.f32 1.0, %v16034_v43  ;;  %v6514_v47 = vmul.f32 %v6502_v45, %v6226_v60  ;;  %v16042_v19 = vsub.f32 0.0, %v16034_v43  ;;  %v6314_v21 = vmul.f32 -0.5, %v16034_v43 }
 0xf5a   :  { %v6501_v17 = vmul.f32 0.5, %v6489_v58  ;;  %v6446_v39 = vand.u32 2147483647, %v16014_v53  ;;  %v6156_v34 = vmul.f32 0.996, %v15980_v3  ;;  %v6325_v2 = vmul.f32 %v16004_v8, %v6324_v14 }
 0xf5b   :  { %9873 = vlog2.f32 %v6311_v7  ;;  %v6431_v63 = vadd.f32 1.0, %v16042_v19  ;;  %v6526_v15 = vmul.f32 %v6514_v47, %v6202_v62  ;;  %v6434_v36 = vmul.f32 -0.5, %v16042_v19 }
 0xf5c   :  { %v6513_v33 = vmul.f32 %v6501_v17, %v6225_v44  ;;  %v6326_v49 = vand.u32 2147483647, %v16004_v8  ;;  %v6445_v10 = vmul.f32 %v6444_v35, %v16014_v53  ;;  %v6315_v56 = vadd.f32 1.0, %v6314_v21 }
 0xf5d   :  { %9875 = vlog2.f32 %v6431_v63  ;;  %v6435_v4 = vadd.f32 1.0, %v6434_v36  ;;  %vm16081_vm11 = vcmp.lt.f32.partialorder %v6446_v39, 0.0004427343  ;;  %v6317_v45 = vand.u32 2147483647, %v16034_v43 }
 0xf5e   :  { %v6525_v57 = vmul.f32 %v6513_v33, %v6201_v28  ;;  %vm6327_vm1 = vcmp.lt.f32.partialorder %v6326_v49, 0.0004427343  ;;  %v6316_v60 = vmul.f32 %v16034_v43, %v6315_v56  ;;  %v6155_v46 = vmul.f32 0.996, %v16006_v6 }
 0xf5f   :  { %v9866_v16 = vpop.eup %9865  ;;  %v6436_v51 = vmul.f32 %v6435_v4, %v16042_v19  ;;  %vm6318_vm4 = vcmp.lt.f32.partialorder %v6317_v45, 0.0004427343  ;;  %v6168_v28 = vmul.f32 %v6156_v34, %v15800_v13 }
 0xf60   :  { %v9868_v26 = vpop.eup %9867  ;;  %v6442_v32 = vmul.f32 0.6931472, %v9866_v16  ;;  %v8745_v48 = vpack.c.bf16 %v6526_v15, %v6525_v57  ;;  %v6167_v14 = vmul.f32 %v6155_v46, %v15802_v23  ;;  %v6227_v57 = vsel %vm6143_vm2, 1.004016, %v16006_v6 }
 0xf61   :  { %v16047_v42 = vpop.xlane.xlu1 %6099  ;;  %v16064_v9 = vpop.eup %9869  ;;  %v6322_v5 = vmul.f32 0.6931472, %v9868_v26 }
 0xf62   :  { %v6112_v41 = vmax.f32 %v16047_v42, 1e-30  ;;  %v16057_v54 = vpop.xlane.xlu0 %6096  ;;  %v16068_v50 = vpop.eup %9871  ;;  %v16072_v25 = vmul.f32 %v16064_v9, %v6110_v52  ;;  %8746 = vmatprep.subr.bf16.mxu1 %v8745_v48  ;;  %v6448_v53 = vsel %vm16081_vm11, %v6445_v10, %v6442_v32  ;;  %v6203_v6 = vsel %vm6143_vm2, %v6167_v14, %v15802_v23 }
 0xf63   :  { %v6111_v24 = vmax.f32 %v16057_v54, 1e-30  ;;  %v16078_v0 = vmul.f32 %v16068_v50, %v6109_v55  ;;  %8748 = vmatpush3.bf16.msra.mxu1 %v8745_v48  ;;  %v6437_v55 = vand.u32 2147483647, %v16042_v19  ;;  %v6328_v38 = vsel %vm6327_vm1, %v6325_v2, %v6322_v5 }
 0xf64   :  { %9877 = vrsqrt.f32 %v6112_v41  ;;  %vm6146_vm15 = vcmp.gt.f32.partialorder %v16072_v25, 0.996  ;;  %v6492_v47 = vsub.f32 %v6328_v38, %v6448_v53  ;;  %v6204_v48 = vsel %vm6144_vm10, %v6168_v28, %v15800_v13 }
 0xf65   :  { %v9874_v30 = vpop.eup %9873  ;;  %v6218_v8 = vsel %vm6146_vm15, 0.996, %v16072_v25  ;;  %9879 = vrsqrt.f32 %v6111_v24  ;;  %vm6145_vm14 = vcmp.gt.f32.partialorder %v16078_v0, 0.996  ;;  %vm6438_vm8 = vcmp.lt.f32.partialorder %v6437_v55, 0.0004427343 }
 0xf66   :  { %v16094_v18 = vclamps-f32 %v6218_v8, 0.9999999  ;;  %v6313_v29 = vmul.f32 0.6931472, %v9874_v30  ;;  %v6217_v11 = vsel %vm6145_vm14, 0.996, %v16078_v0 }
 0xf67   :  { %v9876_v12 = vpop.eup %9875  ;;  %v16106_v1 = vclamps-f32 %v6217_v11, 0.9999999  ;;  %v6504_v44 = vmul.f32 0.5, %v6492_v47  ;;  %v6158_v5 = vmul.f32 0.996, %v16064_v9 }
 0xf68   :  { %v6338_v31 = vadd.f32 1.0, %v16094_v18  ;;  %v6433_v58 = vmul.f32 0.6931472, %v9876_v12  ;;  %v6374_v22 = vsub.f32 0.0, %v16094_v18  ;;  %v6319_v42 = vsel %vm6318_vm4, %v6316_v60, %v6313_v29 }
 0xf69   :  { %v6329_v62 = vadd.f32 1.0, %v16106_v1  ;;  %v16114_v15 = vsub.f32 0.0, %v16106_v1  ;;  %v6341_v35 = vmul.f32 -0.5, %v16094_v18  ;;  %v6344_v49 = vand.u32 2147483647, %v16094_v18 }
 0xf6a   :  { %9881 = vlog2.f32 %v6338_v31  ;;  %v6439_v17 = vsel %vm6438_vm8, %v6436_v51, %v6433_v58  ;;  %v6458_v43 = vadd.f32 1.0, %v6374_v22  ;;  %v6461_v26 = vmul.f32 -0.5, %v6374_v22 }
 0xf6b   :  { %v6491_v63 = vsub.f32 %v6319_v42, %v6439_v17  ;;  %v6449_v21 = vadd.f32 1.0, %v16114_v15  ;;  %v6342_v2 = vadd.f32 1.0, %v6341_v35  ;;  %v6464_v4 = vand.u32 2147483647, %v6374_v22 }
 0xf6c   :  { %9883 = vlog2.f32 %v6458_v43  ;;  %v6462_v56 = vadd.f32 1.0, %v6461_v26  ;;  %v6452_v30 = vmul.f32 -0.5, %v16114_v15  ;;  %vm16155_vm9 = vcmp.lt.f32.partialorder %v6344_v49, 0.0004427343 }
 0xf6d   :  { %v6503_v33 = vmul.f32 0.5, %v6491_v63  ;;  %9885 = vlog2.f32 %v6329_v62  ;;  %v6343_v45 = vmul.f32 %v16094_v18, %v6342_v2  ;;  %vm6465_vm5 = vcmp.lt.f32.partialorder %v6464_v4, 0.0004427343 }
 0xf6e   :  { %v16103_v7 = vpop.eup %9877  ;;  %9887 = vlog2.f32 %v6449_v21  ;;  %v6463_v12 = vmul.f32 %v6462_v56, %v6374_v22  ;;  %v6335_v38 = vand.u32 2147483647, %v16106_v1  ;;  %v6453_v51 = vadd.f32 1.0, %v6452_v30 }
 0xf6f   :  { %v16110_v19 = vmul.f32 %v16103_v7, %v6112_v41  ;;  %v16116_v16 = vpop.eup %9879  ;;  %v6228_v41 = vsel %vm6144_vm10, 1.004016, %v15980_v3  ;;  %v6515_v34 = vmul.f32 %v6503_v33, %v6227_v57  ;;  %v6455_v18 = vand.u32 2147483647, %v16114_v15 }
 0xf70   :  { %v6516_v36 = vmul.f32 %v6504_v44, %v6228_v41  ;;  %v16137_v3 = vmul.f32 %v16116_v16, %v6111_v24  ;;  %v6332_v24 = vmul.f32 -0.5, %v16106_v1  ;;  %v6157_v17 = vmul.f32 0.996, %v16068_v50 }
 0xf71   :  { %vm6148_vm3 = vcmp.gt.f32.partialorder %v16110_v19, 0.996  ;;  %v6527_v20 = vmul.f32 %v6515_v34, %v6203_v6  ;;  %v6170_v62 = vmul.f32 %v6158_v5, %v15821_v37  ;;  %v6454_v26 = vmul.f32 %v6453_v51, %v16114_v15 }
 0xf72   :  { %v6220_v39 = vsel %vm6148_vm3, 0.996, %v16110_v19  ;;  %vm6147_vm10 = vcmp.gt.f32.partialorder %v16137_v3, 0.996  ;;  %v6528_v27 = vmul.f32 %v6516_v36, %v6204_v48  ;;  %v6333_v60 = vadd.f32 1.0, %v6332_v24  ;;  %v10156_v19 = vld [vmem:[%s17298_s2 + $0x20] sm:$0xff] }
 0xf73   :  { %v16132_v32 = vclamps-f32 %v6220_v39, 0.9999999  ;;  %v6219_v55 = vsel %vm6147_vm10, 0.996, %v16137_v3  ;;  %vm6336_vm2 = vcmp.lt.f32.partialorder %v6335_v38, 0.0004427343  ;;  %v6206_v5 = vsel %vm6146_vm15, %v6170_v62, %v15821_v37 }
 0xf74   :  { %v9882_v10 = vpop.eup %9881  ;;  %v16167_v58 = vclamps-f32 %v6219_v55, 0.9999999  ;;  %v8749_v46 = vpack.c.bf16 %v6528_v27, %v6527_v20  ;;  %v6334_v35 = vmul.f32 %v16106_v1, %v6333_v60  ;;  %vm6456_vm12 = vcmp.lt.f32.partialorder %v6455_v18, 0.0004427343  ;;  %v10158_v3 = vld [vmem:[%s17298_s2 + $0x30] sm:$0xff] }
 0xf75   :  { %v6356_v54 = vadd.f32 1.0, %v16132_v32  ;;  %v16151_v13 = vsub.f32 0.0, %v16132_v32  ;;  %v6340_v23 = vmul.f32 0.6931472, %v9882_v10  ;;  %v6359_v22 = vmul.f32 -0.5, %v16132_v32 }
 0xf76   :  { %v9884_v52 = vpop.eup %9883  ;;  %v6347_v33 = vadd.f32 1.0, %v16167_v58  ;;  %v6375_v28 = vsub.f32 0.0, %v16167_v58  ;;  %8750 = vmatprep.subr.bf16.mxu1 %v8749_v46  ;;  %v6230_v36 = vsel %vm6146_vm15, 1.004016, %v16064_v9  ;;  %v6169_v1 = vmul.f32 %v6157_v17, %v15828_v61 }
 0xf77   :  { %9889 = vlog2.f32 %v6356_v54  ;;  %v6476_v53 = vadd.f32 1.0, %v16151_v13  ;;  %v9886_v29 = vpop.eup %9885  ;;  %v6460_v11 = vmul.f32 0.6931472, %v9884_v52  ;;  %v6346_v31 = vsel %vm16155_vm9, %v6343_v45, %v6340_v23  ;;  %8752 = vmatpush3.bf16.msra.mxu1 %v8749_v46 }
 0xf78   :  { %v6331_v43 = vmul.f32 0.6931472, %v9886_v29  ;;  %v9888_v63 = vpop.eup %9887  ;;  %v6479_v44 = vmul.f32 -0.5, %v16151_v13  ;;  %v6467_v21 = vadd.f32 1.0, %v6375_v28  ;;  %v6360_v34 = vadd.f32 1.0, %v6359_v22 }
 0xf79   :  { %9891 = vlog2.f32 %v6476_v53  ;;  %v6466_v47 = vsel %vm6465_vm5, %v6463_v12, %v6460_v11  ;;  %v6451_v41 = vmul.f32 0.6931472, %v9888_v63  ;;  %v6362_v15 = vand.u32 2147483647, %v16132_v32 }
 0xf7a   :  { %v6494_v42 = vsub.f32 %v6346_v31, %v6466_v47  ;;  %9893 = vlog2.f32 %v6347_v33  ;;  %v6337_v57 = vsel %vm6336_vm2, %v6334_v35, %v6331_v43  ;;  %v6480_v49 = vadd.f32 1.0, %v6479_v44 }
 0xf7b   :  { %v6457_v39 = vsel %vm6456_vm12, %v6454_v26, %v6451_v41  ;;  %9895 = vlog2.f32 %v6467_v21  ;;  %v6482_v10 = vand.u32 2147483647, %v16151_v13  ;;  %v6229_v54 = vsel %vm6145_vm14, 1.004016, %v16068_v50  ;;  %v10153_v26 = vld [vmem:[%s17298_s2 + $0x8] sm:$0xff]  ;;  %v10159_v21 = vld [vmem:[%s17298_s2 + $0x38] sm:$0xff] }
 0xf7c   :  { %v6506_v14 = vmul.f32 0.5, %v6494_v42  ;;  %v6493_v2 = vsub.f32 %v6337_v57, %v6457_v39  ;;  %v6361_v24 = vmul.f32 %v16132_v32, %v6360_v34  ;;  %v6350_v30 = vmul.f32 -0.5, %v16167_v58  ;;  %v10161_v57 = vld [vmem:[%s17298_s2 + $0x48] sm:$0xff]  ;;  %v10162_v39 = vld [vmem:[%s17298_s2 + $0x50] sm:$0xff]  ;;  %v10163_v34 = vld [vmem:[%s17298_s2 + $0x58] sm:$0xff] }
 0xf7d   :  { %v6470_v23 = vmul.f32 -0.5, %v6375_v28  ;;  %v6481_v52 = vmul.f32 %v6480_v49, %v16151_v13  ;;  %v6205_v37 = vsel %vm6145_vm14, %v6169_v1, %v15828_v61  ;;  %vm6363_vm7 = vcmp.lt.f32.partialorder %v6362_v15, 0.0004427343 }
 0xf7e   :  { %v6518_v6 = vmul.f32 %v6506_v14, %v6230_v36  ;;  %v6505_v56 = vmul.f32 0.5, %v6493_v2  ;;  %vm6483_vm15 = vcmp.lt.f32.partialorder %v6482_v10, 0.0004427343  ;;  %v6351_v55 = vadd.f32 1.0, %v6350_v30  ;;  %v10160_v36 = vld [vmem:[%s17298_s2 + $0x40] sm:$0xff] }
 0xf7f   :  { %v6471_v32 = vadd.f32 1.0, %v6470_v23  ;;  %v6353_v11 = vand.u32 2147483647, %v16167_v58  ;;  %v6473_v12 = vand.u32 2147483647, %v6375_v28 }
 0xf80   :  { %v6517_v20 = vmul.f32 %v6505_v56, %v6229_v54  ;;  %v6530_v45 = vmul.f32 %v6518_v6, %v6206_v5  ;;  %v6160_v13 = vmul.f32 0.996, %v16103_v7  ;;  %v6159_v61 = vmul.f32 0.996, %v16116_v16 }
 0xf81   :  { %v9890_v48 = vpop.eup %9889  ;;  %v6352_v0 = vmul.f32 %v16167_v58, %v6351_v55  ;;  %v6472_v47 = vmul.f32 %v6471_v32, %v6375_v28  ;;  %vm6354_vm11 = vcmp.lt.f32.partialorder %v6353_v11, 0.0004427343  ;;  %vm6474_vm14 = vcmp.lt.f32.partialorder %v6473_v12, 0.0004427343 }
 0xf82   :  { %v6358_v9 = vmul.f32 0.6931472, %v9890_v48  ;;  %v6529_v53 = vmul.f32 %v6517_v20, %v6205_v37  ;;  %v6172_v46 = vmul.f32 %v6160_v13, %v15839_v40  ;;  %v6232_v42 = vsel %vm6148_vm3, 1.004016, %v16103_v7 }
 0xf83   :  { %v9892_v4 = vpop.eup %9891  ;;  %v6171_v62 = vmul.f32 %v6159_v61, %v15841_v59  ;;  %v6231_v33 = vsel %vm6147_vm10, 1.004016, %v16116_v16  ;;  %v10157_v16 = vld [vmem:[%s17298_s2 + $0x28] sm:$0xff] }
 0xf84   :  { %v6478_v27 = vmul.f32 0.6931472, %v9892_v4  ;;  %v6364_v25 = vsel %vm6363_vm7, %v6361_v24, %v6358_v9  ;;  %v9894_v29 = vpop.eup %9893  ;;  %v8753_v38 = vpack.c.bf16 %v6530_v45, %v6529_v53  ;;  %v6208_v58 = vsel %vm6148_vm3, %v6172_v46, %v15839_v40  ;;  %v10154_v40 = vld [vmem:[%s17298_s2 + $0x10] sm:$0xff] }
 0xf85   :  { %v6349_v60 = vmul.f32 0.6931472, %v9894_v29  ;;  %v9896_v51 = vpop.eup %9895  ;;  %v6207_v7 = vsel %vm6147_vm10, %v6171_v62, %v15841_v59  ;;  %v10155_v59 = vld [vmem:[%s17298_s2 + $0x18] sm:$0xff] }
 0xf86   :  { %v6484_v8 = vsel %vm6483_vm15, %v6481_v52, %v6478_v27  ;;  %8754 = vmatprep.subr.bf16.mxu1 %v8753_v38  ;;  %v6469_v31 = vmul.f32 0.6931472, %v9896_v51 }
 0xf87   :  { %v6496_v50 = vsub.f32 %v6364_v25, %v6484_v8  ;;  %8756 = vmatpush3.bf16.msra.mxu1 %v8753_v38  ;;  %v6355_v17 = vsel %vm6354_vm11, %v6352_v0, %v6349_v60 }
 0xf88   :  { %v6475_v43 = vsel %vm6474_vm14, %v6472_v47, %v6469_v31 }
 0xf89   :  { %v6508_v18 = vmul.f32 0.5, %v6496_v50  ;;  %v6495_v63 = vsub.f32 %v6355_v17, %v6475_v43 }
 0xf8b   :  { %v6520_v22 = vmul.f32 %v6508_v18, %v6232_v42  ;;  %v6507_v44 = vmul.f32 0.5, %v6495_v63 }
 0xf8d   :  { %v6519_v28 = vmul.f32 %v6507_v44, %v6231_v33  ;;  %v6532_v14 = vmul.f32 %v6520_v22, %v6208_v58 }
 0xf8f   :  { %v6531_v35 = vmul.f32 %v6519_v28, %v6207_v7 }
 0xf91   :  { %v8757_v41 = vpack.c.bf16 %v6532_v14, %v6531_v35 }
 0xf93   :  { %8758 = vmatprep.subr.bf16.mxu1 %v8757_v41 }
 0xf94   :  { %8760 = vmatpush3.bf16.msra.mxu1 %v8757_v41 }
 0xf97   :  { %8607 = vmatmul.mubr.msk.f32.vlgmr.msra.gmra.mrb[24].mxu1 %vm1794_vm6, %v10153_v26 }
 0xf98   :  { %8609 = vmatprep.mubr.msk.f32.mxu1 %vm1794_vm6, %v10154_v40 }
 0xf9b   :  { %8610 = vmatmul.mubr.msk.f32.gmra.mrb[26].mxu1 %vm1794_vm6, %v10155_v59 }
 0xf9c   :  { %8612 = vmatprep.mubr.msk.f32.mxu1 %vm1794_vm6, %v10156_v19 }
 0xf9f   :  { %8613 = vmatmul.mubr.msk.f32.gmra.mrb[28].mxu1 %vm1794_vm6, %v10157_v16 }
 0xfa0   :  { %8615 = vmatprep.mubr.msk.f32.mxu1 %vm1794_vm6, %v10158_v3 }
 0xfa3   :  { %8616 = vmatmul.mubr.msk.f32.gmra.mrb[30].mxu1 %vm1794_vm6, %v10159_v21 }
 0xfa4   :  { %8618 = vmatprep.mubr.msk.f32.mxu1 %vm1794_vm6, %v10160_v36 }
 0xfa7   :  { %8619 = vmatmul.mubr.msk.f32.gmra.mrb[32].mxu1 %vm1794_vm6, %v10161_v57 }
 0xfa8   :  { %8621 = vmatprep.mubr.msk.f32.mxu1 %vm1794_vm6, %v10162_v39 }
 0xfab   :  { %8622 = vmatmul.mubr.msk.f32.gmra.mrb[34].mxu1 %vm1794_vm6, %v10163_v34 }
0x106a   :  { %v16257_v48 = vpop.f32.mrb[24].mxu1 }
0x106b   :  { %v6659_v6 = vmul.f32 %v16257_v48, %v16257_v48  ;;  %v16261_v2 = vpop.f32.mrb[25].mxu1 }
0x106c   :  { %v6658_v49 = vmul.f32 %v16261_v2, %v16261_v2 }
0x106d   :  { %v6673_v1 = vsel %vm490_vm13, %v6659_v6, 0.0 }
0x106e   :  { %6674 = vadd.xlane.f32.xlu1 %v6673_v1  ;;  %v16266_v15 = vpop.f32.mrb[26].mxu1  ;;  %v6670_v10 = vsel %vm490_vm13, %v6658_v49, 0.0 }
0x106f   :  { %v6661_v5 = vmul.f32 %v16266_v15, %v16266_v15  ;;  %6671 = vadd.xlane.f32.xlu0 %v6670_v10  ;;  %v16271_v56 = vpop.f32.mrb[27].mxu1 }
0x1070   :  { %v6660_v9 = vmul.f32 %v16271_v56, %v16271_v56 }
0x1071   :  { %v6679_v4 = vsel %vm490_vm13, %v6661_v5, 0.0 }
0x1072   :  { %6680 = vadd.xlane.f32.xlu1 %v6679_v4  ;;  %v16276_v54 = vpop.f32.mrb[28].mxu1  ;;  %v6676_v24 = vsel %vm490_vm13, %v6660_v9, 0.0 }
0x1073   :  { %v6663_v30 = vmul.f32 %v16276_v54, %v16276_v54  ;;  %6677 = vadd.xlane.f32.xlu0 %v6676_v24  ;;  %v16281_v23 = vpop.f32.mrb[29].mxu1 }
0x1074   :  { %v6662_v20 = vmul.f32 %v16281_v23, %v16281_v23 }
0x1075   :  { %v6685_v27 = vsel %vm490_vm13, %v6663_v30, 0.0 }
0x1076   :  { %6686 = vadd.xlane.f32.xlu1 %v6685_v27  ;;  %v16286_v52 = vpop.f32.mrb[30].mxu1  ;;  %v6682_v45 = vsel %vm490_vm13, %v6662_v20, 0.0 }
0x1077   :  { %v6665_v37 = vmul.f32 %v16286_v52, %v16286_v52  ;;  %6683 = vadd.xlane.f32.xlu0 %v6682_v45  ;;  %v16291_v25 = vpop.f32.mrb[31].mxu1 }
0x1078   :  { %v6664_v8 = vmul.f32 %v16291_v25, %v16291_v25 }
0x1079   :  { %v6691_v53 = vsel %vm490_vm13, %v6665_v37, 0.0 }
0x107a   :  { %6692 = vadd.xlane.f32.xlu1 %v6691_v53  ;;  %v16296_v50 = vpop.f32.mrb[32].mxu1  ;;  %v6688_v55 = vsel %vm490_vm13, %v6664_v8, 0.0 }
0x107b   :  { %v6667_v32 = vmul.f32 %v16296_v50, %v16296_v50  ;;  %6689 = vadd.xlane.f32.xlu0 %v6688_v55  ;;  %v16301_v29 = vpop.f32.mrb[33].mxu1 }
0x107c   :  { %v6666_v11 = vmul.f32 %v16301_v29, %v16301_v29 }
0x107d   :  { %v6697_v12 = vsel %vm490_vm13, %v6667_v32, 0.0 }
0x107e   :  { %6698 = vadd.xlane.f32.xlu1 %v6697_v12  ;;  %v16306_v38 = vpop.f32.mrb[34].mxu1  ;;  %v6694_v13 = vsel %vm490_vm13, %v6666_v11, 0.0 }
0x107f   :  { %v6669_v60 = vmul.f32 %v16306_v38, %v16306_v38  ;;  %6695 = vadd.xlane.f32.xlu0 %v6694_v13  ;;  %v16311_v51 = vpop.f32.mrb[35].mxu1 }
0x1080   :  { %v6668_v18 = vmul.f32 %v16311_v51, %v16311_v51 }
0x1081   :  { %v6703_v61 = vsel %vm490_vm13, %v6669_v60, 0.0 }
0x1082   :  { %6704 = vadd.xlane.f32.xlu1 %v6703_v61  ;;  %v6700_v0 = vsel %vm490_vm13, %v6668_v18, 0.0 }
0x1083   :  { %6701 = vadd.xlane.f32.xlu0 %v6700_v0 }
0x10fb   :  { %v6675_v31 = vpop.xlane.xlu1 %6674 }
0x10fc   :  { %v6707_v47 = vmax.f32 %v6675_v31, 1e-30  ;;  %v6672_v46 = vpop.xlane.xlu0 %6671 }
0x10fd   :  { %v6706_v42 = vmax.f32 %v6672_v46, 1e-30 }
0x10fe   :  { %9897 = vrsqrt.f32 %v6707_v47 }
0x10ff   :  { %9899 = vrsqrt.f32 %v6706_v42  ;;  %v6681_v17 = vpop.xlane.xlu1 %6680 }
0x1100   :  { %v6709_v43 = vmax.f32 %v6681_v17, 1e-30  ;;  %v6678_v22 = vpop.xlane.xlu0 %6677 }
0x1101   :  { %v6708_v63 = vmax.f32 %v6678_v22, 1e-30 }
0x1102   :  { %9901 = vrsqrt.f32 %v6709_v43 }
0x1103   :  { %v6687_v62 = vpop.xlane.xlu1 %6686  ;;  %9903 = vrsqrt.f32 %v6708_v63 }
0x1104   :  { %v6684_v44 = vpop.xlane.xlu0 %6683  ;;  %v6711_v58 = vmax.f32 %v6687_v62, 1e-30 }
0x1105   :  { %v6710_v33 = vmax.f32 %v6684_v44, 1e-30 }
0x1106   :  { %9905 = vrsqrt.f32 %v6711_v58 }
0x1107   :  { %v6693_v28 = vpop.xlane.xlu1 %6692  ;;  %9907 = vrsqrt.f32 %v6710_v33 }
0x1108   :  { %v16317_v14 = vpop.eup %9897  ;;  %v6713_v7 = vmax.f32 %v6693_v28, 1e-30  ;;  %v6690_v35 = vpop.xlane.xlu0 %6689 }
0x1109   :  { %v16319_v41 = vpop.eup %9899  ;;  %v6731_v26 = vmul.f32 %v16317_v14, %v6707_v47  ;;  %v6712_v19 = vmax.f32 %v6690_v35, 1e-30 }
0x110a   :  { %v6730_v40 = vmul.f32 %v16319_v41, %v6706_v42  ;;  %9909 = vrsqrt.f32 %v6713_v7 }
0x110b   :  { %v8233_v59 = vclamps-f32 %v6731_v26, 15.0  ;;  %v6699_v16 = vpop.xlane.xlu1 %6698 }
0x110c   :  { %v16323_v3 = vpop.eup %9901  ;;  %v8232_v21 = vclamps-f32 %v6730_v40, 15.0  ;;  %v6696_v36 = vpop.xlane.xlu0 %6695  ;;  %v6715_v57 = vmax.f32 %v6699_v16, 1e-30 }
0x110d   :  { %9911 = vtanh.f32 %v8233_v59  ;;  %v6733_v39 = vmul.f32 %v16323_v3, %v6709_v43  ;;  %v6714_v34 = vmax.f32 %v6696_v36, 1e-30  ;;  %v16326_v6 = vpop.eup %9903 }
0x110e   :  { %9913 = vtanh.f32 %v8232_v21  ;;  %v6732_v5 = vmul.f32 %v16326_v6, %v6708_v63 }
0x110f   :  { %9915 = vrsqrt.f32 %v6712_v19  ;;  %v6705_v49 = vpop.xlane.xlu1 %6704  ;;  %v8235_v10 = vclamps-f32 %v6733_v39, 15.0 }
0x1110   :  { %9917 = vrsqrt.f32 %v6715_v57  ;;  %v16328_v1 = vpop.eup %9905  ;;  %v6717_v9 = vmax.f32 %v6705_v49, 1e-30  ;;  %v16333_v24 = vpop.xlane.xlu0 %6701  ;;  %v8234_v45 = vclamps-f32 %v6732_v5, 15.0 }
0x1111   :  { %9919 = vrsqrt.f32 %v6714_v34  ;;  %v16331_v4 = vpop.eup %9907  ;;  %v6735_v20 = vmul.f32 %v16328_v1, %v6711_v58  ;;  %v6716_v8 = vmax.f32 %v16333_v24, 1e-30 }
0x1112   :  { %9921 = vtanh.f32 %v8235_v10  ;;  %v6734_v11 = vmul.f32 %v16331_v4, %v6710_v33 }
0x1113   :  { %9923 = vrsqrt.f32 %v6717_v9  ;;  %v8237_v32 = vclamps-f32 %v6735_v20, 15.0 }
0x1114   :  { %v16335_v30 = vpop.eup %9909  ;;  %9925 = vtanh.f32 %v8234_v45  ;;  %v8236_v42 = vclamps-f32 %v6734_v11, 15.0 }
0x1115   :  { %v6737_v60 = vmul.f32 %v16335_v30, %v6713_v7  ;;  %9927 = vrsqrt.f32 %v6716_v8 }
0x1116   :  { %9929 = vtanh.f32 %v8237_v32 }
0x1117   :  { %v16338_v27 = vpop.eup %9911  ;;  %v8239_v22 = vclamps-f32 %v6737_v60, 15.0 }
0x1118   :  { %v16340_v37 = vpop.eup %9913  ;;  %vm6779_vm1 = vcmp.gt.f32.partialorder %v16338_v27, 0.996  ;;  %v6827_v18 = vmax.f32 %v16338_v27, 1e-15 }
0x1119   :  { %v16344_v53 = vpop.eup %9915  ;;  %v6791_v55 = vsel %vm6779_vm1, 0.996, %v16338_v27  ;;  %vm6778_vm4 = vcmp.gt.f32.partialorder %v16340_v37, 0.996 }
0x111a   :  { %v16351_v12 = vclamps-f32 %v6791_v55, 0.9999999  ;;  %v16353_v13 = vpop.eup %9917  ;;  %v6790_v61 = vsel %vm6778_vm4, 0.996, %v16340_v37  ;;  %v6736_v0 = vmul.f32 %v16344_v53, %v6712_v19  ;;  %9931 = vrcp.f32 %v6827_v18 }
0x111b   :  { %v16364_v47 = vpop.eup %9919  ;;  %v6739_v17 = vmul.f32 %v16353_v13, %v6715_v57  ;;  %v16368_v43 = vclamps-f32 %v6790_v61, 0.9999999  ;;  %v6803_v33 = vmul.f32 %v16317_v14, %v6791_v55  ;;  %v6826_v14 = vmax.f32 %v16340_v37, 1e-15 }
0x111c   :  { %v6907_v31 = vadd.f32 1.0, %v16351_v12  ;;  %v7007_v46 = vsub.f32 0.0, %v16351_v12  ;;  %v8238_v62 = vclamps-f32 %v6736_v0, 15.0  ;;  %v6738_v44 = vmul.f32 %v16364_v47, %v6714_v34  ;;  %v16371_v58 = vpop.eup %9921 }
0x111d   :  { %v16374_v28 = vpop.eup %9923  ;;  %v8241_v7 = vclamps-f32 %v6739_v17, 15.0  ;;  %v6910_v35 = vmul.f32 -0.5, %v16351_v12  ;;  %v6898_v26 = vadd.f32 1.0, %v16368_v43  ;;  %v6913_v40 = vand.u32 2147483647, %v16351_v12 }
0x111e   :  { %v7027_v63 = vadd.f32 1.0, %v7007_v46  ;;  %9933 = vlog2.f32 %v6907_v31  ;;  %v7030_v59 = vmul.f32 -0.5, %v7007_v46  ;;  %v16380_v19 = vsub.f32 0.0, %v16368_v43  ;;  %v16384_v21 = vpop.eup %9925 }
0x111f   :  { %v8240_v16 = vclamps-f32 %v6738_v44, 15.0  ;;  %vm6781_vm8 = vcmp.gt.f32.partialorder %v16371_v58, 0.996  ;;  %v16387_v36 = vmul.f32 %v16374_v28, %v6717_v9  ;;  %v16390_v57 = vmul.f32 %v16257_v48, %v6803_v33  ;;  %v16393_v34 = vpop.eup %9927 }
0x1120   :  { %9935 = vlog2.f32 %v7027_v63  ;;  %v7018_v39 = vadd.f32 1.0, %v16380_v19  ;;  %v6911_v49 = vadd.f32 1.0, %v6910_v35  ;;  %v6802_v10 = vmul.f32 %v16319_v41, %v6790_v61  ;;  %v16403_v45 = vpop.eup %9929 }
0x1121   :  { %9937 = vtanh.f32 %v8236_v42  ;;  %v6793_v5 = vsel %vm6781_vm8, 0.996, %v16371_v58  ;;  %vm16399_vm3 = vcmp.lt.f32.partialorder %v6913_v40, 0.0004427343  ;;  %v7031_v9 = vadd.f32 1.0, %v7030_v59 }
0x1122   :  { %9939 = vtanh.f32 %v8239_v22  ;;  %v7033_v48 = vand.u32 2147483647, %v7007_v46  ;;  %v6901_v55 = vmul.f32 -0.5, %v16368_v43  ;;  %v16406_v32 = vclamps-f32 %v6793_v5, 0.9999999 }
0x1123   :  { %9941 = vtanh.f32 %v8238_v62  ;;  %vm6780_vm10 = vcmp.gt.f32.partialorder %v16384_v21, 0.996  ;;  %v8243_v11 = vclamps-f32 %v16387_v36, 15.0  ;;  %v16413_v60 = vmul.f32 %v16393_v34, %v6716_v8 }
0x1124   :  { %9943 = vlog2.f32 %v6898_v26  ;;  %v9932_v41 = vpop.eup %9931  ;;  %v6904_v18 = vand.u32 2147483647, %v16368_v43  ;;  %v6792_v61 = vsel %vm6780_vm10, 0.996, %v16384_v21  ;;  %v7021_v31 = vmul.f32 -0.5, %v16380_v19 }
0x1125   :  { %9945 = vtanh.f32 %v8241_v7  ;;  %v6925_v42 = vadd.f32 1.0, %v16406_v32  ;;  %v16422_v17 = vsub.f32 0.0, %v16406_v32  ;;  %v6912_v8 = vmul.f32 %v16351_v12, %v6911_v49 }
0x1126   :  { %9947 = vlog2.f32 %v7018_v39  ;;  %v7032_v63 = vmul.f32 %v7031_v9, %v7007_v46  ;;  %vm16425_vm9 = vcmp.lt.f32.partialorder %v7033_v48, 0.0004427343  ;;  %v6902_v7 = vadd.f32 1.0, %v6901_v55 }
0x1127   :  { %9949 = vtanh.f32 %v8240_v16  ;;  %v16431_v35 = vclamps-f32 %v6792_v61, 0.9999999  ;;  %v16436_v40 = vmul.f32 %v6802_v10, %v16261_v2  ;;  %vm16438_vm5 = vcmp.lt.f32.partialorder %v6904_v18, 0.0004427343 }
0x1128   :  { %v9934_v0 = vpop.eup %9933  ;;  %9951 = vrcp.f32 %v6826_v14  ;;  %v6829_v12 = vmax.f32 %v16371_v58, 1e-15  ;;  %v7045_v46 = vadd.f32 1.0, %v16422_v17  ;;  %v6863_v14 = vsel %vm6779_vm1, 1.004016, %v9932_v41 }
0x1129   :  { %v6909_v24 = vmul.f32 0.6931472, %v9934_v0  ;;  %9953 = vlog2.f32 %v6925_v42  ;;  %v7022_v49 = vadd.f32 1.0, %v7021_v31  ;;  %v7024_v48 = vand.u32 2147483647, %v16380_v19 }
0x112a   :  { %v9936_v22 = vpop.eup %9935  ;;  %v6805_v55 = vmul.f32 %v16323_v3, %v6793_v5  ;;  %9955 = vlog2.f32 %v7045_v46  ;;  %v6903_v27 = vmul.f32 %v16368_v43, %v6902_v7  ;;  %v6928_v41 = vmul.f32 -0.5, %v16406_v32 }
0x112b   :  { %v16429_v44 = vpop.eup %9937  ;;  %v7029_v33 = vmul.f32 0.6931472, %v9936_v22  ;;  %v6915_v39 = vsel %vm16399_vm3, %v6912_v8, %v6909_v24  ;;  %v6916_v20 = vadd.f32 1.0, %v16431_v35  ;;  %9957 = vrcp.f32 %v6829_v12 }
0x112c   :  { %v16433_v26 = vpop.eup %9939  ;;  %v6931_v31 = vand.u32 2147483647, %v16406_v32  ;;  %v16461_v24 = vsub.f32 0.0, %v16431_v35  ;;  %v7023_v5 = vmul.f32 %v7022_v49, %v16380_v19  ;;  %vm7025_vm2 = vcmp.lt.f32.partialorder %v7024_v48, 0.0004427343 }
0x112d   :  { %v16444_v16 = vpop.eup %9941  ;;  %v7035_v2 = vsel %vm16425_vm9, %v7032_v63, %v7029_v33  ;;  %v7048_v63 = vmul.f32 -0.5, %v16422_v17  ;;  %9959 = vlog2.f32 %v6916_v20  ;;  %v16468_v62 = vmul.f32 %v16266_v15, %v6805_v55 }
0x112e   :  { %v9944_v10 = vpop.eup %9943  ;;  %v7127_v9 = vsub.f32 %v6915_v39, %v7035_v2  ;;  %v7036_v33 = vadd.f32 1.0, %v16461_v24  ;;  %v6929_v39 = vadd.f32 1.0, %v6928_v41  ;;  %v6828_v2 = vmax.f32 %v16384_v21, 1e-15 }
0x112f   :  { %v16454_v18 = vpop.eup %9945  ;;  %v6900_v0 = vmul.f32 0.6931472, %v9944_v10  ;;  %vm16475_vm12 = vcmp.lt.f32.partialorder %v6931_v31, 0.0004427343  ;;  %v6804_v48 = vmul.f32 %v16326_v6, %v6792_v61  ;;  %vm6783_vm7 = vcmp.gt.f32.partialorder %v16403_v45, 0.996 }
0x1130   :  { %v9948_v42 = vpop.eup %9947  ;;  %v7139_v22 = vmul.f32 0.5, %v7127_v9  ;;  %9961 = vlog2.f32 %v7036_v33  ;;  %v7051_v9 = vand.u32 2147483647, %v16422_v17  ;;  %v6930_v41 = vmul.f32 %v16406_v32, %v6929_v39 }
0x1131   :  { %v16463_v8 = vpop.eup %9949  ;;  %v7020_v3 = vmul.f32 0.6931472, %v9948_v42  ;;  %v6906_v12 = vsel %vm16438_vm5, %v6903_v27, %v6900_v0  ;;  %v6919_v0 = vmul.f32 -0.5, %v16431_v35  ;;  %v7039_v20 = vmul.f32 -0.5, %v16461_v24 }
0x1132   :  { %v7151_v43 = vmul.f32 %v7139_v22, %v6863_v14  ;;  %v9952_v7 = vpop.eup %9951  ;;  %v7049_v14 = vadd.f32 1.0, %v7048_v63  ;;  %v16492_v42 = vsel %vm6783_vm7, 0.996, %v16403_v45  ;;  %9963 = vrcp.f32 %v6828_v2 }
0x1133   :  { %v7026_v46 = vsel %vm7025_vm2, %v7023_v5, %v7020_v3  ;;  %v9954_v15 = vpop.eup %9953  ;;  %v6862_v55 = vsel %vm6778_vm4, 1.004016, %v9952_v7  ;;  %v6922_v37 = vand.u32 2147483647, %v16431_v35  ;;  %vm7052_vm15 = vcmp.lt.f32.partialorder %v7051_v9, 0.0004427343 }
0x1134   :  { %v7163_v19 = vmul.f32 %v7151_v43, %v16390_v57  ;;  %v7126_v49 = vsub.f32 %v6906_v12, %v7026_v46  ;;  %v6927_v27 = vmul.f32 0.6931472, %v9954_v15  ;;  %v9956_v6 = vpop.eup %9955  ;;  %v7050_v3 = vmul.f32 %v7049_v14, %v16422_v17 }
0x1135   :  { %v7047_v31 = vmul.f32 0.6931472, %v9956_v6  ;;  %v16499_v32 = vclamps-f32 %v16492_v42, 0.9999999  ;;  %v9958_v5 = vpop.eup %9957  ;;  %v6920_v33 = vadd.f32 1.0, %v6919_v0  ;;  %v7040_v39 = vadd.f32 1.0, %v7039_v20 }
0x1136   :  { %v16482_v59 = vmax.f32 %v7163_v19, 0.0  ;;  %v7138_v57 = vmul.f32 0.5, %v7126_v49  ;;  %vm6782_vm11 = vcmp.gt.f32.partialorder %v16429_v44, 0.996  ;;  %v6933_v12 = vsel %vm16475_vm12, %v6930_v41, %v6927_v27 }
0x1137   :  { %v9960_v7 = vpop.eup %9959  ;;  %v7053_v46 = vsel %vm7052_vm15, %v7050_v3, %v7047_v31  ;;  %v6943_v17 = vadd.f32 1.0, %v16499_v32  ;;  %vm16509_vm14 = vcmp.lt.f32.partialorder %v6922_v37, 0.0004427343  ;;  %v7011_v14 = vsub.f32 0.0, %v16499_v32 }
0x1138   :  { %v7187_v61 = vmul.f32 %v16482_v59, %v16482_v59  ;;  %v7150_v22 = vmul.f32 %v7138_v57, %v6862_v55  ;;  %v7129_v19 = vsub.f32 %v6933_v12, %v7053_v46  ;;  %v6918_v15 = vmul.f32 0.6931472, %v9960_v7 }
0x1139   :  { %9965 = vlog2.f32 %v6943_v17  ;;  %v6794_v10 = vsel %vm6782_vm11, 0.996, %v16429_v44  ;;  %v6865_v57 = vsel %vm6781_vm8, 1.004016, %v9958_v5  ;;  %v6921_v27 = vmul.f32 %v16431_v35, %v6920_v33 }
0x113a   :  { %v7201_v63 = vsel %vm490_vm13, %v7187_v61, 0.0  ;;  %v7162_v43 = vmul.f32 %v7150_v22, %v16436_v40  ;;  %v7042_v40 = vand.u32 2147483647, %v16461_v24  ;;  %v9962_v9 = vpop.eup %9961  ;;  %v7141_v0 = vmul.f32 0.5, %v7129_v19 }
0x113b   :  { %7202 = vadd.xlane.f32.xlu1 %v7201_v63  ;;  %v7038_v41 = vmul.f32 0.6931472, %v9962_v9  ;;  %v7041_v20 = vmul.f32 %v7040_v39, %v16461_v24  ;;  %v6831_v6 = vmax.f32 %v16403_v45, 1e-15  ;;  %v7063_v61 = vadd.f32 1.0, %v7011_v14 }
0x113c   :  { %v16507_v2 = vmax.f32 %v7162_v43, 0.0  ;;  %v7153_v37 = vmul.f32 %v7141_v0, %v6865_v57  ;;  %vm7043_vm1 = vcmp.lt.f32.partialorder %v7042_v40, 0.0004427343  ;;  %v16526_v31 = vclamps-f32 %v6794_v10, 0.9999999  ;;  %v9964_v35 = vpop.eup %9963 }
0x113d   :  { %v8242_v3 = vclamps-f32 %v16413_v60, 15.0  ;;  %v6924_v58 = vsel %vm16509_vm14, %v6921_v27, %v6918_v15  ;;  %v7044_v5 = vsel %vm7043_vm1, %v7041_v20, %v7038_v41  ;;  %9967 = vlog2.f32 %v7063_v61 }
0x113e   :  { %v7186_v55 = vmul.f32 %v16507_v2, %v16507_v2  ;;  %9969 = vtanh.f32 %v8243_v11  ;;  %v7165_v24 = vmul.f32 %v7153_v37, %v16468_v62  ;;  %v7128_v63 = vsub.f32 %v6924_v58, %v7044_v5 }
0x113f   :  { %v6946_v43 = vmul.f32 -0.5, %v16499_v32  ;;  %v6816_v33 = vmul.f32 %v6804_v48, %v16271_v56  ;;  %9971 = vrcp.f32 %v6831_v6  ;;  %v7066_v7 = vmul.f32 -0.5, %v7011_v14 }
0x1140   :  { %v7198_v22 = vsel %vm490_vm13, %v7186_v55, 0.0  ;;  %v6934_v12 = vadd.f32 1.0, %v16526_v31  ;;  %v16537_v46 = vmax.f32 %v7165_v24, 0.0  ;;  %v7140_v39 = vmul.f32 0.5, %v7128_v63 }
0x1141   :  { %7199 = vadd.xlane.f32.xlu0 %v7198_v22  ;;  %v16540_v17 = vsub.f32 0.0, %v16526_v31  ;;  %vm6785_vm4 = vcmp.gt.f32.partialorder %v16433_v26, 0.996  ;;  %v6864_v36 = vsel %vm6780_vm10, 1.004016, %v9964_v35  ;;  %v6947_v19 = vadd.f32 1.0, %v6946_v43 }
0x1142   :  { %v6949_v11 = vand.u32 2147483647, %v16499_v32  ;;  %v6830_v62 = vmax.f32 %v16429_v44, 1e-15  ;;  %9973 = vlog2.f32 %v6934_v12  ;;  %v7189_v56 = vmul.f32 %v16537_v46, %v16537_v46 }
0x1143   :  { %v7152_v48 = vmul.f32 %v7140_v39, %v6864_v36  ;;  %v7054_v49 = vadd.f32 1.0, %v16540_v17  ;;  %v9966_v40 = vpop.eup %9965  ;;  %v6807_v15 = vmul.f32 %v16328_v1, %v16492_v42  ;;  %v7067_v9 = vadd.f32 1.0, %v7066_v7 }
0x1144   :  { %v7069_v55 = vand.u32 2147483647, %v7011_v14  ;;  %v16555_v21 = vsel %vm6785_vm4, 0.996, %v16433_v26  ;;  %v7207_v57 = vsel %vm490_vm13, %v7189_v56, 0.0  ;;  %v6937_v27 = vmul.f32 -0.5, %v16526_v31 }
0x1145   :  { %v7164_v0 = vmul.f32 %v7152_v48, %v6816_v33  ;;  %9975 = vlog2.f32 %v7054_v49  ;;  %7208 = vadd.xlane.f32.xlu1 %v7207_v57  ;;  %v6945_v41 = vmul.f32 0.6931472, %v9966_v40  ;;  %v6806_v20 = vmul.f32 %v16331_v4, %v6794_v10 }
0x1146   :  { %9977 = vrcp.f32 %v6830_v62  ;;  %v7057_v1 = vmul.f32 -0.5, %v16540_v17  ;;  %v6948_v6 = vmul.f32 %v16499_v32, %v6947_v19  ;;  %vm16564_vm8 = vcmp.lt.f32.partialorder %v6949_v11, 0.0004427343 }
0x1147   :  { %v16561_v42 = vmax.f32 %v7164_v0, 0.0  ;;  %v16569_v22 = vclamps-f32 %v16555_v21, 0.9999999  ;;  %v9968_v37 = vpop.eup %9967  ;;  %v7068_v58 = vmul.f32 %v7067_v9, %v7011_v14  ;;  %vm16571_vm3 = vcmp.lt.f32.partialorder %v7069_v55, 0.0004427343 }
0x1148   :  { %v6940_v4 = vand.u32 2147483647, %v16526_v31  ;;  %vm6784_vm10 = vcmp.gt.f32.partialorder %v16444_v16, 0.996  ;;  %v16577_v10 = vpop.eup %9969  ;;  %v7065_v35 = vmul.f32 0.6931472, %v9968_v37  ;;  %v6951_v14 = vsel %vm16564_vm8, %v6948_v6, %v6945_v41 }
0x1149   :  { %v7188_v32 = vmul.f32 %v16561_v42, %v16561_v42  ;;  %v6938_v24 = vadd.f32 1.0, %v6937_v27  ;;  %v6961_v63 = vadd.f32 1.0, %v16569_v22  ;;  %v9972_v43 = vpop.eup %9971  ;;  %v7058_v33 = vadd.f32 1.0, %v7057_v1 }
0x114a   :  { %v7060_v7 = vand.u32 2147483647, %v16540_v17  ;;  %v16586_v12 = vsub.f32 0.0, %v16569_v22  ;;  %v7071_v36 = vsel %vm16571_vm3, %v7068_v58, %v7065_v35  ;;  %v16594_v11 = vsel %vm6784_vm10, 0.996, %v16444_v16 }
0x114b   :  { %v7204_v39 = vsel %vm490_vm13, %v7188_v32, 0.0  ;;  %9979 = vlog2.f32 %v6961_v63  ;;  %v7131_v56 = vsub.f32 %v6951_v14, %v7071_v36  ;;  %v6819_v19 = vmul.f32 %v16276_v54, %v6807_v15 }
0x114c   :  { %v9974_v62 = vpop.eup %9973  ;;  %9981 = vtanh.f32 %v8242_v3  ;;  %7205 = vadd.xlane.f32.xlu0 %v7204_v39  ;;  %v7081_v48 = vadd.f32 1.0, %v16586_v12  ;;  %v6867_v49 = vsel %vm6783_vm7, 1.004016, %v9972_v43  ;;  %v6818_v40 = vmul.f32 %v6806_v20, %v16281_v23 }
0x114d   :  { %v6833_v9 = vmax.f32 %v16433_v26, 1e-15  ;;  %v7143_v55 = vmul.f32 0.5, %v7131_v56  ;;  %v6936_v57 = vmul.f32 0.6931472, %v9974_v62  ;;  %v6939_v3 = vmul.f32 %v16526_v31, %v6938_v24 }
0x114e   :  { %9983 = vlog2.f32 %v7081_v48  ;;  %v16605_v0 = vclamps-f32 %v16594_v11, 0.9999999  ;;  %vm16608_vm9 = vcmp.lt.f32.partialorder %v6940_v4, 0.0004427343  ;;  %v7059_v54 = vmul.f32 %v7058_v33, %v16540_v17 }
0x114f   :  { %v9976_v60 = vpop.eup %9975  ;;  %vm7061_vm5 = vcmp.lt.f32.partialorder %v7060_v7, 0.0004427343  ;;  %v7155_v23 = vmul.f32 %v7143_v55, %v6867_v49  ;;  %v6964_v41 = vmul.f32 -0.5, %v16569_v22  ;;  %9985 = vrcp.f32 %v6833_v9 }
0x1150   :  { %v9978_v45 = vpop.eup %9977  ;;  %v7056_v15 = vmul.f32 0.6931472, %v9976_v60  ;;  %v6952_v20 = vadd.f32 1.0, %v16605_v0  ;;  %v7084_v1 = vmul.f32 -0.5, %v16586_v12  ;;  %v16617_v6 = vsub.f32 0.0, %v16605_v0 }
0x1151   :  { %vm6787_vm2 = vcmp.gt.f32.partialorder %v16454_v18, 0.996  ;;  %v7167_v31 = vmul.f32 %v7155_v23, %v6819_v19  ;;  %v6942_v17 = vsel %vm16608_vm9, %v6939_v3, %v6936_v57  ;;  %v6967_v58 = vand.u32 2147483647, %v16569_v22 }
0x1152   :  { %v7062_v61 = vsel %vm7061_vm5, %v7059_v54, %v7056_v15  ;;  %9987 = vlog2.f32 %v6952_v20  ;;  %v6832_v5 = vmax.f32 %v16444_v16, 1e-15  ;;  %v7072_v4 = vadd.f32 1.0, %v16617_v6 }
0x1153   :  { %v7130_v37 = vsub.f32 %v6942_v17, %v7062_v61  ;;  %v16625_v32 = vmax.f32 %v7167_v31, 0.0  ;;  %v6965_v35 = vadd.f32 1.0, %v6964_v41  ;;  %v7087_v24 = vand.u32 2147483647, %v16586_v12 }
0x1154   :  { %v16631_v63 = vsel %vm6787_vm2, 0.996, %v16454_v18  ;;  %v6866_v14 = vsel %vm6782_vm11, 1.004016, %v9978_v45  ;;  %v7085_v7 = vadd.f32 1.0, %v7084_v1  ;;  %9989 = vlog2.f32 %v7072_v4 }
0x1155   :  { %v9980_v43 = vpop.eup %9979  ;;  %v7142_v33 = vmul.f32 0.5, %v7130_v37  ;;  %v7191_v36 = vmul.f32 %v16625_v32, %v16625_v32  ;;  %v6809_v62 = vmul.f32 %v16335_v30, %v16555_v21  ;;  %v6955_v56 = vmul.f32 -0.5, %v16605_v0 }
0x1156   :  { %v16635_v39 = vpop.eup %9981  ;;  %v7075_v48 = vmul.f32 -0.5, %v16617_v6  ;;  %v6963_v49 = vmul.f32 0.6931472, %v9980_v43  ;;  %9991 = vrcp.f32 %v6832_v5  ;;  %v16644_v44 = vclamps-f32 %v16631_v63, 0.9999999 }
0x1157   :  { %v7154_v19 = vmul.f32 %v7142_v33, %v6866_v14  ;;  %v7213_v55 = vsel %vm490_vm13, %v7191_v36, 0.0  ;;  %v6966_v57 = vmul.f32 %v16569_v22, %v6965_v35  ;;  %vm16648_vm12 = vcmp.lt.f32.partialorder %v6967_v58, 0.0004427343 }
0x1158   :  { %v9984_v9 = vpop.eup %9983  ;;  %vm16652_vm7 = vcmp.lt.f32.partialorder %v7087_v24, 0.0004427343  ;;  %7214 = vadd.xlane.f32.xlu1 %v7213_v55  ;;  %v7086_v27 = vmul.f32 %v7085_v7, %v16586_v12  ;;  %v6979_v54 = vadd.f32 1.0, %v16644_v44  ;;  %v6956_v45 = vadd.f32 1.0, %v6955_v56 }
0x1159   :  { %v7166_v21 = vmul.f32 %v7154_v19, %v6818_v40  ;;  %v7083_v3 = vmul.f32 0.6931472, %v9984_v9  ;;  %v7076_v23 = vadd.f32 1.0, %v7075_v48  ;;  %v16659_v15 = vsub.f32 0.0, %v16644_v44  ;;  %v9986_v22 = vpop.eup %9985 }
0x115a   :  { %vm6786_vm15 = vcmp.gt.f32.partialorder %v16463_v8, 0.996  ;;  %v6969_v20 = vsel %vm16648_vm12, %v6966_v57, %v6963_v49  ;;  %9993 = vlog2.f32 %v6979_v54  ;;  %v6821_v1 = vmul.f32 %v16286_v52, %v6809_v62 }
0x115b   :  { %v16662_v41 = vmax.f32 %v7166_v21, 0.0  ;;  %v7089_v40 = vsel %vm16652_vm7, %v7086_v27, %v7083_v3  ;;  %v6835_v17 = vmax.f32 %v16454_v18, 1e-15  ;;  %v7099_v61 = vadd.f32 1.0, %v16659_v15 }
0x115c   :  { %v9988_v12 = vpop.eup %9987  ;;  %v7133_v31 = vsub.f32 %v6969_v20, %v7089_v40  ;;  %v6958_v58 = vand.u32 2147483647, %v16605_v0  ;;  %v7078_v5 = vand.u32 2147483647, %v16617_v6  ;;  %v16678_v4 = vsel %vm6786_vm15, 0.996, %v16463_v8 }
0x115d   :  { %v7190_v37 = vmul.f32 %v16662_v41, %v16662_v41  ;;  %v6808_v52 = vmul.f32 %v16344_v53, %v16594_v11  ;;  %v6954_v24 = vmul.f32 0.6931472, %v9988_v12  ;;  %9995 = vlog2.f32 %v7099_v61 }
0x115e   :  { %v7145_v35 = vmul.f32 0.5, %v7133_v31  ;;  %v9990_v43 = vpop.eup %9989  ;;  %v6869_v33 = vsel %vm6785_vm4, 1.004016, %v9986_v22  ;;  %v6957_v7 = vmul.f32 %v16605_v0, %v6956_v45  ;;  %v7077_v36 = vmul.f32 %v7076_v23, %v16617_v6 }
0x115f   :  { %v7210_v14 = vsel %vm490_vm13, %v7190_v37, 0.0  ;;  %v7074_v56 = vmul.f32 0.6931472, %v9990_v43  ;;  %v6982_v48 = vmul.f32 -0.5, %v16644_v44  ;;  %v16689_v19 = vclamps-f32 %v16678_v4, 0.9999999 }
0x1160   :  { %7211 = vadd.xlane.f32.xlu0 %v7210_v14  ;;  %v7157_v62 = vmul.f32 %v7145_v35, %v6869_v33  ;;  %v9992_v53 = vpop.eup %9991  ;;  %vm6959_vm11 = vcmp.lt.f32.partialorder %v6958_v58, 0.0004427343  ;;  %vm7079_vm14 = vcmp.lt.f32.partialorder %v7078_v5, 0.0004427343  ;;  %9997 = vrcp.f32 %v6835_v17 }
0x1161   :  { %v7102_v11 = vmul.f32 -0.5, %v16659_v15  ;;  %v6960_v49 = vsel %vm6959_vm11, %v6957_v7, %v6954_v24  ;;  %v7080_v9 = vsel %vm7079_vm14, %v7077_v36, %v7074_v56  ;;  %v6970_v0 = vadd.f32 1.0, %v16689_v19 }
0x1162   :  { %v7169_v26 = vmul.f32 %v7157_v62, %v6821_v1  ;;  %v6820_v6 = vmul.f32 %v6808_v52, %v16291_v25  ;;  %v7132_v55 = vsub.f32 %v6960_v49, %v7080_v9  ;;  %v6985_v57 = vand.u32 2147483647, %v16644_v44 }
0x1163   :  { %v16696_v60 = vsub.f32 0.0, %v16689_v19  ;;  %v6983_v21 = vadd.f32 1.0, %v6982_v48  ;;  %9999 = vlog2.f32 %v6970_v0  ;;  %vm6789_vm1 = vcmp.gt.f32.partialorder %v16577_v10, 0.996 }
0x1164   :  { %v16698_v30 = vmax.f32 %v7169_v26, 0.0  ;;  %v9994_v3 = vpop.eup %9993  ;;  %v6868_v27 = vsel %vm6784_vm10, 1.004016, %v9992_v53  ;;  %v7144_v54 = vmul.f32 0.5, %v7132_v55  ;;  %v7103_v45 = vadd.f32 1.0, %v7102_v11 }
0x1165   :  { %v7090_v25 = vadd.f32 1.0, %v16696_v60  ;;  %v7105_v22 = vand.u32 2147483647, %v16659_v15  ;;  %v6834_v20 = vmax.f32 %v16463_v8, 1e-15  ;;  %v6984_v17 = vmul.f32 %v16644_v44, %v6983_v21 }
0x1166   :  { %v7193_v23 = vmul.f32 %v16698_v30, %v16698_v30  ;;  %vm6788_vm4 = vcmp.gt.f32.partialorder %v16635_v39, 0.996  ;;  %v7156_v40 = vmul.f32 %v7144_v54, %v6868_v27  ;;  %v6981_v12 = vmul.f32 0.6931472, %v9994_v3 }
0x1167   :  { %10001 = vlog2.f32 %v7090_v25  ;;  %v16712_v16 = vsel %vm6789_vm1, 0.996, %v16577_v10  ;;  %v9996_v1 = vpop.eup %9995  ;;  %vm16716_vm8 = vcmp.lt.f32.partialorder %v6985_v57, 0.0004427343  ;;  %v7104_v5 = vmul.f32 %v7103_v45, %v16659_v15 }
0x1168   :  { %v7219_v31 = vsel %vm490_vm13, %v7193_v23, 0.0  ;;  %v7168_v37 = vmul.f32 %v7156_v40, %v6820_v6  ;;  %v7101_v58 = vmul.f32 0.6931472, %v9996_v1  ;;  %v16724_v35 = vsel %vm6788_vm4, 0.996, %v16635_v39 }
0x1169   :  { %7220 = vadd.xlane.f32.xlu1 %v7219_v31  ;;  %vm7106_vm3 = vcmp.lt.f32.partialorder %v7105_v22, 0.0004427343  ;;  %v6973_v52 = vmul.f32 -0.5, %v16689_v19  ;;  %v7093_v24 = vmul.f32 -0.5, %v16696_v60  ;;  %v16729_v44 = vclamps-f32 %v16712_v16, 0.9999999 }
0x116a   :  { %v9998_v43 = vpop.eup %9997  ;;  %v16731_v14 = vmax.f32 %v7168_v37, 0.0  ;;  %v6987_v33 = vsel %vm16716_vm8, %v6984_v17, %v6981_v12  ;;  %v7107_v15 = vsel %vm7106_vm3, %v7104_v5, %v7101_v58  ;;  %10003 = vrcp.f32 %v6834_v20 }
0x116b   :  { %v6811_v7 = vmul.f32 %v16353_v13, %v16631_v63  ;;  %v7135_v36 = vsub.f32 %v6987_v33, %v7107_v15  ;;  %v6997_v62 = vadd.f32 1.0, %v16729_v44  ;;  %v16739_v56 = vclamps-f32 %v16724_v35, 0.9999999 }
0x116c   :  { %v7192_v48 = vmul.f32 %v16731_v14, %v16731_v14  ;;  %v6976_v53 = vand.u32 2147483647, %v16689_v19  ;;  %v16745_v11 = vsub.f32 0.0, %v16729_v44  ;;  %v6974_v9 = vadd.f32 1.0, %v6973_v52 }
0x116d   :  { %v10000_v26 = vpop.eup %9999  ;;  %v7147_v49 = vmul.f32 0.5, %v7135_v36  ;;  %v7094_v0 = vadd.f32 1.0, %v7093_v24  ;;  %10005 = vlog2.f32 %v6997_v62  ;;  %v6871_v63 = vsel %vm6787_vm2, 1.004016, %v9998_v43 }
0x116e   :  { %v7216_v13 = vsel %vm490_vm13, %v7192_v48, 0.0  ;;  %v7096_v6 = vand.u32 2147483647, %v16696_v60  ;;  %v7117_v55 = vadd.f32 1.0, %v16745_v11  ;;  %v6823_v57 = vmul.f32 %v16296_v50, %v6811_v7 }
0x116f   :  { %7217 = vadd.xlane.f32.xlu0 %v7216_v13  ;;  %v7159_v21 = vmul.f32 %v7147_v49, %v6871_v63  ;;  %v6972_v3 = vmul.f32 0.6931472, %v10000_v26  ;;  %v6988_v27 = vadd.f32 1.0, %v16739_v56  ;;  %vm16754_vm10 = vcmp.lt.f32.partialorder %v6976_v53, 0.0004427343 }
0x1170   :  { %v6837_v25 = vmax.f32 %v16577_v10, 1e-15  ;;  %10007 = vlog2.f32 %v7117_v55  ;;  %v6975_v23 = vmul.f32 %v16689_v19, %v6974_v9  ;;  %v7095_v20 = vmul.f32 %v7094_v0, %v16696_v60 }
0x1171   :  { %v10002_v54 = vpop.eup %10001  ;;  %v7171_v18 = vmul.f32 %v7159_v21, %v6823_v57  ;;  %vm7097_vm9 = vcmp.lt.f32.partialorder %v7096_v6, 0.0004427343  ;;  %v7000_v50 = vmul.f32 -0.5, %v16729_v44  ;;  %10009 = vlog2.f32 %v6988_v27 }
0x1172   :  { %v7092_v22 = vmul.f32 0.6931472, %v10002_v54  ;;  %v7016_v40 = vsub.f32 0.0, %v16739_v56  ;;  %v6978_v1 = vsel %vm16754_vm10, %v6975_v23, %v6972_v3  ;;  %v7120_v17 = vmul.f32 -0.5, %v16745_v11 }
0x1173   :  { %v16763_v12 = vmax.f32 %v7171_v18, 0.0  ;;  %v6810_v19 = vmul.f32 %v16364_v47, %v16678_v4  ;;  %10011 = vrcp.f32 %v6837_v25  ;;  %v6836_v52 = vmax.f32 %v16635_v39, 1e-15 }
0x1174   :  { %v7098_v31 = vsel %vm7097_vm9, %v7095_v20, %v7092_v22  ;;  %v10004_v61 = vpop.eup %10003  ;;  %v7108_v60 = vadd.f32 1.0, %v7016_v40  ;;  %v7001_v15 = vadd.f32 1.0, %v7000_v50  ;;  %v7121_v7 = vadd.f32 1.0, %v7120_v17 }
0x1175   :  { %v7134_v37 = vsub.f32 %v6978_v1, %v7098_v31  ;;  %v7195_v58 = vmul.f32 %v16763_v12, %v16763_v12  ;;  %v6870_v33 = vsel %vm6786_vm15, 1.004016, %v10004_v61  ;;  %v6822_v47 = vmul.f32 %v6810_v19, %v16301_v29 }
0x1176   :  { %10013 = vlog2.f32 %v7108_v60  ;;  %v7003_v36 = vand.u32 2147483647, %v16729_v44  ;;  %v7123_v62 = vand.u32 2147483647, %v16745_v11  ;;  %v6991_v53 = vmul.f32 -0.5, %v16739_v56 }
0x1177   :  { %v7146_v5 = vmul.f32 0.5, %v7134_v37  ;;  %v10006_v24 = vpop.eup %10005  ;;  %v7225_v43 = vsel %vm490_vm13, %v7195_v58, 0.0  ;;  %v7111_v26 = vmul.f32 -0.5, %v7016_v40  ;;  %10015 = vrcp.f32 %v6836_v52 }
0x1178   :  { %7226 = vadd.xlane.f32.xlu1 %v7225_v43  ;;  %v6999_v48 = vmul.f32 0.6931472, %v10006_v24  ;;  %v7002_v8 = vmul.f32 %v16729_v44, %v7001_v15  ;;  %v7122_v13 = vmul.f32 %v7121_v7, %v16745_v11  ;;  %v6813_v29 = vmul.f32 %v16374_v28, %v16712_v16 }
0x1179   :  { %v7158_v4 = vmul.f32 %v7146_v5, %v6870_v33  ;;  %vm7004_vm5 = vcmp.lt.f32.partialorder %v7003_v36, 0.0004427343  ;;  %vm7124_vm2 = vcmp.lt.f32.partialorder %v7123_v62, 0.0004427343  ;;  %v6992_v21 = vadd.f32 1.0, %v6991_v53 }
0x117a   :  { %v10008_v49 = vpop.eup %10007  ;;  %v7005_v55 = vsel %vm7004_vm5, %v7002_v8, %v6999_v48  ;;  %v7112_v3 = vadd.f32 1.0, %v7111_v26  ;;  %v6994_v45 = vand.u32 2147483647, %v16739_v56  ;;  %v7114_v11 = vand.u32 2147483647, %v7016_v40 }
0x117b   :  { %v7170_v9 = vmul.f32 %v7158_v4, %v6822_v47  ;;  %v7119_v0 = vmul.f32 0.6931472, %v10008_v49  ;;  %v10010_v63 = vpop.eup %10009  ;;  %v6993_v16 = vmul.f32 %v16739_v56, %v6992_v21  ;;  %v6825_v1 = vmul.f32 %v16306_v38, %v6813_v29 }
0x117c   :  { %v6990_v25 = vmul.f32 0.6931472, %v10010_v63  ;;  %v7113_v50 = vmul.f32 %v7112_v3, %v7016_v40  ;;  %vm6995_vm12 = vcmp.lt.f32.partialorder %v6994_v45, 0.0004427343  ;;  %vm7115_vm7 = vcmp.lt.f32.partialorder %v7114_v11, 0.0004427343 }
0x117d   :  { %v16782_v6 = vmax.f32 %v7170_v9, 0.0  ;;  %v7125_v57 = vsel %vm7124_vm2, %v7122_v13, %v7119_v0  ;;  %v10012_v27 = vpop.eup %10011  ;;  %v6812_v60 = vmul.f32 %v16393_v34, %v16724_v35  ;;  %v10204_v39 = vmov 0.0|0.0  }
0x117e   :  { %v7137_v44 = vsub.f32 %v7005_v55, %v7125_v57  ;;  %v6873_v28 = vsel %vm6789_vm1, 1.004016, %v10012_v27  ;;  %v6996_v17 = vsel %vm6995_vm12, %v6993_v16, %v6990_v25  ;;  %8761 = vmatprep.subr.bf16.mxu0 %v10204_v39  ;;  %vm10205_vm15 = vmmov 0  }
0x117f   :  { %v7194_v54 = vmul.f32 %v16782_v6, %v16782_v6  ;;  %v6824_v40 = vmul.f32 %v6812_v60, %v16311_v51  ;;  %v10206_v55 = vmov 0.0  }
0x1180   :  { %v10014_v18 = vpop.eup %10013  ;;  %v7149_v22 = vmul.f32 0.5, %v7137_v44  ;;  %8648 = vmatprep.mubr.msk.f32.mxu0 %vm10205_vm15, %v10206_v55 }
0x1181   :  { %v7222_v23 = vsel %vm490_vm13, %v7194_v54, 0.0  ;;  %v7110_v20 = vmul.f32 0.6931472, %v10014_v18  ;;  %v10016_v19 = vpop.eup %10015 }
0x1182   :  { %7223 = vadd.xlane.f32.xlu0 %v7222_v23  ;;  %v7161_v31 = vmul.f32 %v7149_v22, %v6873_v28  ;;  %v6872_v56 = vsel %vm6788_vm4, 1.004016, %v10016_v19 }
0x1183   :  { %v7116_v61 = vsel %vm7115_vm7, %v7113_v50, %v7110_v20 }
0x1184   :  { %v7173_v37 = vmul.f32 %v7161_v31, %v6825_v1  ;;  %v7136_v58 = vsub.f32 %v6996_v17, %v7116_v61 }
0x1186   :  { %v16796_v5 = vmax.f32 %v7173_v37, 0.0  ;;  %v7148_v10 = vmul.f32 0.5, %v7136_v58 }
0x1188   :  { %v7197_v38 = vmul.f32 %v16796_v5, %v16796_v5  ;;  %v7160_v52 = vmul.f32 %v7148_v10, %v6872_v56 }
0x118a   :  { %v7231_v24 = vsel %vm490_vm13, %v7197_v38, 0.0  ;;  %v7172_v43 = vmul.f32 %v7160_v52, %v6824_v40 }
0x118b   :  { %7232 = vadd.xlane.f32.xlu1 %v7231_v24 }
0x118c   :  { %v16804_v33 = vmax.f32 %v7172_v43, 0.0 }
0x118e   :  { %v7196_v34 = vmul.f32 %v16804_v33, %v16804_v33 }
0x1190   :  { %v7228_v35 = vsel %vm490_vm13, %v7196_v34, 0.0 }
0x1191   :  { %7229 = vadd.xlane.f32.xlu0 %v7228_v35 }
0x11c8   :  { %v7203_v15 = vpop.xlane.xlu1 %7202 }
0x11c9   :  { %v7235_v7 = vmax.f32 %v7203_v15, 1e-30 }
0x11cb   :  { %10017 = vrsqrt.f32 %v7235_v7 }
0x11ce   :  { %v7200_v51 = vpop.xlane.xlu0 %7199 }
0x11cf   :  { %v7234_v47 = vmax.f32 %v7200_v51, 1e-30 }
0x11d1   :  { %10019 = vrsqrt.f32 %v7234_v47 }
0x11d2   :  { %v7209_v62 = vpop.xlane.xlu1 %7208 }
0x11d3   :  { %v7237_v48 = vmax.f32 %v7209_v62, 1e-30 }
0x11d5   :  { %v10018_v4 = vpop.eup %10017  ;;  %10021 = vrsqrt.f32 %v7237_v48 }
0x11d6   :  { %v7259_v36 = vmul.f32 %v10018_v4, %v7235_v7 }
0x11d8   :  { %v8257_v53 = vclamps-f32 %v7259_v36, 15.0 }
0x11d9   :  { %v7206_v9 = vpop.xlane.xlu0 %7205 }
0x11da   :  { %10023 = vtanh.f32 %v8257_v53  ;;  %v7236_v8 = vmax.f32 %v7206_v9, 1e-30 }
0x11db   :  { %v10020_v26 = vpop.eup %10019 }
0x11dc   :  { %v7258_v49 = vmul.f32 %v10020_v26, %v7234_v47  ;;  %10025 = vrsqrt.f32 %v7236_v8 }
0x11de   :  { %v8256_v0 = vclamps-f32 %v7258_v49, 15.0 }
0x11df   :  { %v16810_v13 = vpop.eup %10021 }
0x11e0   :  { %10027 = vtanh.f32 %v8256_v0  ;;  %v7261_v29 = vmul.f32 %v16810_v13, %v7237_v48 }
0x11e2   :  { %v8259_v57 = vclamps-f32 %v7261_v29, 15.0 }
0x11e4   :  { %v16812_v63 = vpop.eup %10023  ;;  %10029 = vtanh.f32 %v8259_v57 }
0x11e5   :  { %vm7307_vm11 = vcmp.gt.f32.partialorder %v16812_v63, 0.996  ;;  %v7215_v54 = vpop.xlane.xlu1 %7214  ;;  %v7355_v23 = vmax.f32 %v16812_v63, 1e-15 }
0x11e6   :  { %v7319_v21 = vsel %vm7307_vm11, 0.996, %v16812_v63  ;;  %v16821_v27 = vpop.eup %10025  ;;  %v7239_v25 = vmax.f32 %v7215_v54, 1e-30 }
0x11e7   :  { %v8269_v3 = vclamps-f32 %v7319_v21, 0.9999999  ;;  %v7260_v11 = vmul.f32 %v16821_v27, %v7236_v8  ;;  %v7331_v37 = vmul.f32 %v10018_v4, %v7319_v21 }
0x11e9   :  { %v7435_v44 = vadd.f32 1.0, %v8269_v3  ;;  %v7535_v18 = vsub.f32 0.0, %v8269_v3  ;;  %v8258_v22 = vclamps-f32 %v7260_v11, 15.0  ;;  %v7438_v31 = vmul.f32 -0.5, %v8269_v3 }
0x11ea   :  { %v16823_v45 = vpop.eup %10027  ;;  %v7441_v60 = vand.u32 2147483647, %v8269_v3  ;;  %v16851_v35 = vmul.f32 %v7331_v37, %v16482_v59 }
0x11eb   :  { %vm7306_vm14 = vcmp.gt.f32.partialorder %v16823_v45, 0.996  ;;  %10031 = vlog2.f32 %v7435_v44  ;;  %v7555_v20 = vadd.f32 1.0, %v7535_v18  ;;  %v7558_v10 = vmul.f32 -0.5, %v7535_v18 }
0x11ec   :  { %10033 = vrsqrt.f32 %v7239_v25  ;;  %v7318_v28 = vsel %vm7306_vm14, 0.996, %v16823_v45  ;;  %v7354_v56 = vmax.f32 %v16823_v45, 1e-15  ;;  %v7439_v38 = vadd.f32 1.0, %v7438_v31 }
0x11ed   :  { %v16831_v16 = vclamps-f32 %v7318_v28, 0.9999999  ;;  %10035 = vtanh.f32 %v8258_v22  ;;  %v7212_v1 = vpop.xlane.xlu0 %7211  ;;  %v7561_v40 = vand.u32 2147483647, %v7535_v18  ;;  %vm16853_vm4 = vcmp.lt.f32.partialorder %v7441_v60, 0.0004427343 }
0x11ee   :  { %10037 = vrcp.f32 %v7355_v23  ;;  %v7238_v61 = vmax.f32 %v7212_v1, 1e-30  ;;  %v16837_v19 = vpop.eup %10029  ;;  %v7559_v7 = vadd.f32 1.0, %v7558_v10  ;;  %v7330_v4 = vmul.f32 %v10020_v26, %v7318_v28 }
0x11ef   :  { %v7426_v50 = vadd.f32 1.0, %v16831_v16  ;;  %v16835_v17 = vsub.f32 0.0, %v16831_v16  ;;  %10039 = vlog2.f32 %v7555_v20  ;;  %vm7309_vm1 = vcmp.gt.f32.partialorder %v16837_v19, 0.996 }
0x11f0   :  { %v16845_v52 = vsel %vm7309_vm1, 0.996, %v16837_v19  ;;  %v7429_v43 = vmul.f32 -0.5, %v16831_v16  ;;  %v7432_v48 = vand.u32 2147483647, %v16831_v16  ;;  %v7440_v59 = vmul.f32 %v8269_v3, %v7439_v38 }
0x11f1   :  { %10041 = vlog2.f32 %v7426_v50  ;;  %v7546_v58 = vadd.f32 1.0, %v16835_v17  ;;  %v16858_v51 = vclamps-f32 %v16845_v52, 0.9999999  ;;  %v7549_v36 = vmul.f32 -0.5, %v16835_v17 }
0x11f2   :  { %10043 = vrsqrt.f32 %v7238_v61  ;;  %v7552_v53 = vand.u32 2147483647, %v16835_v17  ;;  %vm16866_vm8 = vcmp.lt.f32.partialorder %v7561_v40, 0.0004427343  ;;  %v7430_v29 = vadd.f32 1.0, %v7429_v43 }
0x11f3   :  { %10045 = vlog2.f32 %v7546_v58  ;;  %v7560_v54 = vmul.f32 %v7559_v7, %v7535_v18  ;;  %v7453_v44 = vadd.f32 1.0, %v16858_v51  ;;  %vm16885_vm10 = vcmp.lt.f32.partialorder %v7432_v48, 0.0004427343 }
0x11f4   :  { %10047 = vrcp.f32 %v7354_v56  ;;  %v16897_v60 = vsub.f32 0.0, %v16858_v51  ;;  %v7431_v10 = vmul.f32 %v16831_v16, %v7430_v29  ;;  %vm7553_vm9 = vcmp.lt.f32.partialorder %v7552_v53, 0.0004427343 }
0x11f5   :  { %v10032_v24 = vpop.eup %10031 }
0x11f6   :  { %v16848_v34 = vpop.eup %10033  ;;  %v16870_v0 = vpop.xlane.xlu1 %7220  ;;  %v7437_v26 = vmul.f32 0.6931472, %v10032_v24 }
0x11f7   :  { %v7263_v47 = vmul.f32 %v16848_v34, %v7239_v25  ;;  %v16862_v62 = vpop.eup %10035  ;;  %v7241_v21 = vmax.f32 %v16870_v0, 1e-30  ;;  %v7550_v25 = vadd.f32 1.0, %v7549_v36  ;;  %v7456_v0 = vmul.f32 -0.5, %v16858_v51 }
0x11f8   :  { %v10038_v9 = vpop.eup %10037  ;;  %vm7308_vm3 = vcmp.gt.f32.partialorder %v16862_v62, 0.996  ;;  %v7443_v1 = vsel %vm16853_vm4, %v7440_v59, %v7437_v26  ;;  %v7342_v59 = vmul.f32 %v7330_v4, %v16507_v2 }
0x11f9   :  { %v8261_v8 = vclamps-f32 %v7263_v47, 15.0  ;;  %v10040_v57 = vpop.eup %10039  ;;  %v16877_v3 = vsel %vm7308_vm3, 0.996, %v16862_v62  ;;  %v7391_v28 = vsel %vm7307_vm11, 1.004016, %v10038_v9  ;;  %v7551_v40 = vmul.f32 %v7550_v25, %v16835_v17 }
0x11fa   :  { %v7557_v23 = vmul.f32 0.6931472, %v10040_v57  ;;  %v16881_v22 = vclamps-f32 %v16877_v3, 0.9999999  ;;  %v7573_v17 = vadd.f32 1.0, %v16897_v60  ;;  %v16917_v9 = vmul.f32 %v16810_v13, %v16845_v52 }
0x11fb   :  { %v10042_v11 = vpop.eup %10041  ;;  %10049 = vtanh.f32 %v8261_v8  ;;  %v7357_v8 = vmax.f32 %v16837_v19, 1e-15  ;;  %v7356_v57 = vmax.f32 %v16862_v62, 1e-15  ;;  %v7459_v13 = vand.u32 2147483647, %v16858_v51 }
0x11fc   :  { %10051 = vrsqrt.f32 %v7241_v21  ;;  %v7428_v20 = vmul.f32 0.6931472, %v10042_v11  ;;  %v16889_v50 = vpop.eup %10043  ;;  %v7563_v31 = vsel %vm16866_vm8, %v7560_v54, %v7557_v23  ;;  %v7444_v37 = vadd.f32 1.0, %v16881_v22  ;;  %v16905_v15 = vpop.xlane.xlu0 %7217 }
0x11fd   :  { %v10046_v63 = vpop.eup %10045  ;;  %v7262_v58 = vmul.f32 %v16889_v50, %v7238_v61  ;;  %v7655_v56 = vsub.f32 %v7443_v1, %v7563_v31  ;;  %10053 = vlog2.f32 %v7453_v44  ;;  %v16903_v24 = vsub.f32 0.0, %v16881_v22 }
0x11fe   :  { %v7548_v38 = vmul.f32 0.6931472, %v10046_v63  ;;  %v7434_v7 = vsel %vm16885_vm10, %v7431_v10, %v7428_v20  ;;  %10055 = vlog2.f32 %v7444_v37  ;;  %v10048_v61 = vpop.eup %10047  ;;  %v7240_v16 = vmax.f32 %v16905_v15, 1e-30 }
0x11ff   :  { %v8260_v43 = vclamps-f32 %v7262_v58, 15.0  ;;  %v7667_v47 = vmul.f32 0.5, %v7655_v56  ;;  %v7564_v48 = vadd.f32 1.0, %v16903_v24  ;;  %v7390_v29 = vsel %vm7306_vm14, 1.004016, %v10048_v61 }
0x1200   :  { %v7554_v36 = vsel %vm7553_vm9, %v7551_v40, %v7548_v38  ;;  %v7447_v4 = vmul.f32 -0.5, %v16881_v22  ;;  %v7450_v54 = vand.u32 2147483647, %v16881_v22  ;;  %v7567_v45 = vmul.f32 -0.5, %v16903_v24 }
0x1201   :  { %10057 = vtanh.f32 %v8260_v43  ;;  %v7654_v53 = vsub.f32 %v7434_v7, %v7554_v36  ;;  %v7679_v49 = vmul.f32 %v7667_v47, %v7391_v28  ;;  %v7457_v23 = vadd.f32 1.0, %v7456_v0 }
0x1202   :  { %10059 = vrsqrt.f32 %v7240_v16  ;;  %v7570_v1 = vand.u32 2147483647, %v16903_v24  ;;  %v7332_v37 = vmul.f32 %v16821_v27, %v16877_v3  ;;  %vm16946_vm2 = vcmp.lt.f32.partialorder %v7450_v54, 0.0004427343 }
0x1203   :  { %v7666_v26 = vmul.f32 0.5, %v7654_v53  ;;  %10061 = vlog2.f32 %v7564_v48  ;;  %v7691_v11 = vmul.f32 %v7679_v49, %v16851_v35  ;;  %v7576_v35 = vmul.f32 -0.5, %v16897_v60 }
0x1204   :  { %10063 = vlog2.f32 %v7573_v17  ;;  %vm16950_vm12 = vcmp.lt.f32.partialorder %v7459_v13, 0.0004427343  ;;  %v7568_v7 = vadd.f32 1.0, %v7567_v45  ;;  %v7458_v27 = vmul.f32 %v16858_v51, %v7457_v23 }
0x1205   :  { %v16924_v2 = vpop.eup %10049  ;;  %v7678_v44 = vmul.f32 %v7666_v26, %v7390_v29  ;;  %10065 = vrcp.f32 %v7357_v8  ;;  %v16942_v31 = vpop.xlane.xlu1 %7226  ;;  %v7579_v3 = vand.u32 2147483647, %v16897_v60  ;;  %vm16963_vm7 = vcmp.lt.f32.partialorder %v7570_v1, 0.0004427343 }
0x1206   :  { %v16929_v52 = vpop.eup %10051  ;;  %vm7311_vm5 = vcmp.gt.f32.partialorder %v16924_v2, 0.996  ;;  %10067 = vrcp.f32 %v7356_v57  ;;  %v7243_v40 = vmax.f32 %v16942_v31, 1e-30  ;;  %v7577_v17 = vadd.f32 1.0, %v7576_v35 }
0x1207   :  { %v7265_v25 = vmul.f32 %v16929_v52, %v7241_v21  ;;  %v16938_v28 = vsel %vm7311_vm5, 0.996, %v16924_v2  ;;  %v10054_v20 = vpop.eup %10053  ;;  %v7690_v18 = vmul.f32 %v7678_v44, %v7342_v59  ;;  %v7448_v21 = vadd.f32 1.0, %v7447_v4 }
0x1208   :  { %v16955_v10 = vclamps-f32 %v16938_v28, 0.9999999  ;;  %v10056_v56 = vpop.eup %10055  ;;  %v7455_v47 = vmul.f32 0.6931472, %v10054_v20  ;;  %10069 = vrsqrt.f32 %v7243_v40  ;;  %v7359_v8 = vmax.f32 %v16924_v2, 1e-15 }
0x1209   :  { %v8263_v38 = vclamps-f32 %v7265_v25, 15.0  ;;  %v8762_v43 = vpack.c.bf16 %v7691_v11, %v7690_v18  ;;  %v7446_v51 = vmul.f32 0.6931472, %v10056_v56  ;;  %v7449_v49 = vmul.f32 %v16881_v22, %v7448_v21 }
0x120a   :  { %v7471_v61 = vadd.f32 1.0, %v16955_v10  ;;  %v16968_v59 = vsub.f32 0.0, %v16955_v10  ;;  %v7569_v26 = vmul.f32 %v7568_v7, %v16903_v24  ;;  %vm16983_vm14 = vcmp.lt.f32.partialorder %v7579_v3, 0.0004427343 }
0x120b   :  { %v16961_v36 = vpop.eup %10057  ;;  %8763 = vmatpush3.bf16.msra.mxu0 %v8762_v43  ;;  %10071 = vtanh.f32 %v8263_v38  ;;  %v7578_v15 = vmul.f32 %v7577_v17, %v16897_v60  ;;  %v7452_v45 = vsel %vm16946_vm2, %v7449_v49, %v7446_v51  ;;  %v7461_v1 = vsel %vm16950_vm12, %v7458_v27, %v7455_v47 }
0x120c   :  { %v16970_v53 = vpop.eup %10059  ;;  %8764 = vmatprep.subr.bf16.mxu0 %v10204_v39  ;;  %vm7310_vm11 = vcmp.gt.f32.partialorder %v16961_v36, 0.996  ;;  %10073 = vlog2.f32 %v7471_v61  ;;  %v7344_v21 = vmul.f32 %v7332_v37, %v16561_v42  ;;  %v7474_v47 = vmul.f32 -0.5, %v16955_v10 }
0x120d   :  { %v10062_v0 = vpop.eup %10061  ;;  %v7264_v29 = vmul.f32 %v16970_v53, %v7240_v16  ;;  %v7322_v57 = vsel %vm7310_vm11, 0.996, %v16961_v36  ;;  %v7591_v16 = vadd.f32 1.0, %v16968_v59  ;;  %10075 = vrcp.f32 %v7359_v8 }
0x120e   :  { %v10064_v4 = vpop.eup %10063  ;;  %v7566_v54 = vmul.f32 0.6931472, %v10062_v0  ;;  %v16987_v13 = vclamps-f32 %v7322_v57, 0.9999999  ;;  %v7358_v37 = vmax.f32 %v16961_v36, 1e-15  ;;  %v7345_v48 = vmul.f32 %v16917_v9, %v16537_v46 }
0x120f   :  { %v8262_v44 = vclamps-f32 %v7264_v29, 15.0  ;;  %v7575_v11 = vmul.f32 0.6931472, %v10064_v4  ;;  %v10066_v24 = vpop.eup %10065  ;;  %v16996_v18 = vpop.xlane.xlu0 %7223  ;;  %v7477_v19 = vand.u32 2147483647, %v16955_v10  ;;  %v7594_v62 = vmul.f32 -0.5, %v16968_v59 }
0x1210   :  { %v7572_v25 = vsel %vm16963_vm7, %v7569_v26, %v7566_v54  ;;  %v7462_v23 = vadd.f32 1.0, %v16987_v13  ;;  %v10068_v20 = vpop.eup %10067  ;;  %v7242_v31 = vmax.f32 %v16996_v18, 1e-30  ;;  %v7393_v56 = vsel %vm7309_vm1, 1.004016, %v10066_v24 }
0x1211   :  { %10077 = vtanh.f32 %v8262_v44  ;;  %v7581_v60 = vsel %vm16983_vm14, %v7578_v15, %v7575_v11  ;;  %v7656_v35 = vsub.f32 %v7452_v45, %v7572_v25  ;;  %v17007_v43 = vsub.f32 0.0, %v16987_v13 }
0x1212   :  { %v7657_v63 = vsub.f32 %v7461_v1, %v7581_v60  ;;  %10079 = vlog2.f32 %v7462_v23  ;;  %v7392_v58 = vsel %vm7308_vm3, 1.004016, %v10068_v20  ;;  %v17012_v27 = vpop.eup %10069  ;;  %v17025_v26 = vmul.f32 %v16848_v34, %v16938_v28 }
0x1213   :  { %v7668_v38 = vmul.f32 0.5, %v7656_v35  ;;  %10081 = vlog2.f32 %v7591_v16  ;;  %v7582_v3 = vadd.f32 1.0, %v17007_v43  ;;  %v7267_v61 = vmul.f32 %v17012_v27, %v7243_v40 }
0x1214   :  { %10083 = vrsqrt.f32 %v7242_v31  ;;  %v7669_v7 = vmul.f32 0.5, %v7657_v63  ;;  %v7465_v40 = vmul.f32 -0.5, %v16987_v13  ;;  %v7475_v4 = vadd.f32 1.0, %v7474_v47 }
0x1215   :  { %v7680_v42 = vmul.f32 %v7668_v38, %v7392_v58  ;;  %v17021_v51 = vpop.eup %10071  ;;  %10085 = vlog2.f32 %v7582_v3  ;;  %v8265_v0 = vclamps-f32 %v7267_v61, 15.0  ;;  %vm17028_vm1 = vcmp.lt.f32.partialorder %v7477_v19, 0.0004427343 }
0x1216   :  { %v7681_v17 = vmul.f32 %v7669_v7, %v7393_v56  ;;  %v10074_v8 = vpop.eup %10073  ;;  %10087 = vrcp.f32 %v7358_v37  ;;  %v7585_v22 = vmul.f32 -0.5, %v17007_v43  ;;  %v7595_v44 = vadd.f32 1.0, %v7594_v62 }
0x1217   :  { %v7692_v49 = vmul.f32 %v7680_v42, %v7344_v21  ;;  %v10076_v9 = vpop.eup %10075  ;;  %vm7313_vm4 = vcmp.gt.f32.partialorder %v17021_v51, 0.996  ;;  %v7334_v34 = vmul.f32 %v16889_v50, %v7322_v57  ;;  %v7468_v28 = vand.u32 2147483647, %v16987_v13 }
0x1218   :  { %v7693_v29 = vmul.f32 %v7681_v17, %v7345_v48  ;;  %v17036_v15 = vpop.xlane.xlu1 %7232  ;;  %v7473_v16 = vmul.f32 0.6931472, %v10074_v8  ;;  %v7597_v24 = vand.u32 2147483647, %v16968_v59  ;;  %10089 = vtanh.f32 %v8265_v0 }
0x1219   :  { %v7245_v25 = vmax.f32 %v17036_v15, 1e-30  ;;  %v17046_v23 = vsel %vm7313_vm4, 0.996, %v17021_v51  ;;  %v7466_v50 = vadd.f32 1.0, %v7465_v40  ;;  %v7476_v57 = vmul.f32 %v16955_v10, %v7475_v4 }
0x121a   :  { %v8765_v54 = vpack.c.bf16 %v7693_v29, %v7692_v49  ;;  %v7588_v18 = vand.u32 2147483647, %v17007_v43  ;;  %v7586_v35 = vadd.f32 1.0, %v7585_v22  ;;  %v7596_v63 = vmul.f32 %v7595_v44, %v16968_v59 }
0x121b   :  { %v17034_v11 = vpop.eup %10077  ;;  %10091 = vrsqrt.f32 %v7245_v25  ;;  %vm7598_vm3 = vcmp.lt.f32.partialorder %v7597_v24, 0.0004427343  ;;  %v17064_v10 = vclamps-f32 %v17046_v23, 0.9999999  ;;  %vm17066_vm10 = vcmp.lt.f32.partialorder %v7468_v28, 0.0004427343 }
0x121c   :  { %v10080_v45 = vpop.eup %10079  ;;  %8766 = vmatpush3.bf16.msra.mxu0 %v8765_v54  ;;  %vm7312_vm8 = vcmp.gt.f32.partialorder %v17034_v11, 0.996  ;;  %v7479_v47 = vsel %vm17028_vm1, %v7476_v57, %v7473_v16  ;;  %v7467_v3 = vmul.f32 %v16987_v13, %v7466_v50  ;;  %v7587_v62 = vmul.f32 %v7586_v35, %v17007_v43 }
0x121d   :  { %v10082_v20 = vpop.eup %10081  ;;  %8767 = vmatprep.subr.bf16.mxu0 %v10204_v39  ;;  %v17054_v1 = vsel %vm7312_vm8, 0.996, %v17034_v11  ;;  %v7464_v58 = vmul.f32 0.6931472, %v10080_v45  ;;  %vm7589_vm9 = vcmp.lt.f32.partialorder %v7588_v18, 0.0004427343  ;;  %v7347_v43 = vmul.f32 %v17025_v26, %v16625_v32 }
0x121e   :  { %v17056_v60 = vpop.eup %10083  ;;  %v7593_v21 = vmul.f32 0.6931472, %v10082_v20  ;;  %v17061_v38 = vclamps-f32 %v17054_v1, 0.9999999  ;;  %v7230_v19 = vpop.xlane.xlu0 %7229  ;;  %v7489_v29 = vadd.f32 1.0, %v17064_v10  ;;  %v17089_v22 = vsub.f32 0.0, %v17064_v10 }
0x121f   :  { %v7266_v56 = vmul.f32 %v17056_v60, %v7242_v31  ;;  %v10086_v37 = vpop.eup %10085  ;;  %v7395_v31 = vsel %vm7311_vm5, 1.004016, %v10076_v9  ;;  %v7244_v48 = vmax.f32 %v7230_v19, 1e-30  ;;  %v7470_v2 = vsel %vm17066_vm10, %v7467_v3, %v7464_v58 }
0x1220   :  { %v7599_v42 = vsel %vm7598_vm3, %v7596_v63, %v7593_v21  ;;  %v7584_v17 = vmul.f32 0.6931472, %v10086_v37  ;;  %v7480_v49 = vadd.f32 1.0, %v17061_v38  ;;  %v10088_v8 = vpop.eup %10087  ;;  %v7361_v13 = vmax.f32 %v17021_v51, 1e-15 }
0x1221   :  { %v8264_v59 = vclamps-f32 %v7266_v56, 15.0  ;;  %v7659_v61 = vsub.f32 %v7479_v47, %v7599_v42  ;;  %v17086_v54 = vsub.f32 0.0, %v17061_v38  ;;  %v7346_v44 = vmul.f32 %v7334_v34, %v16662_v41 }
0x1222   :  { %v7590_v40 = vsel %vm7589_vm9, %v7587_v62, %v7584_v17  ;;  %v17081_v9 = vpop.eup %10089  ;;  %v7394_v15 = vsel %vm7310_vm11, 1.004016, %v10088_v8  ;;  %v7360_v45 = vmax.f32 %v17034_v11, 1e-15  ;;  %v7609_v50 = vadd.f32 1.0, %v17089_v22 }
0x1223   :  { %10093 = vtanh.f32 %v8264_v59  ;;  %v7671_v0 = vmul.f32 0.5, %v7659_v61  ;;  %v7658_v4 = vsub.f32 %v7470_v2, %v7590_v40  ;;  %v7600_v32 = vadd.f32 1.0, %v17086_v54 }
0x1224   :  { %10095 = vrsqrt.f32 %v7244_v48  ;;  %vm7315_vm5 = vcmp.gt.f32.partialorder %v17081_v9, 0.996  ;;  %v7483_v41 = vmul.f32 -0.5, %v17061_v38  ;;  %v7492_v57 = vmul.f32 -0.5, %v17064_v10 }
0x1225   :  { %v7683_v46 = vmul.f32 %v7671_v0, %v7395_v31  ;;  %10097 = vlog2.f32 %v7480_v49  ;;  %v7670_v28 = vmul.f32 0.5, %v7658_v4  ;;  %v17094_v16 = vpop.eup %10091  ;;  %v17106_v18 = vsel %vm7315_vm5, 0.996, %v17081_v9 }
0x1226   :  { %10099 = vlog2.f32 %v7489_v29  ;;  %v7269_v26 = vmul.f32 %v17094_v16, %v7245_v25  ;;  %v7486_v21 = vand.u32 2147483647, %v17061_v38  ;;  %v7603_v63 = vmul.f32 -0.5, %v17086_v54 }
0x1227   :  { %v7695_v24 = vmul.f32 %v7683_v46, %v7347_v43  ;;  %10101 = vrcp.f32 %v7361_v13  ;;  %v7682_v20 = vmul.f32 %v7670_v28, %v7394_v15  ;;  %v7484_v58 = vadd.f32 1.0, %v7483_v41 }
0x1228   :  { %10103 = vlog2.f32 %v7600_v32  ;;  %v8267_v36 = vclamps-f32 %v7269_v26, 15.0  ;;  %v7495_v7 = vand.u32 2147483647, %v17064_v10  ;;  %v7612_v47 = vmul.f32 -0.5, %v17089_v22 }
0x1229   :  { %v7694_v34 = vmul.f32 %v7682_v20, %v7346_v44  ;;  %10105 = vlog2.f32 %v7609_v50  ;;  %v17124_v59 = vclamps-f32 %v17106_v18, 0.9999999  ;;  %v7336_v31 = vmul.f32 %v16970_v53, %v17054_v1 }
0x122a   :  { %10107 = vrcp.f32 %v7360_v45  ;;  %v7337_v3 = vmul.f32 %v16929_v52, %v17046_v23  ;;  %v7493_v61 = vadd.f32 1.0, %v7492_v57  ;;  %vm17132_vm12 = vcmp.lt.f32.partialorder %v7486_v21, 0.0004427343 }
0x122b   :  { %10109 = vtanh.f32 %v8267_v36  ;;  %v8768_v35 = vpack.c.bf16 %v7695_v24, %v7694_v34  ;;  %v7604_v8 = vadd.f32 1.0, %v7603_v63  ;;  %v7485_v2 = vmul.f32 %v17061_v38, %v7484_v58 }
0x122c   :  { %vm17140_vm7 = vcmp.lt.f32.partialorder %v7495_v7, 0.0004427343  ;;  %v7613_v52 = vadd.f32 1.0, %v7612_v47  ;;  %v7615_v23 = vand.u32 2147483647, %v17089_v22  ;;  %v7507_v13 = vadd.f32 1.0, %v17124_v59 }
0x122d   :  { %v17108_v25 = vpop.eup %10093  ;;  %8769 = vmatpush3.bf16.msra.mxu0 %v8768_v35  ;;  %v7494_v43 = vmul.f32 %v17064_v10, %v7493_v61  ;;  %v7605_v24 = vmul.f32 %v7604_v8, %v17086_v54  ;;  %v17157_v45 = vsub.f32 0.0, %v17124_v59  ;;  %v7363_v63 = vmax.f32 %v17081_v9, 1e-15 }
0x122e   :  { %v17112_v56 = vpop.eup %10095  ;;  %vm7314_vm2 = vcmp.gt.f32.partialorder %v17108_v25, 0.996  ;;  %8770 = vmatprep.subr.bf16.mxu0 %v10204_v39  ;;  %v7614_v20 = vmul.f32 %v7613_v52, %v17089_v22  ;;  %vm7616_vm14 = vcmp.lt.f32.partialorder %v7615_v23, 0.0004427343  ;;  %v7348_v7 = vmul.f32 %v7336_v31, %v16731_v14 }
0x122f   :  { %v7268_v42 = vmul.f32 %v17112_v56, %v7244_v48  ;;  %v17121_v37 = vsel %vm7314_vm2, 0.996, %v17108_v25  ;;  %v10098_v19 = vpop.eup %10097  ;;  %v7606_v48 = vand.u32 2147483647, %v17086_v54  ;;  %v7362_v54 = vmax.f32 %v17108_v25, 1e-15 }
0x1230   :  { %v10100_v17 = vpop.eup %10099  ;;  %v17137_v0 = vclamps-f32 %v17121_v37, 0.9999999  ;;  %v7482_v1 = vmul.f32 0.6931472, %v10098_v19  ;;  %v7627_v58 = vadd.f32 1.0, %v17157_v45  ;;  %v7349_v31 = vmul.f32 %v7337_v3, %v16698_v30 }
0x1231   :  { %v8266_v62 = vclamps-f32 %v7268_v42, 15.0  ;;  %v10102_v29 = vpop.eup %10101  ;;  %v7491_v46 = vmul.f32 0.6931472, %v10100_v17  ;;  %vm17148_vm11 = vcmp.lt.f32.partialorder %v7606_v48, 0.0004427343  ;;  %v7510_v17 = vmul.f32 -0.5, %v17124_v59 }
0x1232   :  { %v7498_v40 = vadd.f32 1.0, %v17137_v0  ;;  %v10104_v4 = vpop.eup %10103  ;;  %v17153_v38 = vsub.f32 0.0, %v17137_v0  ;;  %v7488_v41 = vsel %vm17132_vm12, %v7485_v2, %v7482_v1  ;;  %v7397_v22 = vsel %vm7313_vm4, 1.004016, %v10102_v29 }
0x1233   :  { %10111 = vtanh.f32 %v8266_v62  ;;  %v10106_v15 = vpop.eup %10105  ;;  %v7602_v28 = vmul.f32 0.6931472, %v10104_v4  ;;  %v7497_v34 = vsel %vm17140_vm7, %v7494_v43, %v7491_v46  ;;  %v7501_v61 = vmul.f32 -0.5, %v17137_v0 }
0x1234   :  { %10113 = vlog2.f32 %v7498_v40  ;;  %v10108_v32 = vpop.eup %10107  ;;  %v7611_v26 = vmul.f32 0.6931472, %v10106_v15  ;;  %v7618_v10 = vadd.f32 1.0, %v17153_v38  ;;  %v7621_v48 = vmul.f32 -0.5, %v17153_v38 }
0x1235   :  { %v17161_v50 = vpop.eup %10109  ;;  %v7608_v36 = vsel %vm17148_vm11, %v7605_v24, %v7602_v28  ;;  %10115 = vlog2.f32 %v7507_v13  ;;  %v7396_v47 = vsel %vm7312_vm8, 1.004016, %v10108_v32  ;;  %v7504_v49 = vand.u32 2147483647, %v17137_v0 }
0x1236   :  { %v7617_v57 = vsel %vm7616_vm14, %v7614_v20, %v7611_v26  ;;  %v7660_v35 = vsub.f32 %v7488_v41, %v7608_v36  ;;  %10117 = vlog2.f32 %v7618_v10  ;;  %vm7317_vm1 = vcmp.gt.f32.partialorder %v17161_v50, 0.996 }
0x1237   :  { %v7661_v21 = vsub.f32 %v7497_v34, %v7617_v57  ;;  %10119 = vlog2.f32 %v7627_v58  ;;  %v17184_v14 = vsel %vm7317_vm1, 0.996, %v17161_v50  ;;  %v7630_v29 = vmul.f32 -0.5, %v17157_v45 }
0x1238   :  { %v7672_v42 = vmul.f32 0.5, %v7660_v35  ;;  %10121 = vrcp.f32 %v7362_v54  ;;  %v17193_v2 = vclamps-f32 %v17184_v14, 0.9999999  ;;  %v7502_v23 = vadd.f32 1.0, %v7501_v61 }
0x1239   :  { %v7673_v19 = vmul.f32 0.5, %v7661_v21  ;;  %10123 = vrcp.f32 %v7363_v63  ;;  %v7622_v1 = vadd.f32 1.0, %v7621_v48  ;;  %v7339_v3 = vmul.f32 %v17012_v27, %v17106_v18 }
0x123a   :  { %v7684_v51 = vmul.f32 %v7672_v42, %v7396_v47  ;;  %v7511_v40 = vadd.f32 1.0, %v7510_v17  ;;  %v7624_v13 = vand.u32 2147483647, %v17153_v38  ;;  %v7338_v44 = vmul.f32 %v17056_v60, %v17121_v37 }
0x123b   :  { %v7685_v62 = vmul.f32 %v7673_v19, %v7397_v22  ;;  %v7513_v28 = vand.u32 2147483647, %v17124_v59  ;;  %vm17209_vm8 = vcmp.lt.f32.partialorder %v7504_v49, 0.0004427343  ;;  %v7631_v27 = vadd.f32 1.0, %v7630_v29 }
0x123c   :  { %v7696_v8 = vmul.f32 %v7684_v51, %v7348_v7  ;;  %v7525_v26 = vadd.f32 1.0, %v17193_v2  ;;  %v7503_v20 = vmul.f32 %v17137_v0, %v7502_v23  ;;  %v7623_v41 = vmul.f32 %v7622_v1, %v17153_v38 }
0x123d   :  { %v17186_v11 = vpop.eup %10111  ;;  %v7697_v52 = vmul.f32 %v7685_v62, %v7349_v31  ;;  %v7633_v60 = vand.u32 2147483647, %v17157_v45  ;;  %v7512_v36 = vmul.f32 %v17124_v59, %v7511_v40  ;;  %vm7625_vm3 = vcmp.lt.f32.partialorder %v7624_v13, 0.0004427343 }
0x123e   :  { %vm7316_vm4 = vcmp.gt.f32.partialorder %v17186_v11, 0.996  ;;  %v10114_v53 = vpop.eup %10113  ;;  %v17224_v0 = vsub.f32 0.0, %v17193_v2  ;;  %v7632_v21 = vmul.f32 %v7631_v27, %v17157_v45  ;;  %vm7514_vm10 = vcmp.lt.f32.partialorder %v7513_v28, 0.0004427343 }
0x123f   :  { %v17198_v30 = vsel %vm7316_vm4, 0.996, %v17186_v11  ;;  %v10116_v46 = vpop.eup %10115  ;;  %v8771_v43 = vpack.c.bf16 %v7697_v52, %v7696_v8  ;;  %v7500_v15 = vmul.f32 0.6931472, %v10114_v53  ;;  %vm7634_vm9 = vcmp.lt.f32.partialorder %v7633_v60, 0.0004427343 }
0x1240   :  { %v17204_v4 = vclamps-f32 %v17198_v30, 0.9999999  ;;  %v10118_v24 = vpop.eup %10117  ;;  %v7509_v37 = vmul.f32 0.6931472, %v10116_v46  ;;  %v7645_v7 = vadd.f32 1.0, %v17224_v0  ;;  %v7350_v31 = vmul.f32 %v7338_v44, %v16782_v6 }
0x1241   :  { %8772 = vmatpush3.bf16.msra.mxu0 %v8771_v43  ;;  %v7620_v10 = vmul.f32 0.6931472, %v10118_v24  ;;  %v10120_v34 = vpop.eup %10119  ;;  %v7506_v57 = vsel %vm17209_vm8, %v7503_v20, %v7500_v15  ;;  %v7364_v61 = vmax.f32 %v17186_v11, 1e-15  ;;  %v7365_v45 = vmax.f32 %v17161_v50, 1e-15 }
0x1242   :  { %v7516_v18 = vadd.f32 1.0, %v17204_v4  ;;  %8773 = vmatprep.subr.bf16.mxu0 %v10204_v39  ;;  %v7544_v54 = vsub.f32 0.0, %v17204_v4  ;;  %v10122_v38 = vpop.eup %10121  ;;  %v7629_v22 = vmul.f32 0.6931472, %v10120_v34  ;;  %v7515_v47 = vsel %vm7514_vm10, %v7512_v36, %v7509_v37  ;;  %v7779_v50 = vld [vmem:[%s17306_s10 + $0x18] sm:$0xff] }
0x1243   :  { %v7626_v35 = vsel %vm7625_vm3, %v7623_v41, %v7620_v10  ;;  %v10124_v58 = vpop.eup %10123  ;;  %v7398_v48 = vsel %vm7314_vm2, 1.004016, %v10122_v38  ;;  %v7351_v62 = vmul.f32 %v7339_v3, %v16763_v12  ;;  %v7519_v29 = vmul.f32 -0.5, %v17204_v4 }
0x1244   :  { %10125 = vlog2.f32 %v7516_v18  ;;  %v7662_v63 = vsub.f32 %v7506_v57, %v7626_v35  ;;  %v7636_v59 = vadd.f32 1.0, %v7544_v54  ;;  %v7635_v42 = vsel %vm7634_vm9, %v7632_v21, %v7629_v22 }
0x1245   :  { %10127 = vlog2.f32 %v7525_v26  ;;  %v7663_v51 = vsub.f32 %v7515_v47, %v7635_v42  ;;  %v7399_v8 = vsel %vm7315_vm5, 1.004016, %v10124_v58  ;;  %v7639_v53 = vmul.f32 -0.5, %v7544_v54 }
0x1246   :  { %v7674_v19 = vmul.f32 0.5, %v7662_v63  ;;  %10129 = vlog2.f32 %v7636_v59  ;;  %v7528_v23 = vmul.f32 -0.5, %v17193_v2  ;;  %v7648_v1 = vmul.f32 -0.5, %v17224_v0 }
0x1247   :  { %10131 = vlog2.f32 %v7645_v7  ;;  %v7675_v49 = vmul.f32 0.5, %v7663_v51  ;;  %v7520_v46 = vadd.f32 1.0, %v7519_v29  ;;  %v7522_v12 = vand.u32 2147483647, %v17204_v4 }
0x1248   :  { %v7686_v17 = vmul.f32 %v7674_v19, %v7398_v48  ;;  %10133 = vrcp.f32 %v7364_v61  ;;  %v7640_v3 = vadd.f32 1.0, %v7639_v53  ;;  %v7529_v43 = vadd.f32 1.0, %v7528_v23 }
0x1249   :  { %v7687_v25 = vmul.f32 %v7675_v49, %v7399_v8  ;;  %10135 = vrcp.f32 %v7365_v45  ;;  %v7642_v44 = vand.u32 2147483647, %v7544_v54  ;;  %v7649_v15 = vadd.f32 1.0, %v7648_v1 }
0x124a   :  { %v7698_v52 = vmul.f32 %v7686_v17, %v7350_v31  ;;  %v7531_v24 = vand.u32 2147483647, %v17193_v2  ;;  %v7651_v32 = vand.u32 2147483647, %v17224_v0  ;;  %v7521_v20 = vmul.f32 %v17204_v4, %v7520_v46  ;;  %v7861_v31 = vld [vmem:[%s17308_s12] sm:$0xff] }
0x124b   :  { %v7699_v13 = vmul.f32 %v7687_v25, %v7351_v62  ;;  %vm7523_vm5 = vcmp.lt.f32.partialorder %v7522_v12, 0.0004427343  ;;  %v7641_v41 = vmul.f32 %v7640_v3, %v7544_v54  ;;  %v7530_v60 = vmul.f32 %v17193_v2, %v7529_v43  ;;  %v7862_v62 = vld [vmem:[%s17308_s12 + $0x8] sm:$0xff] }
0x124c   :  { %vm7643_vm2 = vcmp.lt.f32.partialorder %v7642_v44, 0.0004427343  ;;  %v7650_v36 = vmul.f32 %v7649_v15, %v17224_v0  ;;  %vm7532_vm12 = vcmp.lt.f32.partialorder %v7531_v24, 0.0004427343  ;;  %vm7652_vm7 = vcmp.lt.f32.partialorder %v7651_v32, 0.0004427343 }
0x124d   :  { %v8774_v9 = vpack.c.bf16 %v7699_v13, %v7698_v52  ;;  %v7340_v38 = vmul.f32 %v17112_v56, %v17198_v30  ;;  %v7341_v54 = vmul.f32 %v17094_v16, %v17184_v14  ;;  %v7776_v16 = vld [vmem:[%s17306_s10] sm:$0xff]  ;;  %v7777_v14 = vld [vmem:[%s17306_s10 + $0x8] sm:$0xff]  ;;  %v8786_v49 = vpack.c.bf16 %v7862_v62, %v7861_v31 }
0x124e   :  { %v10126_v40 = vpop.eup %10125  ;;  %v8780_v48 = vpack.c.bf16 %v7777_v14, %v7776_v16 }
0x124f   :  { %v10128_v6 = vpop.eup %10127  ;;  %v7518_v28 = vmul.f32 0.6931472, %v10126_v40  ;;  %8775 = vmatpush3.bf16.msra.mxu0 %v8774_v9  ;;  %v7352_v7 = vmul.f32 %v7340_v38, %v16804_v33  ;;  %v7353_v56 = vmul.f32 %v7341_v54, %v16796_v5  ;;  %v7702_v33 = vld [vmem:[#allocation5] sm:$0xff]  ;;  %v7778_v5 = vld [vmem:[%s17306_s10 + $0x10] sm:$0xff] }
0x1250   :  { %v10130_v27 = vpop.eup %10129  ;;  %v7527_v18 = vmul.f32 0.6931472, %v10128_v6  ;;  %8776 = vmatprep.subr.bf16.mxu0 %v10204_v39  ;;  %v8783_v51 = vpack.c.bf16 %v7779_v50, %v7778_v5 }
0x1251   :  { %v10132_v26 = vpop.eup %10131  ;;  %v7638_v10 = vmul.f32 0.6931472, %v10130_v27  ;;  %v7524_v57 = vsel %vm7523_vm5, %v7521_v20, %v7518_v28 }
0x1252   :  { %v7647_v37 = vmul.f32 0.6931472, %v10132_v26  ;;  %v10134_v34 = vpop.eup %10133  ;;  %v7533_v22 = vsel %vm7532_vm12, %v7530_v60, %v7527_v18 }
0x1253   :  { %v7644_v35 = vsel %vm7643_vm2, %v7641_v41, %v7638_v10  ;;  %v10136_v63 = vpop.eup %10135  ;;  %v7400_v0 = vsel %vm7316_vm4, 1.004016, %v10134_v34 }
0x1254   :  { %v7653_v21 = vsel %vm7652_vm7, %v7650_v36, %v7647_v37  ;;  %v7664_v4 = vsub.f32 %v7524_v57, %v7644_v35  ;;  %v7401_v47 = vsel %vm7317_vm1, 1.004016, %v10136_v63 }
0x1255   :  { %v7665_v2 = vsub.f32 %v7533_v22, %v7653_v21 }
0x1256   :  { %v7676_v58 = vmul.f32 0.5, %v7664_v4 }
0x1257   :  { %v7677_v59 = vmul.f32 0.5, %v7665_v2 }
0x1258   :  { %v7688_v42 = vmul.f32 %v7676_v58, %v7400_v0 }
0x1259   :  { %v7689_v30 = vmul.f32 %v7677_v59, %v7401_v47 }
0x125a   :  { %v7700_v19 = vmul.f32 %v7688_v42, %v7352_v7 }
0x125b   :  { %v7701_v61 = vmul.f32 %v7689_v30, %v7353_v56 }
0x125d   :  { %v8777_v11 = vpack.c.bf16 %v7701_v61, %v7700_v19 }
0x125f   :  { %8778 = vmatpush3.bf16.msra.mxu0 %v8777_v11 }
0x1260   :  { %8779 = vmatprep.subr.bf16.mxu0 %v10204_v39 }
0x1262   :  { %8649 = vmatmul.mubr.msk.f32.vlgmr.msra.gmra.mrb[36].mxu0 %vm1794_vm6, %v7702_v33 }
0x1263   :  { %8781 = vmatpush3.bf16.msra.mxu0 %v8780_v48  ;;  %8659 = vmatprep.mubr.msk.f32.mxu0 %vm10205_vm15, %v10206_v55 }
0x1264   :  { %8782 = vmatprep.subr.bf16.mxu0 %v10204_v39 }
0x1267   :  { %8784 = vmatpush3.bf16.msra.mxu0 %v8783_v51 }
0x1268   :  { %8785 = vmatprep.subr.bf16.mxu0 %v10204_v39  ;;  %v8281_v39 = vld [vmem:[%s17307_s11] ss:$0 sm:$0xff] }
0x1335   :  { %v7772_v17 = vpop.f32.mrb[36].mxu0 }
0x1336   :  { %v8650_v45 = vpop.f32.mrb[37].mxu0  ;;  %8660 = vmatmul.mubr.msk.f32.vlgmr.msra.gmra.mrb[38].mxu0 %vm490_vm13, %v7772_v17  ;;  %vm7943_vm13 = vcmask 31744  }
0x1337   :  { %8666 = vmatprep.mubr.msk.f32.mxu0 %vm10205_vm15, %v10206_v55  ;;  %8787 = vmatpush3.bf16.msra.mxu0 %v8786_v49  ;;  %v8283_v55 = vld [vmem:[%s17309_s13] ss:$0 sm:$0xff] }
0x1409   :  { %v7856_v8 = vpop.f32.mrb[38].mxu0 }
0x140a   :  { %v7857_v29 = vadd.f32 %v8281_v39, %v7856_v8  ;;  %v8661_v53 = vpop.f32.mrb[39].mxu0 }
0x140c   :  { %v7860_v25 = vmax.f32 %v7857_v29, 0.0 }
0x140e   :  { %8667 = vmatmul.mubr.msk.f32.vlgmr.msra.gmra.mrb[40].mxu0 %vm108_vm0, %v7860_v25 }
0x14e1   :  { %v7939_v52 = vpop.f32.mrb[40].mxu0 }
0x14e2   :  { %v7940_v23 = vadd.f32 %v8283_v55, %v7939_v52  ;;  %v8668_v1 = vpop.f32.mrb[41].mxu0 }
0x14e4   :  { %v7944_v40 = vsel %vm7943_vm13, %v7940_v23, -inf }
0x14e5   :  { %7945 = vmax.xlane.f32.xlu0 %v7944_v40 }
0x1572   :  { %v7946_v13 = vpop.xlane.xlu0 %7945 }
0x1573   :  { %v7947_v6 = vsub.f32 %v7940_v23, %v7946_v13 }
0x1575   :  { %v7948_v46 = vmul.f32 1.442695, %v7947_v6 }
0x1577   :  { %10137 = vpow2.f32 %v7948_v46 }
0x1581   :  { %v10138_v12 = vpop.eup %10137 }
0x1582   :  { %v7950_v3 = vsel %vm7943_vm13, %v10138_v12, 0.0 }
0x1583   :  { %7951 = vadd.xlane.f32.xlu1 %v7950_v3 }
0x1610   :  { %v7952_v9 = vpop.xlane.xlu1 %7951 }
0x1611   :  { %10139 = vlog2.f32 %v7952_v9 }
0x161b   :  { %v10140_v43 = vpop.eup %10139 }
0x161c   :  { %v7954_v44 = vmul.f32 0.6931472, %v10140_v43 }
0x161e   :  { %v7955_v15 = vsub.f32 %v7947_v6, %v7954_v44 }
0x1620   :  { %7956 = vst.msk [vmem:[%s17310_s14] sm:$0xff] %vm7943_vm13, %v7955_v15 }
0x1621   :  { %7961 = vsyncpa [#allocation3], 1 }
0x1622   :  { %7962 = vsyncpa [#allocation4], 1 }

</bundles_post_ra>
